<compile_context>
chip_gen: v5e
topology: v5e:2x2
jax: 0.10.0
libtpu: 0.0.40
codegen_flags: <defaults>
</compile_context>

<pallas_src>
import functools

import jax
import jax.numpy as jnp
from jax.experimental import pallas as pl
from jax.experimental.pallas import tpu as pltpu

BN_EPS = 1e-5
LANE = 128
_TAPS = tuple((dy, dx) for dy in range(3) for dx in range(3))


def _elu(y):
    # ELU(alpha=1) in f32. exp(min(y,0)) keeps the dead branch from overflowing.
    return jnp.where(y > 0, y, jnp.exp(jnp.minimum(y, 0.0)) - 1.0)


def _vmem_limit_bytes():
    cap = 128 * 1024 * 1024
    try:
        cap = int(pltpu.get_tpu_info().vmem_capacity_bytes)
    except Exception:
        pass
    # Leave headroom for compiler-internal scratch / semaphores; cap at 100 MiB.
    return max(32 * 1024 * 1024, min(cap - 16 * 1024 * 1024, 100 * 1024 * 1024))


def _compiler_params():
    return pltpu.CompilerParams(
        dimension_semantics=("parallel",),       # one image per grid step
        vmem_limit_bytes=_vmem_limit_bytes(),
    )


# ---------------------------------------------------------------------------
# Kernel 1: conv3x3 (tap accumulation over a pre-padded input) + BN1 partials
# ---------------------------------------------------------------------------
def _make_conv1_kernel(hi, wi, cin_p, cp):
    ho, wo = hi - 2, wi - 2

    def kernel(x_ref, w_ref, b_ref, o_ref, ssum_ref, ssq_ref):
        x = x_ref[0]                                         # (hi, wi, cin_p) bf16
        acc = jnp.zeros((ho * wo, cp), jnp.float32)
        for t, (dy, dx) in enumerate(_TAPS):
            lhs = x[dy:dy + ho, dx:dx + wo, :].reshape(ho * wo, cin_p)
            acc = acc + jnp.dot(lhs, w_ref[t],
                                preferred_element_type=jnp.float32)
        acc = acc + b_ref[...]                               # pre-BN conv output
        o_ref[...] = acc.reshape(1, ho, wo, cp).astype(o_ref.dtype)
        ssum_ref[...] = jnp.sum(acc, axis=0, keepdims=True).reshape(1, 1, cp)
        ssq_ref[...] = jnp.sum(acc * acc, axis=0, keepdims=True).reshape(1, 1, cp)

    return kernel


def _conv1_stats(x_pad, w, b, *, cp):
    n, hi, wi, cin_p = x_pad.shape
    ho, wo = hi - 2, wi - 2
    flops = 2 * n * ho * wo * 9 * cin_p * cp
    bytes_accessed = (x_pad.size * 2 + w.size * 2 + b.size * 4
                      + n * ho * wo * cp * 2 + 2 * n * cp * 4)
    return pl.pallas_call(
        _make_conv1_kernel(hi, wi, cin_p, cp),
        grid=(n,),
        in_specs=[
            pl.BlockSpec((1, hi, wi, cin_p), lambda i: (i, 0, 0, 0)),
            pl.BlockSpec((9, cin_p, cp), lambda i: (0, 0, 0)),
            pl.BlockSpec((1, cp), lambda i: (0, 0)),
        ],
        out_specs=[
            pl.BlockSpec((1, ho, wo, cp), lambda i: (i, 0, 0, 0)),
            pl.BlockSpec((1, 1, cp), lambda i: (i, 0, 0)),
            pl.BlockSpec((1, 1, cp), lambda i: (i, 0, 0)),
        ],
        out_shape=[
            jax.ShapeDtypeStruct((n, ho, wo, cp), jnp.bfloat16),
            jax.ShapeDtypeStruct((n, 1, cp), jnp.float32),
            jax.ShapeDtypeStruct((n, 1, cp), jnp.float32),
        ],
        compiler_params=_compiler_params(),
        cost_estimate=pl.CostEstimate(flops=flops, transcendentals=0,
                                      bytes_accessed=bytes_accessed),
    )(x_pad, w, b)


# ---------------------------------------------------------------------------
# Kernel 2: BN1 affine + ELU1 -> zero-ring in VMEM -> conv3x3 (taps) + BN2
#           partial sums.  Input is the *unpadded* stage-1 conv output.
# ---------------------------------------------------------------------------
def _make_bn_elu_conv2_kernel(h1, w1, cp, pad):
    hp, wp = h1 + 2 * pad, w1 + 2 * pad      # padded activation extent
    ho, wo = hp - 2, wp - 2                  # conv2 output extent

    def kernel(x_ref, sc_ref, sh_ref, w_ref, b_ref,
               o_ref, ssum_ref, ssq_ref, a_ref):
        x = x_ref[0].astype(jnp.float32)                     # (h1, w1, cp) pre-BN
        act = _elu(x * sc_ref[...] + sh_ref[...])            # BN1 affine + ELU1
        if pad > 0:
            # Build the exact-zero padding ring in VMEM (no HBM round trip,
            # no iota masks); the interior store is a cheap VMEM write.
            a_ref[...] = jnp.zeros_like(a_ref)
            a_ref[pad:pad + h1, pad:pad + w1, :] = act
        else:
            a_ref[...] = act
        acc = jnp.zeros((ho * wo, cp), jnp.float32)
        for t, (dy, dx) in enumerate(_TAPS):
            lhs = a_ref[dy:dy + ho, dx:dx + wo, :].astype(jnp.bfloat16)
            acc = acc + jnp.dot(lhs.reshape(ho * wo, cp), w_ref[t],
                                preferred_element_type=jnp.float32)
        acc = acc + b_ref[...]
        o_ref[...] = acc.reshape(1, ho, wo, cp).astype(o_ref.dtype)
        ssum_ref[...] = jnp.sum(acc, axis=0, keepdims=True).reshape(1, 1, cp)
        ssq_ref[...] = jnp.sum(acc * acc, axis=0, keepdims=True).reshape(1, 1, cp)

    return kernel


def _bn_elu_conv2_stats(conv1, scale, shift, w, b, *, pad, cp):
    n, h1, w1, _ = conv1.shape
    hp, wp = h1 + 2 * pad, w1 + 2 * pad
    ho, wo = hp - 2, wp - 2
    flops = 2 * n * ho * wo * 9 * cp * cp
    trans = n * h1 * w1 * cp
    bytes_accessed = (conv1.size * 2 + w.size * 2
                      + (scale.size + shift.size + b.size) * 4
                      + n * ho * wo * cp * 2 + 2 * n * cp * 4)
    return pl.pallas_call(
        _make_bn_elu_conv2_kernel(h1, w1, cp, pad),
        grid=(n,),
        in_specs=[
            pl.BlockSpec((1, h1, w1, cp), lambda i: (i, 0, 0, 0)),
            pl.BlockSpec((1, cp), lambda i: (0, 0)),
            pl.BlockSpec((1, cp), lambda i: (0, 0)),
            pl.BlockSpec((9, cp, cp), lambda i: (0, 0, 0)),
            pl.BlockSpec((1, cp), lambda i: (0, 0)),
        ],
        out_specs=[
            pl.BlockSpec((1, ho, wo, cp), lambda i: (i, 0, 0, 0)),
            pl.BlockSpec((1, 1, cp), lambda i: (i, 0, 0)),
            pl.BlockSpec((1, 1, cp), lambda i: (i, 0, 0)),
        ],
        out_shape=[
            jax.ShapeDtypeStruct((n, ho, wo, cp), jnp.bfloat16),
            jax.ShapeDtypeStruct((n, 1, cp), jnp.float32),
            jax.ShapeDtypeStruct((n, 1, cp), jnp.float32),
        ],
        scratch_shapes=[pltpu.VMEM((hp, wp, cp), jnp.float32)],
        compiler_params=_compiler_params(),
        cost_estimate=pl.CostEstimate(flops=flops, transcendentals=trans,
                                      bytes_accessed=bytes_accessed),
    )(conv1, scale, shift, w, b)


# ---------------------------------------------------------------------------
# Kernel 3: BN2 affine + ELU2 over flattened spatial rows; only the valid
#           out_ch channels are written back to HBM.
# ---------------------------------------------------------------------------
def _make_bn_elu_kernel(rows, out_ch):
    def kernel(x_ref, sc_ref, sh_ref, o_ref):
        y = x_ref[0].astype(jnp.float32) * sc_ref[...] + sh_ref[...]
        o_ref[...] = _elu(y)[:, :out_ch].reshape(1, rows, out_ch)
    return kernel


def _bn_elu_out(conv2_flat, scale, shift, *, cp, out_ch):
    n, rows, _ = conv2_flat.shape
    bytes_accessed = (conv2_flat.size * 2 + (scale.size + shift.size) * 4
                      + n * rows * out_ch * 4)
    return pl.pallas_call(
        _make_bn_elu_kernel(rows, out_ch),
        grid=(n,),
        in_specs=[
            pl.BlockSpec((1, rows, cp), lambda i: (i, 0, 0)),
            pl.BlockSpec((1, cp), lambda i: (0, 0)),
            pl.BlockSpec((1, cp), lambda i: (0, 0)),
        ],
        out_specs=pl.BlockSpec((1, rows, out_ch), lambda i: (i, 0, 0)),
        out_shape=jax.ShapeDtypeStruct((n, rows, out_ch), jnp.float32),
        compiler_params=_compiler_params(),
        cost_estimate=pl.CostEstimate(flops=2 * n * rows * cp,
                                      transcendentals=n * rows * cp,
                                      bytes_accessed=bytes_accessed),
    )(conv2_flat, scale, shift)


# ---------------------------------------------------------------------------
# Host glue
# ---------------------------------------------------------------------------
def _bn_scale_shift(ssum, ssq, count, gamma, beta, eps=BN_EPS):
    """Combine per-image (sum, sumsq) partials into a BN affine (scale, shift).

    Training-mode batch statistics (biased variance, eps=1e-5) folded into a
    per-channel affine y = x * scale + shift.  Tiny (Cp,)-sized plain JAX.
    """
    s = jnp.sum(ssum, axis=(0, 1))
    q = jnp.sum(ssq, axis=(0, 1))
    mean = s / count
    var = jnp.maximum(q / count - mean * mean, 0.0)
    scale = gamma * jax.lax.rsqrt(var + eps)
    shift = beta - mean * scale
    return scale.reshape(1, -1), shift.reshape(1, -1)


def _pad_last(a, cp):
    pads = [(0, 0)] * (a.ndim - 1) + [(0, cp - a.shape[-1])]
    return jnp.pad(a, pads)


def _round_up(v, m):
    return ((v + m - 1) // m) * m


def double_conv(x_nchw, params, no_padding=False):
    """Forward pass of DoubleConv: (conv3x3 -> BatchNorm2d -> ELU) * 2.

    x_nchw : (N, C_in, H, W) float32 (PyTorch NCHW)
    params : [(w (3,3,Cin,Cout),  b (Cout,), gamma (Cout,), beta (Cout,)),
              (w (3,3,Cout,Cout), b (Cout,), gamma (Cout,), beta (Cout,))]
    """
    pad = 0 if no_padding else 1
    (w1, b1, g1, be1), (w2, b2, g2, be2) = params
    cin = w1.shape[2]
    out_ch = w1.shape[3]
    cp = _round_up(out_ch, LANE)          # lane-dense channel count
    cin_p = _round_up(cin, 8)             # sublane-friendly input channels

    # ---- pack / pad parameters (host, once) into (9, Cin_p, Cp) tap layout ----
    w1p = jnp.pad(w1, ((0, 0), (0, 0), (0, cin_p - cin), (0, cp - out_ch)))
    w1p = w1p.reshape(9, cin_p, cp).astype(jnp.bfloat16)
    b1p = _pad_last(b1, cp).reshape(1, cp).astype(jnp.float32)
    w2p = jnp.pad(w2, ((0, 0), (0, 0), (0, cp - out_ch), (0, cp - out_ch)))
    w2p = w2p.reshape(9, cp, cp).astype(jnp.bfloat16)
    b2p = _pad_last(b2, cp).reshape(1, cp).astype(jnp.float32)
    g1p, be1p = _pad_last(g1, cp), _pad_last(be1, cp)   # padded gamma=0 -> padded
    g2p, be2p = _pad_last(g2, cp), _pad_last(be2, cp)   # channels stay exactly 0

    # ---- stage 1: conv1 (tap-accumulated) + per-image BN partial sums ----
    x = jnp.transpose(x_nchw, (0, 2, 3, 1))                      # NHWC
    x = jnp.pad(x, ((0, 0), (pad, pad), (pad, pad), (0, cin_p - cin)))
    x = x.astype(jnp.bfloat16)
    conv1, s1, q1 = _conv1_stats(x, w1p, b1p, cp=cp)
    n, h1, w1s, _ = conv1.shape
    scale1, shift1 = _bn_scale_shift(s1, q1, n * h1 * w1s, g1p, be1p)

    # ---- stage 2: BN1+ELU1 fused into conv2 (+BN2 partials); padding ring
    #      built inside the kernel (no host pad of the intermediate) ----
    conv2, s2, q2 = _bn_elu_conv2_stats(conv1, scale1, shift1, w2p, b2p,
                                        pad=pad, cp=cp)
    n, h2, w2s, _ = conv2.shape
    scale2, shift2 = _bn_scale_shift(s2, q2, n * h2 * w2s, g2p, be2p)

    # ---- stage 3: BN2 + ELU2; only valid channels written to HBM ----
    out = _bn_elu_out(conv2.reshape(n, h2 * w2s, cp), scale2, shift2,
                      cp=cp, out_ch=out_ch)
    out = out.reshape(n, h2, w2s, out_ch)
    return jnp.transpose(out, (0, 3, 1, 2))                      # back to NCHW


def make_params(in_ch, out_ch, key):
    """Deterministic synthetic parameters matching nn.Conv2d / nn.BatchNorm2d."""
    k1, k2, k3, k4 = jax.random.split(key, 4)

    def conv_stage(kw, kb, c_in, c_out):
        # Weight layout (kh, kw, cin, cout) == PyTorch (cout, cin, kh, kw)
        # permuted; matches the (dy, dx) tap ordering used by the kernels.
        w = jax.random.normal(kw, (3, 3, c_in, c_out), jnp.float32) * 0.1
        b = jax.random.normal(kb, (c_out,), jnp.float32) * 0.1
        gamma = jnp.ones((c_out,), jnp.float32)     # BatchNorm2d weight init
        beta = jnp.zeros((c_out,), jnp.float32)     # BatchNorm2d bias init
        return (w, b, gamma, beta)

    return [conv_stage(k1, k2, in_ch, out_ch),
            conv_stage(k3, k4, out_ch, out_ch)]


if __name__ == "__main__":
    in_ch, out_ch = 4, 8
    N, H, W = 2, 16, 16

    key = jax.random.PRNGKey(0)
    kx, kp = jax.random.split(key)
    x = jax.random.normal(kx, (N, in_ch, H, W), jnp.float32)
    params = make_params(in_ch, out_ch, kp)

    fwd = jax.jit(functools.partial(double_conv, no_padding=False))
    y = jax.block_until_ready(fwd(x, params))
    assert y.shape == (N, out_ch, H, W), y.shape
    assert bool(jnp.all(jnp.isfinite(y)))
    print("KERNEL_OK")
</pallas_src>

<mosaic_0001>
module attributes {stable_mosaic.version = 11 : i64} {
  func.func @kernel(%arg0: i32, %arg1: memref<1x18x18x8xbf16, #tpu.memory_space<vmem>>, %arg2: memref<9x8x128xbf16, #tpu.memory_space<vmem>>, %arg3: memref<1x128xf32, #tpu.memory_space<vmem>>, %arg4: memref<1x16x16x128xbf16, #tpu.memory_space<vmem>>, %arg5: memref<1x1x128xf32, #tpu.memory_space<vmem>>, %arg6: memref<1x1x128xf32, #tpu.memory_space<vmem>>) attributes {dimension_semantics = [#tpu.dimension_semantics<parallel>], iteration_bounds = array<i64: 2>, scalar_prefetch = 0 : i64, scratch_operands = 0 : i64, tpu.core_type = #tpu.core_type<tc>, window_params = [{transform_indices = @transform_0, window_bounds = array<i64: 1, 18, 18, 8>}, {pipeline_mode = #tpu.pipeline_mode<synchronous>, transform_indices = @transform_1, window_bounds = array<i64: 9, 8, 128>}, {pipeline_mode = #tpu.pipeline_mode<synchronous>, transform_indices = @transform_2, window_bounds = array<i64: 1, 128>}, {transform_indices = @transform_3, window_bounds = array<i64: 1, 16, 16, 128>}, {transform_indices = @transform_4, window_bounds = array<i64: 1, 1, 128>}, {transform_indices = @transform_5, window_bounds = array<i64: 1, 1, 128>}]} {
    %c0 = arith.constant 0 : index
    %c0_0 = arith.constant 0 : index
    %c0_1 = arith.constant 0 : index
    %c0_2 = arith.constant 0 : index
    %0 = vector.load %arg1[%c0, %c0_0, %c0_1, %c0_2] : memref<1x18x18x8xbf16, #tpu.memory_space<vmem>>, vector<1x18x18x8xbf16>
    %1 = vector.shape_cast %0 : vector<1x18x18x8xbf16> to vector<18x18x8xbf16>
    %cst = arith.constant 0.000000e+00 : f32
    %2 = vector.broadcast %cst : f32 to vector<256x128xf32>
    %3 = vector.extract_strided_slice %1 {offsets = [0, 0, 0], sizes = [16, 16, 8], strides = [1, 1, 1]} : vector<18x18x8xbf16> to vector<16x16x8xbf16>
    %4 = vector.shape_cast %3 : vector<16x16x8xbf16> to vector<256x8xbf16>
    %c0_3 = arith.constant 0 : index
    %c0_4 = arith.constant 0 : index
    %c0_5 = arith.constant 0 : index
    %5 = vector.load %arg2[%c0_3, %c0_4, %c0_5] : memref<9x8x128xbf16, #tpu.memory_space<vmem>>, vector<1x8x128xbf16>
    %6 = vector.shape_cast %5 : vector<1x8x128xbf16> to vector<8x128xbf16>
    %cst_6 = arith.constant dense<0.000000e+00> : vector<256x128xf32>
    %7 = tpu.matmul %4, %6, %cst_6 {dimension_numbers = #tpu.dot_dimension_numbers<[1], [0], [0], [1], [0, 0, 1, 1], [], []>} : vector<256x8xbf16>, vector<8x128xbf16>, vector<256x128xf32> -> vector<256x128xf32>
    %8 = arith.addf %2, %7 : vector<256x128xf32>
    %9 = vector.extract_strided_slice %1 {offsets = [0, 1, 0], sizes = [16, 16, 8], strides = [1, 1, 1]} : vector<18x18x8xbf16> to vector<16x16x8xbf16>
    %10 = vector.shape_cast %9 : vector<16x16x8xbf16> to vector<256x8xbf16>
    %c1 = arith.constant 1 : index
    %c0_7 = arith.constant 0 : index
    %c0_8 = arith.constant 0 : index
    %11 = vector.load %arg2[%c1, %c0_7, %c0_8] : memref<9x8x128xbf16, #tpu.memory_space<vmem>>, vector<1x8x128xbf16>
    %12 = vector.shape_cast %11 : vector<1x8x128xbf16> to vector<8x128xbf16>
    %cst_9 = arith.constant dense<0.000000e+00> : vector<256x128xf32>
    %13 = tpu.matmul %10, %12, %cst_9 {dimension_numbers = #tpu.dot_dimension_numbers<[1], [0], [0], [1], [0, 0, 1, 1], [], []>} : vector<256x8xbf16>, vector<8x128xbf16>, vector<256x128xf32> -> vector<256x128xf32>
    %14 = arith.addf %8, %13 : vector<256x128xf32>
    %15 = vector.extract_strided_slice %1 {offsets = [0, 2, 0], sizes = [16, 16, 8], strides = [1, 1, 1]} : vector<18x18x8xbf16> to vector<16x16x8xbf16>
    %16 = vector.shape_cast %15 : vector<16x16x8xbf16> to vector<256x8xbf16>
    %c2 = arith.constant 2 : index
    %c0_10 = arith.constant 0 : index
    %c0_11 = arith.constant 0 : index
    %17 = vector.load %arg2[%c2, %c0_10, %c0_11] : memref<9x8x128xbf16, #tpu.memory_space<vmem>>, vector<1x8x128xbf16>
    %18 = vector.shape_cast %17 : vector<1x8x128xbf16> to vector<8x128xbf16>
    %cst_12 = arith.constant dense<0.000000e+00> : vector<256x128xf32>
    %19 = tpu.matmul %16, %18, %cst_12 {dimension_numbers = #tpu.dot_dimension_numbers<[1], [0], [0], [1], [0, 0, 1, 1], [], []>} : vector<256x8xbf16>, vector<8x128xbf16>, vector<256x128xf32> -> vector<256x128xf32>
    %20 = arith.addf %14, %19 : vector<256x128xf32>
    %21 = vector.extract_strided_slice %1 {offsets = [1, 0, 0], sizes = [16, 16, 8], strides = [1, 1, 1]} : vector<18x18x8xbf16> to vector<16x16x8xbf16>
    %22 = vector.shape_cast %21 : vector<16x16x8xbf16> to vector<256x8xbf16>
    %c3 = arith.constant 3 : index
    %c0_13 = arith.constant 0 : index
    %c0_14 = arith.constant 0 : index
    %23 = vector.load %arg2[%c3, %c0_13, %c0_14] : memref<9x8x128xbf16, #tpu.memory_space<vmem>>, vector<1x8x128xbf16>
    %24 = vector.shape_cast %23 : vector<1x8x128xbf16> to vector<8x128xbf16>
    %cst_15 = arith.constant dense<0.000000e+00> : vector<256x128xf32>
    %25 = tpu.matmul %22, %24, %cst_15 {dimension_numbers = #tpu.dot_dimension_numbers<[1], [0], [0], [1], [0, 0, 1, 1], [], []>} : vector<256x8xbf16>, vector<8x128xbf16>, vector<256x128xf32> -> vector<256x128xf32>
    %26 = arith.addf %20, %25 : vector<256x128xf32>
    %27 = vector.extract_strided_slice %1 {offsets = [1, 1, 0], sizes = [16, 16, 8], strides = [1, 1, 1]} : vector<18x18x8xbf16> to vector<16x16x8xbf16>
    %28 = vector.shape_cast %27 : vector<16x16x8xbf16> to vector<256x8xbf16>
    %c4 = arith.constant 4 : index
    %c0_16 = arith.constant 0 : index
    %c0_17 = arith.constant 0 : index
    %29 = vector.load %arg2[%c4, %c0_16, %c0_17] : memref<9x8x128xbf16, #tpu.memory_space<vmem>>, vector<1x8x128xbf16>
    %30 = vector.shape_cast %29 : vector<1x8x128xbf16> to vector<8x128xbf16>
    %cst_18 = arith.constant dense<0.000000e+00> : vector<256x128xf32>
    %31 = tpu.matmul %28, %30, %cst_18 {dimension_numbers = #tpu.dot_dimension_numbers<[1], [0], [0], [1], [0, 0, 1, 1], [], []>} : vector<256x8xbf16>, vector<8x128xbf16>, vector<256x128xf32> -> vector<256x128xf32>
    %32 = arith.addf %26, %31 : vector<256x128xf32>
    %33 = vector.extract_strided_slice %1 {offsets = [1, 2, 0], sizes = [16, 16, 8], strides = [1, 1, 1]} : vector<18x18x8xbf16> to vector<16x16x8xbf16>
    %34 = vector.shape_cast %33 : vector<16x16x8xbf16> to vector<256x8xbf16>
    %c5 = arith.constant 5 : index
    %c0_19 = arith.constant 0 : index
    %c0_20 = arith.constant 0 : index
    %35 = vector.load %arg2[%c5, %c0_19, %c0_20] : memref<9x8x128xbf16, #tpu.memory_space<vmem>>, vector<1x8x128xbf16>
    %36 = vector.shape_cast %35 : vector<1x8x128xbf16> to vector<8x128xbf16>
    %cst_21 = arith.constant dense<0.000000e+00> : vector<256x128xf32>
    %37 = tpu.matmul %34, %36, %cst_21 {dimension_numbers = #tpu.dot_dimension_numbers<[1], [0], [0], [1], [0, 0, 1, 1], [], []>} : vector<256x8xbf16>, vector<8x128xbf16>, vector<256x128xf32> -> vector<256x128xf32>
    %38 = arith.addf %32, %37 : vector<256x128xf32>
    %39 = vector.extract_strided_slice %1 {offsets = [2, 0, 0], sizes = [16, 16, 8], strides = [1, 1, 1]} : vector<18x18x8xbf16> to vector<16x16x8xbf16>
    %40 = vector.shape_cast %39 : vector<16x16x8xbf16> to vector<256x8xbf16>
    %c6 = arith.constant 6 : index
    %c0_22 = arith.constant 0 : index
    %c0_23 = arith.constant 0 : index
    %41 = vector.load %arg2[%c6, %c0_22, %c0_23] : memref<9x8x128xbf16, #tpu.memory_space<vmem>>, vector<1x8x128xbf16>
    %42 = vector.shape_cast %41 : vector<1x8x128xbf16> to vector<8x128xbf16>
    %cst_24 = arith.constant dense<0.000000e+00> : vector<256x128xf32>
    %43 = tpu.matmul %40, %42, %cst_24 {dimension_numbers = #tpu.dot_dimension_numbers<[1], [0], [0], [1], [0, 0, 1, 1], [], []>} : vector<256x8xbf16>, vector<8x128xbf16>, vector<256x128xf32> -> vector<256x128xf32>
    %44 = arith.addf %38, %43 : vector<256x128xf32>
    %45 = vector.extract_strided_slice %1 {offsets = [2, 1, 0], sizes = [16, 16, 8], strides = [1, 1, 1]} : vector<18x18x8xbf16> to vector<16x16x8xbf16>
    %46 = vector.shape_cast %45 : vector<16x16x8xbf16> to vector<256x8xbf16>
    %c7 = arith.constant 7 : index
    %c0_25 = arith.constant 0 : index
    %c0_26 = arith.constant 0 : index
    %47 = vector.load %arg2[%c7, %c0_25, %c0_26] : memref<9x8x128xbf16, #tpu.memory_space<vmem>>, vector<1x8x128xbf16>
    %48 = vector.shape_cast %47 : vector<1x8x128xbf16> to vector<8x128xbf16>
    %cst_27 = arith.constant dense<0.000000e+00> : vector<256x128xf32>
    %49 = tpu.matmul %46, %48, %cst_27 {dimension_numbers = #tpu.dot_dimension_numbers<[1], [0], [0], [1], [0, 0, 1, 1], [], []>} : vector<256x8xbf16>, vector<8x128xbf16>, vector<256x128xf32> -> vector<256x128xf32>
    %50 = arith.addf %44, %49 : vector<256x128xf32>
    %51 = vector.extract_strided_slice %1 {offsets = [2, 2, 0], sizes = [16, 16, 8], strides = [1, 1, 1]} : vector<18x18x8xbf16> to vector<16x16x8xbf16>
    %52 = vector.shape_cast %51 : vector<16x16x8xbf16> to vector<256x8xbf16>
    %c8 = arith.constant 8 : index
    %c0_28 = arith.constant 0 : index
    %c0_29 = arith.constant 0 : index
    %53 = vector.load %arg2[%c8, %c0_28, %c0_29] : memref<9x8x128xbf16, #tpu.memory_space<vmem>>, vector<1x8x128xbf16>
    %54 = vector.shape_cast %53 : vector<1x8x128xbf16> to vector<8x128xbf16>
    %cst_30 = arith.constant dense<0.000000e+00> : vector<256x128xf32>
    %55 = tpu.matmul %52, %54, %cst_30 {dimension_numbers = #tpu.dot_dimension_numbers<[1], [0], [0], [1], [0, 0, 1, 1], [], []>} : vector<256x8xbf16>, vector<8x128xbf16>, vector<256x128xf32> -> vector<256x128xf32>
    %56 = arith.addf %50, %55 : vector<256x128xf32>
    %c0_31 = arith.constant 0 : index
    %c0_32 = arith.constant 0 : index
    %57 = vector.load %arg3[%c0_31, %c0_32] : memref<1x128xf32, #tpu.memory_space<vmem>>, vector<1x128xf32>
    %58 = vector.broadcast %57 : vector<1x128xf32> to vector<256x128xf32>
    %59 = arith.addf %56, %58 : vector<256x128xf32>
    %60 = vector.shape_cast %59 : vector<256x128xf32> to vector<1x16x16x128xf32>
    %61 = arith.truncf %60 : vector<1x16x16x128xf32> to vector<1x16x16x128xbf16>
    %c0_33 = arith.constant 0 : index
    %c0_34 = arith.constant 0 : index
    %c0_35 = arith.constant 0 : index
    %c0_36 = arith.constant 0 : index
    %62 = vector.load %arg4[%c0_33, %c0_34, %c0_35, %c0_36] : memref<1x16x16x128xbf16, #tpu.memory_space<vmem>>, vector<1x16x16x128xbf16>
    tpu.vector_store %arg4[%c0_33, %c0_34, %c0_35, %c0_36], %61 {strides = array<i32>} : memref<1x16x16x128xbf16, #tpu.memory_space<vmem>>, vector<1x16x16x128xbf16>,
    %cst_37 = arith.constant dense<0.000000e+00> : vector<128xf32>
    %63 = vector.multi_reduction <add>, %59, %cst_37 [0] : vector<256x128xf32> to vector<128xf32>
    %64 = vector.shape_cast %63 : vector<128xf32> to vector<1x128xf32>
    %65 = vector.shape_cast %64 : vector<1x128xf32> to vector<1x1x128xf32>
    %c0_38 = arith.constant 0 : index
    %c0_39 = arith.constant 0 : index
    %c0_40 = arith.constant 0 : index
    %66 = vector.load %arg5[%c0_38, %c0_39, %c0_40] : memref<1x1x128xf32, #tpu.memory_space<vmem>>, vector<1x1x128xf32>
    tpu.vector_store %arg5[%c0_38, %c0_39, %c0_40], %65 {strides = array<i32>} : memref<1x1x128xf32, #tpu.memory_space<vmem>>, vector<1x1x128xf32>,
    %67 = arith.mulf %59, %59 : vector<256x128xf32>
    %cst_41 = arith.constant dense<0.000000e+00> : vector<128xf32>
    %68 = vector.multi_reduction <add>, %67, %cst_41 [0] : vector<256x128xf32> to vector<128xf32>
    %69 = vector.shape_cast %68 : vector<128xf32> to vector<1x128xf32>
    %70 = vector.shape_cast %69 : vector<1x128xf32> to vector<1x1x128xf32>
    %c0_42 = arith.constant 0 : index
    %c0_43 = arith.constant 0 : index
    %c0_44 = arith.constant 0 : index
    %71 = vector.load %arg6[%c0_42, %c0_43, %c0_44] : memref<1x1x128xf32, #tpu.memory_space<vmem>>, vector<1x1x128xf32>
    tpu.vector_store %arg6[%c0_42, %c0_43, %c0_44], %70 {strides = array<i32>} : memref<1x1x128xf32, #tpu.memory_space<vmem>>, vector<1x1x128xf32>,
    return
  }
  func.func @transform_0(%arg0: i32) -> (i32, i32, i32, i32) {
    %c0_i32 = arith.constant 0 : i32
    %c0_i32_0 = arith.constant 0 : i32
    %c0_i32_1 = arith.constant 0 : i32
    %c0_i32_2 = arith.constant 0 : i32
    return %arg0, %c0_i32, %c0_i32_0, %c0_i32_1 : i32, i32, i32, i32
  }
  func.func @transform_1(%arg0: i32) -> (i32, i32, i32) {
    %c0_i32 = arith.constant 0 : i32
    %c0_i32_0 = arith.constant 0 : i32
    %c0_i32_1 = arith.constant 0 : i32
    %c0_i32_2 = arith.constant 0 : i32
    return %c0_i32, %c0_i32_0, %c0_i32_1 : i32, i32, i32
  }
  func.func @transform_2(%arg0: i32) -> (i32, i32) {
    %c0_i32 = arith.constant 0 : i32
    %c0_i32_0 = arith.constant 0 : i32
    %c0_i32_1 = arith.constant 0 : i32
    return %c0_i32, %c0_i32_0 : i32, i32
  }
  func.func @transform_3(%arg0: i32) -> (i32, i32, i32, i32) {
    %c0_i32 = arith.constant 0 : i32
    %c0_i32_0 = arith.constant 0 : i32
    %c0_i32_1 = arith.constant 0 : i32
    %c0_i32_2 = arith.constant 0 : i32
    return %arg0, %c0_i32, %c0_i32_0, %c0_i32_1 : i32, i32, i32, i32
  }
  func.func @transform_4(%arg0: i32) -> (i32, i32, i32) {
    %c0_i32 = arith.constant 0 : i32
    %c0_i32_0 = arith.constant 0 : i32
    %c0_i32_1 = arith.constant 0 : i32
    return %arg0, %c0_i32, %c0_i32_0 : i32, i32, i32
  }
  func.func @transform_5(%arg0: i32) -> (i32, i32, i32) {
    %c0_i32 = arith.constant 0 : i32
    %c0_i32_0 = arith.constant 0 : i32
    %c0_i32_1 = arith.constant 0 : i32
    return %arg0, %c0_i32, %c0_i32_0 : i32, i32, i32
  }
}

module attributes {stable_mosaic.version = 11 : i64} {
  func.func @kernel(%arg0: i32, %arg1: memref<1x256x128xbf16, #tpu.memory_space<vmem>>, %arg2: memref<1x128xf32, #tpu.memory_space<vmem>>, %arg3: memref<1x128xf32, #tpu.memory_space<vmem>>, %arg4: memref<1x256x8xf32, #tpu.memory_space<vmem>>) attributes {dimension_semantics = [#tpu.dimension_semantics<parallel>], iteration_bounds = array<i64: 2>, scalar_prefetch = 0 : i64, scratch_operands = 0 : i64, tpu.core_type = #tpu.core_type<tc>, window_params = [{transform_indices = @transform_0, window_bounds = array<i64: 1, 256, 128>}, {pipeline_mode = #tpu.pipeline_mode<synchronous>, transform_indices = @transform_1, window_bounds = array<i64: 1, 128>}, {pipeline_mode = #tpu.pipeline_mode<synchronous>, transform_indices = @transform_2, window_bounds = array<i64: 1, 128>}, {transform_indices = @transform_3, window_bounds = array<i64: 1, 256, 8>}]} {
    %c0 = arith.constant 0 : index
    %c0_0 = arith.constant 0 : index
    %c0_1 = arith.constant 0 : index
    %0 = vector.load %arg1[%c0, %c0_0, %c0_1] : memref<1x256x128xbf16, #tpu.memory_space<vmem>>, vector<1x256x128xbf16>
    %1 = vector.shape_cast %0 : vector<1x256x128xbf16> to vector<256x128xbf16>
    %2 = arith.extf %1 : vector<256x128xbf16> to vector<256x128xf32>
    %c0_2 = arith.constant 0 : index
    %c0_3 = arith.constant 0 : index
    %3 = vector.load %arg2[%c0_2, %c0_3] : memref<1x128xf32, #tpu.memory_space<vmem>>, vector<1x128xf32>
    %4 = vector.broadcast %3 : vector<1x128xf32> to vector<256x128xf32>
    %5 = arith.mulf %2, %4 : vector<256x128xf32>
    %c0_4 = arith.constant 0 : index
    %c0_5 = arith.constant 0 : index
    %6 = vector.load %arg3[%c0_4, %c0_5] : memref<1x128xf32, #tpu.memory_space<vmem>>, vector<1x128xf32>
    %7 = vector.broadcast %6 : vector<1x128xf32> to vector<256x128xf32>
    %8 = arith.addf %5, %7 : vector<256x128xf32>
    %cst = arith.constant 0.000000e+00 : f32
    %9 = vector.broadcast %cst : f32 to vector<256x128xf32>
    %10 = arith.cmpf ogt, %8, %9 : vector<256x128xf32>
    %cst_6 = arith.constant 0.000000e+00 : f32
    %11 = vector.broadcast %cst_6 : f32 to vector<256x128xf32>
    %12 = arith.minimumf %8, %11 : vector<256x128xf32>
    %13 = math.exp %12 : vector<256x128xf32>
    %cst_7 = arith.constant 1.000000e+00 : f32
    %14 = vector.broadcast %cst_7 : f32 to vector<256x128xf32>
    %15 = arith.subf %13, %14 : vector<256x128xf32>
    %16 = arith.select %10, %8, %15 : vector<256x128xi1>, vector<256x128xf32>
    %17 = vector.extract_strided_slice %16 {offsets = [0, 0], sizes = [256, 8], strides = [1, 1]} : vector<256x128xf32> to vector<256x8xf32>
    %18 = vector.shape_cast %17 : vector<256x8xf32> to vector<1x256x8xf32>
    %c0_8 = arith.constant 0 : index
    %c0_9 = arith.constant 0 : index
    %c0_10 = arith.constant 0 : index
    %19 = vector.load %arg4[%c0_8, %c0_9, %c0_10] : memref<1x256x8xf32, #tpu.memory_space<vmem>>, vector<1x256x8xf32>
    tpu.vector_store %arg4[%c0_8, %c0_9, %c0_10], %18 {strides = array<i32>} : memref<1x256x8xf32, #tpu.memory_space<vmem>>, vector<1x256x8xf32>,
    return
  }
  func.func @transform_0(%arg0: i32) -> (i32, i32, i32) {
    %c0_i32 = arith.constant 0 : i32
    %c0_i32_0 = arith.constant 0 : i32
    %c0_i32_1 = arith.constant 0 : i32
    return %arg0, %c0_i32, %c0_i32_0 : i32, i32, i32
  }
  func.func @transform_1(%arg0: i32) -> (i32, i32) {
    %c0_i32 = arith.constant 0 : i32
    %c0_i32_0 = arith.constant 0 : i32
    %c0_i32_1 = arith.constant 0 : i32
    return %c0_i32, %c0_i32_0 : i32, i32
  }
  func.func @transform_2(%arg0: i32) -> (i32, i32) {
    %c0_i32 = arith.constant 0 : i32
    %c0_i32_0 = arith.constant 0 : i32
    %c0_i32_1 = arith.constant 0 : i32
    return %c0_i32, %c0_i32_0 : i32, i32
  }
  func.func @transform_3(%arg0: i32) -> (i32, i32, i32) {
    %c0_i32 = arith.constant 0 : i32
    %c0_i32_0 = arith.constant 0 : i32
    %c0_i32_1 = arith.constant 0 : i32
    return %arg0, %c0_i32, %c0_i32_0 : i32, i32, i32
  }
}

module attributes {stable_mosaic.version = 11 : i64} {
  func.func @kernel(%arg0: i32, %arg1: memref<1x16x16x128xbf16, #tpu.memory_space<vmem>>, %arg2: memref<1x128xf32, #tpu.memory_space<vmem>>, %arg3: memref<1x128xf32, #tpu.memory_space<vmem>>, %arg4: memref<9x128x128xbf16, #tpu.memory_space<vmem>>, %arg5: memref<1x128xf32, #tpu.memory_space<vmem>>, %arg6: memref<1x16x16x128xbf16, #tpu.memory_space<vmem>>, %arg7: memref<1x1x128xf32, #tpu.memory_space<vmem>>, %arg8: memref<1x1x128xf32, #tpu.memory_space<vmem>>, %arg9: memref<18x18x128xf32, #tpu.memory_space<vmem>>) attributes {dimension_semantics = [#tpu.dimension_semantics<parallel>], iteration_bounds = array<i64: 2>, scalar_prefetch = 0 : i64, scratch_operands = 1 : i64, tpu.core_type = #tpu.core_type<tc>, window_params = [{transform_indices = @transform_0, window_bounds = array<i64: 1, 16, 16, 128>}, {pipeline_mode = #tpu.pipeline_mode<synchronous>, transform_indices = @transform_1, window_bounds = array<i64: 1, 128>}, {pipeline_mode = #tpu.pipeline_mode<synchronous>, transform_indices = @transform_2, window_bounds = array<i64: 1, 128>}, {pipeline_mode = #tpu.pipeline_mode<synchronous>, transform_indices = @transform_3, window_bounds = array<i64: 9, 128, 128>}, {pipeline_mode = #tpu.pipeline_mode<synchronous>, transform_indices = @transform_4, window_bounds = array<i64: 1, 128>}, {transform_indices = @transform_5, window_bounds = array<i64: 1, 16, 16, 128>}, {transform_indices = @transform_6, window_bounds = array<i64: 1, 1, 128>}, {transform_indices = @transform_7, window_bounds = array<i64: 1, 1, 128>}]} {
    %c0 = arith.constant 0 : index
    %c0_0 = arith.constant 0 : index
    %c0_1 = arith.constant 0 : index
    %c0_2 = arith.constant 0 : index
    %0 = vector.load %arg1[%c0, %c0_0, %c0_1, %c0_2] : memref<1x16x16x128xbf16, #tpu.memory_space<vmem>>, vector<1x16x16x128xbf16>
    %1 = vector.shape_cast %0 : vector<1x16x16x128xbf16> to vector<16x16x128xbf16>
    %2 = arith.extf %1 : vector<16x16x128xbf16> to vector<16x16x128xf32>
    %c0_3 = arith.constant 0 : index
    %c0_4 = arith.constant 0 : index
    %3 = vector.load %arg2[%c0_3, %c0_4] : memref<1x128xf32, #tpu.memory_space<vmem>>, vector<1x128xf32>
    %4 = vector.shape_cast %3 : vector<1x128xf32> to vector<1x1x128xf32>
    %5 = vector.broadcast %4 : vector<1x1x128xf32> to vector<16x16x128xf32>
    %6 = arith.mulf %2, %5 : vector<16x16x128xf32>
    %c0_5 = arith.constant 0 : index
    %c0_6 = arith.constant 0 : index
    %7 = vector.load %arg3[%c0_5, %c0_6] : memref<1x128xf32, #tpu.memory_space<vmem>>, vector<1x128xf32>
    %8 = vector.shape_cast %7 : vector<1x128xf32> to vector<1x1x128xf32>
    %9 = vector.broadcast %8 : vector<1x1x128xf32> to vector<16x16x128xf32>
    %10 = arith.addf %6, %9 : vector<16x16x128xf32>
    %cst = arith.constant 0.000000e+00 : f32
    %11 = vector.broadcast %cst : f32 to vector<16x16x128xf32>
    %12 = arith.cmpf ogt, %10, %11 : vector<16x16x128xf32>
    %cst_7 = arith.constant 0.000000e+00 : f32
    %13 = vector.broadcast %cst_7 : f32 to vector<16x16x128xf32>
    %14 = arith.minimumf %10, %13 : vector<16x16x128xf32>
    %15 = math.exp %14 : vector<16x16x128xf32>
    %cst_8 = arith.constant 1.000000e+00 : f32
    %16 = vector.broadcast %cst_8 : f32 to vector<16x16x128xf32>
    %17 = arith.subf %15, %16 : vector<16x16x128xf32>
    %18 = arith.select %12, %10, %17 : vector<16x16x128xi1>, vector<16x16x128xf32>
    %cst_9 = arith.constant 0.000000e+00 : f32
    %19 = vector.broadcast %cst_9 : f32 to vector<18x18x128xf32>
    %c0_10 = arith.constant 0 : index
    %c0_11 = arith.constant 0 : index
    %c0_12 = arith.constant 0 : index
    %20 = vector.load %arg9[%c0_10, %c0_11, %c0_12] : memref<18x18x128xf32, #tpu.memory_space<vmem>>, vector<18x18x128xf32>
    tpu.vector_store %arg9[%c0_10, %c0_11, %c0_12], %19 {strides = array<i32>} : memref<18x18x128xf32, #tpu.memory_space<vmem>>, vector<18x18x128xf32>,
    %c1 = arith.constant 1 : index
    %c1_13 = arith.constant 1 : index
    %c0_14 = arith.constant 0 : index
    %21 = vector.load %arg9[%c1, %c1_13, %c0_14] : memref<18x18x128xf32, #tpu.memory_space<vmem>>, vector<16x16x128xf32>
    tpu.vector_store %arg9[%c1, %c1_13, %c0_14], %18 {strides = array<i32>} : memref<18x18x128xf32, #tpu.memory_space<vmem>>, vector<16x16x128xf32>,
    %cst_15 = arith.constant 0.000000e+00 : f32
    %22 = vector.broadcast %cst_15 : f32 to vector<256x128xf32>
    %c0_16 = arith.constant 0 : index
    %c0_17 = arith.constant 0 : index
    %c0_18 = arith.constant 0 : index
    %23 = vector.load %arg9[%c0_16, %c0_17, %c0_18] : memref<18x18x128xf32, #tpu.memory_space<vmem>>, vector<16x16x128xf32>
    %24 = arith.truncf %23 : vector<16x16x128xf32> to vector<16x16x128xbf16>
    %25 = vector.shape_cast %24 : vector<16x16x128xbf16> to vector<256x128xbf16>
    %c0_19 = arith.constant 0 : index
    %c0_20 = arith.constant 0 : index
    %c0_21 = arith.constant 0 : index
    %26 = vector.load %arg4[%c0_19, %c0_20, %c0_21] : memref<9x128x128xbf16, #tpu.memory_space<vmem>>, vector<1x128x128xbf16>
    %27 = vector.shape_cast %26 : vector<1x128x128xbf16> to vector<128x128xbf16>
    %cst_22 = arith.constant dense<0.000000e+00> : vector<256x128xf32>
    %28 = tpu.matmul %25, %27, %cst_22 {dimension_numbers = #tpu.dot_dimension_numbers<[1], [0], [0], [1], [0, 0, 1, 1], [], []>} : vector<256x128xbf16>, vector<128x128xbf16>, vector<256x128xf32> -> vector<256x128xf32>
    %29 = arith.addf %22, %28 : vector<256x128xf32>
    %c0_23 = arith.constant 0 : index
    %c1_24 = arith.constant 1 : index
    %c0_25 = arith.constant 0 : index
    %30 = vector.load %arg9[%c0_23, %c1_24, %c0_25] : memref<18x18x128xf32, #tpu.memory_space<vmem>>, vector<16x16x128xf32>
    %31 = arith.truncf %30 : vector<16x16x128xf32> to vector<16x16x128xbf16>
    %32 = vector.shape_cast %31 : vector<16x16x128xbf16> to vector<256x128xbf16>
    %c1_26 = arith.constant 1 : index
    %c0_27 = arith.constant 0 : index
    %c0_28 = arith.constant 0 : index
    %33 = vector.load %arg4[%c1_26, %c0_27, %c0_28] : memref<9x128x128xbf16, #tpu.memory_space<vmem>>, vector<1x128x128xbf16>
    %34 = vector.shape_cast %33 : vector<1x128x128xbf16> to vector<128x128xbf16>
    %cst_29 = arith.constant dense<0.000000e+00> : vector<256x128xf32>
    %35 = tpu.matmul %32, %34, %cst_29 {dimension_numbers = #tpu.dot_dimension_numbers<[1], [0], [0], [1], [0, 0, 1, 1], [], []>} : vector<256x128xbf16>, vector<128x128xbf16>, vector<256x128xf32> -> vector<256x128xf32>
    %36 = arith.addf %29, %35 : vector<256x128xf32>
    %c0_30 = arith.constant 0 : index
    %c2 = arith.constant 2 : index
    %c0_31 = arith.constant 0 : index
    %37 = vector.load %arg9[%c0_30, %c2, %c0_31] : memref<18x18x128xf32, #tpu.memory_space<vmem>>, vector<16x16x128xf32>
    %38 = arith.truncf %37 : vector<16x16x128xf32> to vector<16x16x128xbf16>
    %39 = vector.shape_cast %38 : vector<16x16x128xbf16> to vector<256x128xbf16>
    %c2_32 = arith.constant 2 : index
    %c0_33 = arith.constant 0 : index
    %c0_34 = arith.constant 0 : index
    %40 = vector.load %arg4[%c2_32, %c0_33, %c0_34] : memref<9x128x128xbf16, #tpu.memory_space<vmem>>, vector<1x128x128xbf16>
    %41 = vector.shape_cast %40 : vector<1x128x128xbf16> to vector<128x128xbf16>
    %cst_35 = arith.constant dense<0.000000e+00> : vector<256x128xf32>
    %42 = tpu.matmul %39, %41, %cst_35 {dimension_numbers = #tpu.dot_dimension_numbers<[1], [0], [0], [1], [0, 0, 1, 1], [], []>} : vector<256x128xbf16>, vector<128x128xbf16>, vector<256x128xf32> -> vector<256x128xf32>
    %43 = arith.addf %36, %42 : vector<256x128xf32>
    %c1_36 = arith.constant 1 : index
    %c0_37 = arith.constant 0 : index
    %c0_38 = arith.constant 0 : index
    %44 = vector.load %arg9[%c1_36, %c0_37, %c0_38] : memref<18x18x128xf32, #tpu.memory_space<vmem>>, vector<16x16x128xf32>
    %45 = arith.truncf %44 : vector<16x16x128xf32> to vector<16x16x128xbf16>
    %46 = vector.shape_cast %45 : vector<16x16x128xbf16> to vector<256x128xbf16>
    %c3 = arith.constant 3 : index
    %c0_39 = arith.constant 0 : index
    %c0_40 = arith.constant 0 : index
    %47 = vector.load %arg4[%c3, %c0_39, %c0_40] : memref<9x128x128xbf16, #tpu.memory_space<vmem>>, vector<1x128x128xbf16>
    %48 = vector.shape_cast %47 : vector<1x128x128xbf16> to vector<128x128xbf16>
    %cst_41 = arith.constant dense<0.000000e+00> : vector<256x128xf32>
    %49 = tpu.matmul %46, %48, %cst_41 {dimension_numbers = #tpu.dot_dimension_numbers<[1], [0], [0], [1], [0, 0, 1, 1], [], []>} : vector<256x128xbf16>, vector<128x128xbf16>, vector<256x128xf32> -> vector<256x128xf32>
    %50 = arith.addf %43, %49 : vector<256x128xf32>
    %c1_42 = arith.constant 1 : index
    %c1_43 = arith.constant 1 : index
    %c0_44 = arith.constant 0 : index
    %51 = vector.load %arg9[%c1_42, %c1_43, %c0_44] : memref<18x18x128xf32, #tpu.memory_space<vmem>>, vector<16x16x128xf32>
    %52 = arith.truncf %51 : vector<16x16x128xf32> to vector<16x16x128xbf16>
    %53 = vector.shape_cast %52 : vector<16x16x128xbf16> to vector<256x128xbf16>
    %c4 = arith.constant 4 : index
    %c0_45 = arith.constant 0 : index
    %c0_46 = arith.constant 0 : index
    %54 = vector.load %arg4[%c4, %c0_45, %c0_46] : memref<9x128x128xbf16, #tpu.memory_space<vmem>>, vector<1x128x128xbf16>
    %55 = vector.shape_cast %54 : vector<1x128x128xbf16> to vector<128x128xbf16>
    %cst_47 = arith.constant dense<0.000000e+00> : vector<256x128xf32>
    %56 = tpu.matmul %53, %55, %cst_47 {dimension_numbers = #tpu.dot_dimension_numbers<[1], [0], [0], [1], [0, 0, 1, 1], [], []>} : vector<256x128xbf16>, vector<128x128xbf16>, vector<256x128xf32> -> vector<256x128xf32>
    %57 = arith.addf %50, %56 : vector<256x128xf32>
    %c1_48 = arith.constant 1 : index
    %c2_49 = arith.constant 2 : index
    %c0_50 = arith.constant 0 : index
    %58 = vector.load %arg9[%c1_48, %c2_49, %c0_50] : memref<18x18x128xf32, #tpu.memory_space<vmem>>, vector<16x16x128xf32>
    %59 = arith.truncf %58 : vector<16x16x128xf32> to vector<16x16x128xbf16>
    %60 = vector.shape_cast %59 : vector<16x16x128xbf16> to vector<256x128xbf16>
    %c5 = arith.constant 5 : index
    %c0_51 = arith.constant 0 : index
    %c0_52 = arith.constant 0 : index
    %61 = vector.load %arg4[%c5, %c0_51, %c0_52] : memref<9x128x128xbf16, #tpu.memory_space<vmem>>, vector<1x128x128xbf16>
    %62 = vector.shape_cast %61 : vector<1x128x128xbf16> to vector<128x128xbf16>
    %cst_53 = arith.constant dense<0.000000e+00> : vector<256x128xf32>
    %63 = tpu.matmul %60, %62, %cst_53 {dimension_numbers = #tpu.dot_dimension_numbers<[1], [0], [0], [1], [0, 0, 1, 1], [], []>} : vector<256x128xbf16>, vector<128x128xbf16>, vector<256x128xf32> -> vector<256x128xf32>
    %64 = arith.addf %57, %63 : vector<256x128xf32>
    %c2_54 = arith.constant 2 : index
    %c0_55 = arith.constant 0 : index
    %c0_56 = arith.constant 0 : index
    %65 = vector.load %arg9[%c2_54, %c0_55, %c0_56] : memref<18x18x128xf32, #tpu.memory_space<vmem>>, vector<16x16x128xf32>
    %66 = arith.truncf %65 : vector<16x16x128xf32> to vector<16x16x128xbf16>
    %67 = vector.shape_cast %66 : vector<16x16x128xbf16> to vector<256x128xbf16>
    %c6 = arith.constant 6 : index
    %c0_57 = arith.constant 0 : index
    %c0_58 = arith.constant 0 : index
    %68 = vector.load %arg4[%c6, %c0_57, %c0_58] : memref<9x128x128xbf16, #tpu.memory_space<vmem>>, vector<1x128x128xbf16>
    %69 = vector.shape_cast %68 : vector<1x128x128xbf16> to vector<128x128xbf16>
    %cst_59 = arith.constant dense<0.000000e+00> : vector<256x128xf32>
    %70 = tpu.matmul %67, %69, %cst_59 {dimension_numbers = #tpu.dot_dimension_numbers<[1], [0], [0], [1], [0, 0, 1, 1], [], []>} : vector<256x128xbf16>, vector<128x128xbf16>, vector<256x128xf32> -> vector<256x128xf32>
    %71 = arith.addf %64, %70 : vector<256x128xf32>
    %c2_60 = arith.constant 2 : index
    %c1_61 = arith.constant 1 : index
    %c0_62 = arith.constant 0 : index
    %72 = vector.load %arg9[%c2_60, %c1_61, %c0_62] : memref<18x18x128xf32, #tpu.memory_space<vmem>>, vector<16x16x128xf32>
    %73 = arith.truncf %72 : vector<16x16x128xf32> to vector<16x16x128xbf16>
    %74 = vector.shape_cast %73 : vector<16x16x128xbf16> to vector<256x128xbf16>
    %c7 = arith.constant 7 : index
    %c0_63 = arith.constant 0 : index
    %c0_64 = arith.constant 0 : index
    %75 = vector.load %arg4[%c7, %c0_63, %c0_64] : memref<9x128x128xbf16, #tpu.memory_space<vmem>>, vector<1x128x128xbf16>
    %76 = vector.shape_cast %75 : vector<1x128x128xbf16> to vector<128x128xbf16>
    %cst_65 = arith.constant dense<0.000000e+00> : vector<256x128xf32>
    %77 = tpu.matmul %74, %76, %cst_65 {dimension_numbers = #tpu.dot_dimension_numbers<[1], [0], [0], [1], [0, 0, 1, 1], [], []>} : vector<256x128xbf16>, vector<128x128xbf16>, vector<256x128xf32> -> vector<256x128xf32>
    %78 = arith.addf %71, %77 : vector<256x128xf32>
    %c2_66 = arith.constant 2 : index
    %c2_67 = arith.constant 2 : index
    %c0_68 = arith.constant 0 : index
    %79 = vector.load %arg9[%c2_66, %c2_67, %c0_68] : memref<18x18x128xf32, #tpu.memory_space<vmem>>, vector<16x16x128xf32>
    %80 = arith.truncf %79 : vector<16x16x128xf32> to vector<16x16x128xbf16>
    %81 = vector.shape_cast %80 : vector<16x16x128xbf16> to vector<256x128xbf16>
    %c8 = arith.constant 8 : index
    %c0_69 = arith.constant 0 : index
    %c0_70 = arith.constant 0 : index
    %82 = vector.load %arg4[%c8, %c0_69, %c0_70] : memref<9x128x128xbf16, #tpu.memory_space<vmem>>, vector<1x128x128xbf16>
    %83 = vector.shape_cast %82 : vector<1x128x128xbf16> to vector<128x128xbf16>
    %cst_71 = arith.constant dense<0.000000e+00> : vector<256x128xf32>
    %84 = tpu.matmul %81, %83, %cst_71 {dimension_numbers = #tpu.dot_dimension_numbers<[1], [0], [0], [1], [0, 0, 1, 1], [], []>} : vector<256x128xbf16>, vector<128x128xbf16>, vector<256x128xf32> -> vector<256x128xf32>
    %85 = arith.addf %78, %84 : vector<256x128xf32>
    %c0_72 = arith.constant 0 : index
    %c0_73 = arith.constant 0 : index
    %86 = vector.load %arg5[%c0_72, %c0_73] : memref<1x128xf32, #tpu.memory_space<vmem>>, vector<1x128xf32>
    %87 = vector.broadcast %86 : vector<1x128xf32> to vector<256x128xf32>
    %88 = arith.addf %85, %87 : vector<256x128xf32>
    %89 = vector.shape_cast %88 : vector<256x128xf32> to vector<1x16x16x128xf32>
    %90 = arith.truncf %89 : vector<1x16x16x128xf32> to vector<1x16x16x128xbf16>
    %c0_74 = arith.constant 0 : index
    %c0_75 = arith.constant 0 : index
    %c0_76 = arith.constant 0 : index
    %c0_77 = arith.constant 0 : index
    %91 = vector.load %arg6[%c0_74, %c0_75, %c0_76, %c0_77] : memref<1x16x16x128xbf16, #tpu.memory_space<vmem>>, vector<1x16x16x128xbf16>
    tpu.vector_store %arg6[%c0_74, %c0_75, %c0_76, %c0_77], %90 {strides = array<i32>} : memref<1x16x16x128xbf16, #tpu.memory_space<vmem>>, vector<1x16x16x128xbf16>,
    %cst_78 = arith.constant dense<0.000000e+00> : vector<128xf32>
    %92 = vector.multi_reduction <add>, %88, %cst_78 [0] : vector<256x128xf32> to vector<128xf32>
    %93 = vector.shape_cast %92 : vector<128xf32> to vector<1x128xf32>
    %94 = vector.shape_cast %93 : vector<1x128xf32> to vector<1x1x128xf32>
    %c0_79 = arith.constant 0 : index
    %c0_80 = arith.constant 0 : index
    %c0_81 = arith.constant 0 : index
    %95 = vector.load %arg7[%c0_79, %c0_80, %c0_81] : memref<1x1x128xf32, #tpu.memory_space<vmem>>, vector<1x1x128xf32>
    tpu.vector_store %arg7[%c0_79, %c0_80, %c0_81], %94 {strides = array<i32>} : memref<1x1x128xf32, #tpu.memory_space<vmem>>, vector<1x1x128xf32>,
    %96 = arith.mulf %88, %88 : vector<256x128xf32>
    %cst_82 = arith.constant dense<0.000000e+00> : vector<128xf32>
    %97 = vector.multi_reduction <add>, %96, %cst_82 [0] : vector<256x128xf32> to vector<128xf32>
    %98 = vector.shape_cast %97 : vector<128xf32> to vector<1x128xf32>
    %99 = vector.shape_cast %98 : vector<1x128xf32> to vector<1x1x128xf32>
    %c0_83 = arith.constant 0 : index
    %c0_84 = arith.constant 0 : index
    %c0_85 = arith.constant 0 : index
    %100 = vector.load %arg8[%c0_83, %c0_84, %c0_85] : memref<1x1x128xf32, #tpu.memory_space<vmem>>, vector<1x1x128xf32>
    tpu.vector_store %arg8[%c0_83, %c0_84, %c0_85], %99 {strides = array<i32>} : memref<1x1x128xf32, #tpu.memory_space<vmem>>, vector<1x1x128xf32>,
    return
  }
  func.func @transform_0(%arg0: i32) -> (i32, i32, i32, i32) {
    %c0_i32 = arith.constant 0 : i32
    %c0_i32_0 = arith.constant 0 : i32
    %c0_i32_1 = arith.constant 0 : i32
    %c0_i32_2 = arith.constant 0 : i32
    return %arg0, %c0_i32, %c0_i32_0, %c0_i32_1 : i32, i32, i32, i32
  }
  func.func @transform_1(%arg0: i32) -> (i32, i32) {
    %c0_i32 = arith.constant 0 : i32
    %c0_i32_0 = arith.constant 0 : i32
    %c0_i32_1 = arith.constant 0 : i32
    return %c0_i32, %c0_i32_0 : i32, i32
  }
  func.func @transform_2(%arg0: i32) -> (i32, i32) {
    %c0_i32 = arith.constant 0 : i32
    %c0_i32_0 = arith.constant 0 : i32
    %c0_i32_1 = arith.constant 0 : i32
    return %c0_i32, %c0_i32_0 : i32, i32
  }
  func.func @transform_3(%arg0: i32) -> (i32, i32, i32) {
    %c0_i32 = arith.constant 0 : i32
    %c0_i32_0 = arith.constant 0 : i32
    %c0_i32_1 = arith.constant 0 : i32
    %c0_i32_2 = arith.constant 0 : i32
    return %c0_i32, %c0_i32_0, %c0_i32_1 : i32, i32, i32
  }
  func.func @transform_4(%arg0: i32) -> (i32, i32) {
    %c0_i32 = arith.constant 0 : i32
    %c0_i32_0 = arith.constant 0 : i32
    %c0_i32_1 = arith.constant 0 : i32
    return %c0_i32, %c0_i32_0 : i32, i32
  }
  func.func @transform_5(%arg0: i32) -> (i32, i32, i32, i32) {
    %c0_i32 = arith.constant 0 : i32
    %c0_i32_0 = arith.constant 0 : i32
    %c0_i32_1 = arith.constant 0 : i32
    %c0_i32_2 = arith.constant 0 : i32
    return %arg0, %c0_i32, %c0_i32_0, %c0_i32_1 : i32, i32, i32, i32
  }
  func.func @transform_6(%arg0: i32) -> (i32, i32, i32) {
    %c0_i32 = arith.constant 0 : i32
    %c0_i32_0 = arith.constant 0 : i32
    %c0_i32_1 = arith.constant 0 : i32
    return %arg0, %c0_i32, %c0_i32_0 : i32, i32, i32
  }
  func.func @transform_7(%arg0: i32) -> (i32, i32, i32) {
    %c0_i32 = arith.constant 0 : i32
    %c0_i32_0 = arith.constant 0 : i32
    %c0_i32_1 = arith.constant 0 : i32
    return %arg0, %c0_i32, %c0_i32_0 : i32, i32, i32
  }
}

</mosaic_0001>

<bundles_post_ra>
// kernel: double_conv.5
= control target key start
LH: loop header
LB: loop body
LE: loop exit
PB: predicated region body
PF: predicated region fallthrough
CT: control target
= control target key end

     0   :  { %s813_s12 = smov 0   ;;  %s1181_s0 = inlined_call_operand.vmem [shape: bf16[2,256,128], index: 0, kind: input, shape index: {}]   ;;  %s1182_s1 = inlined_call_operand.vmem [shape: f32[1,128], index: 1, kind: input, shape index: {}]   ;;  %s1183_s2 = inlined_call_operand.vmem [shape: f32[1,128], index: 2, kind: input, shape index: {}]   ;;  %s1184_s3 = inlined_call_operand.vmem [shape: f32[2,256,8], index: 3, kind: output, shape index: {}]  }
   0x1 LB: > { %s587_s13 = sadd.s32 4294967295, %s791_s12   ;;  %p591_p0 = scmp.ge.s32.totalorder %s791_s12, 1  ;;  %s791_s12 = sphi %s813_s12, %s13_s12  }
   0x2   : > { %p137_p1 = scmp.lt.s32.totalorder %s791_s12, 3 }
   0x4   : > { %p138_p2 = pnand %p591_p0, %p137_p1 }
   0x5   : > { %p161_p3 = scmp.lt.s32.totalorder (!%p138_p2), %s587_s13, 1 }
   0x6   : > { %141 = sbr.rel (%p138_p2) target bundleno = 96 (0x60), region = 32 }
   0xb   : > { %s1186_s13 = smov (!%p161_p3, %s587_s13), 1  ;;  %v832_v0 = vld [vmem:[%s1182_s1] ss:$0 sm:$0xff]  ;;  %vm499_vm1 = vcmask 64512  }
   0xc   : > { %s630_s14 = sshll.u32 %s1186_s13, 7  ;;  %v840_v5 = vld [vmem:[%s1183_s2] ss:$0 sm:$0xff]  ;;  %s631_s22 = sshll.u32 %s1186_s13, 8 }
   0xd   : > { %s827_s17 = scalar_lea.vmem %s1181_s0, %s630_s14  ;;  %s910_s25 = scalar_lea.vmem %s1184_s3, %s631_s22 }
   0xe   : > { %v633_v1 = vld [vmem:[%s827_s17] sm:$0xff]   ;;  %v696_v2 = vld [vmem:[%s827_s17 + $0x8] sm:$0xff]   ;;  %v697_v3 = vld [vmem:[%s827_s17 + $0x10] sm:$0xff]  }
   0xf   : > { %v634_v4 = vunpack.c.l.bf16 %v633_v1  ;;  %v635_v6 = vunpack.c.h.bf16 %v633_v1  ;;  %v638_v7 = vunpack.c.l.bf16 %v696_v2  ;;  %v639_v8 = vunpack.c.h.bf16 %v696_v2  ;;  %v698_v9 = vld [vmem:[%s827_s17 + $0x18] sm:$0xff]   ;;  %v699_v34 = vld [vmem:[%s827_s17 + $0x20] sm:$0xff]   ;;  %v700_v43 = vld [vmem:[%s827_s17 + $0x28] sm:$0xff]  }
  0x10   : > { %v642_v10 = vunpack.c.l.bf16 %v697_v3  ;;  %v643_v11 = vunpack.c.h.bf16 %v697_v3  ;;  %v646_v12 = vunpack.c.l.bf16 %v698_v9  ;;  %v647_v13 = vunpack.c.h.bf16 %v698_v9  ;;  %v890_v46 = vld [vmem:[%s827_s17 + $0x30] sm:$0xff]  }
  0x11   : > { %v239_v14 = vmul.f32 %v832_v0, %v634_v4  ;;  %v240_v15 = vmul.f32 %v832_v0, %v635_v6  ;;  %v241_v16 = vmul.f32 %v832_v0, %v638_v7  ;;  %v242_v17 = vmul.f32 %v832_v0, %v639_v8 }
  0x12   : > { %v243_v18 = vmul.f32 %v832_v0, %v642_v10  ;;  %v244_v19 = vmul.f32 %v832_v0, %v643_v11  ;;  %v245_v20 = vmul.f32 %v832_v0, %v646_v12  ;;  %v246_v21 = vmul.f32 %v832_v0, %v647_v13 }
  0x13   : > { %v852_v22 = vadd.f32 %v840_v5, %v239_v14  ;;  %v855_v23 = vadd.f32 %v840_v5, %v240_v15  ;;  %v858_v24 = vadd.f32 %v840_v5, %v241_v16  ;;  %v861_v25 = vadd.f32 %v840_v5, %v242_v17 }
  0x14   : > { %v864_v26 = vadd.f32 %v840_v5, %v243_v18  ;;  %v867_v27 = vadd.f32 %v840_v5, %v244_v19  ;;  %v872_v30 = vadd.f32 %v840_v5, %v245_v20  ;;  %v877_v33 = vadd.f32 %v840_v5, %v246_v21 }
  0x15   : > { %v339_v28 = vmin.f32 %v852_v22, 0.0  ;;  %v340_v29 = vmin.f32 %v855_v23, 0.0  ;;  %v341_v31 = vmin.f32 %v858_v24, 0.0  ;;  %v342_v32 = vmin.f32 %v861_v25, 0.0 }
  0x16   : > { %vm307_vm0 = vcmp.gt.f32.partialorder %v852_v22, 0.0  ;;  %v343_v37 = vmin.f32 %v864_v26, 0.0  ;;  %vm308_vm2 = vcmp.gt.f32.partialorder %v855_v23, 0.0  ;;  %v344_v40 = vmin.f32 %v867_v27, 0.0 }
  0x17   : > { %v371_v35 = vmul.f32 1.442695, %v339_v28  ;;  %v373_v36 = vmul.f32 1.442695, %v340_v29  ;;  %v375_v38 = vmul.f32 1.442695, %v341_v31  ;;  %v650_v48 = vunpack.c.l.bf16 %v699_v34 }
  0x18   : > { %v377_v39 = vmul.f32 1.442695, %v342_v32  ;;  %vm309_vm3 = vcmp.gt.f32.partialorder %v858_v24, 0.0  ;;  %v379_v41 = vmul.f32 1.442695, %v343_v37  ;;  %v345_v42 = vmin.f32 %v872_v30, 0.0 }
  0x19   : > { %721 = vpow2.f32 %v371_v35  ;;  %vm310_vm4 = vcmp.gt.f32.partialorder %v861_v25, 0.0  ;;  %v381_v44 = vmul.f32 1.442695, %v344_v40  ;;  %v346_v45 = vmin.f32 %v877_v33, 0.0  ;;  %v702_v29 = vld [vmem:[%s827_s17 + $0x38] sm:$0xff]   ;;  %v703_v37 = vld [vmem:[%s827_s17 + $0x40] sm:$0xff]  }
  0x1a   : > { %723 = vpow2.f32 %v373_v36  ;;  %vm311_vm5 = vcmp.gt.f32.partialorder %v864_v26, 0.0  ;;  %v383_v47 = vmul.f32 1.442695, %v345_v42  ;;  %v651_v49 = vunpack.c.h.bf16 %v699_v34 }
  0x1b   : > { %725 = vpow2.f32 %v375_v38  ;;  %v385_v50 = vmul.f32 1.442695, %v346_v45  ;;  %v654_v51 = vunpack.c.l.bf16 %v700_v43  ;;  %v655_v52 = vunpack.c.h.bf16 %v700_v43  ;;  %v704_v43 = vld [vmem:[%s827_s17 + $0x48] sm:$0xff]  }
  0x1c   : > { %727 = vpow2.f32 %v377_v39  ;;  %v247_v53 = vmul.f32 %v832_v0, %v650_v48  ;;  %v248_v54 = vmul.f32 %v832_v0, %v651_v49  ;;  %v658_v55 = vunpack.c.l.bf16 %v890_v46 }
  0x1d   : > { %729 = vpow2.f32 %v379_v41  ;;  %vm312_vm6 = vcmp.gt.f32.partialorder %v867_v27, 0.0  ;;  %v249_v56 = vmul.f32 %v832_v0, %v654_v51  ;;  %v250_v57 = vmul.f32 %v832_v0, %v655_v52 }
  0x1e   : > { %731 = vpow2.f32 %v381_v44  ;;  %vm313_vm7 = vcmp.gt.f32.partialorder %v872_v30, 0.0  ;;  %v902_v59 = vadd.f32 %v840_v5, %v247_v53  ;;  %v905_v60 = vadd.f32 %v840_v5, %v248_v54 }
  0x1f   : > { %v722_v58 = vpop.eup %721  ;;  %733 = vpow2.f32 %v383_v47  ;;  %vm314_vm8 = vcmp.gt.f32.partialorder %v877_v33, 0.0  ;;  %v914_v63 = vadd.f32 %v840_v5, %v249_v56  ;;  %v251_v4 = vmul.f32 %v832_v0, %v658_v55 }
  0x20   : > { %v724_v61 = vpop.eup %723  ;;  %v596_v62 = vadd.f32 -1.0, %v722_v58  ;;  %735 = vpow2.f32 %v385_v50  ;;  %v347_v3 = vmin.f32 %v902_v59, 0.0  ;;  %v659_v6 = vunpack.c.h.bf16 %v890_v46 }
  0x21   : > { %v726_v1 = vpop.eup %725  ;;  %v597_v2 = vadd.f32 -1.0, %v724_v61  ;;  %v348_v10 = vmin.f32 %v905_v60, 0.0  ;;  %v924_v11 = vadd.f32 %v840_v5, %v250_v57  ;;  %v349_v16 = vmin.f32 %v914_v63, 0.0 }
  0x22   : > { %v728_v7 = vpop.eup %727  ;;  %v467_v8 = vsel %vm307_vm0, %v852_v22, %v596_v62  ;;  %v598_v9 = vadd.f32 -1.0, %v726_v1  ;;  %v387_v15 = vmul.f32 1.442695, %v347_v3  ;;  %vm315_vm9 = vcmp.gt.f32.partialorder %v902_v59, 0.0 }
  0x23   : > { %v730_v12 = vpop.eup %729  ;;  %500 = vst.msk [vmem:[%s910_s25] sm:$0xff] %vm499_vm1, %v467_v8  ;;  %v468_v13 = vsel %vm308_vm2, %v855_v23, %v597_v2  ;;  %v599_v14 = vadd.f32 -1.0, %v728_v7  ;;  %v389_v20 = vmul.f32 1.442695, %v348_v10  ;;  %v391_v28 = vmul.f32 1.442695, %v349_v16 }
  0x24   : > { %v732_v17 = vpop.eup %731  ;;  %501 = vst.msk [vmem:[%s910_s25 + $0x8] sm:$0xff] %vm499_vm1, %v468_v13  ;;  %v469_v18 = vsel %vm309_vm3, %v858_v24, %v598_v9  ;;  %v600_v19 = vadd.f32 -1.0, %v730_v12  ;;  %737 = vpow2.f32 %v387_v15  ;;  %v350_v34 = vmin.f32 %v924_v11, 0.0 }
  0x25   : > { %v734_v21 = vpop.eup %733  ;;  %502 = vst.msk [vmem:[%s910_s25 + $0x10] sm:$0xff] %vm499_vm1, %v469_v18  ;;  %v470_v22 = vsel %vm310_vm4, %v861_v25, %v599_v14  ;;  %v601_v23 = vadd.f32 -1.0, %v732_v17  ;;  %739 = vpow2.f32 %v389_v20  ;;  %v956_v36 = vadd.f32 %v840_v5, %v251_v4 }
  0x26   : > { %v736_v31 = vpop.eup %735  ;;  %503 = vst.msk [vmem:[%s910_s25 + $0x18] sm:$0xff] %vm499_vm1, %v470_v22  ;;  %v471_v24 = vsel %vm311_vm5, %v864_v26, %v600_v19  ;;  %v602_v32 = vadd.f32 -1.0, %v734_v21  ;;  %741 = vpow2.f32 %v391_v28  ;;  %v393_v38 = vmul.f32 1.442695, %v350_v34 }
  0x27   : > { %504 = vst.msk [vmem:[%s910_s25 + $0x20] sm:$0xff] %vm499_vm1, %v471_v24  ;;  %v472_v25 = vsel %vm312_vm6, %v867_v27, %v601_v23  ;;  %v603_v35 = vadd.f32 -1.0, %v736_v31  ;;  %v252_v39 = vmul.f32 %v832_v0, %v659_v6  ;;  %v662_v40 = vunpack.c.l.bf16 %v702_v29  ;;  %v706_v23 = vld [vmem:[%s827_s17 + $0x58] sm:$0xff]  }
  0x28   : > { %505 = vst.msk [vmem:[%s910_s25 + $0x28] sm:$0xff] %vm499_vm1, %v472_v25  ;;  %v473_v26 = vsel %vm313_vm7, %v872_v30, %v602_v32  ;;  %vm316_vm10 = vcmp.gt.f32.partialorder %v905_v60, 0.0  ;;  %v351_v41 = vmin.f32 %v956_v36, 0.0  ;;  %v663_v42 = vunpack.c.h.bf16 %v702_v29 }
  0x29   : > { %506 = vst.msk [vmem:[%s910_s25 + $0x30] sm:$0xff] %vm499_vm1, %v473_v26  ;;  %v474_v27 = vsel %vm314_vm8, %v877_v33, %v603_v35  ;;  %743 = vpow2.f32 %v393_v38  ;;  %v976_v30 = vadd.f32 %v840_v5, %v252_v39  ;;  %v253_v44 = vmul.f32 %v832_v0, %v662_v40 }
  0x2a   : > { %507 = vst.msk [vmem:[%s910_s25 + $0x38] sm:$0xff] %vm499_vm1, %v474_v27  ;;  %v666_v45 = vunpack.c.l.bf16 %v703_v37  ;;  %v738_v46 = vpop.eup %737  ;;  %vm317_vm11 = vcmp.gt.f32.partialorder %v914_v63, 0.0  ;;  %v395_v47 = vmul.f32 1.442695, %v351_v41  ;;  %v254_v33 = vmul.f32 %v832_v0, %v663_v42  ;;  %v707_v41 = vld [vmem:[%s827_s17 + $0x60] sm:$0xff]  }
  0x2b   : > { %v667_v48 = vunpack.c.h.bf16 %v703_v37  ;;  %v740_v49 = vpop.eup %739  ;;  %v604_v50 = vadd.f32 -1.0, %v738_v46  ;;  %v352_v51 = vmin.f32 %v976_v30, 0.0  ;;  %v983_v52 = vadd.f32 %v840_v5, %v253_v44 }
  0x2c   : > { %v670_v53 = vunpack.c.l.bf16 %v704_v43  ;;  %v742_v54 = vpop.eup %741  ;;  %v605_v55 = vadd.f32 -1.0, %v740_v49  ;;  %745 = vpow2.f32 %v395_v47  ;;  %v986_v56 = vadd.f32 %v840_v5, %v254_v33 }
  0x2d   : > { %v255_v57 = vmul.f32 %v832_v0, %v666_v45  ;;  %v475_v58 = vsel %vm315_vm9, %v902_v59, %v604_v50  ;;  %v606_v61 = vadd.f32 -1.0, %v742_v54  ;;  %vm318_vm12 = vcmp.gt.f32.partialorder %v924_v11, 0.0 }
  0x2e   : > { %v397_v62 = vmul.f32 1.442695, %v352_v51  ;;  %508 = vst.msk [vmem:[%s910_s25 + $0x40] sm:$0xff] %vm499_vm1, %v475_v58  ;;  %v476_v1 = vsel %vm316_vm10, %v905_v60, %v605_v55  ;;  %vm319_vm13 = vcmp.gt.f32.partialorder %v956_v36, 0.0  ;;  %v353_v2 = vmin.f32 %v983_v52, 0.0  ;;  %v705_v60 = vld [vmem:[%s827_s17 + $0x50] sm:$0xff]  }
  0x2f   : > { %v354_v3 = vmin.f32 %v986_v56, 0.0  ;;  %v744_v4 = vpop.eup %743  ;;  %509 = vst.msk [vmem:[%s910_s25 + $0x48] sm:$0xff] %vm499_vm1, %v476_v1  ;;  %v477_v59 = vsel %vm317_vm11, %v914_v63, %v606_v61  ;;  %v1007_v6 = vadd.f32 %v840_v5, %v255_v57  ;;  %v256_v7 = vmul.f32 %v832_v0, %v667_v48  ;;  %v708_v55 = vld [vmem:[%s827_s17 + $0x68] sm:$0xff]  }
  0x30   : > { %747 = vpow2.f32 %v397_v62  ;;  %510 = vst.msk [vmem:[%s910_s25 + $0x50] sm:$0xff] %vm499_vm1, %v477_v59  ;;  %v607_v8 = vadd.f32 -1.0, %v744_v4  ;;  %v399_v9 = vmul.f32 1.442695, %v353_v2  ;;  %v257_v12 = vmul.f32 %v832_v0, %v670_v53 }
  0x31   : > { %v401_v10 = vmul.f32 1.442695, %v354_v3  ;;  %vm320_vm14 = vcmp.gt.f32.partialorder %v976_v30, 0.0  ;;  %v355_v13 = vmin.f32 %v1007_v6, 0.0  ;;  %v1017_v63 = vadd.f32 %v840_v5, %v256_v7 }
  0x32   : > { %v671_v14 = vunpack.c.h.bf16 %v704_v43  ;;  %v746_v15 = vpop.eup %745  ;;  %v478_v16 = vsel %vm318_vm12, %v924_v11, %v607_v8  ;;  %749 = vpow2.f32 %v399_v9  ;;  %v1023_v17 = vadd.f32 %v840_v5, %v257_v12 }
  0x33   : > { %v674_v18 = vunpack.c.l.bf16 %v705_v60  ;;  %511 = vst.msk [vmem:[%s910_s25 + $0x58] sm:$0xff] %vm499_vm1, %v478_v16  ;;  %v608_v19 = vadd.f32 -1.0, %v746_v15  ;;  %vm321_vm15 = vcmp.gt.f32.partialorder %v983_v52, 0.0  ;;  %751 = vpow2.f32 %v401_v10 }
  0x34   : > { %v403_v20 = vmul.f32 1.442695, %v355_v13  ;;  %vm322_vm0 = vcmp.gt.f32.partialorder %v986_v56, 0.0  ;;  %v356_v21 = vmin.f32 %v1017_v63, 0.0  ;;  %v357_v22 = vmin.f32 %v1023_v17, 0.0 }
  0x35   : > { %v258_v11 = vmul.f32 %v832_v0, %v671_v14  ;;  %v479_v29 = vsel %vm319_vm13, %v956_v36, %v608_v19  ;;  %v259_v31 = vmul.f32 %v832_v0, %v674_v18  ;;  %v675_v24 = vunpack.c.h.bf16 %v705_v60 }
  0x36   : > { %v748_v28 = vpop.eup %747  ;;  %753 = vpow2.f32 %v403_v20  ;;  %512 = vst.msk [vmem:[%s910_s25 + $0x60] sm:$0xff] %vm499_vm1, %v479_v29  ;;  %v405_v34 = vmul.f32 1.442695, %v356_v21  ;;  %v407_v25 = vmul.f32 1.442695, %v357_v22  ;;  %v678_v36 = vunpack.c.l.bf16 %v706_v23  ;;  %v709_v21 = vld [vmem:[%s827_s17 + $0x70] sm:$0xff]  }
  0x37   : > { %v609_v32 = vadd.f32 -1.0, %v748_v28  ;;  %v1040_v35 = vadd.f32 %v840_v5, %v258_v11  ;;  %v1043_v37 = vadd.f32 %v840_v5, %v259_v31  ;;  %v260_v26 = vmul.f32 %v832_v0, %v675_v24  ;;  %v710_v31 = vld [vmem:[%s827_s17 + $0x78] sm:$0xff]  }
  0x38   : > { %v679_v38 = vunpack.c.h.bf16 %v706_v23  ;;  %v750_v39 = vpop.eup %749  ;;  %vm323_vm2 = vcmp.gt.f32.partialorder %v1007_v6, 0.0  ;;  %755 = vpow2.f32 %v405_v34  ;;  %vm324_vm3 = vcmp.gt.f32.partialorder %v1017_v63, 0.0 }
  0x39   : > { %v480_v40 = vsel %vm320_vm14, %v976_v30, %v609_v32  ;;  %v358_v27 = vmin.f32 %v1040_v35, 0.0  ;;  %v752_v42 = vpop.eup %751  ;;  %v610_v43 = vadd.f32 -1.0, %v750_v39  ;;  %757 = vpow2.f32 %v407_v25 }
  0x3a   : > { %513 = vst.msk [vmem:[%s910_s25 + $0x68] sm:$0xff] %vm499_vm1, %v480_v40  ;;  %v359_v44 = vmin.f32 %v1043_v37, 0.0  ;;  %v611_v45 = vadd.f32 -1.0, %v752_v42  ;;  %v1057_v46 = vadd.f32 %v840_v5, %v260_v26  ;;  %v261_v47 = vmul.f32 %v832_v0, %v678_v36 }
  0x3b   : > { %v409_v30 = vmul.f32 1.442695, %v358_v27  ;;  %v481_v48 = vsel %vm321_vm15, %v983_v52, %v610_v43  ;;  %v262_v50 = vmul.f32 %v832_v0, %v679_v38  ;;  %v682_v51 = vunpack.c.l.bf16 %v707_v41 }
  0x3c   : > { %v754_v33 = vpop.eup %753  ;;  %v411_v49 = vmul.f32 1.442695, %v359_v44  ;;  %514 = vst.msk [vmem:[%s910_s25 + $0x70] sm:$0xff] %vm499_vm1, %v481_v48  ;;  %v482_v53 = vsel %vm322_vm0, %v986_v56, %v611_v45  ;;  %vm325_vm4 = vcmp.gt.f32.partialorder %v1023_v17, 0.0  ;;  %v360_v52 = vmin.f32 %v1057_v46, 0.0 }
  0x3d   : > { %v612_v54 = vadd.f32 -1.0, %v754_v33  ;;  %759 = vpow2.f32 %v409_v30  ;;  %515 = vst.msk [vmem:[%s910_s25 + $0x78] sm:$0xff] %vm499_vm1, %v482_v53  ;;  %v1075_v57 = vadd.f32 %v840_v5, %v261_v47  ;;  %v1078_v58 = vadd.f32 %v840_v5, %v262_v50 }
  0x3e   : > { %761 = vpow2.f32 %v411_v49  ;;  %v756_v61 = vpop.eup %755  ;;  %vm326_vm5 = vcmp.gt.f32.partialorder %v1040_v35, 0.0  ;;  %v263_v62 = vmul.f32 %v832_v0, %v682_v51  ;;  %v683_v1 = vunpack.c.h.bf16 %v707_v41 }
  0x3f   : > { %v483_v56 = vsel %vm323_vm2, %v1007_v6, %v612_v54  ;;  %v758_v2 = vpop.eup %757  ;;  %v613_v3 = vadd.f32 -1.0, %v756_v61  ;;  %v413_v4 = vmul.f32 1.442695, %v360_v52  ;;  %v361_v59 = vmin.f32 %v1075_v57, 0.0 }
  0x40   : > { %516 = vst.msk [vmem:[%s910_s25 + $0x80] sm:$0xff] %vm499_vm1, %v483_v56  ;;  %v686_v7 = vunpack.c.l.bf16 %v708_v55  ;;  %v614_v60 = vadd.f32 -1.0, %v758_v2  ;;  %vm327_vm6 = vcmp.gt.f32.partialorder %v1043_v37, 0.0  ;;  %v362_v6 = vmin.f32 %v1078_v58, 0.0 }
  0x41   : > { %v1091_v8 = vadd.f32 %v840_v5, %v263_v62  ;;  %v484_v9 = vsel %vm324_vm3, %v1017_v63, %v613_v3  ;;  %763 = vpow2.f32 %v413_v4  ;;  %v415_v10 = vmul.f32 1.442695, %v361_v59 }
  0x42   : > { %v264_v12 = vmul.f32 %v832_v0, %v683_v1  ;;  %517 = vst.msk [vmem:[%s910_s25 + $0x88] sm:$0xff] %vm499_vm1, %v484_v9  ;;  %v485_v14 = vsel %vm325_vm4, %v1023_v17, %v614_v60  ;;  %vm328_vm7 = vcmp.gt.f32.partialorder %v1057_v46, 0.0  ;;  %v417_v15 = vmul.f32 1.442695, %v362_v6 }
  0x43   : > { %v760_v13 = vpop.eup %759  ;;  %v363_v16 = vmin.f32 %v1091_v8, 0.0  ;;  %518 = vst.msk [vmem:[%s910_s25 + $0x90] sm:$0xff] %vm499_vm1, %v485_v14  ;;  %765 = vpow2.f32 %v415_v10  ;;  %v265_v20 = vmul.f32 %v832_v0, %v686_v7  ;;  %v687_v11 = vunpack.c.h.bf16 %v708_v55 }
  0x44   : > { %v762_v18 = vpop.eup %761  ;;  %v615_v63 = vadd.f32 -1.0, %v760_v13  ;;  %v1107_v19 = vadd.f32 %v840_v5, %v264_v12  ;;  %767 = vpow2.f32 %v417_v15  ;;  %vm329_vm8 = vcmp.gt.f32.partialorder %v1075_v57, 0.0 }
  0x45   : > { %v616_v17 = vadd.f32 -1.0, %v762_v18  ;;  %v419_v22 = vmul.f32 1.442695, %v363_v16  ;;  %v1117_v29 = vadd.f32 %v840_v5, %v265_v20  ;;  %v266_v32 = vmul.f32 %v832_v0, %v687_v11 }
  0x46   : > { %v486_v23 = vsel %vm326_vm5, %v1040_v35, %v615_v63  ;;  %v364_v28 = vmin.f32 %v1107_v19, 0.0  ;;  %v690_v34 = vunpack.c.l.bf16 %v709_v21  ;;  %vm330_vm9 = vcmp.gt.f32.partialorder %v1078_v58, 0.0 }
  0x47   : > { %519 = vst.msk [vmem:[%s910_s25 + $0x98] sm:$0xff] %vm499_vm1, %v486_v23  ;;  %v487_v24 = vsel %vm327_vm6, %v1043_v37, %v616_v17  ;;  %769 = vpow2.f32 %v419_v22  ;;  %v764_v25 = vpop.eup %763  ;;  %v365_v26 = vmin.f32 %v1117_v29, 0.0  ;;  %v691_v36 = vunpack.c.h.bf16 %v709_v21 }
  0x48   : > { %520 = vst.msk [vmem:[%s910_s25 + $0xa0] sm:$0xff] %vm499_vm1, %v487_v24  ;;  %v421_v35 = vmul.f32 1.442695, %v364_v28  ;;  %v617_v38 = vadd.f32 -1.0, %v764_v25  ;;  %v302_v39 = vadd.f32 %v840_v5, %v266_v32  ;;  %v267_v40 = vmul.f32 %v832_v0, %v690_v34 }
  0x49   : > { %v694_v37 = vunpack.c.l.bf16 %v710_v31  ;;  %v766_v27 = vpop.eup %765  ;;  %v423_v41 = vmul.f32 1.442695, %v365_v26  ;;  %v268_v42 = vmul.f32 %v832_v0, %v691_v36  ;;  %v695_v43 = vunpack.c.h.bf16 %v710_v31 }
  0x4a   : > { %771 = vpow2.f32 %v421_v35  ;;  %v768_v44 = vpop.eup %767  ;;  %v488_v45 = vsel %vm328_vm7, %v1057_v46, %v617_v38  ;;  %v618_v30 = vadd.f32 -1.0, %v766_v27  ;;  %vm331_vm10 = vcmp.gt.f32.partialorder %v1091_v8, 0.0 }
  0x4b   : > { %v366_v47 = vmin.f32 %v302_v39, 0.0  ;;  %521 = vst.msk [vmem:[%s910_s25 + $0xa8] sm:$0xff] %vm499_vm1, %v488_v45  ;;  %v619_v33 = vadd.f32 -1.0, %v768_v44  ;;  %773 = vpow2.f32 %v423_v41  ;;  %v303_v48 = vadd.f32 %v840_v5, %v267_v40 }
  0x4c   : > { %v304_v49 = vadd.f32 %v840_v5, %v268_v42  ;;  %v489_v51 = vsel %vm329_vm8, %v1075_v57, %v618_v30  ;;  %v269_v46 = vmul.f32 %v832_v0, %v694_v37  ;;  %v270_v54 = vmul.f32 %v832_v0, %v695_v43 }
  0x4d   : > { %v770_v50 = vpop.eup %769  ;;  %v425_v53 = vmul.f32 1.442695, %v366_v47  ;;  %522 = vst.msk [vmem:[%s910_s25 + $0xb0] sm:$0xff] %vm499_vm1, %v489_v51  ;;  %v490_v55 = vsel %vm330_vm9, %v1078_v58, %v619_v33  ;;  %v367_v61 = vmin.f32 %v303_v48, 0.0  ;;  %vm332_vm11 = vcmp.gt.f32.partialorder %v1107_v19, 0.0 }
  0x4e   : > { %v620_v52 = vadd.f32 -1.0, %v770_v50  ;;  %523 = vst.msk [vmem:[%s910_s25 + $0xb8] sm:$0xff] %vm499_vm1, %v490_v55  ;;  %v368_v56 = vmin.f32 %v304_v49, 0.0  ;;  %v305_v57 = vadd.f32 %v840_v5, %v269_v46  ;;  %v306_v2 = vadd.f32 %v840_v5, %v270_v54 }
  0x4f   : > { %775 = vpow2.f32 %v425_v53  ;;  %v427_v0 = vmul.f32 1.442695, %v367_v61  ;;  %vm333_vm12 = vcmp.gt.f32.partialorder %v1117_v29, 0.0  ;;  %vm334_vm13 = vcmp.gt.f32.partialorder %v302_v39, 0.0 }
  0x50   : > { %v772_v62 = vpop.eup %771  ;;  %v491_v1 = vsel %vm331_vm10, %v1091_v8, %v620_v52  ;;  %v429_v3 = vmul.f32 1.442695, %v368_v56  ;;  %v369_v4 = vmin.f32 %v305_v57, 0.0  ;;  %v370_v7 = vmin.f32 %v306_v2, 0.0 }
  0x51   : > { %524 = vst.msk [vmem:[%s910_s25 + $0xc0] sm:$0xff] %vm499_vm1, %v491_v1  ;;  %v621_v58 = vadd.f32 -1.0, %v772_v62  ;;  %v774_v59 = vpop.eup %773  ;;  %777 = vpow2.f32 %v427_v0  ;;  %vm335_vm14 = vcmp.gt.f32.partialorder %v303_v48, 0.0  ;;  %vm336_vm15 = vcmp.gt.f32.partialorder %v304_v49, 0.0 }
  0x52   : > { %v622_v6 = vadd.f32 -1.0, %v774_v59  ;;  %779 = vpow2.f32 %v429_v3  ;;  %v431_v8 = vmul.f32 1.442695, %v369_v4  ;;  %v433_v5 = vmul.f32 1.442695, %v370_v7 }
  0x53   : > { %v492_v60 = vsel %vm332_vm11, %v1107_v19, %v621_v58  ;;  %vm337_vm0 = vcmp.gt.f32.partialorder %v305_v57, 0.0  ;;  %vm338_vm2 = vcmp.gt.f32.partialorder %v306_v2, 0.0 }
  0x54   : > { %525 = vst.msk [vmem:[%s910_s25 + $0xc8] sm:$0xff] %vm499_vm1, %v492_v60  ;;  %v493_v10 = vsel %vm333_vm12, %v1117_v29, %v622_v6  ;;  %781 = vpow2.f32 %v431_v8 }
  0x55   : > { %v776_v9 = vpop.eup %775  ;;  %526 = vst.msk [vmem:[%s910_s25 + $0xd0] sm:$0xff] %vm499_vm1, %v493_v10  ;;  %783 = vpow2.f32 %v433_v5 }
  0x56   : > { %v623_v12 = vadd.f32 -1.0, %v776_v9 }
  0x57   : > { %v778_v13 = vpop.eup %777 }
  0x58   : > { %v494_v14 = vsel %vm334_vm13, %v302_v39, %v623_v12  ;;  %v780_v15 = vpop.eup %779  ;;  %v624_v16 = vadd.f32 -1.0, %v778_v13 }
  0x59   : > { %527 = vst.msk [vmem:[%s910_s25 + $0xd8] sm:$0xff] %vm499_vm1, %v494_v14  ;;  %v625_v18 = vadd.f32 -1.0, %v780_v15 }
  0x5a   : > { %v782_v63 = vpop.eup %781  ;;  %v495_v19 = vsel %vm335_vm14, %v303_v48, %v624_v16 }
  0x5b   : > { %v784_v20 = vpop.eup %783  ;;  %528 = vst.msk [vmem:[%s910_s25 + $0xe0] sm:$0xff] %vm499_vm1, %v495_v19  ;;  %v496_v21 = vsel %vm336_vm15, %v304_v49, %v625_v18  ;;  %v626_v17 = vadd.f32 -1.0, %v782_v63 }
  0x5c   : > { %529 = vst.msk [vmem:[%s910_s25 + $0xe8] sm:$0xff] %vm499_vm1, %v496_v21  ;;  %v627_v22 = vadd.f32 -1.0, %v784_v20 }
  0x5d   : > { %v497_v11 = vsel %vm337_vm0, %v305_v57, %v626_v17 }
  0x5e   : > { %530 = vst.msk [vmem:[%s910_s25 + $0xf0] sm:$0xff] %vm499_vm1, %v497_v11  ;;  %v498_v23 = vsel %vm338_vm2, %v306_v2, %v627_v22 }
  0x5f   : > { %531 = vst.msk [vmem:[%s910_s25 + $0xf8] sm:$0xff] %vm499_vm1, %v498_v23 }
  0x60 PF: > { %s13_s12 = sadd.s32 1, %s791_s12  }
  0x61   : > { %p10_p4 = scmp.ge.s32.totalorder %s13_s12, 4  }
  0x63   :  { %12 = sbr.rel (!%p10_p4) target bundleno = 1 (0x1), region = 62 }

// kernel: double_conv.3
= control target key start
LH: loop header
LB: loop body
LE: loop exit
PB: predicated region body
PF: predicated region fallthrough
CT: control target
= control target key end

     0   :  { %s3048_s18 = smov 0   ;;  %s4177_s0 = inlined_call_operand.vmem [shape: bf16[2,18,18,8], index: 0, kind: input, shape index: {}]   ;;  %s4178_s1 = inlined_call_operand.vmem [shape: bf16[9,8,128], index: 1, kind: input, shape index: {}]   ;;  %s4179_s2 = inlined_call_operand.vmem [shape: f32[1,128], index: 2, kind: input, shape index: {}]   ;;  %s4180_s3 = inlined_call_operand.vmem [shape: bf16[2,16,16,128], index: 3, kind: output, shape index: {0}]   ;;  %s4181_s4 = inlined_call_operand.vmem [shape: f32[2,1,128], index: 4, kind: output, shape index: {1}]   ;;  %s4182_s5 = inlined_call_operand.vmem [shape: f32[2,1,128], index: 5, kind: output, shape index: {2}]  }
   0x1 LB: > { %s2623_s19 = sadd.s32 4294967295, %s3016_s18   ;;  %p2627_p0 = scmp.ge.s32.totalorder %s3016_s18, 1  ;;  %s3016_s18 = sphi %s3048_s18, %s16_s18  }
   0x2   : > { %p192_p1 = scmp.lt.s32.totalorder %s3016_s18, 3 }
   0x4   : > { %p193_p2 = pnand %p2627_p0, %p192_p1 }
   0x6   : > { %196 = sbr.rel (%p193_p2) target bundleno = 772 (0x304), region = 32 }
   0xb   : > { %v2631_v0 = vld [vmem:[%s4178_s1 + $0x4] sm:$0xf]  ;;  %vm784_vm0 = vcmask 1043456   ;;  %p226_p3 = scmp.lt.s32.totalorder %s2623_s19, 1  ;;  %v2744_v2 = vld [vmem:[%s4178_s1 + $0x8] sm:$0xf] }
   0xc   : > { %v786_v1 = vsel %vm784_vm0, %v2631_v0, 0  ;;  %v1327_v3 = vsel %vm784_vm0, %v2744_v2, 0  ;;  %v2761_v4 = vld [vmem:[%s4178_s1 + $0xc] sm:$0xf]  ;;  %v297_v5 = vld [vmem:[%s4178_s1] sm:$0xf] }
   0xd   : > { %2989 = vmatpush.bf16.msra.mxu1 %v786_v1  ;;  %2990 = vmatpush.bf16.msra.mxu2 %v786_v1  ;;  %s4322_s19 = smov (!%p226_p3, %s2623_s19), 1  ;;  %v2782_v6 = vld [vmem:[%s4178_s1 + $0x10] sm:$0xf]  ;;  %v1461_v7 = vsel %vm784_vm0, %v2761_v4, 0  ;;  %v1006_v8 = vsel %vm784_vm0, %v297_v5, 0  ;;  %vm735_vm4 = vcmask 64512  }
   0xe   : > { %2991 = vmatpush.bf16.msra.mxu3 %v786_v1  ;;  %795 = vmatpush.bf16.msra.mxu0 %v786_v1  ;;  %s2992_s30 = smul.u32 216, %s4322_s19  ;;  %v1617_v9 = vsel %vm784_vm0, %v2782_v6, 0  ;;  %vm298_vm1 = vsmask.f32 3328  ;;  %vm299_vm2 = vsmask.f32 7440  ;;  %s238_s27 = scalar_lea.vmem %s4181_s4, %s4322_s19 }
   0xf   : > { %vm3109_vm3 = vmor %vm298_vm1, %vm299_vm2  ;;  %vm1113_vm5 = vcmask 1042432   ;;  %vm1114_vm6 = vcmask 1046532   ;;  %s2875_s21 = sshll.u32 %s4322_s19, 7 }
  0x10   : > { %s3082_s8 = scalar_lea.vmem %s4177_s0, %s2992_s30  ;;  %vm3412_vm7 = vmor %vm1113_vm5, %vm1114_vm6  ;;  %s4015_s24 = scalar_lea.vmem %s4180_s3, %s2875_s21 }
  0x11   : > { %1336 = vmatpush.bf16.msrb.mxu2 %v1327_v3  ;;  %1015 = vmatpush.bf16.msrb.mxu1 %v1006_v8  ;;  %v3085_v10 = vld [vmem:[%s3082_s8 + $0x30] sm:$0xf]  ;;  %v3088_v11 = vld [vmem:[%s3082_s8 + $0x34] sm:$0xf]  ;;  %v3091_v12 = vld [vmem:[%s3082_s8 + $0x38] sm:$0x1]  ;;  %s241_s30 = scalar_lea.vmem %s4182_s5, %s4322_s19 }
  0x12   : > { %1470 = vmatpush.bf16.msrb.mxu3 %v1461_v7  ;;  %1626 = vmatpush.bf16.msrb.mxu0 %v1617_v9  ;;  %v398_v13 = vshrl.u32 %v3085_v10, 16  ;;  %v401_v14 = vshll.u32 %v3085_v10, 16  ;;  %v407_v15 = vshll.u32 %v3088_v11, 16  ;;  %v411_v16 = vshrl.u32 %v3088_v11, 16  ;;  %v267_v17 = vld [vmem:[%s3082_s8 + $0x60] sm:$0xf] }
  0x13   : > { %v417_v18 = vshll.u32 %v3091_v12, 16  ;;  %v3100_v19 = vld [vmem:[%s3082_s8 + $0x64] sm:$0xf]  ;;  %v269_v20 = vld [vmem:[%s3082_s8 + $0x68] sm:$0x1]  ;;  %v494_v21 = vshrl.u32 %v267_v17, 16 }
  0x14   : > { %v400_v22 = vrot.slane %v398_v13, 4  ;;  %v403_v23 = vrot.slane %v401_v14, 5  ;;  %v409_v24 = vrot.slane %v407_v15, 5  ;;  %v413_v25 = vrot.slane %v411_v16, 4  ;;  %v279_v26 = vld [vmem:[%s3082_s8 + $0x90] sm:$0xf] }
  0x15   : > { %v419_v27 = vrot.slane %v417_v18, 5  ;;  %v496_v28 = vrot.slane %v494_v21, 4  ;;  %v497_v29 = vshll.u32 %v267_v17, 16  ;;  %v503_v30 = vshll.u32 %v3100_v19, 16  ;;  %v280_v35 = vld [vmem:[%s3082_s8 + $0x94] sm:$0xf] }
  0x16   : > { %v404_v31 = vor.u32 %v403_v23, %v400_v22  ;;  %v414_v32 = vor.u32 %v413_v25, %v409_v24  ;;  %v507_v33 = vshrl.u32 %v3100_v19, 16  ;;  %v513_v34 = vshll.u32 %v269_v20, 16  ;;  %v281_v45 = vld [vmem:[%s3082_s8 + $0x98] sm:$0x1]  ;;  %v3119_v61 = vld [vmem:[%s3082_s8] sm:$0xf] }
  0x17   : > { %v499_v37 = vrot.slane %v497_v29, 5  ;;  %v505_v38 = vrot.slane %v503_v30, 5  ;;  %v590_v39 = vshrl.u32 %v279_v26, 16  ;;  %v593_v47 = vshll.u32 %v279_v26, 16  ;;  %v3126_v1 = vld [vmem:[%s3082_s8 + $0x4] sm:$0xf] }
  0x18   : > { %v405_v40 = vrot.slane %v404_v31, 4  ;;  %v415_v41 = vrot.slane %v414_v32, 4  ;;  %v509_v42 = vrot.slane %v507_v33, 4  ;;  %v515_v43 = vrot.slane %v513_v34, 5  ;;  %v3129_v2 = vld [vmem:[%s3082_s8 + $0x8] sm:$0x1] }
  0x19   : > { %v500_v44 = vor.u32 %v499_v37, %v496_v28  ;;  %v592_v46 = vrot.slane %v590_v39, 4  ;;  %v599_v48 = vshll.u32 %v280_v35, 16  ;;  %v603_v52 = vshrl.u32 %v280_v35, 16  ;;  %v3145_v23 = vld [vmem:[%s3082_s8 + $0x3c] sm:$0xf] }
  0x1a   : > { %v410_v49 = vsel %vm3109_vm3, %v405_v40, %v409_v24  ;;  %v420_v50 = vsel %vm3109_vm3, %v415_v41, %v419_v27  ;;  %v510_v51 = vor.u32 %v509_v42, %v505_v38  ;;  %v595_v56 = vrot.slane %v593_v47, 5  ;;  %v3148_v24 = vld [vmem:[%s3082_s8 + $0x40] sm:$0xf]  ;;  %v3153_v29 = vld [vmem:[%s3082_s8 + $0x44] sm:$0x1] }
  0x1b   : > { %v695_v53 = vunpack.c.l.b16 %v410_v49  ;;  %v696_v54 = vunpack.c.l.b16 %v420_v50  ;;  %v501_v55 = vrot.slane %v500_v44, 4  ;;  %v601_v58 = vrot.slane %v599_v48, 5  ;;  %v3168_v47 = vld [vmem:[%s3082_s8 + $0x70] sm:$0xf] }
  0x1c   : > { %v511_v57 = vrot.slane %v510_v51, 4  ;;  %v605_v59 = vrot.slane %v603_v52, 4  ;;  %v609_v60 = vshll.u32 %v281_v45, 16  ;;  %v596_v0 = vor.u32 %v595_v56, %v592_v46  ;;  %v3175_v51 = vld [vmem:[%s3082_s8 + $0x74] sm:$0x1] }
  0x1d   : > { %v3121_v62 = vpack.c.b16 %v696_v54, %v695_v53  ;;  %v506_v63 = vsel %vm3109_vm3, %v501_v55, %v505_v38  ;;  %v302_v9 = vshrl.u32 %v3119_v61, 16  ;;  %v305_v13 = vshll.u32 %v3119_v61, 16  ;;  %v3161_v38 = vld [vmem:[%s3082_s8 + $0x6c] sm:$0xf] }
  0x1e   : > { %v516_v3 = vsel %vm3109_vm3, %v511_v57, %v515_v43  ;;  %v703_v4 = vunpack.c.l.b16 %v506_v63  ;;  %v606_v5 = vor.u32 %v605_v59, %v601_v58  ;;  %v611_v6 = vrot.slane %v609_v60, 5 }
  0x1f   : > { %2636 = vmatmul.msk.bf16.vlgmr.msra.gmra.mxu1 %vm735_vm4, %v3121_v62  ;;  %v704_v7 = vunpack.c.l.b16 %v516_v3  ;;  %v597_v8 = vrot.slane %v596_v0, 4  ;;  %v311_v15 = vshll.u32 %v3126_v1, 16  ;;  %v315_v16 = vshrl.u32 %v3126_v1, 16 }
  0x20   : > { %v607_v14 = vrot.slane %v606_v5, 4  ;;  %v321_v17 = vshll.u32 %v3129_v2, 16  ;;  %v304_v21 = vrot.slane %v302_v9, 4  ;;  %v307_v22 = vrot.slane %v305_v13, 5  ;;  %v282_v5 = vld [vmem:[%s3082_s8 + $0x9c] sm:$0xf] }
  0x21   : > { %v3140_v18 = vpack.c.b16 %v704_v7, %v703_v4  ;;  %v602_v20 = vsel %vm3109_vm3, %v597_v8, %v601_v58  ;;  %v313_v27 = vrot.slane %v311_v15, 5  ;;  %v317_v28 = vrot.slane %v315_v16, 4  ;;  %v283_v9 = vld [vmem:[%s3082_s8 + $0xa0] sm:$0xf] }
  0x22   : > { %v612_v25 = vsel %vm3109_vm3, %v607_v14, %v611_v6  ;;  %v711_v26 = vunpack.c.l.b16 %v602_v20  ;;  %v308_v31 = vor.u32 %v307_v22, %v304_v21  ;;  %v323_v32 = vrot.slane %v321_v17, 5  ;;  %v284_v17 = vld [vmem:[%s3082_s8 + $0xa4] sm:$0x1] }
  0x23   : > { %4225 = vst [vmem:[#allocation2_spill] sm:$0xff] %v3140_v18  ;;  %2640 = vmatmul.msk.bf16.vlgmr.msra.gmra.mxu2 %vm735_vm4, %v3140_v18  ;;  %v712_v30 = vunpack.c.l.b16 %v612_v25  ;;  %v318_v33 = vor.u32 %v317_v28, %v313_v27  ;;  %v422_v34 = vshrl.u32 %v3145_v23, 16  ;;  %v425_v35 = vshll.u32 %v3145_v23, 16 }
  0x24   : > { %v431_v37 = vshll.u32 %v3148_v24, 16  ;;  %v309_v40 = vrot.slane %v308_v31, 4  ;;  %v435_v41 = vshrl.u32 %v3148_v24, 16  ;;  %v441_v42 = vshll.u32 %v3153_v29, 16 }
  0x25   : > { %v3163_v39 = vpack.c.b16 %v712_v30, %v711_v26  ;;  %v319_v43 = vrot.slane %v318_v33, 4  ;;  %v424_v44 = vrot.slane %v422_v34, 4  ;;  %v427_v45 = vrot.slane %v425_v35, 5  ;;  %v3193_v35 = vld [vmem:[%s3082_s8 + $0xc] sm:$0xf] }
  0x26   : > { %v433_v46 = vrot.slane %v431_v37, 5  ;;  %v314_v48 = vsel %vm3109_vm3, %v309_v40, %v313_v27  ;;  %v437_v49 = vrot.slane %v435_v41, 4  ;;  %v443_v50 = vrot.slane %v441_v42, 5 }
  0x27   : > { %4226 = vst [vmem:[#allocation3_spill] sm:$0xff] %v3163_v39  ;;  %2644 = vmatmul.msk.bf16.vlgmr.msra.gmra.mxu3 %vm735_vm4, %v3163_v39  ;;  %v518_v52 = vshrl.u32 %v3161_v38, 16  ;;  %v324_v53 = vsel %vm3109_vm3, %v319_v43, %v323_v32  ;;  %v687_v54 = vunpack.c.l.b16 %v314_v48  ;;  %v428_v55 = vor.u32 %v427_v45, %v424_v44  ;;  %v3200_v43 = vld [vmem:[%s3082_s8 + $0x10] sm:$0xf]  ;;  %v3203_v48 = vld [vmem:[%s3082_s8 + $0x14] sm:$0x1] }
  0x28   : > { %v521_v56 = vshll.u32 %v3161_v38, 16  ;;  %v688_v57 = vunpack.c.l.b16 %v324_v53  ;;  %v438_v58 = vor.u32 %v437_v49, %v433_v46  ;;  %v527_v60 = vshll.u32 %v3168_v47, 16  ;;  %v3380_v39 = vld [vmem:[%s3082_s8 + $0x2c] sm:$0x1] }
  0x29   : > { %v520_v59 = vrot.slane %v518_v52, 4  ;;  %v429_v63 = vrot.slane %v428_v55, 4  ;;  %v531_v3 = vshrl.u32 %v3168_v47, 16  ;;  %v537_v4 = vshll.u32 %v3175_v51, 16 }
  0x2a   : > { %v523_v0 = vrot.slane %v521_v56, 5  ;;  %v719_v6 = vpack.c.b16 %v688_v57, %v687_v54  ;;  %v439_v7 = vrot.slane %v438_v58, 4  ;;  %v529_v8 = vrot.slane %v527_v60, 5  ;;  %v3213_v58 = vld [vmem:[%s3082_s8 + $0x48] sm:$0xf] }
  0x2b   : > { %v434_v13 = vsel %vm3109_vm3, %v429_v63, %v433_v46  ;;  %v533_v15 = vrot.slane %v531_v3, 4  ;;  %v539_v16 = vrot.slane %v537_v4, 5  ;;  %v614_v22 = vshrl.u32 %v282_v5, 16  ;;  %v3218_v3 = vld [vmem:[%s3082_s8 + $0x4c] sm:$0xf] }
  0x2c   : > { %v524_v14 = vor.u32 %v523_v0, %v520_v59  ;;  %2632 = vmatmul.msk.bf16.vlgmr.msra.gmra.mxu0 %vm735_vm4, %v719_v6  ;;  %v444_v20 = vsel %vm3109_vm3, %v439_v7, %v443_v50  ;;  %v697_v21 = vunpack.c.l.b16 %v434_v13  ;;  %v617_v25 = vshll.u32 %v282_v5, 16 }
  0x2d   : > { %v698_v26 = vunpack.c.l.b16 %v444_v20  ;;  %v534_v28 = vor.u32 %v533_v15, %v529_v8  ;;  %v623_v30 = vshll.u32 %v283_v9, 16  ;;  %v616_v31 = vrot.slane %v614_v22, 4  ;;  %v3225_v15 = vld [vmem:[%s3082_s8 + $0x50] sm:$0x1] }
  0x2e   : > { %v525_v27 = vrot.slane %v524_v14, 4  ;;  %v619_v32 = vrot.slane %v617_v25, 5  ;;  %v627_v33 = vshrl.u32 %v283_v9, 16  ;;  %v633_v34 = vshll.u32 %v284_v17, 16 }
  0x2f   : > { %v3195_v37 = vpack.c.b16 %v698_v26, %v697_v21  ;;  %v535_v41 = vrot.slane %v534_v28, 4  ;;  %v625_v42 = vrot.slane %v623_v30, 5  ;;  %v326_v52 = vshrl.u32 %v3193_v35, 16  ;;  %v3236_v28 = vld [vmem:[%s3082_s8 + $0x78] sm:$0xf] }
  0x30   : > { %v530_v40 = vsel %vm3109_vm3, %v525_v27, %v529_v8  ;;  %v620_v45 = vor.u32 %v619_v32, %v616_v31  ;;  %v629_v46 = vrot.slane %v627_v33, 4  ;;  %v635_v50 = vrot.slane %v633_v34, 5  ;;  %v3240_v34 = vld [vmem:[%s3082_s8 + $0x7c] sm:$0xf] }
  0x31   : > { %v705_v44 = vunpack.c.l.b16 %v530_v40  ;;  %2637 = vmatmul.msk.bf16.gmra.mxu1 %vm735_vm4, %v3195_v37  ;;  %v540_v49 = vsel %vm3109_vm3, %v535_v41, %v539_v16  ;;  %v329_v53 = vshll.u32 %v3193_v35, 16  ;;  %v335_v57 = vshll.u32 %v3200_v43, 16 }
  0x32   : > { %v706_v54 = vunpack.c.l.b16 %v540_v49  ;;  %v621_v55 = vrot.slane %v620_v45, 4  ;;  %v630_v56 = vor.u32 %v629_v46, %v625_v42  ;;  %v328_v59 = vrot.slane %v326_v52, 4 }
  0x33   : > { %v331_v60 = vrot.slane %v329_v53, 5  ;;  %v339_v63 = vshrl.u32 %v3200_v43, 16  ;;  %v345_v0 = vshll.u32 %v3203_v48, 16  ;;  %v337_v7 = vrot.slane %v335_v57, 5 }
  0x34   : > { %v3220_v4 = vpack.c.b16 %v706_v54, %v705_v44  ;;  %v626_v5 = vsel %vm3109_vm3, %v621_v55, %v625_v42  ;;  %v631_v6 = vrot.slane %v630_v56, 4  ;;  %v446_v17 = vshrl.u32 %v3213_v58, 16 }
  0x35   : > { %v713_v8 = vunpack.c.l.b16 %v626_v5  ;;  %v332_v9 = vor.u32 %v331_v60, %v328_v59  ;;  %v341_v13 = vrot.slane %v339_v63, 4  ;;  %v347_v14 = vrot.slane %v345_v0, 5 }
  0x36   : > { %2641 = vmatmul.msk.bf16.gmra.mxu2 %vm735_vm4, %v3220_v4  ;;  %v636_v16 = vsel %vm3109_vm3, %v631_v6, %v635_v50  ;;  %v449_v20 = vshll.u32 %v3213_v58, 16  ;;  %v455_v21 = vshll.u32 %v3218_v3, 16  ;;  %v459_v27 = vshrl.u32 %v3218_v3, 16  ;;  %v3247_v50 = vld [vmem:[%s3082_s8 + $0x80] sm:$0x1] }
  0x37   : > { %v714_v22 = vunpack.c.l.b16 %v636_v16  ;;  %v333_v25 = vrot.slane %v332_v9, 4  ;;  %v342_v26 = vor.u32 %v341_v13, %v337_v7  ;;  %v448_v30 = vrot.slane %v446_v17, 4  ;;  %v3266_v16 = vld [vmem:[%s3082_s8 + $0xac] sm:$0xf]  ;;  %v3269_v17 = vld [vmem:[%s3082_s8 + $0xb0] sm:$0x1] }
  0x38   : > { %v451_v31 = vrot.slane %v449_v20, 5  ;;  %v457_v32 = vrot.slane %v455_v21, 5  ;;  %v465_v33 = vshll.u32 %v3225_v15, 16  ;;  %v461_v44 = vrot.slane %v459_v27, 4  ;;  %4229 = vst [vmem:[#allocation6_spill] sm:$0xff] %v3266_v16 }
  0x39   : > { %v3242_v40 = vpack.c.b16 %v714_v22, %v713_v8  ;;  %v338_v41 = vsel %vm3109_vm3, %v333_v25, %v337_v7  ;;  %v343_v42 = vrot.slane %v342_v26, 4  ;;  %v542_v52 = vshrl.u32 %v3236_v28, 16  ;;  %v3259_v8 = vld [vmem:[%s3082_s8 + $0xa8] sm:$0xf]  ;;  %4230 = vst [vmem:[#allocation7_spill] sm:$0xff] %v3269_v17 }
  0x3a   : > { %v689_v45 = vunpack.c.l.b16 %v338_v41  ;;  %v452_v46 = vor.u32 %v451_v31, %v448_v30  ;;  %v467_v49 = vrot.slane %v465_v33, 5  ;;  %v462_v54 = vor.u32 %v461_v44, %v457_v32  ;;  %4228 = vst [vmem:[#allocation5_spill] sm:$0xff] %v3259_v8 }
  0x3b   : > { %4227 = vst [vmem:[#allocation4_spill] sm:$0xff] %v3242_v40  ;;  %2645 = vmatmul.msk.bf16.gmra.mxu3 %vm735_vm4, %v3242_v40  ;;  %v348_v53 = vsel %vm3109_vm3, %v343_v42, %v347_v14  ;;  %v545_v55 = vshll.u32 %v3236_v28, 16  ;;  %v551_v56 = vshll.u32 %v3240_v34, 16  ;;  %v544_v60 = vrot.slane %v542_v52, 4  ;;  %v3283_v52 = vld [vmem:[%s3082_s8 + $0x18] sm:$0xf] }
  0x3c   : > { %v690_v57 = vunpack.c.l.b16 %v348_v53  ;;  %v453_v59 = vrot.slane %v452_v46, 4  ;;  %v555_v63 = vshrl.u32 %v3240_v34, 16  ;;  %v463_v0 = vrot.slane %v462_v54, 4  ;;  %v3369_v40 = vld [vmem:[%s3082_s8 + $0x24] sm:$0xf] }
  0x3d   : > { %v547_v5 = vrot.slane %v545_v55, 5  ;;  %v553_v6 = vrot.slane %v551_v56, 5  ;;  %v561_v7 = vshll.u32 %v3247_v50, 16  ;;  %v638_v30 = vshrl.u32 %v3259_v8, 16  ;;  %v3288_v56 = vld [vmem:[%s3082_s8 + $0x1c] sm:$0xf] }
  0x3e   : > { %v3261_v9 = vpack.c.b16 %v690_v57, %v689_v45  ;;  %v458_v13 = vsel %vm3109_vm3, %v453_v59, %v457_v32  ;;  %v557_v14 = vrot.slane %v555_v63, 4  ;;  %v468_v20 = vsel %vm3109_vm3, %v463_v0, %v467_v49  ;;  %v3291_v57 = vld [vmem:[%s3082_s8 + $0x20] sm:$0x1] }
  0x3f   : > { %v699_v21 = vunpack.c.l.b16 %v458_v13  ;;  %v548_v22 = vor.u32 %v547_v5, %v544_v60  ;;  %v563_v25 = vrot.slane %v561_v7, 5  ;;  %v700_v26 = vunpack.c.l.b16 %v468_v20 }
  0x40   : > { %2633 = vmatmul.msk.bf16.gmra.mxu0 %vm735_vm4, %v3261_v9  ;;  %v558_v27 = vor.u32 %v557_v14, %v553_v6  ;;  %v641_v31 = vshll.u32 %v3259_v8, 16  ;;  %v647_v33 = vshll.u32 %v3266_v16, 16  ;;  %v651_v41 = vshrl.u32 %v3266_v16, 16 }
  0x41   : > { %v549_v32 = vrot.slane %v548_v22, 4  ;;  %v657_v42 = vshll.u32 %v3269_v17, 16  ;;  %v3280_v44 = vpack.c.b16 %v700_v26, %v699_v21  ;;  %v640_v46 = vrot.slane %v638_v30, 4  ;;  %v3303_v26 = vld [vmem:[%s3082_s8 + $0x54] sm:$0xf] }
  0x42   : > { %v559_v45 = vrot.slane %v558_v27, 4  ;;  %v643_v49 = vrot.slane %v641_v31, 5  ;;  %v649_v54 = vrot.slane %v647_v33, 5  ;;  %v653_v55 = vrot.slane %v651_v41, 4  ;;  %v3347_v17 = vld [vmem:[%s3082_s8 + $0xb4] sm:$0xf] }
  0x43   : > { %4231 = vst [vmem:[#allocation8_spill] sm:$0xff] %v3280_v44  ;;  %v554_v53 = vsel %vm3109_vm3, %v549_v32, %v553_v6  ;;  %2638 = vmatmul.msk.bf16.gmra.mxu1 %vm735_vm4, %v3280_v44  ;;  %v659_v0 = vrot.slane %v657_v42, 5  ;;  %v350_v6 = vshrl.u32 %v3283_v52, 16  ;;  %v353_v13 = vshll.u32 %v3283_v52, 16  ;;  %v3308_v32 = vld [vmem:[%s3082_s8 + $0x58] sm:$0xf] }
  0x44   : > { %v564_v59 = vsel %vm3109_vm3, %v559_v45, %v563_v25  ;;  %v707_v60 = vunpack.c.l.b16 %v554_v53  ;;  %v644_v63 = vor.u32 %v643_v49, %v640_v46  ;;  %v654_v7 = vor.u32 %v653_v55, %v649_v54  ;;  %v3313_v46 = vld [vmem:[%s3082_s8 + $0x5c] sm:$0x1]  ;;  %4234 = vst [vmem:[#allocation11_spill] sm:$0xff] %v3347_v17 }
  0x45   : > { %v708_v5 = vunpack.c.l.b16 %v564_v59  ;;  %v359_v20 = vshll.u32 %v3288_v56, 16  ;;  %v363_v21 = vshrl.u32 %v3288_v56, 16  ;;  %v369_v22 = vshll.u32 %v3291_v57, 16 }
  0x46   : > { %v645_v14 = vrot.slane %v644_v63, 4  ;;  %v655_v27 = vrot.slane %v654_v7, 4  ;;  %v352_v30 = vrot.slane %v350_v6, 4  ;;  %v355_v31 = vrot.slane %v353_v13, 5  ;;  %v3323_v7 = vld [vmem:[%s3082_s8 + $0x84] sm:$0xf] }
  0x47   : > { %v3305_v25 = vpack.c.b16 %v708_v5, %v707_v60  ;;  %v361_v41 = vrot.slane %v359_v20, 5  ;;  %v365_v42 = vrot.slane %v363_v21, 4  ;;  %v371_v45 = vrot.slane %v369_v22, 5  ;;  %4232 = vst [vmem:[#allocation9_spill] sm:$0xff] %v3323_v7 }
  0x48   : > { %v650_v33 = vsel %vm3109_vm3, %v645_v14, %v649_v54  ;;  %v660_v49 = vsel %vm3109_vm3, %v655_v27, %v659_v0  ;;  %v356_v55 = vor.u32 %v355_v31, %v352_v30  ;;  %v470_v59 = vshrl.u32 %v3303_v26, 16  ;;  %v3330_v30 = vld [vmem:[%s3082_s8 + $0x88] sm:$0xf] }
  0x49   : > { %2642 = vmatmul.msk.bf16.gmra.mxu2 %vm735_vm4, %v3305_v25  ;;  %v715_v53 = vunpack.c.l.b16 %v650_v33  ;;  %v716_v60 = vunpack.c.l.b16 %v660_v49  ;;  %v366_v63 = vor.u32 %v365_v42, %v361_v41  ;;  %v473_v54 = vshll.u32 %v3303_v26, 16  ;;  %v3335_v49 = vld [vmem:[%s3082_s8 + $0x8c] sm:$0x1] }
  0x4a   : > { %v479_v5 = vshll.u32 %v3308_v32, 16  ;;  %v357_v6 = vrot.slane %v356_v55, 4  ;;  %v472_v13 = vrot.slane %v470_v59, 4  ;;  %v483_v14 = vshrl.u32 %v3308_v32, 16 }
  0x4b   : > { %v489_v0 = vshll.u32 %v3313_v46, 16  ;;  %v3327_v20 = vpack.c.b16 %v716_v60, %v715_v53  ;;  %v367_v21 = vrot.slane %v366_v63, 4  ;;  %v475_v22 = vrot.slane %v473_v54, 5 }
  0x4c   : > { %v481_v27 = vrot.slane %v479_v5, 5  ;;  %v362_v31 = vsel %vm3109_vm3, %v357_v6, %v361_v41  ;;  %v485_v33 = vrot.slane %v483_v14, 4  ;;  %v566_v55 = vshrl.u32 %v3323_v7, 16 }
  0x4d   : > { %4233 = vst [vmem:[#allocation10_spill] sm:$0xff] %v3327_v20  ;;  %v491_v42 = vrot.slane %v489_v0, 5  ;;  %2646 = vmatmul.msk.bf16.gmra.mxu3 %vm735_vm4, %v3327_v20  ;;  %v372_v53 = vsel %vm3109_vm3, %v367_v21, %v371_v45  ;;  %v691_v59 = vunpack.c.l.b16 %v362_v31  ;;  %v476_v60 = vor.u32 %v475_v22, %v472_v13  ;;  %v3352_v22 = vld [vmem:[%s3082_s8 + $0xb8] sm:$0xf] }
  0x4e   : > { %v569_v63 = vshll.u32 %v3323_v7, 16  ;;  %v692_v54 = vunpack.c.l.b16 %v372_v53  ;;  %v486_v41 = vor.u32 %v485_v33, %v481_v27  ;;  %v568_v5 = vrot.slane %v566_v55, 4  ;;  %4235 = vst [vmem:[#allocation12_spill] sm:$0xff] %v3352_v22 }
  0x4f   : > { %v575_v6 = vshll.u32 %v3330_v30, 16  ;;  %v477_v14 = vrot.slane %v476_v60, 4  ;;  %v579_v8 = vshrl.u32 %v3330_v30, 16  ;;  %v585_v20 = vshll.u32 %v3335_v49, 16  ;;  %v3357_v60 = vld [vmem:[%s3082_s8 + $0xbc] sm:$0x1] }
  0x50   : > { %v571_v0 = vrot.slane %v569_v63, 5  ;;  %v3349_v45 = vpack.c.b16 %v692_v54, %v691_v59  ;;  %v487_v21 = vrot.slane %v486_v41, 4  ;;  %4236 = vst [vmem:[#allocation13_spill] sm:$0xff] %v3357_v60  ;;  %v662_v54 = vshrl.u32 %v3347_v17, 16 }
  0x51   : > { %v577_v13 = vrot.slane %v575_v6, 5  ;;  %v482_v31 = vsel %vm3109_vm3, %v477_v14, %v481_v27  ;;  %v581_v55 = vrot.slane %v579_v8, 4  ;;  %v587_v53 = vrot.slane %v585_v20, 5 }
  0x52   : > { %v572_v33 = vor.u32 %v571_v0, %v568_v5  ;;  %2634 = vmatmul.msk.bf16.gmra.mxu0 %vm735_vm4, %v3349_v45  ;;  %v492_v59 = vsel %vm3109_vm3, %v487_v21, %v491_v42  ;;  %v701_v63 = vunpack.c.l.b16 %v482_v31  ;;  %v665_v41 = vshll.u32 %v3347_v17, 16 }
  0x53   : > { %v702_v6 = vunpack.c.l.b16 %v492_v59  ;;  %v582_v5 = vor.u32 %v581_v55, %v577_v13  ;;  %v671_v8 = vshll.u32 %v3352_v22, 16  ;;  %v664_v20 = vrot.slane %v662_v54, 4 }
  0x54   : > { %v573_v27 = vrot.slane %v572_v33, 4  ;;  %v667_v14 = vrot.slane %v665_v41, 5  ;;  %v675_v0 = vshrl.u32 %v3352_v22, 16  ;;  %v681_v16 = vshll.u32 %v3357_v60, 16  ;;  %v3376_v33 = vld [vmem:[%s3082_s8 + $0x28] sm:$0xf] }
  0x55   : > { %v3371_v42 = vpack.c.b16 %v702_v6, %v701_v63  ;;  %v583_v31 = vrot.slane %v582_v5, 4  ;;  %v673_v59 = vrot.slane %v671_v8, 5  ;;  %v1121_v55 = vrot.slane %v3129_v2, 5 }
  0x56   : > { %v578_v21 = vsel %vm3109_vm3, %v573_v27, %v577_v13  ;;  %v668_v54 = vor.u32 %v667_v14, %v664_v20  ;;  %v677_v41 = vrot.slane %v675_v0, 4  ;;  %v683_v6 = vrot.slane %v681_v16, 5 }
  0x57   : > { %4237 = vst [vmem:[#allocation14_spill] sm:$0xff] %v3371_v42  ;;  %v709_v17 = vunpack.c.l.b16 %v578_v21  ;;  %2639 = vmatmul.msk.bf16.gmra.mxu1 %vm735_vm4, %v3371_v42  ;;  %v588_v63 = vsel %vm3109_vm3, %v583_v31, %v587_v53  ;;  %v374_v13 = vshrl.u32 %v3369_v40, 16  ;;  %v377_v27 = vshll.u32 %v3369_v40, 16 }
  0x58   : > { %v710_v5 = vunpack.c.l.b16 %v588_v63  ;;  %v669_v8 = vrot.slane %v668_v54, 4  ;;  %v678_v60 = vor.u32 %v677_v41, %v673_v59  ;;  %v383_v2 = vshll.u32 %v3376_v33, 16  ;;  %v2817_v54 = vld [vmem:[%s4178_s1 + $0x18] sm:$0xf]  ;;  %v2838_v41 = vld [vmem:[%s4178_s1 + $0x1c] sm:$0xf] }
  0x59   : > { %v376_v20 = vrot.slane %v374_v13, 4  ;;  %v379_v14 = vrot.slane %v377_v27, 5  ;;  %v387_v0 = vshrl.u32 %v3376_v33, 16  ;;  %v393_v21 = vshll.u32 %v3380_v39, 16 }
  0x5a   : > { %v3391_v22 = vpack.c.b16 %v710_v5, %v709_v17  ;;  %v674_v16 = vsel %vm3109_vm3, %v669_v8, %v673_v59  ;;  %v679_v53 = vrot.slane %v678_v60, 4  ;;  %v385_v31 = vrot.slane %v383_v2, 5  ;;  %v2800_v17 = vld [vmem:[%s4178_s1 + $0x14] sm:$0xf]  ;;  %v2856_v60 = vld [vmem:[%s4178_s1 + $0x20] sm:$0xf] }
  0x5b   : > { %v717_v63 = vunpack.c.l.b16 %v674_v16  ;;  %v380_v13 = vor.u32 %v379_v14, %v376_v20  ;;  %v389_v27 = vrot.slane %v387_v0, 4  ;;  %v395_v7 = vrot.slane %v393_v21, 5 }
  0x5c   : > { %4238 = vst [vmem:[#allocation15_spill] sm:$0xff] %v3391_v22  ;;  %2643 = vmatmul.msk.bf16.gmra.mxu2 %vm735_vm4, %v3391_v22  ;;  %v684_v59 = vsel %vm3109_vm3, %v679_v53, %v683_v6  ;;  %v2728_v5 = vrot.slane %v3119_v61, 9  ;;  %v1118_v0 = vrot.slane %v3126_v1, 5  ;;  %v1891_v21 = vsel %vm784_vm0, %v2817_v54, 0 }
  0x5d   : > { %v718_v8 = vunpack.c.l.b16 %v684_v59  ;;  %v381_v2 = vrot.slane %v380_v13, 4  ;;  %v390_v20 = vor.u32 %v389_v27, %v385_v31  ;;  %v2047_v16 = vsel %vm784_vm0, %v2838_v41, 0  ;;  %1900 = vmatpush.bf16.msra.mxu2 %v1891_v21  ;;  %v2877_v21 = vld [vmem:[%s3082_s8 + $0xc] sm:$0xff] }
  0x5e   : > { %v1757_v22 = vsel %vm784_vm0, %v2800_v17, 0  ;;  %v2187_v6 = vsel %vm784_vm0, %v2856_v60, 0  ;;  %v1119_v27 = vsel %vm3412_vm7, %v2728_v5, %v1118_v0  ;;  %2056 = vmatpush.bf16.msra.mxu3 %v2047_v16  ;;  %v1120_v54 = vrot.slane %v1118_v0, 4 }
  0x5f   : > { %v3421_v53 = vpack.c.b16 %v718_v8, %v717_v63  ;;  %v386_v61 = vsel %vm3109_vm3, %v381_v2, %v385_v31  ;;  %v391_v13 = vrot.slane %v390_v20, 4  ;;  %1766 = vmatpush.bf16.msra.mxu1 %v1757_v22  ;;  %2196 = vmatpush.bf16.msra.mxu0 %v2187_v6  ;;  %v2729_v41 = vrot.slane %v3193_v35, 9  ;;  %v2876_v22 = vld [vmem:[%s3082_s8] sm:$0xff]  ;;  %v3458_v6 = vld [vmem:[%s3082_s8 + $0x18] sm:$0xff] }
  0x60   : > { %v693_v1 = vunpack.c.l.b16 %v386_v61  ;;  %v1230_v31 = vunpack.c.l.b16 %v1119_v27  ;;  %v1125_v17 = vrot.slane %v3200_v43, 5  ;;  %v1128_v60 = vrot.slane %v3203_v48, 5 }
  0x61   : > { %2647 = vmatmul.msk.bf16.gmra.mxu3 %vm735_vm4, %v3421_v53  ;;  %v396_v63 = vsel %vm3109_vm3, %v391_v13, %v395_v7  ;;  %v1122_v5 = vsel %vm3412_vm7, %v1120_v54, %v1121_v55  ;;  %v1132_v16 = vrot.slane %v3288_v56, 5  ;;  %v2730_v61 = vrot.slane %v3283_v52, 9 }
  0x62   : > { %v694_v59 = vunpack.c.l.b16 %v396_v63  ;;  %v1231_v8 = vunpack.c.l.b16 %v1122_v5  ;;  %v1126_v35 = vsel %vm3412_vm7, %v2729_v41, %v1125_v17  ;;  %v1127_v2 = vrot.slane %v1125_v17, 4  ;;  %v3478_v41 = vld [vmem:[%s3082_s8 + $0x24] sm:$0xff] }
  0x63   : > { %v1232_v7 = vunpack.c.l.b16 %v1126_v35  ;;  %v1134_v13 = vrot.slane %v1132_v16, 4  ;;  %v1135_v27 = vrot.slane %v3291_v57, 5  ;;  %v1139_v57 = vrot.slane %v3376_v33, 5 }
  0x64   : > { %v3439_v20 = vpack.c.b16 %v694_v59, %v693_v1  ;;  %v1262_v0 = vpack.c.b16 %v1231_v8, %v1230_v31  ;;  %v1129_v43 = vsel %vm3412_vm7, %v1127_v2, %v1128_v60  ;;  %v2731_v63 = vrot.slane %v3369_v40, 9  ;;  %v3500_v8 = vld [vmem:[%s3082_s8 + $0x30] sm:$0xff] }
  0x65   : > { %v1233_v48 = vunpack.c.l.b16 %v1129_v43  ;;  %v1136_v56 = vsel %vm3412_vm7, %v1134_v13, %v1135_v27  ;;  %v1141_v31 = vrot.slane %v1139_v57, 4  ;;  %v1142_v17 = vrot.slane %v3380_v39, 5  ;;  %v3528_v27 = vld [vmem:[%s3082_s8 + $0x3c] sm:$0xff] }
  0x66   : > { %2635 = vmatmul.msk.bf16.gmra.mxu0 %vm735_vm4, %v3439_v20  ;;  %v1235_v54 = vunpack.c.l.b16 %v1136_v56  ;;  %v1140_v60 = vsel %vm3412_vm7, %v2731_v63, %v1139_v57  ;;  %v1146_v39 = vrot.slane %v3088_v11, 5  ;;  %v2732_v35 = vrot.slane %v3085_v10, 9 }
  0x67   : > { %2712 = vmatmul.msk.bf16.vlgmr.msrb.gmra.mxu1 %vm735_vm4, %v2876_v22  ;;  %v3446_v55 = vpack.c.b16 %v1233_v48, %v1232_v7  ;;  %v1143_v33 = vsel %vm3412_vm7, %v1141_v31, %v1142_v17  ;;  %v1236_v59 = vunpack.c.l.b16 %v1140_v60  ;;  %v1149_v7 = vrot.slane %v3091_v12, 5 }
  0x68   : > { %v1237_v5 = vunpack.c.l.b16 %v1143_v33  ;;  %v1148_v2 = vrot.slane %v1146_v39, 4  ;;  %v1153_v13 = vrot.slane %v3148_v24, 5  ;;  %v2733_v56 = vrot.slane %v3145_v23, 9 }
  0x6a   : > { %v3492_v40 = vpack.c.b16 %v1237_v5, %v1236_v59  ;;  %v1150_v11 = vsel %vm3412_vm7, %v1148_v2, %v1149_v7  ;;  %v1154_v24 = vsel %vm3412_vm7, %v2733_v56, %v1153_v13  ;;  %v1160_v5 = vrot.slane %v3218_v3, 5 }
  0x6b   : > { %v1240_v23 = vunpack.c.l.b16 %v1154_v24  ;;  %v2734_v7 = vrot.slane %v3213_v58, 9  ;;  %v1167_v24 = vrot.slane %v3308_v32, 5 }
  0x6c   : > { %2745 = vmatmul.msk.bf16.vlgmr.msrb.gmra.mxu2 %vm735_vm4, %v1262_v0  ;;  %v1147_v0 = vsel %vm3412_vm7, %v2732_v35, %v1146_v39  ;;  %v3562_v35 = vld [vmem:[%s3082_s8 + $0x48] sm:$0xff] }
  0x6d   : > { %v1238_v48 = vunpack.c.l.b16 %v1147_v0  ;;  %4243 = vst [vmem:[#allocation18_spill] sm:$0xff] %v3562_v35  ;;  %v1162_v0 = vrot.slane %v1160_v5, 4 }
  0x71   : > { %2766 = vmatmul.msk.bf16.vlgmr.msrb.gmra.mxu3 %vm735_vm4, %v2877_v21 }
  0x76   : > { %2783 = vmatmul.msk.bf16.vlgmr.msrb.gmra.mxu0 %vm735_vm4, %v3261_v9  ;;  %v1133_v9 = vsel %vm3412_vm7, %v2730_v61, %v1132_v16 }
  0x77   : > { %2713 = vmatmul.msk.bf16.gmra.mxu1 %vm735_vm4, %v2877_v21  ;;  %v1234_v1 = vunpack.c.l.b16 %v1133_v9  ;;  %v1239_v21 = vunpack.c.l.b16 %v1150_v11  ;;  %v1163_v11 = vrot.slane %v3225_v15, 5 }
  0x79   : > { %v3472_v52 = vpack.c.b16 %v1235_v54, %v1234_v1  ;;  %v3520_v12 = vpack.c.b16 %v1239_v21, %v1238_v48  ;;  %v1155_v1 = vrot.slane %v1153_v13, 4  ;;  %v1156_v54 = vrot.slane %v3153_v29, 5 }
  0x7a   : > { %v1161_v21 = vsel %vm3412_vm7, %v2734_v7, %v1160_v5  ;;  %v1164_v13 = vsel %vm3412_vm7, %v1162_v0, %v1163_v11  ;;  %v2735_v5 = vrot.slane %v3303_v26, 9  ;;  %v1169_v7 = vrot.slane %v1167_v24, 4 }
  0x7b   : > { %v1157_v63 = vsel %vm3412_vm7, %v1155_v1, %v1156_v54  ;;  %v1242_v56 = vunpack.c.l.b16 %v1161_v21  ;;  %v1243_v1 = vunpack.c.l.b16 %v1164_v13  ;;  %v1170_v0 = vrot.slane %v3313_v46, 5 }
  0x7c   : > { %2746 = vmatmul.msk.bf16.gmra.mxu2 %vm735_vm4, %v3446_v55  ;;  %v1241_v60 = vunpack.c.l.b16 %v1157_v63  ;;  %v1168_v32 = vsel %vm3412_vm7, %v2735_v5, %v1167_v24  ;;  %v1174_v5 = vrot.slane %v3100_v19, 5 }
  0x7d   : > { %v3586_v54 = vpack.c.b16 %v1243_v1, %v1242_v56  ;;  %v1171_v13 = vsel %vm3412_vm7, %v1169_v7, %v1170_v0  ;;  %v1244_v56 = vunpack.c.l.b16 %v1168_v32  ;;  %v3002_v32 = vld [vmem:[%s3082_s8 + $0x68] sm:$0x1] }
  0x7e   : > { %v3552_v33 = vpack.c.b16 %v1241_v60, %v1240_v23  ;;  %v3596_v60 = vld [vmem:[%s3082_s8 + $0x54] sm:$0xff]  ;;  %v1245_v46 = vunpack.c.l.b16 %v1171_v13  ;;  %v1177_v13 = vrot.slane %v3002_v32, 5 }
  0x7f   : > { %4246 = vst [vmem:[#allocation21_spill] sm:$0xff] %v3586_v54 }
  0x80   : > { %4247 = vst [vmem:[#allocation22_spill] sm:$0xff] %v3596_v60 }
  0x81   : > { %2767 = vmatmul.msk.bf16.gmra.mxu3 %vm735_vm4, %v3458_v6 }
  0x86   : > { %2784 = vmatmul.msk.bf16.gmra.mxu0 %vm735_vm4, %v3349_v45 }
  0x87   : > { %2714 = vmatmul.msk.bf16.gmra.mxu1 %vm735_vm4, %v3458_v6 }
  0x8c   : > { %2747 = vmatmul.msk.bf16.gmra.mxu2 %vm735_vm4, %v3472_v52 }
  0x91   : > { %2768 = vmatmul.msk.bf16.gmra.mxu3 %vm735_vm4, %v3478_v41 }
  0x96   : > { %2785 = vmatmul.msk.bf16.gmra.mxu0 %vm735_vm4, %v3439_v20 }
  0x97   : > { %2715 = vmatmul.msk.bf16.gmra.mxu1 %vm735_vm4, %v3478_v41 }
  0x9c   : > { %v3495_v22 = vpop.f32.mrf.mxu1  ;;  %2748 = vmatmul.msk.bf16.gmra.mxu2 %vm735_vm4, %v3492_v40 }
  0xa1   : > { %2769 = vmatmul.msk.bf16.gmra.mxu3 %vm735_vm4, %v3500_v8 }
  0xa4   : > { %v3510_v43 = vpop.f32.mrf.mxu1 }
  0xa6   : > { %v3512_v16 = vpop.f32.mrf.mxu2  ;;  %2786 = vmatmul.msk.bf16.gmra.mxu0 %vm735_vm4, %v3121_v62 }
  0xa7   : > { %2716 = vmatmul.msk.bf16.gmra.mxu1 %vm735_vm4, %v3500_v8 }
  0xa9   : > { %v3518_v10 = vpop.f32.mrf.mxu0 }
  0xaa   : > { %v3522_v61 = vpop.f32.mrf.mxu3 }
  0xab   : > { %4241 = vst [vmem:[#allocation16_spill] sm:$0xff] %v3522_v61 }
  0xac   : > { %2749 = vmatmul.msk.bf16.gmra.mxu2 %vm735_vm4, %v3520_v12 }
  0xae   : > { %v3530_v9 = vpop.f32.mrf.mxu1  ;;  %v3534_v57 = vpop.f32.mrf.mxu2 }
  0xb1   : > { %2770 = vmatmul.msk.bf16.gmra.mxu3 %vm735_vm4, %v3528_v27  ;;  %v3542_v31 = vpop.f32.mrf.mxu0 }
  0xb2   : > { %v3544_v17 = vpop.f32.mrf.mxu3 }
  0xb3   : > { %4242 = vst [vmem:[#allocation17_spill] sm:$0xff] %v3544_v17 }
  0xb6   : > { %2787 = vmatmul.msk.bf16.gmra.mxu0 %vm735_vm4, %v3195_v37  ;;  %v3548_v29 = vpop.f32.mrf.mxu1 }
  0xb7   : > { %2717 = vmatmul.msk.bf16.gmra.mxu1 %vm735_vm4, %v3528_v27 }
  0xb9   : > { %v3554_v59 = vpop.f32.mrf.mxu2 }
  0xbc   : > { %2750 = vmatmul.msk.bf16.gmra.mxu2 %vm735_vm4, %v3552_v33 }
  0xbd   : > { %v3557_v39 = vpop.f32.mrf.mxu0 }
  0xbe   : > { %v3564_v2 = vpop.f32.mrf.mxu3 }
  0xbf   : > { %4244 = vst [vmem:[#allocation19_spill] sm:$0xff] %v3564_v2 }
  0xc0   : > { %v3568_v48 = vpop.f32.mrf.mxu1 }
  0xc1   : > { %2771 = vmatmul.msk.bf16.gmra.mxu3 %vm735_vm4, %v3562_v35  ;;  %v3572_v3 = vpop.f32.mrf.mxu2 }
  0xc5   : > { %v3578_v58 = vpop.f32.mrf.mxu0 }
  0xc6   : > { %2788 = vmatmul.msk.bf16.gmra.mxu0 %vm735_vm4, %v3280_v44  ;;  %v3582_v15 = vpop.f32.mrf.mxu3 }
  0xc7   : > { %4245 = vst [vmem:[#allocation20_spill] sm:$0xff] %v3582_v15  ;;  %2718 = vmatmul.msk.bf16.gmra.mxu1 %vm735_vm4, %v3562_v35  ;;  %v3631_v15 = vld [vmem:[%s3082_s8 + $0x60] sm:$0xff] }
  0xc8   : > { %v3589_v63 = vpop.f32.mrf.mxu1  ;;  %4251 = vst [vmem:[#allocation26_spill] sm:$0xff] %v3631_v15 }
  0xcc   : > { %v3591_v23 = vpop.f32.mrf.mxu2  ;;  %2751 = vmatmul.msk.bf16.gmra.mxu2 %vm735_vm4, %v3586_v54 }
  0xcf   : > { %v3600_v11 = vpop.f32.mrf.mxu0 }
  0xd0   : > { %v3602_v21 = vpop.f32.mrf.mxu3 }
  0xd1   : > { %4248 = vst [vmem:[#allocation23_spill] sm:$0xff] %v3602_v21  ;;  %2772 = vmatmul.msk.bf16.gmra.mxu3 %vm735_vm4, %v3596_v60  ;;  %v3618_v21 = vpack.c.b16 %v1245_v46, %v1244_v56 }
  0xd3   : > { %4249 = vst [vmem:[#allocation24_spill] sm:$0xff] %v3618_v21 }
  0xd4   : > { %v3610_v26 = vpop.f32.mrf.mxu1  ;;  %v3612_v1 = vpop.f32.mrf.mxu2 }
  0xd6   : > { %2789 = vmatmul.msk.bf16.gmra.mxu0 %vm735_vm4, %v3371_v42  ;;  %v3003_v42 = vld [vmem:[%s3082_s8 + $0x60] sm:$0xf] }
  0xd7   : > { %2719 = vmatmul.msk.bf16.gmra.mxu1 %vm735_vm4, %v3596_v60  ;;  %v3620_v24 = vpop.f32.mrf.mxu0  ;;  %v2736_v2 = vrot.slane %v3003_v42, 9  ;;  %v1176_v60 = vrot.slane %v1174_v5, 4 }
  0xd8   : > { %v3623_v7 = vpop.f32.mrf.mxu3 }
  0xd9   : > { %4250 = vst [vmem:[#allocation25_spill] sm:$0xff] %v3623_v7  ;;  %v1175_v19 = vsel %vm3412_vm7, %v2736_v2, %v1174_v5  ;;  %v1178_v46 = vsel %vm3412_vm7, %v1176_v60, %v1177_v13  ;;  %v1181_v60 = vrot.slane %v3168_v47, 5 }
  0xda   : > { %v1246_v17 = vunpack.c.l.b16 %v1175_v19  ;;  %v1247_v42 = vunpack.c.l.b16 %v1178_v46  ;;  %v3664_v19 = vld [vmem:[%s3082_s8 + $0x6c] sm:$0xff] }
  0xdc   : > { %2752 = vmatmul.msk.bf16.gmra.mxu2 %vm735_vm4, %v3618_v21  ;;  %v3627_v0 = vpop.f32.mrf.mxu1  ;;  %v3653_v2 = vpack.c.b16 %v1247_v42, %v1246_v17  ;;  %v1183_v17 = vrot.slane %v1181_v60, 4 }
  0xde   : > { %4253 = vst [vmem:[#allocation28_spill] sm:$0xff] %v3653_v2 }
  0xdf   : > { %v3634_v56 = vpop.f32.mrf.mxu2 }
  0xe1   : > { %2773 = vmatmul.msk.bf16.gmra.mxu3 %vm735_vm4, %v3631_v15 }
  0xe3   : > { %v3642_v7 = vpop.f32.mrf.mxu0 }
  0xe4   : > { %v3644_v32 = vpop.f32.mrf.mxu3  ;;  %v1017_v21 = vpop.f32.mrf.mxu1 }
  0xe5   : > { %4252 = vst [vmem:[#allocation27_spill] sm:$0xff] %v3644_v32  ;;  %v1018_v54 = vadd.f32 %v1017_v21, %v3518_v10  ;;  %v1184_v21 = vrot.slane %v3175_v51, 5  ;;  %v2737_v32 = vrot.slane %v3161_v38, 9 }
  0xe6   : > { %2790 = vmatmul.msk.bf16.gmra.mxu0 %vm735_vm4, %v3140_v18 }
  0xe7   : > { %v3649_v44 = vpop.f32.mrf.mxu2  ;;  %2720 = vmatmul.msk.bf16.gmra.mxu1 %vm735_vm4, %v3631_v15  ;;  %v1182_v47 = vsel %vm3412_vm7, %v2737_v32, %v1181_v60 }
  0xe8   : > { %v1248_v61 = vunpack.c.l.b16 %v1182_v47 }
  0xeb   : > { %v3656_v5 = vpop.f32.mrf.mxu0 }
  0xec   : > { %v3658_v13 = vpop.f32.mrf.mxu3  ;;  %2753 = vmatmul.msk.bf16.gmra.mxu2 %vm735_vm4, %v3653_v2  ;;  %v1019_v10 = vpop.f32.mrf.mxu1 }
  0xed   : > { %4254 = vst [vmem:[#allocation29_spill] sm:$0xff] %v3658_v13  ;;  %v1020_v46 = vadd.f32 %v1019_v10, %v3542_v31  ;;  %v1185_v13 = vsel %vm3412_vm7, %v1183_v17, %v1184_v21  ;;  %v1188_v21 = vrot.slane %v3240_v34, 5 }
  0xee   : > { %v1249_v35 = vunpack.c.l.b16 %v1185_v13  ;;  %v1191_v13 = vrot.slane %v3247_v50, 5 }
  0xef   : > { %v1338_v42 = vpop.f32.mrf.mxu2 }
  0xf0   : > { %v1418_v18 = vadd.f32 %v1338_v42, %v1018_v54  ;;  %v3681_v10 = vpack.c.b16 %v1249_v35, %v1248_v61  ;;  %v3688_v42 = vld [vmem:[%s3082_s8 + $0x78] sm:$0xff] }
  0xf1   : > { %2774 = vmatmul.msk.bf16.gmra.mxu3 %vm735_vm4, %v3664_v19 }
  0xf3   : > { %v1628_v2 = vpop.f32.mrf.mxu0 }
  0xf4   : > { %v1472_v51 = vpop.f32.mrf.mxu3  ;;  %v1022_v15 = vpop.f32.mrf.mxu1 }
  0xf5   : > { %v1552_v31 = vadd.f32 %v1472_v51, %v1418_v18  ;;  %v1023_v38 = vadd.f32 %v1022_v15, %v3557_v39 }
  0xf6   : > { %2791 = vmatmul.msk.bf16.gmra.mxu0 %vm735_vm4, %v3220_v4 }
  0xf7   : > { %v1340_v54 = vpop.f32.mrf.mxu2  ;;  %2721 = vmatmul.msk.bf16.gmra.mxu1 %vm735_vm4, %v3664_v19  ;;  %v3679_v32 = vadd.f32 %v1628_v2, %v1552_v31  ;;  %v2738_v2 = vrot.slane %v3236_v28, 9 }
  0xf8   : > { %v1419_v60 = vadd.f32 %v1340_v54, %v1020_v46  ;;  %v1190_v46 = vrot.slane %v1188_v21, 4 }
  0xf9   : > { %v1189_v50 = vsel %vm3412_vm7, %v2738_v2, %v1188_v21 }
  0xfa   : > { %v1192_v51 = vsel %vm3412_vm7, %v1190_v46, %v1191_v13  ;;  %v1198_v46 = vrot.slane %v3335_v49, 5 }
  0xfb   : > { %v1630_v17 = vpop.f32.mrf.mxu0 }
  0xfc   : > { %v1474_v18 = vpop.f32.mrf.mxu3  ;;  %2754 = vmatmul.msk.bf16.gmra.mxu2 %vm735_vm4, %v3681_v10  ;;  %v1024_v39 = vpop.f32.mrf.mxu1 }
  0xfd   : > { %v1553_v15 = vadd.f32 %v1474_v18, %v1419_v60  ;;  %v1025_v47 = vadd.f32 %v1024_v39, %v3578_v58  ;;  %v1250_v58 = vunpack.c.l.b16 %v1189_v50  ;;  %v1251_v18 = vunpack.c.l.b16 %v1192_v51  ;;  %v3714_v50 = vld [vmem:[%s3082_s8 + $0x84] sm:$0xff] }
  0xff   : > { %v1343_v61 = vpop.f32.mrf.mxu2  ;;  %v3692_v35 = vadd.f32 %v1630_v17, %v1553_v15  ;;  %v3707_v13 = vpack.c.b16 %v1251_v18, %v1250_v58  ;;  %v1195_v15 = vrot.slane %v3330_v30, 5 }
 0x100   : > { %v1420_v34 = vadd.f32 %v1343_v61, %v1023_v38 }
 0x101   : > { %2775 = vmatmul.msk.bf16.gmra.mxu3 %vm735_vm4, %v3688_v42 }
 0x103   : > { %v1633_v31 = vpop.f32.mrf.mxu0 }
 0x104   : > { %v1477_v54 = vpop.f32.mrf.mxu3  ;;  %v1027_v60 = vpop.f32.mrf.mxu1 }
 0x105   : > { %v1554_v28 = vadd.f32 %v1477_v54, %v1420_v34  ;;  %v1028_v17 = vadd.f32 %v1027_v60, %v3600_v11 }
 0x106   : > { %2792 = vmatmul.msk.bf16.gmra.mxu0 %vm735_vm4, %v3305_v25 }
 0x107   : > { %v1345_v38 = vpop.f32.mrf.mxu2  ;;  %2722 = vmatmul.msk.bf16.gmra.mxu1 %vm735_vm4, %v3688_v42  ;;  %v3705_v21 = vadd.f32 %v1633_v31, %v1554_v28  ;;  %v4255_v31 = vld [vmem:[#allocation9_spill] sm:$0xff] }
 0x108   : > { %v1421_v39 = vadd.f32 %v1345_v38, %v1025_v47  ;;  %v2739_v54 = vrot.slane %v4255_v31, 9  ;;  %v1197_v47 = vrot.slane %v1195_v15, 4 }
 0x10a   : > { %v1196_v49 = vsel %vm3412_vm7, %v2739_v54, %v1195_v15  ;;  %v1199_v18 = vsel %vm3412_vm7, %v1197_v47, %v1198_v46  ;;  %v3004_v54 = vld [vmem:[%s3082_s8 + $0x94] sm:$0xf] }
 0x10b   : > { %v1635_v2 = vpop.f32.mrf.mxu0  ;;  %v1202_v47 = vrot.slane %v3004_v54, 5 }
 0x10c   : > { %v1479_v61 = vpop.f32.mrf.mxu3  ;;  %2755 = vmatmul.msk.bf16.gmra.mxu2 %vm735_vm4, %v3707_v13  ;;  %v1029_v11 = vpop.f32.mrf.mxu1 }
 0x10d   : > { %v1555_v34 = vadd.f32 %v1479_v61, %v1421_v39  ;;  %v1030_v51 = vadd.f32 %v1029_v11, %v3620_v24  ;;  %v1252_v39 = vunpack.c.l.b16 %v1196_v49  ;;  %v1253_v61 = vunpack.c.l.b16 %v1199_v18 }
 0x10f   : > { %v1348_v60 = vpop.f32.mrf.mxu2  ;;  %v3718_v58 = vadd.f32 %v1635_v2, %v1555_v34  ;;  %v3733_v31 = vpack.c.b16 %v1253_v61, %v1252_v39 }
 0x110   : > { %v1422_v30 = vadd.f32 %v1348_v60, %v1028_v17  ;;  %v4257_v17 = vld [vmem:[#allocation15_spill] sm:$0xff] }
 0x111   : > { %4256 = vst [vmem:[#allocation9_spill] sm:$0xff] %v3718_v58  ;;  %2776 = vmatmul.msk.bf16.gmra.mxu3 %vm735_vm4, %v3714_v50 }
 0x112   : > { %4259 = vst [vmem:[#allocation31_spill] sm:$0xff] %v3733_v31 }
 0x113   : > { %v1638_v28 = vpop.f32.mrf.mxu0 }
 0x114   : > { %v1482_v24 = vpop.f32.mrf.mxu3  ;;  %v1032_v38 = vpop.f32.mrf.mxu1 }
 0x115   : > { %v1556_v11 = vadd.f32 %v1482_v24, %v1422_v30  ;;  %v1033_v2 = vadd.f32 %v1032_v38, %v3642_v7  ;;  %v3005_v30 = vld [vmem:[%s3082_s8 + $0x98] sm:$0x1]  ;;  %v3740_v38 = vld [vmem:[%s3082_s8 + $0x90] sm:$0xff] }
 0x116   : > { %2793 = vmatmul.msk.bf16.gmra.mxu0 %vm735_vm4, %v4257_v17  ;;  %v1205_v49 = vrot.slane %v3005_v30, 5  ;;  %4260 = vst [vmem:[#allocation32_spill] sm:$0xff] %v3740_v38 }
 0x117   : > { %v1350_v34 = vpop.f32.mrf.mxu2  ;;  %2723 = vmatmul.msk.bf16.gmra.mxu1 %vm735_vm4, %v3714_v50  ;;  %v3731_v15 = vadd.f32 %v1638_v28, %v1556_v11  ;;  %v3006_v28 = vld [vmem:[%s3082_s8 + $0x90] sm:$0xf] }
 0x118   : > { %v1423_v46 = vadd.f32 %v1350_v34, %v1030_v51  ;;  %v2740_v11 = vrot.slane %v3006_v28, 9  ;;  %v1204_v51 = vrot.slane %v1202_v47, 4 }
 0x119   : > { %4258 = vst [vmem:[#allocation30_spill] sm:$0xff] %v3731_v15 }
 0x11a   : > { %v1203_v54 = vsel %vm3412_vm7, %v2740_v11, %v1202_v47  ;;  %v3007_v11 = vld [vmem:[%s3082_s8 + $0xa0] sm:$0xf] }
 0x11b   : > { %v1640_v60 = vpop.f32.mrf.mxu0 }
 0x11c   : > { %v1484_v7 = vpop.f32.mrf.mxu3  ;;  %2756 = vmatmul.msk.bf16.gmra.mxu2 %vm735_vm4, %v3733_v31  ;;  %v1034_v18 = vpop.f32.mrf.mxu1  ;;  %v3009_v31 = vld [vmem:[%s3082_s8 + $0x9c] sm:$0xf] }
 0x11d   : > { %v1557_v24 = vadd.f32 %v1484_v7, %v1423_v46  ;;  %v1035_v58 = vadd.f32 %v1034_v18, %v3656_v5  ;;  %v1206_v46 = vsel %vm3412_vm7, %v1204_v51, %v1205_v49  ;;  %v1254_v18 = vunpack.c.l.b16 %v1203_v54 }
 0x11e   : > { %v1255_v28 = vunpack.c.l.b16 %v1206_v46  ;;  %v1209_v51 = vrot.slane %v3007_v11, 5  ;;  %v3008_v46 = vld [vmem:[%s3082_s8 + $0xa4] sm:$0x1] }
 0x11f   : > { %v1353_v39 = vpop.f32.mrf.mxu2  ;;  %v3744_v61 = vadd.f32 %v1640_v60, %v1557_v24  ;;  %v4262_v60 = vld [vmem:[#allocation3_spill] sm:$0xff] }
 0x120   : > { %v1424_v34 = vadd.f32 %v1353_v39, %v1033_v2  ;;  %v3758_v49 = vpack.c.b16 %v1255_v28, %v1254_v18 }
 0x121   : > { %4261 = vst [vmem:[#allocation33_spill] sm:$0xff] %v3744_v61  ;;  %2777 = vmatmul.msk.bf16.gmra.mxu3 %vm735_vm4, %v3740_v38 }
 0x122   : > { %4264 = vst [vmem:[#allocation35_spill] sm:$0xff] %v3758_v49 }
 0x123   : > { %v1643_v30 = vpop.f32.mrf.mxu0 }
 0x124   : > { %v1487_v7 = vpop.f32.mrf.mxu3  ;;  %v1037_v5 = vpop.f32.mrf.mxu1 }
 0x125   : > { %v1558_v15 = vadd.f32 %v1487_v7, %v1424_v34  ;;  %v1212_v7 = vrot.slane %v3008_v46, 5 }
 0x126   : > { %2794 = vmatmul.msk.bf16.gmra.mxu0 %vm735_vm4, %v4262_v60  ;;  %v3765_v60 = vld [vmem:[%s3082_s8 + $0x9c] sm:$0xff] }
 0x127   : > { %v1355_v2 = vpop.f32.mrf.mxu2  ;;  %2724 = vmatmul.msk.bf16.gmra.mxu1 %vm735_vm4, %v3740_v38  ;;  %v3756_v47 = vadd.f32 %v1643_v30, %v1558_v15  ;;  %4265 = vst [vmem:[#allocation36_spill] sm:$0xff] %v3765_v60  ;;  %v2741_v38 = vrot.slane %v3009_v31, 9  ;;  %v1211_v15 = vrot.slane %v1209_v51, 4 }
 0x128   : > { %v1425_v24 = vadd.f32 %v1355_v2, %v1035_v58  ;;  %v1038_v58 = vadd.f32 %v1037_v5, %v3495_v22  ;;  %v4267_v5 = vld [vmem:[#allocation4_spill] sm:$0xff] }
 0x129   : > { %4263 = vst [vmem:[#allocation34_spill] sm:$0xff] %v3756_v47  ;;  %v1210_v2 = vsel %vm3412_vm7, %v2741_v38, %v1209_v51 }
 0x12a   : > { %v1256_v31 = vunpack.c.l.b16 %v1210_v2 }
 0x12b   : > { %v1645_v39 = vpop.f32.mrf.mxu0 }
 0x12c   : > { %v1489_v54 = vpop.f32.mrf.mxu3  ;;  %2757 = vmatmul.msk.bf16.gmra.mxu2 %vm735_vm4, %v3758_v49  ;;  %v1039_v34 = vpop.f32.mrf.mxu1 }
 0x12d   : > { %v1559_v61 = vadd.f32 %v1489_v54, %v1425_v24  ;;  %v1213_v24 = vsel %vm3412_vm7, %v1211_v15, %v1212_v7  ;;  %v4270_v15 = vld [vmem:[#allocation6_spill] sm:$0xff] }
 0x12e   : > { %v1257_v47 = vunpack.c.l.b16 %v1213_v24  ;;  %v4271_v24 = vld [vmem:[#allocation7_spill] sm:$0xff] }
 0x12f   : > { %v1358_v30 = vpop.f32.mrf.mxu2  ;;  %v3769_v18 = vadd.f32 %v1645_v39, %v1559_v61  ;;  %v1040_v61 = vadd.f32 %v1039_v34, %v3510_v43  ;;  %v3791_v34 = vld [vmem:[%s3082_s8 + $0xa8] sm:$0xff] }
 0x130   : > { %v1426_v28 = vadd.f32 %v1358_v30, %v1038_v58  ;;  %v3784_v7 = vpack.c.b16 %v1257_v47, %v1256_v31  ;;  %v1216_v58 = vrot.slane %v4270_v15, 5  ;;  %4272 = vst [vmem:[#allocation6_spill] sm:$0xff] %v3791_v34 }
 0x131   : > { %4266 = vst [vmem:[#allocation37_spill] sm:$0xff] %v3769_v18  ;;  %2778 = vmatmul.msk.bf16.gmra.mxu3 %vm735_vm4, %v3765_v60  ;;  %v4273_v18 = vld [vmem:[#allocation5_spill] sm:$0xff] }
 0x132   : > { %4269 = vst [vmem:[#allocation39_spill] sm:$0xff] %v3784_v7 }
 0x133   : > { %v1648_v11 = vpop.f32.mrf.mxu0 }
 0x134   : > { %v1492_v54 = vpop.f32.mrf.mxu3  ;;  %v1042_v46 = vpop.f32.mrf.mxu1 }
 0x135   : > { %v1560_v22 = vadd.f32 %v1492_v54, %v1426_v28  ;;  %v1219_v54 = vrot.slane %v4271_v24, 5 }
 0x136   : > { %2795 = vmatmul.msk.bf16.gmra.mxu0 %vm735_vm4, %v4267_v5  ;;  %v2742_v5 = vrot.slane %v4273_v18, 9 }
 0x137   : > { %v1360_v39 = vpop.f32.mrf.mxu2  ;;  %2725 = vmatmul.msk.bf16.gmra.mxu1 %vm735_vm4, %v3765_v60  ;;  %v3782_v38 = vadd.f32 %v1648_v11, %v1560_v22  ;;  %v1218_v11 = vrot.slane %v1216_v58, 4  ;;  %v1043_v22 = vadd.f32 %v1042_v46, %v3530_v9 }
 0x138   : > { %v1427_v51 = vadd.f32 %v1360_v39, %v1040_v61  ;;  %v1217_v39 = vsel %vm3412_vm7, %v2742_v5, %v1216_v58  ;;  %v3809_v5 = vld [vmem:[%s3082_s8 + $0xc0] sm:$0xf] }
 0x139   : > { %4268 = vst [vmem:[#allocation38_spill] sm:$0xff] %v3782_v38  ;;  %v1258_v24 = vunpack.c.l.b16 %v1217_v39  ;;  %v4275_v38 = vld [vmem:[#allocation10_spill] sm:$0xff]  ;;  %v1585_v39 = vshrl.u32 %v3809_v5, 16 }
 0x13a   : > { %4276 = vst [vmem:[#allocation5_spill] sm:$0xff] %v3809_v5 }
 0x13b   : > { %v1650_v30 = vpop.f32.mrf.mxu0 }
 0x13c   : > { %v1494_v2 = vpop.f32.mrf.mxu3  ;;  %2758 = vmatmul.msk.bf16.gmra.mxu2 %vm735_vm4, %v3784_v7  ;;  %v1044_v28 = vpop.f32.mrf.mxu1 }
 0x13d   : > { %v1561_v43 = vadd.f32 %v1494_v2, %v1427_v51  ;;  %v1220_v51 = vsel %vm3412_vm7, %v1218_v11, %v1219_v54 }
 0x13e   : > { %v1259_v9 = vunpack.c.l.b16 %v1220_v51 }
 0x13f   : > { %v1363_v47 = vpop.f32.mrf.mxu2  ;;  %v3795_v31 = vadd.f32 %v1650_v30, %v1561_v43  ;;  %v1045_v30 = vadd.f32 %v1044_v28, %v3548_v29  ;;  %v1588_v29 = vshll.u32 %v3809_v5, 16 }
 0x140   : > { %v1428_v61 = vadd.f32 %v1363_v47, %v1043_v22  ;;  %v3813_v11 = vpack.c.b16 %v1259_v9, %v1258_v24  ;;  %v3816_v22 = vld [vmem:[%s3082_s8 + $0xc4] sm:$0xf]  ;;  %v4280_v47 = vld [vmem:[#allocation12_spill] sm:$0xff]  ;;  %v4281_v24 = vld [vmem:[#allocation13_spill] sm:$0xff] }
 0x141   : > { %4274 = vst [vmem:[#allocation7_spill] sm:$0xff] %v3795_v31  ;;  %2779 = vmatmul.msk.bf16.gmra.mxu3 %vm735_vm4, %v3791_v34  ;;  %v1594_v28 = vshll.u32 %v3816_v22, 16  ;;  %v1226_v9 = vrot.slane %v4281_v24, 5  ;;  %v1590_v7 = vrot.slane %v1588_v29, 5 }
 0x142   : > { %4278 = vst [vmem:[#allocation41_spill] sm:$0xff] %v3813_v11 }
 0x143   : > { %v1653_v15 = vpop.f32.mrf.mxu0  ;;  %4279 = vst [vmem:[#allocation42_spill] sm:$0xff] %v3816_v22 }
 0x144   : > { %v1497_v18 = vpop.f32.mrf.mxu3  ;;  %v1047_v2 = vpop.f32.mrf.mxu1 }
 0x145   : > { %v1562_v46 = vadd.f32 %v1497_v18, %v1428_v61  ;;  %v1223_v61 = vrot.slane %v4280_v47, 5  ;;  %v1598_v18 = vshrl.u32 %v3816_v22, 16  ;;  %v1048_v5 = vadd.f32 %v1047_v2, %v3568_v48 }
 0x146   : > { %2796 = vmatmul.msk.bf16.gmra.mxu0 %vm735_vm4, %v4275_v38  ;;  %v1587_v38 = vrot.slane %v1585_v39, 4  ;;  %v1596_v22 = vrot.slane %v1594_v28, 5 }
 0x147   : > { %v1365_v43 = vpop.f32.mrf.mxu2  ;;  %2726 = vmatmul.msk.bf16.gmra.mxu1 %vm735_vm4, %v3791_v34  ;;  %v3811_v58 = vadd.f32 %v1653_v15, %v1562_v46  ;;  %v1600_v60 = vrot.slane %v1598_v18, 4 }
 0x148   : > { %v1429_v54 = vadd.f32 %v1365_v43, %v1045_v30  ;;  %v3827_v30 = vld [vmem:[%s3082_s8 + $0xb4] sm:$0xff]  ;;  %v4282_v43 = vld [vmem:[#allocation11_spill] sm:$0xff]  ;;  %v1591_v2 = vor.u32 %v1590_v7, %v1587_v38 }
 0x149   : > { %4277 = vst [vmem:[#allocation40_spill] sm:$0xff] %v3811_v58  ;;  %v2743_v47 = vrot.slane %v4282_v43, 9  ;;  %v1225_v58 = vrot.slane %v1223_v61, 4  ;;  %v1601_v39 = vor.u32 %v1600_v60, %v1596_v22 }
 0x14b   : > { %v1655_v51 = vpop.f32.mrf.mxu0  ;;  %v1602_v38 = vrot.slane %v1601_v39, 4 }
 0x14c   : > { %v1499_v31 = vpop.f32.mrf.mxu3  ;;  %2759 = vmatmul.msk.bf16.gmra.mxu2 %vm735_vm4, %v3813_v11  ;;  %v1049_v15 = vpop.f32.mrf.mxu1  ;;  %v3834_v11 = vld [vmem:[%s3082_s8 + $0xc8] sm:$0x1] }
 0x14d   : > { %v1563_v46 = vadd.f32 %v1499_v31, %v1429_v54  ;;  %v1224_v31 = vsel %vm3412_vm7, %v2743_v47, %v1223_v61  ;;  %v1227_v54 = vsel %vm3412_vm7, %v1225_v58, %v1226_v9  ;;  %v1604_v29 = vshll.u32 %v3834_v11, 16 }
 0x14e   : > { %v1260_v18 = vunpack.c.l.b16 %v1224_v31  ;;  %v1050_v24 = vadd.f32 %v1049_v15, %v3589_v63  ;;  %v1592_v58 = vrot.slane %v1591_v2, 4 }
 0x14f   : > { %v1368_v34 = vpop.f32.mrf.mxu2  ;;  %v3831_v49 = vadd.f32 %v1655_v51, %v1563_v46  ;;  %v1606_v60 = vrot.slane %v1604_v29, 5 }
 0x150   : > { %v1430_v17 = vadd.f32 %v1368_v34, %v1048_v5  ;;  %v1261_v34 = vunpack.c.l.b16 %v1227_v54  ;;  %v3859_v54 = vld [vmem:[%s3082_s8 + $0xc0] sm:$0xff] }
 0x151   : > { %2780 = vmatmul.msk.bf16.gmra.mxu3 %vm735_vm4, %v3827_v30  ;;  %v1607_v63 = vsel %vm3109_vm3, %v1602_v38, %v1606_v60 }
 0x152   : > { %v3850_v46 = vpack.c.b16 %v1261_v34, %v1260_v18  ;;  %v1611_v39 = vunpack.c.l.b16 %v1607_v63 }
 0x153   : > { %v1658_v48 = vpop.f32.mrf.mxu0 }
 0x154   : > { %v1502_v28 = vpop.f32.mrf.mxu3  ;;  %v1052_v51 = vpop.f32.mrf.mxu1 }
 0x155   : > { %v1564_v5 = vadd.f32 %v1502_v28, %v1430_v17  ;;  %v1597_v17 = vsel %vm3109_vm3, %v1592_v58, %v1596_v22 }
 0x156   : > { %2797 = vmatmul.msk.bf16.gmra.mxu0 %vm735_vm4, %v3421_v53  ;;  %v1610_v2 = vunpack.c.l.b16 %v1597_v17 }
 0x157   : > { %v1370_v61 = vpop.f32.mrf.mxu2  ;;  %2727 = vmatmul.msk.bf16.gmra.mxu1 %vm735_vm4, %v3827_v30  ;;  %v3848_v7 = vadd.f32 %v1658_v48, %v1564_v5  ;;  %v1053_v48 = vadd.f32 %v1052_v51, %v3610_v26 }
 0x158   : > { %v1431_v9 = vadd.f32 %v1370_v61, %v1050_v24  ;;  %v3866_v22 = vpack.c.b16 %v1611_v39, %v1610_v2 }
 0x15b   : > { %v1660_v43 = vpop.f32.mrf.mxu0 }
 0x15c   : > { %v1504_v15 = vpop.f32.mrf.mxu3  ;;  %2760 = vmatmul.msk.bf16.gmra.mxu2 %vm735_vm4, %v3850_v46  ;;  %v1054_v47 = vpop.f32.mrf.mxu1 }
 0x15d   : > { %v1565_v31 = vadd.f32 %v1504_v15, %v1431_v9  ;;  %v1055_v26 = vadd.f32 %v1054_v47, %v3627_v0 }
 0x15f   : > { %v1373_v29 = vpop.f32.mrf.mxu2  ;;  %v3862_v28 = vadd.f32 %v1660_v43, %v1565_v31 }
 0x160   : > { %v1432_v18 = vadd.f32 %v1373_v29, %v1053_v48 }
 0x161   : > { %2781 = vmatmul.msk.bf16.gmra.mxu3 %vm735_vm4, %v3859_v54 }
 0x163   : > { %v1663_v34 = vpop.f32.mrf.mxu0 }
 0x164   : > { %v1507_v5 = vpop.f32.mrf.mxu3  ;;  %v1057_v24 = vpop.f32.mrf.mxu1 }
 0x165   : > { %v1566_v61 = vadd.f32 %v1507_v5, %v1432_v18  ;;  %v1058_v63 = vadd.f32 %v1057_v24, %v3512_v16 }
 0x166   : > { %2798 = vmatmul.msk.bf16.gmra.mxu0 %vm735_vm4, %v3866_v22 }
 0x167   : > { %v1375_v51 = vpop.f32.mrf.mxu2  ;;  %2801 = vmatmul.msk.bf16.vlgmr.msra.gmra.mxu1 %vm735_vm4, %v3446_v55  ;;  %v3873_v58 = vadd.f32 %v1663_v34, %v1566_v61 }
 0x168   : > { %v1433_v38 = vadd.f32 %v1375_v51, %v1055_v26 }
 0x16b   : > { %v1665_v60 = vpop.f32.mrf.mxu0 }
 0x16c   : > { %v1509_v9 = vpop.f32.mrf.mxu3  ;;  %2822 = vmatmul.msk.bf16.vlgmr.msra.gmra.mxu2 %vm735_vm4, %v3458_v6  ;;  %v1059_v43 = vpop.f32.mrf.mxu1 }
 0x16d   : > { %v1567_v17 = vadd.f32 %v1509_v9, %v1433_v38  ;;  %v1060_v6 = vadd.f32 %v1059_v43, %v3534_v57 }
 0x16f   : > { %v1378_v15 = vpop.f32.mrf.mxu2  ;;  %v3878_v31 = vadd.f32 %v1665_v60, %v1567_v17 }
 0x170   : > { %v1434_v0 = vadd.f32 %v1378_v15, %v1058_v63 }
 0x171   : > { %2839 = vmatmul.msk.bf16.vlgmr.msra.gmra.mxu3 %vm735_vm4, %v3349_v45 }
 0x173   : > { %v1668_v55 = vpop.f32.mrf.mxu0 }
 0x174   : > { %v1512_v47 = vpop.f32.mrf.mxu3  ;;  %v1062_v48 = vpop.f32.mrf.mxu1 }
 0x175   : > { %v1568_v2 = vadd.f32 %v1512_v47, %v1434_v0  ;;  %v1063_v24 = vadd.f32 %v1062_v48, %v3554_v59 }
 0x176   : > { %2857 = vmatmul.msk.bf16.vlgmr.msra.gmra.mxu0 %vm735_vm4, %v3472_v52 }
 0x177   : > { %v1380_v39 = vpop.f32.mrf.mxu2  ;;  %2802 = vmatmul.msk.bf16.gmra.mxu1 %vm735_vm4, %v3472_v52  ;;  %v3887_v16 = vadd.f32 %v1668_v55, %v1568_v2 }
 0x178   : > { %v1435_v29 = vadd.f32 %v1380_v39, %v1060_v6 }
 0x17b   : > { %v1670_v18 = vpop.f32.mrf.mxu0 }
 0x17c   : > { %v1514_v34 = vpop.f32.mrf.mxu3  ;;  %2823 = vmatmul.msk.bf16.gmra.mxu2 %vm735_vm4, %v3478_v41  ;;  %v1064_v45 = vpop.f32.mrf.mxu1 }
 0x17d   : > { %v1569_v5 = vadd.f32 %v1514_v34, %v1435_v29  ;;  %v1065_v41 = vadd.f32 %v1064_v45, %v3572_v3 }
 0x17f   : > { %v1383_v61 = vpop.f32.mrf.mxu2  ;;  %v3892_v26 = vadd.f32 %v1670_v18, %v1569_v5 }
 0x180   : > { %v1436_v57 = vadd.f32 %v1383_v61, %v1063_v24 }
 0x181   : > { %2840 = vmatmul.msk.bf16.gmra.mxu3 %vm735_vm4, %v3439_v20 }
 0x183   : > { %v1673_v52 = vpop.f32.mrf.mxu0 }
 0x184   : > { %v1517_v51 = vpop.f32.mrf.mxu3  ;;  %v1067_v38 = vpop.f32.mrf.mxu1 }
 0x185   : > { %v1570_v60 = vadd.f32 %v1517_v51, %v1436_v57  ;;  %v1068_v0 = vadd.f32 %v1067_v38, %v3591_v23 }
 0x186   : > { %2858 = vmatmul.msk.bf16.gmra.mxu0 %vm735_vm4, %v3492_v40 }
 0x187   : > { %v1385_v9 = vpop.f32.mrf.mxu2  ;;  %2803 = vmatmul.msk.bf16.gmra.mxu1 %vm735_vm4, %v3492_v40  ;;  %v3901_v59 = vadd.f32 %v1673_v52, %v1570_v60 }
 0x188   : > { %v1437_v43 = vadd.f32 %v1385_v9, %v1065_v41 }
 0x18b   : > { %v1675_v17 = vpop.f32.mrf.mxu0 }
 0x18c   : > { %v1519_v63 = vpop.f32.mrf.mxu3  ;;  %2824 = vmatmul.msk.bf16.gmra.mxu2 %vm735_vm4, %v3500_v8  ;;  %v1069_v20 = vpop.f32.mrf.mxu1 }
 0x18d   : > { %v1571_v15 = vadd.f32 %v1519_v63, %v1437_v43  ;;  %v1070_v8 = vadd.f32 %v1069_v20, %v3612_v1  ;;  %v4283_v43 = vld [vmem:[#allocation18_spill] sm:$0xff]  ;;  %v4284_v63 = vld [vmem:[#allocation16_spill] sm:$0xff] }
 0x18f   : > { %v1388_v55 = vpop.f32.mrf.mxu2  ;;  %v3906_v47 = vadd.f32 %v1675_v17, %v1571_v15 }
 0x190   : > { %v1438_v3 = vadd.f32 %v1388_v55, %v1068_v0  ;;  %v4285_v55 = vld [vmem:[#allocation8_spill] sm:$0xff] }
 0x191   : > { %2841 = vmatmul.msk.bf16.gmra.mxu3 %vm735_vm4, %v3121_v62 }
 0x193   : > { %v1678_v40 = vpop.f32.mrf.mxu0 }
 0x194   : > { %v1522_v48 = vpop.f32.mrf.mxu3  ;;  %v1072_v2 = vpop.f32.mrf.mxu1 }
 0x195   : > { %v1572_v6 = vadd.f32 %v1522_v48, %v1438_v3  ;;  %v1073_v5 = vadd.f32 %v1072_v2, %v3634_v56  ;;  %v4286_v2 = vld [vmem:[#allocation21_spill] sm:$0xff] }
 0x196   : > { %2859 = vmatmul.msk.bf16.gmra.mxu0 %vm735_vm4, %v3520_v12 }
 0x197   : > { %v1390_v39 = vpop.f32.mrf.mxu2  ;;  %2804 = vmatmul.msk.bf16.gmra.mxu1 %vm735_vm4, %v3520_v12  ;;  %v3915_v23 = vadd.f32 %v1678_v40, %v1572_v6  ;;  %v4287_v6 = vld [vmem:[#allocation17_spill] sm:$0xff] }
 0x198   : > { %v1439_v29 = vadd.f32 %v1390_v39, %v1070_v8 }
 0x19b   : > { %v1680_v18 = vpop.f32.mrf.mxu0 }
 0x19c   : > { %v1524_v34 = vpop.f32.mrf.mxu3  ;;  %2825 = vmatmul.msk.bf16.gmra.mxu2 %vm735_vm4, %v3528_v27  ;;  %v1074_v62 = vpop.f32.mrf.mxu1 }
 0x19d   : > { %v1573_v45 = vadd.f32 %v1524_v34, %v1439_v29  ;;  %v1075_v27 = vadd.f32 %v1074_v62, %v3649_v44 }
 0x19f   : > { %v1393_v24 = vpop.f32.mrf.mxu2  ;;  %v3920_v61 = vadd.f32 %v1680_v18, %v1573_v45  ;;  %v4288_v45 = vld [vmem:[#allocation22_spill] sm:$0xff] }
 0x1a0   : > { %v1440_v1 = vadd.f32 %v1393_v24, %v1073_v5 }
 0x1a1   : > { %2842 = vmatmul.msk.bf16.gmra.mxu3 %vm735_vm4, %v3195_v37 }
 0x1a3   : > { %v1683_v12 = vpop.f32.mrf.mxu0 }
 0x1a4   : > { %v1527_v57 = vpop.f32.mrf.mxu3  ;;  %v1077_v52 = vpop.f32.mrf.mxu1 }
 0x1a5   : > { %v1574_v51 = vadd.f32 %v1527_v57, %v1440_v1  ;;  %v1078_v20 = vadd.f32 %v1077_v52, %v4284_v63  ;;  %v4289_v1 = vld [vmem:[#allocation19_spill] sm:$0xff] }
 0x1a6   : > { %2860 = vmatmul.msk.bf16.gmra.mxu0 %vm735_vm4, %v3552_v33 }
 0x1a7   : > { %v1395_v38 = vpop.f32.mrf.mxu2  ;;  %2805 = vmatmul.msk.bf16.gmra.mxu1 %vm735_vm4, %v3552_v33  ;;  %v3929_v56 = vadd.f32 %v1683_v12, %v1574_v51 }
 0x1a8   : > { %v1441_v60 = vadd.f32 %v1395_v38, %v1075_v27  ;;  %v4290_v27 = vld [vmem:[#allocation14_spill] sm:$0xff] }
 0x1ab   : > { %v1685_v41 = vpop.f32.mrf.mxu0 }
 0x1ac   : > { %v1529_v9 = vpop.f32.mrf.mxu3  ;;  %2826 = vmatmul.msk.bf16.gmra.mxu2 %vm735_vm4, %v4283_v43  ;;  %v1079_v37 = vpop.f32.mrf.mxu1  ;;  %v4291_v43 = vld [vmem:[#allocation24_spill] sm:$0xff] }
 0x1ad   : > { %v1575_v17 = vadd.f32 %v1529_v9, %v1441_v60  ;;  %v1080_v8 = vadd.f32 %v1079_v37, %v4287_v6  ;;  %v4292_v37 = vld [vmem:[#allocation20_spill] sm:$0xff] }
 0x1af   : > { %v1398_v15 = vpop.f32.mrf.mxu2  ;;  %v3934_v0 = vadd.f32 %v1685_v41, %v1575_v17 }
 0x1b0   : > { %v1442_v44 = vadd.f32 %v1398_v15, %v1078_v20 }
 0x1b1   : > { %2843 = vmatmul.msk.bf16.gmra.mxu3 %vm735_vm4, %v4285_v55 }
 0x1b3   : > { %v1688_v33 = vpop.f32.mrf.mxu0 }
 0x1b4   : > { %v1532_v3 = vpop.f32.mrf.mxu3  ;;  %v1082_v40 = vpop.f32.mrf.mxu1 }
 0x1b5   : > { %v1576_v48 = vadd.f32 %v1532_v3, %v1442_v44  ;;  %v1083_v12 = vadd.f32 %v1082_v40, %v4289_v1  ;;  %v4297_v1 = vld [vmem:[#allocation25_spill] sm:$0xff] }
 0x1b6   : > { %2861 = vmatmul.msk.bf16.gmra.mxu0 %vm735_vm4, %v4286_v2 }
 0x1b7   : > { %v1400_v39 = vpop.f32.mrf.mxu2  ;;  %2806 = vmatmul.msk.bf16.gmra.mxu1 %vm735_vm4, %v4286_v2  ;;  %v3943_v29 = vadd.f32 %v1688_v33, %v1576_v48  ;;  %v4293_v33 = vld [vmem:[#allocation26_spill] sm:$0xff]  ;;  %v4294_v48 = vld [vmem:[#allocation23_spill] sm:$0xff] }
 0x1b8   : > { %v1443_v18 = vadd.f32 %v1400_v39, %v1080_v8 }
 0x1bb   : > { %v1690_v34 = vpop.f32.mrf.mxu0 }
 0x1bc   : > { %v1534_v62 = vpop.f32.mrf.mxu3  ;;  %2827 = vmatmul.msk.bf16.gmra.mxu2 %vm735_vm4, %v4288_v45  ;;  %v1084_v5 = vpop.f32.mrf.mxu1 }
 0x1bd   : > { %v1577_v24 = vadd.f32 %v1534_v62, %v1443_v18  ;;  %v1085_v17 = vadd.f32 %v1084_v5, %v4292_v37  ;;  %v4295_v18 = vld [vmem:[#allocation2_spill] sm:$0xff] }
 0x1bf   : > { %v1403_v57 = vpop.f32.mrf.mxu2  ;;  %v3948_v52 = vadd.f32 %v1690_v34, %v1577_v24  ;;  %v4296_v24 = vld [vmem:[#allocation28_spill] sm:$0xff] }
 0x1c0   : > { %v1444_v51 = vadd.f32 %v1403_v57, %v1083_v12 }
 0x1c1   : > { %2844 = vmatmul.msk.bf16.gmra.mxu3 %vm735_vm4, %v4290_v27 }
 0x1c3   : > { %v1693_v38 = vpop.f32.mrf.mxu0 }
 0x1c4   : > { %v1537_v60 = vpop.f32.mrf.mxu3  ;;  %v1087_v41 = vpop.f32.mrf.mxu1 }
 0x1c5   : > { %v1578_v9 = vadd.f32 %v1537_v60, %v1444_v51  ;;  %v1088_v2 = vadd.f32 %v1087_v41, %v4294_v48 }
 0x1c6   : > { %2862 = vmatmul.msk.bf16.gmra.mxu0 %vm735_vm4, %v4291_v43 }
 0x1c7   : > { %v1405_v63 = vpop.f32.mrf.mxu2  ;;  %2807 = vmatmul.msk.bf16.gmra.mxu1 %vm735_vm4, %v4291_v43  ;;  %v3957_v20 = vadd.f32 %v1693_v38, %v1578_v9  ;;  %v4298_v43 = vld [vmem:[#allocation27_spill] sm:$0xff] }
 0x1c8   : > { %v1445_v15 = vadd.f32 %v1405_v63, %v1085_v17 }
 0x1cb   : > { %v1695_v44 = vpop.f32.mrf.mxu0 }
 0x1cc   : > { %v1539_v55 = vpop.f32.mrf.mxu3  ;;  %2828 = vmatmul.msk.bf16.gmra.mxu2 %vm735_vm4, %v4293_v33  ;;  %v1089_v3 = vpop.f32.mrf.mxu1 }
 0x1cd   : > { %v1579_v40 = vadd.f32 %v1539_v55, %v1445_v15  ;;  %v1090_v12 = vadd.f32 %v1089_v3, %v4297_v1 }
 0x1cf   : > { %v1408_v6 = vpop.f32.mrf.mxu2  ;;  %v3962_v8 = vadd.f32 %v1695_v44, %v1579_v40  ;;  %v4299_v40 = vld [vmem:[#allocation29_spill] sm:$0xff] }
 0x1d0   : > { %v1446_v39 = vadd.f32 %v1408_v6, %v1088_v2 }
 0x1d1   : > { %2845 = vmatmul.msk.bf16.gmra.mxu3 %vm735_vm4, %v4295_v18 }
 0x1d3   : > { %v1698_v34 = vpop.f32.mrf.mxu0 }
 0x1d4   : > { %v1542_v62 = vpop.f32.mrf.mxu3  ;;  %v1092_v45 = vpop.f32.mrf.mxu1 }
 0x1d5   : > { %v1580_v5 = vadd.f32 %v1542_v62, %v1446_v39  ;;  %v1093_v37 = vadd.f32 %v1092_v45, %v4298_v43 }
 0x1d6   : > { %2863 = vmatmul.msk.bf16.gmra.mxu0 %vm735_vm4, %v4296_v24 }
 0x1d7   : > { %v1410_v57 = vpop.f32.mrf.mxu2  ;;  %2808 = vmatmul.msk.bf16.gmra.mxu1 %vm735_vm4, %v4296_v24  ;;  %v3971_v51 = vadd.f32 %v1698_v34, %v1580_v5 }
 0x1d8   : > { %v1447_v27 = vadd.f32 %v1410_v57, %v1090_v12 }
 0x1db   : > { %v1700_v38 = vpop.f32.mrf.mxu0 }
 0x1dc   : > { %v1544_v60 = vpop.f32.mrf.mxu3  ;;  %2829 = vmatmul.msk.bf16.gmra.mxu2 %vm735_vm4, %v3664_v19  ;;  %v1094_v41 = vpop.f32.mrf.mxu1 }
 0x1dd   : > { %v1581_v9 = vadd.f32 %v1544_v60, %v1447_v27  ;;  %v1095_v19 = vadd.f32 %v1094_v41, %v4299_v40 }
 0x1df   : > { %v1413_v17 = vpop.f32.mrf.mxu2  ;;  %v3976_v63 = vadd.f32 %v1700_v38, %v1581_v9 }
 0x1e0   : > { %v1448_v15 = vadd.f32 %v1413_v17, %v1093_v37 }
 0x1e1   : > { %2846 = vmatmul.msk.bf16.gmra.mxu3 %vm735_vm4, %v3220_v4 }
 0x1e3   : > { %v1703_v44 = vpop.f32.mrf.mxu0 }
 0x1e4   : > { %v1547_v55 = vpop.f32.mrf.mxu3  ;;  %v1768_v33 = vpop.f32.mrf.mxu1 }
 0x1e5   : > { %v1582_v3 = vadd.f32 %v1547_v55, %v1448_v15  ;;  %v1848_v5 = vadd.f32 %v1768_v33, %v3679_v32 }
 0x1e6   : > { %2864 = vmatmul.msk.bf16.gmra.mxu0 %vm735_vm4, %v3681_v10 }
 0x1e7   : > { %v1415_v48 = vpop.f32.mrf.mxu2  ;;  %2809 = vmatmul.msk.bf16.gmra.mxu1 %vm735_vm4, %v3681_v10  ;;  %v3985_v2 = vadd.f32 %v1703_v44, %v1582_v3  ;;  %v4300_v44 = vld [vmem:[#allocation15_spill] sm:$0xff] }
 0x1e8   : > { %v1449_v6 = vadd.f32 %v1415_v48, %v1095_v19 }
 0x1eb   : > { %v1705_v39 = vpop.f32.mrf.mxu0 }
 0x1ec   : > { %v1549_v18 = vpop.f32.mrf.mxu3  ;;  %2830 = vmatmul.msk.bf16.gmra.mxu2 %vm735_vm4, %v3688_v42  ;;  %v1770_v4 = vpop.f32.mrf.mxu1 }
 0x1ed   : > { %v1583_v34 = vadd.f32 %v1549_v18, %v1449_v6  ;;  %v1849_v42 = vadd.f32 %v1770_v4, %v3692_v35  ;;  %v4301_v18 = vld [vmem:[#allocation31_spill] sm:$0xff] }
 0x1ef   : > { %v1902_v62 = vpop.f32.mrf.mxu2  ;;  %v3989_v45 = vadd.f32 %v1705_v39, %v1583_v34  ;;  %v4302_v34 = vld [vmem:[#allocation9_spill] sm:$0xff] }
 0x1f0   : > { %v1982_v10 = vadd.f32 %v1902_v62, %v1848_v5 }
 0x1f1   : > { %2847 = vmatmul.msk.bf16.gmra.mxu3 %vm735_vm4, %v3305_v25  ;;  %v4002_v25 = vld [vmem:[%s4179_s2] ss:$0 sm:$0xff] }
 0x1f3   : > { %v2198_v24 = vpop.f32.mrf.mxu0 }
 0x1f4   : > { %v2058_v1 = vpop.f32.mrf.mxu3  ;;  %v1773_v12 = vpop.f32.mrf.mxu1 }
 0x1f5   : > { %v2138_v57 = vadd.f32 %v2058_v1, %v1982_v10 }
 0x1f6   : > { %2865 = vmatmul.msk.bf16.gmra.mxu0 %vm735_vm4, %v3707_v13 }
 0x1f7   : > { %v1904_v27 = vpop.f32.mrf.mxu2  ;;  %2810 = vmatmul.msk.bf16.gmra.mxu1 %vm735_vm4, %v3707_v13  ;;  %v2278_v32 = vadd.f32 %v2198_v24, %v2138_v57  ;;  %v1850_v13 = vadd.f32 %v1773_v12, %v3705_v21 }
 0x1f8   : > { %v1983_v38 = vadd.f32 %v1904_v27, %v1849_v42  ;;  %v4303_v27 = vld [vmem:[#allocation32_spill] sm:$0xff] }
 0x1f9   : > { %v2314_v35 = vadd.f32 %v4002_v25, %v2278_v32 }
 0x1fb   : > { %v2200_v60 = vpop.f32.mrf.mxu0 }
 0x1fc   : > { %v2060_v41 = vpop.f32.mrf.mxu3  ;;  %2831 = vmatmul.msk.bf16.gmra.mxu2 %vm735_vm4, %v3714_v50  ;;  %v1775_v9 = vpop.f32.mrf.mxu1  ;;  %v2448_v50 = vmul.f32 %v2314_v35, %v2314_v35 }
 0x1fd   : > { %v2139_v43 = vadd.f32 %v2060_v41, %v1983_v38  ;;  %v1851_v62 = vadd.f32 %v1775_v9, %v4302_v34  ;;  %v4304_v9 = vld [vmem:[#allocation30_spill] sm:$0xff] }
 0x1ff   : > { %v2279_v37 = vadd.f32 %v2200_v60, %v2139_v43  ;;  %v1907_v17 = vpop.f32.mrf.mxu2 }
 0x200   : > { %v1984_v55 = vadd.f32 %v1907_v17, %v1850_v13  ;;  %v4305_v13 = vld [vmem:[#allocation3_spill] sm:$0xff] }
 0x201   : > { %v2315_v15 = vadd.f32 %v4002_v25, %v2279_v37  ;;  %2848 = vmatmul.msk.bf16.gmra.mxu3 %vm735_vm4, %v4300_v44 }
 0x203   : > { %v2897_v33 = vpack.c.bf16 %v2315_v15, %v2314_v35  ;;  %v2410_v3 = vadd.f32 %v2315_v15, %v2314_v35  ;;  %v2449_v40 = vmul.f32 %v2315_v15, %v2315_v15  ;;  %v2203_v19 = vpop.f32.mrf.mxu0 }
 0x204   : > { %v2063_v48 = vpop.f32.mrf.mxu3  ;;  %v1778_v21 = vpop.f32.mrf.mxu1 }
 0x205   : > { %2898 = vst [vmem:[%s4015_s24] sm:$0xff] %v2897_v33   ;;  %v2480_v6 = vadd.f32 %v2449_v40, %v2448_v50  ;;  %v2140_v39 = vadd.f32 %v2063_v48, %v1984_v55  ;;  %v1852_v43 = vadd.f32 %v1778_v21, %v4304_v9  ;;  %v4306_v48 = vld [vmem:[#allocation35_spill] sm:$0xff]  ;;  %v4310_v9 = vld [vmem:[#allocation4_spill] sm:$0xff] }
 0x206   : > { %2866 = vmatmul.msk.bf16.gmra.mxu0 %vm735_vm4, %v4301_v18 }
 0x207   : > { %v2280_v4 = vadd.f32 %v2203_v19, %v2140_v39  ;;  %v1909_v5 = vpop.f32.mrf.mxu2  ;;  %2811 = vmatmul.msk.bf16.gmra.mxu1 %vm735_vm4, %v4301_v18 }
 0x208   : > { %v1985_v10 = vadd.f32 %v1909_v5, %v1851_v62 }
 0x209   : > { %v2316_v24 = vadd.f32 %v4002_v25, %v2280_v4 }
 0x20b   : > { %v2411_v1 = vadd.f32 %v2410_v3, %v2316_v24  ;;  %v2450_v12 = vmul.f32 %v2316_v24, %v2316_v24  ;;  %v2205_v57 = vpop.f32.mrf.mxu0 }
 0x20c   : > { %v2065_v42 = vpop.f32.mrf.mxu3  ;;  %2832 = vmatmul.msk.bf16.gmra.mxu2 %vm735_vm4, %v4303_v27  ;;  %v1780_v38 = vpop.f32.mrf.mxu1 }
 0x20d   : > { %v2481_v32 = vadd.f32 %v2480_v6, %v2450_v12  ;;  %v2141_v60 = vadd.f32 %v2065_v42, %v1985_v10  ;;  %v4307_v6 = vld [vmem:[#allocation33_spill] sm:$0xff] }
 0x20e   : > { %v1853_v39 = vadd.f32 %v1780_v38, %v4307_v6  ;;  %v4309_v38 = vld [vmem:[#allocation34_spill] sm:$0xff] }
 0x20f   : > { %v2281_v41 = vadd.f32 %v2205_v57, %v2141_v60  ;;  %v1912_v35 = vpop.f32.mrf.mxu2 }
 0x210   : > { %v1986_v17 = vadd.f32 %v1912_v35, %v1852_v43 }
 0x211   : > { %v2317_v37 = vadd.f32 %v4002_v25, %v2281_v41  ;;  %2849 = vmatmul.msk.bf16.gmra.mxu3 %vm735_vm4, %v4305_v13 }
 0x213   : > { %v2902_v15 = vpack.c.bf16 %v2317_v37, %v2316_v24  ;;  %v2412_v44 = vadd.f32 %v2411_v1, %v2317_v37  ;;  %v2451_v55 = vmul.f32 %v2317_v37, %v2317_v37  ;;  %v2208_v50 = vpop.f32.mrf.mxu0  ;;  %v4308_v1 = vld [vmem:[#allocation36_spill] sm:$0xff] }
 0x214   : > { %v2068_v33 = vpop.f32.mrf.mxu3  ;;  %v1783_v3 = vpop.f32.mrf.mxu1 }
 0x215   : > { %2974 = vst [vmem:[%s4015_s24 + $0x8] sm:$0xff] %v2902_v15   ;;  %v2482_v40 = vadd.f32 %v2481_v32, %v2451_v55  ;;  %v2142_v19 = vadd.f32 %v2068_v33, %v1986_v17  ;;  %v1854_v32 = vadd.f32 %v1783_v3, %v4309_v38  ;;  %v4311_v33 = vld [vmem:[#allocation39_spill] sm:$0xff]  ;;  %v4315_v38 = vld [vmem:[#allocation10_spill] sm:$0xff] }
 0x216   : > { %2867 = vmatmul.msk.bf16.gmra.mxu0 %vm735_vm4, %v4306_v48 }
 0x217   : > { %v2282_v21 = vadd.f32 %v2208_v50, %v2142_v19  ;;  %v1914_v18 = vpop.f32.mrf.mxu2  ;;  %2812 = vmatmul.msk.bf16.gmra.mxu1 %vm735_vm4, %v4306_v48 }
 0x218   : > { %v1987_v34 = vadd.f32 %v1914_v18, %v1853_v39 }
 0x219   : > { %v2318_v4 = vadd.f32 %v4002_v25, %v2282_v21 }
 0x21b   : > { %v2413_v62 = vadd.f32 %v2412_v44, %v2318_v4  ;;  %v2452_v5 = vmul.f32 %v2318_v4, %v2318_v4  ;;  %v2210_v24 = vpop.f32.mrf.mxu0 }
 0x21c   : > { %v2070_v10 = vpop.f32.mrf.mxu3  ;;  %2833 = vmatmul.msk.bf16.gmra.mxu2 %vm735_vm4, %v4308_v1  ;;  %v1785_v12 = vpop.f32.mrf.mxu1 }
 0x21d   : > { %v2483_v57 = vadd.f32 %v2482_v40, %v2452_v5  ;;  %v2143_v42 = vadd.f32 %v2070_v10, %v1987_v34  ;;  %v4312_v40 = vld [vmem:[#allocation37_spill] sm:$0xff] }
 0x21e   : > { %v1855_v19 = vadd.f32 %v1785_v12, %v4312_v40  ;;  %v4314_v12 = vld [vmem:[#allocation38_spill] sm:$0xff] }
 0x21f   : > { %v2283_v27 = vadd.f32 %v2210_v24, %v2143_v42  ;;  %v1917_v60 = vpop.f32.mrf.mxu2 }
 0x220   : > { %v1988_v43 = vadd.f32 %v1917_v60, %v1854_v32 }
 0x221   : > { %v2319_v41 = vadd.f32 %v4002_v25, %v2283_v27  ;;  %2850 = vmatmul.msk.bf16.gmra.mxu3 %vm735_vm4, %v4310_v9 }
 0x223   : > { %v2907_v35 = vpack.c.bf16 %v2319_v41, %v2318_v4  ;;  %v2414_v37 = vadd.f32 %v2413_v62, %v2319_v41  ;;  %v2453_v13 = vmul.f32 %v2319_v41, %v2319_v41  ;;  %v2213_v17 = vpop.f32.mrf.mxu0  ;;  %v4313_v62 = vld [vmem:[#allocation6_spill] sm:$0xff] }
 0x224   : > { %v2073_v15 = vpop.f32.mrf.mxu3  ;;  %v1788_v44 = vpop.f32.mrf.mxu1 }
 0x225   : > { %2975 = vst [vmem:[%s4015_s24 + $0x10] sm:$0xff] %v2907_v35   ;;  %v2484_v55 = vadd.f32 %v2483_v57, %v2453_v13  ;;  %v2144_v50 = vadd.f32 %v2073_v15, %v1988_v43  ;;  %v1856_v57 = vadd.f32 %v1788_v44, %v4314_v12  ;;  %v4316_v15 = vld [vmem:[#allocation41_spill] sm:$0xff] }
 0x226   : > { %2868 = vmatmul.msk.bf16.gmra.mxu0 %vm735_vm4, %v4311_v33 }
 0x227   : > { %v2284_v3 = vadd.f32 %v2213_v17, %v2144_v50  ;;  %v1919_v48 = vpop.f32.mrf.mxu2  ;;  %2813 = vmatmul.msk.bf16.gmra.mxu1 %vm735_vm4, %v4311_v33 }
 0x228   : > { %v1989_v6 = vadd.f32 %v1919_v48, %v1855_v19 }
 0x229   : > { %v2320_v21 = vadd.f32 %v4002_v25, %v2284_v3 }
 0x22b   : > { %v2415_v39 = vadd.f32 %v2414_v37, %v2320_v21  ;;  %v2454_v18 = vmul.f32 %v2320_v21, %v2320_v21  ;;  %v2215_v4 = vpop.f32.mrf.mxu0 }
 0x22c   : > { %v2075_v34 = vpop.f32.mrf.mxu3  ;;  %2834 = vmatmul.msk.bf16.gmra.mxu2 %vm735_vm4, %v4313_v62  ;;  %v1790_v5 = vpop.f32.mrf.mxu1  ;;  %v4318_v62 = vld [vmem:[#allocation40_spill] sm:$0xff] }
 0x22d   : > { %v2485_v24 = vadd.f32 %v2484_v55, %v2454_v18  ;;  %v2145_v10 = vadd.f32 %v2075_v34, %v1989_v6  ;;  %v4317_v55 = vld [vmem:[#allocation7_spill] sm:$0xff] }
 0x22e   : > { %v1857_v50 = vadd.f32 %v1790_v5, %v4317_v55 }
 0x22f   : > { %v2285_v1 = vadd.f32 %v2215_v4, %v2145_v10  ;;  %v1922_v42 = vpop.f32.mrf.mxu2 }
 0x230   : > { %v1990_v32 = vadd.f32 %v1922_v42, %v1856_v57 }
 0x231   : > { %v2321_v27 = vadd.f32 %v4002_v25, %v2285_v1  ;;  %2851 = vmatmul.msk.bf16.gmra.mxu3 %vm735_vm4, %v4315_v38 }
 0x233   : > { %v2912_v60 = vpack.c.bf16 %v2321_v27, %v2320_v21  ;;  %v2416_v41 = vadd.f32 %v2415_v39, %v2321_v27  ;;  %v2455_v9 = vmul.f32 %v2321_v27, %v2321_v27  ;;  %v2218_v43 = vpop.f32.mrf.mxu0 }
 0x234   : > { %v2078_v35 = vpop.f32.mrf.mxu3  ;;  %v1793_v37 = vpop.f32.mrf.mxu1 }
 0x235   : > { %2976 = vst [vmem:[%s4015_s24 + $0x18] sm:$0xff] %v2912_v60   ;;  %v2486_v13 = vadd.f32 %v2485_v24, %v2455_v9  ;;  %v2146_v17 = vadd.f32 %v2078_v35, %v1990_v32  ;;  %v1858_v5 = vadd.f32 %v1793_v37, %v4318_v62  ;;  %v4071_v32 = vld [vmem:[%s3082_s8 + $0xcc] sm:$0xf]  ;;  %v4074_v60 = vld [vmem:[%s3082_s8 + $0xd0] sm:$0xf]  ;;  %v4320_v37 = vld [vmem:[#allocation5_spill] sm:$0xff] }
 0x236   : > { %2869 = vmatmul.msk.bf16.gmra.mxu0 %vm735_vm4, %v4316_v15 }
 0x237   : > { %v2286_v44 = vadd.f32 %v2218_v43, %v2146_v17  ;;  %v1924_v33 = vpop.f32.mrf.mxu2  ;;  %2814 = vmatmul.msk.bf16.gmra.mxu1 %vm735_vm4, %v4316_v15  ;;  %v2018_v17 = vshll.u32 %v4071_v32, 16  ;;  %v2024_v15 = vshll.u32 %v4074_v60, 16 }
 0x238   : > { %v1991_v40 = vadd.f32 %v1924_v33, %v1857_v50 }
 0x239   : > { %v2322_v3 = vadd.f32 %v4002_v25, %v2286_v44  ;;  %v2028_v44 = vshrl.u32 %v4074_v60, 16 }
 0x23b   : > { %v2417_v19 = vadd.f32 %v2416_v41, %v2322_v3  ;;  %v2456_v48 = vmul.f32 %v2322_v3, %v2322_v3  ;;  %v2220_v21 = vpop.f32.mrf.mxu0 }
 0x23c   : > { %v2080_v6 = vpop.f32.mrf.mxu3  ;;  %2835 = vmatmul.msk.bf16.gmra.mxu2 %vm735_vm4, %v3827_v30  ;;  %v1795_v39 = vpop.f32.mrf.mxu1  ;;  %v4319_v30 = vld [vmem:[#allocation42_spill] sm:$0xff] }
 0x23d   : > { %v2487_v18 = vadd.f32 %v2486_v13, %v2456_v48  ;;  %v2147_v4 = vadd.f32 %v2080_v6, %v1991_v40  ;;  %v1743_v38 = vrot.slane %v4319_v30, 5  ;;  %v2799_v13 = vrot.slane %v4320_v37, 9 }
 0x23e   : > { %v1859_v50 = vadd.f32 %v1795_v39, %v3831_v49  ;;  %v1746_v40 = vrot.slane %v3834_v11, 5 }
 0x23f   : > { %v2287_v34 = vadd.f32 %v2220_v21, %v2147_v4  ;;  %v1927_v24 = vpop.f32.mrf.mxu2  ;;  %v1744_v21 = vsel %vm3412_vm7, %v2799_v13, %v1743_v38  ;;  %v2026_v4 = vrot.slane %v2024_v15, 5 }
 0x240   : > { %v1992_v1 = vadd.f32 %v1927_v24, %v1858_v5 }
 0x241   : > { %v2323_v10 = vadd.f32 %v4002_v25, %v2287_v34  ;;  %2852 = vmatmul.msk.bf16.gmra.mxu3 %vm735_vm4, %v3421_v53  ;;  %v2015_v53 = vshrl.u32 %v4071_v32, 16  ;;  %v2030_v34 = vrot.slane %v2028_v44, 4 }
 0x243   : > { %v2917_v12 = vpack.c.bf16 %v2323_v10, %v2322_v3  ;;  %v2418_v57 = vadd.f32 %v2417_v19, %v2323_v10  ;;  %v2457_v42 = vmul.f32 %v2323_v10, %v2323_v10  ;;  %v2223_v27 = vpop.f32.mrf.mxu0  ;;  %v1745_v3 = vrot.slane %v1743_v38, 4 }
 0x244   : > { %v2083_v41 = vpop.f32.mrf.mxu3  ;;  %v1798_v9 = vpop.f32.mrf.mxu1  ;;  %v2017_v6 = vrot.slane %v2015_v53, 4  ;;  %v2031_v30 = vor.u32 %v2030_v34, %v2026_v4 }
 0x245   : > { %2977 = vst [vmem:[%s4015_s24 + $0x20] sm:$0xff] %v2917_v12   ;;  %v2488_v43 = vadd.f32 %v2487_v18, %v2457_v42  ;;  %v2148_v35 = vadd.f32 %v2083_v41, %v1992_v1  ;;  %v2020_v18 = vrot.slane %v2018_v17, 5  ;;  %v1747_v5 = vsel %vm3412_vm7, %v1745_v3, %v1746_v40 }
 0x246   : > { %2870 = vmatmul.msk.bf16.gmra.mxu0 %vm735_vm4, %v3850_v46  ;;  %v1750_v12 = vunpack.c.l.b16 %v1744_v21  ;;  %v1751_v42 = vunpack.c.l.b16 %v1747_v5 }
 0x247   : > { %v2288_v55 = vadd.f32 %v2223_v27, %v2148_v35  ;;  %v1929_v33 = vpop.f32.mrf.mxu2  ;;  %2815 = vmatmul.msk.bf16.gmra.mxu1 %vm735_vm4, %v3850_v46  ;;  %v296_v46 = vld [vmem:[%s3082_s8 + $0xd4] sm:$0x1]  ;;  %v2021_v27 = vor.u32 %v2020_v18, %v2017_v6 }
 0x248   : > { %v1993_v48 = vadd.f32 %v1929_v33, %v1859_v50  ;;  %v2034_v38 = vshll.u32 %v296_v46, 16  ;;  %v2173_v33 = vrot.slane %v4074_v60, 5  ;;  %v2176_v34 = vrot.slane %v296_v46, 5 }
 0x249   : > { %v2324_v19 = vadd.f32 %v4002_v25, %v2288_v55  ;;  %v2022_v53 = vrot.slane %v2021_v27, 4 }
 0x24a   : > { %v2036_v17 = vrot.slane %v2034_v38, 5  ;;  %v2175_v18 = vrot.slane %v2173_v33, 4 }
 0x24b   : > { %v2419_v62 = vadd.f32 %v2418_v57, %v2324_v19  ;;  %v2458_v49 = vmul.f32 %v2324_v19, %v2324_v19  ;;  %v2225_v39 = vpop.f32.mrf.mxu0  ;;  %v1860_v57 = vadd.f32 %v1798_v9, %v3848_v7 }
 0x24c   : > { %v2085_v24 = vpop.f32.mrf.mxu3  ;;  %2836 = vmatmul.msk.bf16.gmra.mxu2 %vm735_vm4, %v3859_v54  ;;  %v1800_v11 = vpop.f32.mrf.mxu1  ;;  %v1752_v54 = vpack.c.b16 %v1751_v42, %v1750_v12 }
 0x24d   : > { %v2489_v10 = vadd.f32 %v2488_v43, %v2458_v49  ;;  %v2149_v1 = vadd.f32 %v2085_v24, %v1993_v48  ;;  %v2032_v43 = vrot.slane %v2031_v30, 4  ;;  %v1861_v6 = vadd.f32 %v1800_v11, %v3862_v28 }
 0x24e   : > { %v2177_v28 = vsel %vm3412_vm7, %v2175_v18, %v2176_v34 }
 0x24f   : > { %v2289_v41 = vadd.f32 %v2225_v39, %v2149_v1  ;;  %v1932_v35 = vpop.f32.mrf.mxu2  ;;  %v2037_v48 = vsel %vm3109_vm3, %v2032_v43, %v2036_v17  ;;  %v2181_v30 = vunpack.c.l.b16 %v2177_v28 }
 0x250   : > { %v1994_v13 = vadd.f32 %v1932_v35, %v1860_v57  ;;  %v2041_v24 = vunpack.c.l.b16 %v2037_v48 }
 0x251   : > { %v2325_v37 = vadd.f32 %v4002_v25, %v2289_v41  ;;  %2853 = vmatmul.msk.bf16.gmra.mxu3 %vm735_vm4, %v3866_v22  ;;  %v2027_v22 = vsel %vm3109_vm3, %v2022_v53, %v2026_v4 }
 0x252   : > { %v2040_v5 = vunpack.c.l.b16 %v2027_v22 }
 0x253   : > { %v2922_v15 = vpack.c.bf16 %v2325_v37, %v2324_v19  ;;  %v2420_v44 = vadd.f32 %v2419_v62, %v2325_v37  ;;  %v2459_v55 = vmul.f32 %v2325_v37, %v2325_v37  ;;  %v2228_v50 = vpop.f32.mrf.mxu0  ;;  %v2855_v19 = vrot.slane %v4071_v32, 9  ;;  %v2893_v62 = vld [vmem:[%s3082_s8 + $0xcc] sm:$0xff] }
 0x254   : > { %v2088_v7 = vpop.f32.mrf.mxu3  ;;  %v1803_v9 = vpop.f32.mrf.mxu1  ;;  %v2042_v42 = vpack.c.b16 %v2041_v24, %v2040_v5 }
 0x255   : > { %2978 = vst [vmem:[%s4015_s24 + $0x28] sm:$0xff] %v2922_v15   ;;  %v2490_v3 = vadd.f32 %v2489_v10, %v2459_v55  ;;  %v2150_v40 = vadd.f32 %v2088_v7, %v1994_v13  ;;  %v2174_v32 = vsel %vm3412_vm7, %v2855_v19, %v2173_v33  ;;  %v1862_v41 = vadd.f32 %v1803_v9, %v3873_v58 }
 0x256   : > { %2871 = vmatmul.msk.bf16.gmra.mxu0 %vm735_vm4, %v1752_v54  ;;  %v2180_v27 = vunpack.c.l.b16 %v2174_v32 }
 0x257   : > { %v2290_v21 = vadd.f32 %v2228_v50, %v2150_v40  ;;  %v1934_v60 = vpop.f32.mrf.mxu2  ;;  %2816 = vmatmul.msk.bf16.gmra.mxu1 %vm735_vm4, %v1752_v54 }
 0x258   : > { %v1995_v39 = vadd.f32 %v1934_v60, %v1861_v6  ;;  %v2182_v37 = vpack.c.b16 %v2181_v30, %v2180_v27 }
 0x259   : > { %v2326_v49 = vadd.f32 %v4002_v25, %v2290_v21 }
 0x25b   : > { %v2421_v4 = vadd.f32 %v2420_v44, %v2326_v49  ;;  %v2460_v10 = vmul.f32 %v2326_v49, %v2326_v49  ;;  %v2230_v36 = vpop.f32.mrf.mxu0 }
 0x25c   : > { %v2090_v11 = vpop.f32.mrf.mxu3  ;;  %2837 = vmatmul.msk.bf16.gmra.mxu2 %vm735_vm4, %v2893_v62  ;;  %v1805_v1 = vpop.f32.mrf.mxu1 }
 0x25d   : > { %v2491_v46 = vadd.f32 %v2490_v3, %v2460_v10  ;;  %v2151_v12 = vadd.f32 %v2090_v11, %v1995_v39  ;;  %v1863_v58 = vadd.f32 %v1805_v1, %v3878_v31 }
 0x25f   : > { %v2291_v38 = vadd.f32 %v2230_v36, %v2151_v12  ;;  %v1937_v57 = vpop.f32.mrf.mxu2 }
 0x260   : > { %v1996_v14 = vadd.f32 %v1937_v57, %v1862_v41 }
 0x261   : > { %v2327_v35 = vadd.f32 %v4002_v25, %v2291_v38  ;;  %2854 = vmatmul.msk.bf16.gmra.mxu3 %vm735_vm4, %v2042_v42 }
 0x263   : > { %v2927_v13 = vpack.c.bf16 %v2327_v35, %v2326_v49  ;;  %v2422_v54 = vadd.f32 %v2421_v4, %v2327_v35  ;;  %v2461_v53 = vmul.f32 %v2327_v35, %v2327_v35  ;;  %v2233_v43 = vpop.f32.mrf.mxu0 }
 0x264   : > { %v2093_v17 = vpop.f32.mrf.mxu3  ;;  %v1808_v15 = vpop.f32.mrf.mxu1 }
 0x265   : > { %2979 = vst [vmem:[%s4015_s24 + $0x30] sm:$0xff] %v2927_v13   ;;  %v2492_v44 = vadd.f32 %v2491_v46, %v2461_v53  ;;  %v2152_v55 = vadd.f32 %v2093_v17, %v1996_v14  ;;  %v1864_v18 = vadd.f32 %v1808_v15, %v3887_v16 }
 0x266   : > { %2872 = vmatmul.msk.bf16.gmra.mxu0 %vm735_vm4, %v2182_v37 }
 0x267   : > { %v2292_v50 = vadd.f32 %v2233_v43, %v2152_v55  ;;  %v1939_v33 = vpop.f32.mrf.mxu2 }
 0x268   : > { %v1997_v9 = vadd.f32 %v1939_v33, %v1863_v58 }
 0x269   : > { %v2328_v7 = vadd.f32 %v4002_v25, %v2292_v50 }
 0x26b   : > { %v2423_v3 = vadd.f32 %v2422_v54, %v2328_v7  ;;  %v2462_v40 = vmul.f32 %v2328_v7, %v2328_v7  ;;  %v2235_v22 = vpop.f32.mrf.mxu0 }
 0x26c   : > { %v2095_v48 = vpop.f32.mrf.mxu3  ;;  %v1810_v19 = vpop.f32.mrf.mxu1 }
 0x26d   : > { %v2493_v21 = vadd.f32 %v2492_v44, %v2462_v40  ;;  %v2153_v6 = vadd.f32 %v2095_v48, %v1997_v9  ;;  %v1865_v11 = vadd.f32 %v1810_v19, %v3892_v26 }
 0x26f   : > { %v2293_v60 = vadd.f32 %v2235_v22, %v2153_v6  ;;  %v1942_v34 = vpop.f32.mrf.mxu2 }
 0x270   : > { %v1998_v49 = vadd.f32 %v1942_v34, %v1864_v18 }
 0x271   : > { %v2329_v62 = vadd.f32 %v4002_v25, %v2293_v60 }
 0x273   : > { %v2932_v31 = vpack.c.bf16 %v2329_v62, %v2328_v7  ;;  %v2424_v39 = vadd.f32 %v2423_v3, %v2329_v62  ;;  %v2463_v5 = vmul.f32 %v2329_v62, %v2329_v62  ;;  %v2238_v24 = vpop.f32.mrf.mxu0 }
 0x274   : > { %v2098_v4 = vpop.f32.mrf.mxu3  ;;  %v1813_v10 = vpop.f32.mrf.mxu1 }
 0x275   : > { %2980 = vst [vmem:[%s4015_s24 + $0x38] sm:$0xff] %v2932_v31   ;;  %v2494_v36 = vadd.f32 %v2493_v21, %v2463_v5  ;;  %v2154_v32 = vadd.f32 %v2098_v4, %v1998_v49  ;;  %v1866_v14 = vadd.f32 %v1813_v10, %v3901_v59 }
 0x277   : > { %v2294_v28 = vadd.f32 %v2238_v24, %v2154_v32  ;;  %v1944_v1 = vpop.f32.mrf.mxu2 }
 0x278   : > { %v1999_v16 = vadd.f32 %v1944_v1, %v1865_v11 }
 0x279   : > { %v2330_v46 = vadd.f32 %v4002_v25, %v2294_v28 }
 0x27b   : > { %v2425_v12 = vadd.f32 %v2424_v39, %v2330_v46  ;;  %v2464_v42 = vmul.f32 %v2330_v46, %v2330_v46  ;;  %v2240_v27 = vpop.f32.mrf.mxu0 }
 0x27c   : > { %v2100_v30 = vpop.f32.mrf.mxu3  ;;  %v1815_v38 = vpop.f32.mrf.mxu1 }
 0x27d   : > { %v2495_v41 = vadd.f32 %v2494_v36, %v2464_v42  ;;  %v2155_v57 = vadd.f32 %v2100_v30, %v1999_v16  ;;  %v1867_v33 = vadd.f32 %v1815_v38, %v3906_v47 }
 0x27f   : > { %v2295_v35 = vadd.f32 %v2240_v27, %v2155_v57  ;;  %v1947_v37 = vpop.f32.mrf.mxu2 }
 0x280   : > { %v2000_v54 = vadd.f32 %v1947_v37, %v1866_v14 }
 0x281   : > { %v2331_v13 = vadd.f32 %v4002_v25, %v2295_v35 }
 0x283   : > { %v2937_v26 = vpack.c.bf16 %v2331_v13, %v2330_v46  ;;  %v2426_v53 = vadd.f32 %v2425_v12, %v2331_v13  ;;  %v2465_v43 = vmul.f32 %v2331_v13, %v2331_v13  ;;  %v2243_v17 = vpop.f32.mrf.mxu0 }
 0x284   : > { %v2103_v15 = vpop.f32.mrf.mxu3  ;;  %v1818_v44 = vpop.f32.mrf.mxu1 }
 0x285   : > { %2981 = vst [vmem:[%s4015_s24 + $0x40] sm:$0xff] %v2937_v26   ;;  %v2496_v55 = vadd.f32 %v2495_v41, %v2465_v43  ;;  %v2156_v50 = vadd.f32 %v2103_v15, %v2000_v54  ;;  %v1868_v18 = vadd.f32 %v1818_v44, %v3915_v23 }
 0x287   : > { %v2296_v58 = vadd.f32 %v2243_v17, %v2156_v50  ;;  %v1949_v7 = vpop.f32.mrf.mxu2 }
 0x288   : > { %v2001_v59 = vadd.f32 %v1949_v7, %v1867_v33 }
 0x289   : > { %v2332_v9 = vadd.f32 %v4002_v25, %v2296_v58 }
 0x28b   : > { %v2427_v3 = vadd.f32 %v2426_v53, %v2332_v9  ;;  %v2466_v40 = vmul.f32 %v2332_v9, %v2332_v9  ;;  %v2245_v22 = vpop.f32.mrf.mxu0 }
 0x28c   : > { %v2105_v48 = vpop.f32.mrf.mxu3  ;;  %v1820_v19 = vpop.f32.mrf.mxu1 }
 0x28d   : > { %v2497_v21 = vadd.f32 %v2496_v55, %v2466_v40  ;;  %v2157_v6 = vadd.f32 %v2105_v48, %v2001_v59  ;;  %v1869_v28 = vadd.f32 %v1820_v19, %v3920_v61 }
 0x28f   : > { %v2297_v60 = vadd.f32 %v2245_v22, %v2157_v6  ;;  %v1952_v34 = vpop.f32.mrf.mxu2 }
 0x290   : > { %v2002_v49 = vadd.f32 %v1952_v34, %v1868_v18 }
 0x291   : > { %v2333_v62 = vadd.f32 %v4002_v25, %v2297_v60 }
 0x293   : > { %v2942_v47 = vpack.c.bf16 %v2333_v62, %v2332_v9  ;;  %v2428_v31 = vadd.f32 %v2427_v3, %v2333_v62  ;;  %v2467_v39 = vmul.f32 %v2333_v62, %v2333_v62  ;;  %v2248_v5 = vpop.f32.mrf.mxu0 }
 0x294   : > { %v2108_v24 = vpop.f32.mrf.mxu3  ;;  %v1823_v4 = vpop.f32.mrf.mxu1 }
 0x295   : > { %2982 = vst [vmem:[%s4015_s24 + $0x48] sm:$0xff] %v2942_v47   ;;  %v2498_v10 = vadd.f32 %v2497_v21, %v2467_v39  ;;  %v2158_v36 = vadd.f32 %v2108_v24, %v2002_v49  ;;  %v1870_v57 = vadd.f32 %v1823_v4, %v3929_v56 }
 0x297   : > { %v2298_v32 = vadd.f32 %v2248_v5, %v2158_v36  ;;  %v1954_v11 = vpop.f32.mrf.mxu2 }
 0x298   : > { %v2003_v23 = vadd.f32 %v1954_v11, %v1869_v28 }
 0x299   : > { %v2334_v1 = vadd.f32 %v4002_v25, %v2298_v32 }
 0x29b   : > { %v2429_v46 = vadd.f32 %v2428_v31, %v2334_v1  ;;  %v2468_v16 = vmul.f32 %v2334_v1, %v2334_v1  ;;  %v2250_v12 = vpop.f32.mrf.mxu0 }
 0x29c   : > { %v2110_v42 = vpop.f32.mrf.mxu3  ;;  %v1825_v27 = vpop.f32.mrf.mxu1 }
 0x29d   : > { %v2499_v30 = vadd.f32 %v2498_v10, %v2468_v16  ;;  %v2159_v38 = vadd.f32 %v2110_v42, %v2003_v23  ;;  %v1871_v55 = vadd.f32 %v1825_v27, %v3934_v0 }
 0x29f   : > { %v2299_v41 = vadd.f32 %v2250_v12, %v2159_v38  ;;  %v1957_v35 = vpop.f32.mrf.mxu2 }
 0x2a0   : > { %v2004_v37 = vadd.f32 %v1957_v35, %v1870_v57 }
 0x2a1   : > { %v2335_v14 = vadd.f32 %v4002_v25, %v2299_v41 }
 0x2a3   : > { %v2947_v61 = vpack.c.bf16 %v2335_v14, %v2334_v1  ;;  %v2430_v13 = vadd.f32 %v2429_v46, %v2335_v14  ;;  %v2469_v54 = vmul.f32 %v2335_v14, %v2335_v14  ;;  %v2253_v26 = vpop.f32.mrf.mxu0 }
 0x2a4   : > { %v2113_v53 = vpop.f32.mrf.mxu3  ;;  %v1828_v43 = vpop.f32.mrf.mxu1 }
 0x2a5   : > { %2983 = vst [vmem:[%s4015_s24 + $0x50] sm:$0xff] %v2947_v61   ;;  %v2500_v17 = vadd.f32 %v2499_v30, %v2469_v54  ;;  %v2160_v15 = vadd.f32 %v2113_v53, %v2004_v37  ;;  %v1872_v19 = vadd.f32 %v1828_v43, %v3943_v29 }
 0x2a7   : > { %v2300_v44 = vadd.f32 %v2253_v26, %v2160_v15  ;;  %v1959_v50 = vpop.f32.mrf.mxu2 }
 0x2a8   : > { %v2005_v56 = vadd.f32 %v1959_v50, %v1871_v55 }
 0x2a9   : > { %v2336_v58 = vadd.f32 %v4002_v25, %v2300_v44 }
 0x2ab   : > { %v2431_v33 = vadd.f32 %v2430_v13, %v2336_v58  ;;  %v2470_v7 = vmul.f32 %v2336_v58, %v2336_v58  ;;  %v2255_v9 = vpop.f32.mrf.mxu0 }
 0x2ac   : > { %v2115_v59 = vpop.f32.mrf.mxu3  ;;  %v1830_v3 = vpop.f32.mrf.mxu1 }
 0x2ad   : > { %v2501_v40 = vadd.f32 %v2500_v17, %v2470_v7  ;;  %v2161_v22 = vadd.f32 %v2115_v59, %v2005_v56  ;;  %v1873_v24 = vadd.f32 %v1830_v3, %v3948_v52 }
 0x2af   : > { %v2301_v48 = vadd.f32 %v2255_v9, %v2161_v22  ;;  %v1962_v21 = vpop.f32.mrf.mxu2 }
 0x2b0   : > { %v2006_v60 = vadd.f32 %v1962_v21, %v1872_v19 }
 0x2b1   : > { %v2337_v6 = vadd.f32 %v4002_v25, %v2301_v48 }
 0x2b3   : > { %v2952_v0 = vpack.c.bf16 %v2337_v6, %v2336_v58  ;;  %v2432_v18 = vadd.f32 %v2431_v33, %v2337_v6  ;;  %v2471_v34 = vmul.f32 %v2337_v6, %v2337_v6  ;;  %v2258_v62 = vpop.f32.mrf.mxu0 }
 0x2b4   : > { %v2118_v49 = vpop.f32.mrf.mxu3  ;;  %v1833_v47 = vpop.f32.mrf.mxu1 }
 0x2b5   : > { %2984 = vst [vmem:[%s4015_s24 + $0x58] sm:$0xff] %v2952_v0   ;;  %v2502_v31 = vadd.f32 %v2501_v40, %v2471_v34  ;;  %v2162_v39 = vadd.f32 %v2118_v49, %v2006_v60  ;;  %v1874_v12 = vadd.f32 %v1833_v47, %v3957_v20 }
 0x2b7   : > { %v2302_v5 = vadd.f32 %v2258_v62, %v2162_v39  ;;  %v1964_v4 = vpop.f32.mrf.mxu2 }
 0x2b8   : > { %v2007_v29 = vadd.f32 %v1964_v4, %v1873_v24 }
 0x2b9   : > { %v2338_v10 = vadd.f32 %v4002_v25, %v2302_v5 }
 0x2bb   : > { %v2433_v36 = vadd.f32 %v2432_v18, %v2338_v10  ;;  %v2472_v32 = vmul.f32 %v2338_v10, %v2338_v10  ;;  %v2260_v28 = vpop.f32.mrf.mxu0 }
 0x2bc   : > { %v2120_v11 = vpop.f32.mrf.mxu3  ;;  %v1835_v1 = vpop.f32.mrf.mxu1 }
 0x2bd   : > { %v2503_v23 = vadd.f32 %v2502_v31, %v2472_v32  ;;  %v2163_v46 = vadd.f32 %v2120_v11, %v2007_v29  ;;  %v1875_v54 = vadd.f32 %v1835_v1, %v3962_v8 }
 0x2bf   : > { %v2303_v16 = vadd.f32 %v2260_v28, %v2163_v46  ;;  %v1967_v42 = vpop.f32.mrf.mxu2 }
 0x2c0   : > { %v2008_v30 = vadd.f32 %v1967_v42, %v1874_v12 }
 0x2c1   : > { %v2339_v27 = vadd.f32 %v4002_v25, %v2303_v16 }
 0x2c3   : > { %v2957_v52 = vpack.c.bf16 %v2339_v27, %v2338_v10  ;;  %v2434_v38 = vadd.f32 %v2433_v36, %v2339_v27  ;;  %v2473_v41 = vmul.f32 %v2339_v27, %v2339_v27  ;;  %v2263_v57 = vpop.f32.mrf.mxu0 }
 0x2c4   : > { %v2123_v35 = vpop.f32.mrf.mxu3  ;;  %v1838_v61 = vpop.f32.mrf.mxu1 }
 0x2c5   : > { %2985 = vst [vmem:[%s4015_s24 + $0x60] sm:$0xff] %v2957_v52   ;;  %v2504_v14 = vadd.f32 %v2503_v23, %v2473_v41  ;;  %v2164_v37 = vadd.f32 %v2123_v35, %v2008_v30  ;;  %v1876_v56 = vadd.f32 %v1838_v61, %v3971_v51 }
 0x2c7   : > { %v2304_v13 = vadd.f32 %v2263_v57, %v2164_v37  ;;  %v1969_v26 = vpop.f32.mrf.mxu2 }
 0x2c8   : > { %v2009_v20 = vadd.f32 %v1969_v26, %v1875_v54 }
 0x2c9   : > { %v2340_v53 = vadd.f32 %v4002_v25, %v2304_v13 }
 0x2cb   : > { %v2435_v43 = vadd.f32 %v2434_v38, %v2340_v53  ;;  %v2474_v17 = vmul.f32 %v2340_v53, %v2340_v53  ;;  %v2265_v15 = vpop.f32.mrf.mxu0 }
 0x2cc   : > { %v2125_v44 = vpop.f32.mrf.mxu3  ;;  %v1840_v7 = vpop.f32.mrf.mxu1 }
 0x2cd   : > { %v2505_v55 = vadd.f32 %v2504_v14, %v2474_v17  ;;  %v2165_v50 = vadd.f32 %v2125_v44, %v2009_v20  ;;  %v1877_v60 = vadd.f32 %v1840_v7, %v3976_v63 }
 0x2cf   : > { %v2305_v58 = vadd.f32 %v2265_v15, %v2165_v50  ;;  %v1972_v33 = vpop.f32.mrf.mxu2 }
 0x2d0   : > { %v2010_v59 = vadd.f32 %v1972_v33, %v1876_v56 }
 0x2d1   : > { %v2341_v9 = vadd.f32 %v4002_v25, %v2305_v58 }
 0x2d3   : > { %v2962_v8 = vpack.c.bf16 %v2341_v9, %v2340_v53  ;;  %v2436_v3 = vadd.f32 %v2435_v43, %v2341_v9  ;;  %v2475_v40 = vmul.f32 %v2341_v9, %v2341_v9  ;;  %v2268_v22 = vpop.f32.mrf.mxu0 }
 0x2d4   : > { %v2128_v48 = vpop.f32.mrf.mxu3  ;;  %v1843_v34 = vpop.f32.mrf.mxu1 }
 0x2d5   : > { %2986 = vst [vmem:[%s4015_s24 + $0x68] sm:$0xff] %v2962_v8   ;;  %v2506_v19 = vadd.f32 %v2505_v55, %v2475_v40  ;;  %v2166_v21 = vadd.f32 %v2128_v48, %v2010_v59  ;;  %v1878_v4 = vadd.f32 %v1843_v34, %v3985_v2 }
 0x2d7   : > { %v2306_v6 = vadd.f32 %v2268_v22, %v2166_v21  ;;  %v1974_v0 = vpop.f32.mrf.mxu2 }
 0x2d8   : > { %v2011_v51 = vadd.f32 %v1974_v0, %v1877_v60 }
 0x2d9   : > { %v2342_v18 = vadd.f32 %v4002_v25, %v2306_v6 }
 0x2db   : > { %v2437_v62 = vadd.f32 %v2436_v3, %v2342_v18  ;;  %v2476_v49 = vmul.f32 %v2342_v18, %v2342_v18  ;;  %v2270_v47 = vpop.f32.mrf.mxu0 }
 0x2dc   : > { %v2130_v31 = vpop.f32.mrf.mxu3  ;;  %v1845_v11 = vpop.f32.mrf.mxu1 }
 0x2dd   : > { %v2507_v39 = vadd.f32 %v2506_v19, %v2476_v49  ;;  %v2167_v5 = vadd.f32 %v2130_v31, %v2011_v51  ;;  %v1879_v42 = vadd.f32 %v1845_v11, %v3989_v45 }
 0x2df   : > { %v2307_v24 = vadd.f32 %v2270_v47, %v2167_v5  ;;  %v1977_v10 = vpop.f32.mrf.mxu2 }
 0x2e0   : > { %v2012_v36 = vadd.f32 %v1977_v10, %v1878_v4 }
 0x2e1   : > { %v2343_v29 = vadd.f32 %v4002_v25, %v2307_v24 }
 0x2e3   : > { %v2967_v63 = vpack.c.bf16 %v2343_v29, %v2342_v18  ;;  %v2438_v32 = vadd.f32 %v2437_v62, %v2343_v29  ;;  %v2477_v28 = vmul.f32 %v2343_v29, %v2343_v29  ;;  %v2273_v1 = vpop.f32.mrf.mxu0 }
 0x2e4   : > { %v2133_v23 = vpop.f32.mrf.mxu3 }
 0x2e5   : > { %2987 = vst [vmem:[%s4015_s24 + $0x70] sm:$0xff] %v2967_v63   ;;  %v2508_v46 = vadd.f32 %v2507_v39, %v2477_v28  ;;  %v2168_v16 = vadd.f32 %v2133_v23, %v2012_v36 }
 0x2e7   : > { %v2308_v12 = vadd.f32 %v2273_v1, %v2168_v16  ;;  %v1979_v27 = vpop.f32.mrf.mxu2 }
 0x2e8   : > { %v2013_v30 = vadd.f32 %v1979_v27, %v1879_v42 }
 0x2e9   : > { %v2344_v2 = vadd.f32 %v4002_v25, %v2308_v12 }
 0x2eb   : > { %v2439_v52 = vadd.f32 %v2438_v32, %v2344_v2  ;;  %v2478_v38 = vmul.f32 %v2344_v2, %v2344_v2  ;;  %v2275_v14 = vpop.f32.mrf.mxu0 }
 0x2ec   : > { %v2135_v41 = vpop.f32.mrf.mxu3 }
 0x2ed   : > { %v2509_v57 = vadd.f32 %v2508_v46, %v2478_v38  ;;  %v2169_v35 = vadd.f32 %v2135_v41, %v2013_v30 }
 0x2ef   : > { %v2309_v37 = vadd.f32 %v2275_v14, %v2169_v35 }
 0x2f1   : > { %v2345_v61 = vadd.f32 %v4002_v25, %v2309_v37 }
 0x2f3   : > { %v2972_v13 = vpack.c.bf16 %v2345_v61, %v2344_v2  ;;  %v2440_v54 = vadd.f32 %v2439_v52, %v2345_v61  ;;  %v2479_v26 = vmul.f32 %v2345_v61, %v2345_v61 }
 0x2f5   : > { %2988 = vst [vmem:[%s4015_s24 + $0x78] sm:$0xff] %v2972_v13   ;;  %v2441_v45 = vrot.slane %v2440_v54, 4  ;;  %v2510_v53 = vadd.f32 %v2509_v57, %v2479_v26 }
 0x2f7   : > { %v2442_v20 = vadd.f32 %v2441_v45, %v2440_v54  ;;  %v2511_v43 = vrot.slane %v2510_v53, 4 }
 0x2f9   : > { %v2443_v17 = vrot.slane %v2442_v20, 2  ;;  %v2512_v15 = vadd.f32 %v2511_v43, %v2510_v53 }
 0x2fb   : > { %v2444_v44 = vadd.f32 %v2443_v17, %v2442_v20  ;;  %v2513_v55 = vrot.slane %v2512_v15, 2 }
 0x2fd   : > { %v2445_v50 = vrot.slane %v2444_v44, 1  ;;  %v2514_v58 = vadd.f32 %v2513_v55, %v2512_v15 }
 0x2ff   : > { %v2446_v25 = vadd.f32 %v2445_v50, %v2444_v44  ;;  %v2515_v56 = vrot.slane %v2514_v58, 1 }
 0x301   : > { %2447 = vst [vmem:[%s238_s27] sm:$0x1] %v2446_v25  ;;  %v2516_v33 = vadd.f32 %v2515_v56, %v2514_v58 }
 0x303   : > { %2517 = vst [vmem:[%s241_s30] sm:$0x1] %v2516_v33 }
 0x304 PF: > { %s16_s18 = sadd.s32 1, %s3016_s18  }
 0x305   : > { %p13_p4 = scmp.ge.s32.totalorder %s16_s18, 4  }
 0x307   :  { %15 = sbr.rel (!%p13_p4) target bundleno = 1 (0x1), region = 94 }

// kernel: double_conv.4
= control target key start
LH: loop header
LB: loop body
LE: loop exit
PB: predicated region body
PF: predicated region fallthrough
CT: control target
= control target key end

     0   :  { %s4936_s24 = smov 0   ;;  %s5913_s0 = inlined_call_operand.vmem [shape: bf16[2,16,16,128], index: 0, kind: input, shape index: {}]   ;;  %s5914_s1 = inlined_call_operand.vmem [shape: f32[1,128], index: 1, kind: input, shape index: {}]   ;;  %s5915_s2 = inlined_call_operand.vmem [shape: f32[1,128], index: 2, kind: input, shape index: {}]   ;;  %s5916_s3 = inlined_call_operand.vmem [shape: bf16[9,128,128], index: 3, kind: input, shape index: {}]   ;;  %s5917_s4 = inlined_call_operand.vmem [shape: f32[1,128], index: 4, kind: input, shape index: {}]   ;;  %s5918_s5 = inlined_call_operand.vmem [shape: bf16[2,16,16,128], index: 5, kind: output, shape index: {0}]   ;;  %s5919_s6 = inlined_call_operand.vmem [shape: f32[2,1,128], index: 6, kind: output, shape index: {1}]   ;;  %s5920_s7 = inlined_call_operand.vmem [shape: f32[2,1,128], index: 7, kind: output, shape index: {2}]  }
   0x1 LB: > { %s4074_s25 = sadd.s32 4294967295, %s4893_s24   ;;  %p4078_p0 = scmp.ge.s32.totalorder %s4893_s24, 1  ;;  %s4893_s24 = sphi %s4936_s24, %s18_s24  }
   0x2   : > { %p242_p1 = scmp.lt.s32.totalorder %s4893_s24, 3 }
   0x4   : > { %p243_p2 = pnand %p4078_p0, %p242_p1 }
   0x5   : > { %p280_p3 = scmp.lt.s32.totalorder (!%p243_p2), %s4074_s25, 1 }
   0x6   : > { %246 = sbr.rel (%p243_p2) target bundleno = 785 (0x311), region = 40 }
   0xb   : > { %v4550_v0 = vld [vmem:[%s5916_s3 + $0x78] sm:$0xff]  ;;  %v4895_v1 = vmov 0.0   ;;  %v4549_v2 = vld [vmem:[%s5916_s3 + $0x70] sm:$0xff]  ;;  %s5922_s25 = smov (!%p280_p3, %s4074_s25), 1  ;;  %v4548_v3 = vld [vmem:[%s5916_s3 + $0x68] sm:$0xff] }
   0xc   : > { %636 = vst [vmem:[#allocation2 + $0x60] sm:$0xff] %v4895_v1  ;;  %4781 = vmatpush.bf16.msra.mxu1 %v4550_v0  ;;  %4782 = vmatpush.bf16.msra.mxu2 %v4550_v0  ;;  %s4533_s30 = sshll.u32 %s5922_s25, 7  ;;  %v4969_v4 = vld [vmem:[%s5914_s1] ss:$0 sm:$0xff]  ;;  %v4546_v35 = vld [vmem:[%s5916_s3 + $0x58] sm:$0xff]  ;;  %v4545_v50 = vld [vmem:[%s5916_s3 + $0x50] sm:$0xff]  ;;  %s292_s16 = scalar_lea.vmem %s5919_s6, %s5922_s25 }
   0xd   : > { %637 = vst [vmem:[#allocation2 + $0x68] sm:$0xff] %v4895_v1  ;;  %4783 = vmatpush.bf16.msra.mxu3 %v4550_v0  ;;  %1016 = vmatpush.bf16.msra.mxu0 %v4550_v0  ;;  %s4964_s12 = scalar_lea.vmem %s5913_s0, %s4533_s30  ;;  %v4979_v10 = vld [vmem:[%s5915_s2] ss:$0 sm:$0xff]  ;;  %v4544_v62 = vld [vmem:[%s5916_s3 + $0x48] sm:$0xff]  ;;  %s5826_s11 = scalar_lea.vmem %s5918_s5, %s4533_s30 }
   0xe   : > { %638 = vst [vmem:[#allocation2 + $0x70] sm:$0x3] %v4895_v1  ;;  %v4753_v5 = vld [vmem:[%s4964_s12 + $0x18] sm:$0xff]   ;;  %v4754_v13 = vld [vmem:[%s4964_s12 + $0x20] sm:$0xff]   ;;  %s295_s19 = scalar_lea.vmem %s5920_s7, %s5922_s25 }
   0xf   : > { %624 = vst [vmem:[#allocation2] sm:$0xff] %v4895_v1  ;;  %v4757_v6 = vld [vmem:[%s4964_s12 + $0x38] sm:$0xff]   ;;  %v4621_v8 = vunpack.c.l.bf16 %v4753_v5  ;;  %v4622_v9 = vunpack.c.h.bf16 %v4753_v5  ;;  %v4625_v16 = vunpack.c.l.bf16 %v4754_v13  ;;  %v4626_v17 = vunpack.c.h.bf16 %v4754_v13  ;;  %v4547_v22 = vld [vmem:[%s5916_s3 + $0x60] sm:$0xff] }
  0x10   : > { %4784 = vmatpush.bf16.msra.mxu1 %v4549_v2  ;;  %4785 = vmatpush.bf16.msra.mxu2 %v4549_v2  ;;  %625 = vst [vmem:[#allocation2 + $0x8] sm:$0xff] %v4895_v1  ;;  %v4761_v7 = vld [vmem:[%s4964_s12 + $0x58] sm:$0xff]   ;;  %v4637_v11 = vunpack.c.l.bf16 %v4757_v6  ;;  %v4638_v12 = vunpack.c.h.bf16 %v4757_v6  ;;  %v4758_v39 = vld [vmem:[%s4964_s12 + $0x40] sm:$0xff]  }
  0x11   : > { %4786 = vmatpush.bf16.msra.mxu3 %v4549_v2  ;;  %1017 = vmatpush.bf16.msra.mxu0 %v4549_v2  ;;  %626 = vst [vmem:[#allocation2 + $0x10] sm:$0x3] %v4895_v1  ;;  %v4653_v14 = vunpack.c.l.bf16 %v4761_v7  ;;  %v4654_v15 = vunpack.c.h.bf16 %v4761_v7  ;;  %v370_v18 = vmul.f32 %v4969_v4, %v4621_v8  ;;  %v371_v19 = vmul.f32 %v4969_v4, %v4622_v9  ;;  %v4762_v52 = vld [vmem:[%s4964_s12 + $0x60] sm:$0xff]  }
  0x12   : > { %627 = vst [vmem:[#allocation2 + $0x18] sm:$0xff] %v4895_v1  ;;  %v378_v20 = vmul.f32 %v4969_v4, %v4637_v11  ;;  %v379_v21 = vmul.f32 %v4969_v4, %v4638_v12  ;;  %v372_v30 = vmul.f32 %v4969_v4, %v4625_v16  ;;  %v373_v34 = vmul.f32 %v4969_v4, %v4626_v17  ;;  %v5070_v8 = vld [vmem:[%s4964_s12] sm:$0xff]  }
  0x13   : > { %628 = vst [vmem:[#allocation2 + $0x20] sm:$0xff] %v4895_v1  ;;  %v386_v23 = vmul.f32 %v4969_v4, %v4653_v14  ;;  %v387_v24 = vmul.f32 %v4969_v4, %v4654_v15  ;;  %v4996_v25 = vadd.f32 %v4979_v10, %v370_v18  ;;  %v4999_v26 = vadd.f32 %v4979_v10, %v371_v19  ;;  %v4543_v18 = vld [vmem:[%s5916_s3 + $0x40] sm:$0xff] }
  0x14   : > { %4787 = vmatpush.bf16.msra.mxu1 %v4548_v3  ;;  %4788 = vmatpush.bf16.msra.mxu2 %v4548_v3  ;;  %629 = vst [vmem:[#allocation2 + $0x28] sm:$0x3] %v4895_v1  ;;  %v5003_v27 = vadd.f32 %v4979_v10, %v378_v20  ;;  %v5007_v28 = vadd.f32 %v4979_v10, %v379_v21  ;;  %v4641_v55 = vunpack.c.l.bf16 %v4758_v39  ;;  %v4642_v60 = vunpack.c.h.bf16 %v4758_v39 }
  0x15   : > { %4789 = vmatpush.bf16.msra.mxu3 %v4548_v3  ;;  %1018 = vmatpush.bf16.msra.mxu0 %v4548_v3  ;;  %630 = vst [vmem:[#allocation2 + $0x30] sm:$0xff] %v4895_v1  ;;  %v5010_v29 = vadd.f32 %v4979_v10, %v386_v23  ;;  %v470_v31 = vmin.f32 %v4996_v25, 0.0  ;;  %v471_v32 = vmin.f32 %v4999_v26, 0.0  ;;  %v5017_v33 = vadd.f32 %v4979_v10, %v387_v24 }
  0x16   : > { %631 = vst [vmem:[#allocation2 + $0x38] sm:$0xff] %v4895_v1  ;;  %v478_v36 = vmin.f32 %v5003_v27, 0.0  ;;  %v479_v37 = vmin.f32 %v5007_v28, 0.0  ;;  %vm438_vm0 = vcmp.gt.f32.partialorder %v4996_v25, 0.0  ;;  %vm439_vm1 = vcmp.gt.f32.partialorder %v4999_v26, 0.0 }
  0x17   : > { %632 = vst [vmem:[#allocation2 + $0x40] sm:$0x3] %v4895_v1  ;;  %v791_v38 = vld [vmem:[#allocation2 + $0x1] sm:$0xff]  ;;  %v508_v40 = vmul.f32 1.442695, %v470_v31  ;;  %v5032_v45 = vadd.f32 %v4979_v10, %v372_v30  ;;  %v486_v46 = vmin.f32 %v5010_v29, 0.0  ;;  %v5038_v49 = vadd.f32 %v4979_v10, %v373_v34 }
  0x18   : > { %4790 = vmatpush.bf16.msra.mxu1 %v4547_v22  ;;  %4791 = vmatpush.bf16.msra.mxu2 %v4547_v22  ;;  %633 = vst [vmem:[#allocation2 + $0x48] sm:$0xff] %v4895_v1  ;;  %v510_v41 = vmul.f32 1.442695, %v471_v32  ;;  %v524_v42 = vmul.f32 1.442695, %v478_v36  ;;  %v823_v44 = vpack.c.bf16 %v791_v38, %v791_v38  ;;  %v487_v47 = vmin.f32 %v5017_v33, 0.0 }
  0x19   : > { %4792 = vmatpush.bf16.msra.mxu3 %v4547_v22  ;;  %1019 = vmatpush.bf16.msra.mxu0 %v4547_v22  ;;  %634 = vst [vmem:[#allocation2 + $0x50] sm:$0xff] %v4895_v1  ;;  %v526_v43 = vmul.f32 1.442695, %v479_v37  ;;  %4817 = vpow2.f32 %v508_v40  ;;  %v792_v48 = vld [vmem:[#allocation2 + $0x9] sm:$0xff]  ;;  %vm446_vm2 = vcmp.gt.f32.partialorder %v5003_v27, 0.0  ;;  %vm447_vm3 = vcmp.gt.f32.partialorder %v5007_v28, 0.0 }
  0x1a   : > { %635 = vst [vmem:[#allocation2 + $0x58] sm:$0x3] %v4895_v1  ;;  %4819 = vpow2.f32 %v510_v41  ;;  %v824_v51 = vpack.c.bf16 %v792_v48, %v792_v48  ;;  %vm454_vm4 = vcmp.gt.f32.partialorder %v5010_v29, 0.0  ;;  %v540_v53 = vmul.f32 1.442695, %v486_v46  ;;  %v4566_v41 = vld [vmem:[%s5916_s3 + $0xf8] sm:$0xff] }
  0x1b   : > { %639 = vst [vmem:[#allocation2 + $0x78] sm:$0xff] %v4895_v1  ;;  %4821 = vpow2.f32 %v524_v42  ;;  %v542_v54 = vmul.f32 1.442695, %v487_v47  ;;  %vm455_vm5 = vcmp.gt.f32.partialorder %v5017_v33, 0.0  ;;  %v5051_v56 = vunpack.c.l.b16 %v823_v44  ;;  %v4542_v42 = vld [vmem:[%s5916_s3 + $0x38] sm:$0xff] }
  0x1c   : > { %4793 = vmatpush.bf16.msra.mxu1 %v4546_v35  ;;  %4794 = vmatpush.bf16.msra.mxu2 %v4546_v35  ;;  %640 = vst [vmem:[#allocation2 + $0x80] sm:$0xff] %v4895_v1  ;;  %4823 = vpow2.f32 %v526_v43  ;;  %v5053_v57 = vunpack.c.l.b16 %v824_v51  ;;  %v472_v58 = vmin.f32 %v5032_v45, 0.0  ;;  %v473_v59 = vmin.f32 %v5038_v49, 0.0  ;;  %v4574_v47 = vld [vmem:[%s5916_s3 + $0x138] sm:$0xff] }
  0x1d   : > { %4795 = vmatpush.bf16.msra.mxu3 %v4546_v35  ;;  %1020 = vmatpush.bf16.msra.mxu0 %v4546_v35  ;;  %641 = vst [vmem:[#allocation2 + $0x88] sm:$0x3] %v4895_v1  ;;  %4825 = vpow2.f32 %v540_v53  ;;  %v380_v61 = vmul.f32 %v4969_v4, %v4641_v55  ;;  %vm440_vm6 = vcmp.gt.f32.partialorder %v5032_v45, 0.0  ;;  %v4657_v0 = vunpack.c.l.bf16 %v4762_v52 }
  0x1e   : > { %642 = vst [vmem:[#allocation2 + $0x90] sm:$0xff] %v4895_v1  ;;  %4827 = vpow2.f32 %v542_v54  ;;  %v512_v63 = vmul.f32 1.442695, %v472_v58  ;;  %v514_v3 = vmul.f32 1.442695, %v473_v59  ;;  %v381_v5 = vmul.f32 %v4969_v4, %v4642_v60  ;;  %v4755_v54 = vld [vmem:[%s4964_s12 + $0x28] sm:$0xff]  }
  0x1f   : > { %643 = vst [vmem:[#allocation2 + $0x98] sm:$0xff] %v4895_v1  ;;  %v4818_v2 = vpop.eup %4817  ;;  %v5067_v6 = vadd.f32 %v4979_v10, %v380_v61  ;;  %v4658_v7 = vunpack.c.h.bf16 %v4762_v52  ;;  %v936_v12 = vpack.c.b16 %v5053_v57, %v5051_v56  ;;  %vm441_vm7 = vcmp.gt.f32.partialorder %v5038_v49, 0.0  ;;  %v4557_v60 = vld [vmem:[%s5916_s3 + $0xb0] sm:$0xff]  ;;  %v4556_v57 = vld [vmem:[%s5916_s3 + $0xa8] sm:$0xff] }
  0x20   : > { %4796 = vmatpush.bf16.msra.mxu1 %v4545_v50  ;;  %4797 = vmatpush.bf16.msra.mxu2 %v4545_v50  ;;  %644 = vst [vmem:[#allocation2 + $0xa0] sm:$0x3] %v4895_v1  ;;  %v4820_v9 = vpop.eup %4819  ;;  %v4089_v11 = vadd.f32 -1.0, %v4818_v2  ;;  %4829 = vpow2.f32 %v512_v63  ;;  %v5078_v15 = vadd.f32 %v4979_v10, %v381_v5  ;;  %v5081_v16 = vmul.f32 %v4969_v4, %v4657_v0  ;;  %v4541_v61 = vld [vmem:[%s5916_s3 + $0x30] sm:$0xff] }
  0x21   : > { %4798 = vmatpush.bf16.msra.mxu3 %v4545_v50  ;;  %1021 = vmatpush.bf16.msra.mxu0 %v4545_v50  ;;  %645 = vst [vmem:[#allocation2 + $0xa8] sm:$0xff] %v4895_v1  ;;  %v4822_v13 = vpop.eup %4821  ;;  %v4090_v14 = vadd.f32 -1.0, %v4820_v9  ;;  %4831 = vpow2.f32 %v514_v3  ;;  %v5091_v21 = vmul.f32 %v4969_v4, %v4658_v7  ;;  %v4609_v22 = vunpack.c.l.bf16 %v5070_v8 }
  0x22   : > { %646 = vst [vmem:[#allocation2 + $0xb0] sm:$0xff] %v4895_v1  ;;  %v4824_v17 = vpop.eup %4823  ;;  %v598_v19 = vsel %vm438_vm0, %v4996_v25, %v4089_v11  ;;  %v4097_v20 = vadd.f32 -1.0, %v4822_v13  ;;  %v480_v25 = vmin.f32 %v5067_v6, 0.0  ;;  %v481_v37 = vmin.f32 %v5078_v15, 0.0 }
  0x23   : > { %647 = vst [vmem:[#allocation2 + $0xb8] sm:$0x3] %v4895_v1  ;;  %v4826_v23 = vpop.eup %4825  ;;  %v599_v24 = vsel %vm439_vm1, %v4999_v26, %v4090_v14  ;;  %v831_v30 = vpack.c.bf16 %v598_v19, %v598_v19  ;;  %v4098_v31 = vadd.f32 -1.0, %v4824_v17  ;;  %v4610_v48 = vunpack.c.h.bf16 %v5070_v8  ;;  %v4564_v17 = vld [vmem:[%s5916_s3 + $0xe8] sm:$0xff] }
  0x24   : > { %4799 = vmatpush.bf16.msra.mxu1 %v4544_v62  ;;  %4800 = vmatpush.bf16.msra.mxu2 %v4544_v62  ;;  %648 = vst [vmem:[#allocation2 + $0xc0] sm:$0xff] %v4895_v1  ;;  %v4828_v32 = vpop.eup %4827  ;;  %v832_v34 = vpack.c.bf16 %v599_v24, %v599_v24  ;;  %v5101_v35 = vsel %vm446_vm2, %v5003_v27, %v4097_v20  ;;  %v4105_v36 = vadd.f32 -1.0, %v4826_v23  ;;  %v4558_v27 = vld [vmem:[%s5916_s3 + $0xb8] sm:$0xff]  ;;  %v528_v2 = vmul.f32 1.442695, %v480_v25 }
  0x25   : > { %4801 = vmatpush.bf16.msra.mxu3 %v4544_v62  ;;  %1022 = vmatpush.bf16.msra.mxu0 %v4544_v62  ;;  %685 = vst [vmem:[#allocation2 + $0x61] sm:$0xff] %v598_v19  ;;  %v912_v38 = vunpack.c.l.b16 %v831_v30  ;;  %v5108_v26 = vsel %vm447_vm3, %v5007_v28, %v4098_v31  ;;  %v839_v39 = vpack.c.bf16 %v5101_v35, %v5101_v35  ;;  %v4106_v40 = vadd.f32 -1.0, %v4828_v32  ;;  %v4540_v19 = vld [vmem:[%s5916_s3 + $0x28] sm:$0xff] }
  0x26   : > { %686 = vst [vmem:[#allocation2 + $0x69] sm:$0xff] %v599_v24  ;;  %v4830_v43 = vpop.eup %4829  ;;  %v913_v28 = vunpack.c.l.b16 %v832_v34  ;;  %v840_v44 = vpack.c.bf16 %v5108_v26, %v5108_v26  ;;  %v5127_v46 = vsel %vm454_vm4, %v5010_v29, %v4105_v36  ;;  %v530_v3 = vmul.f32 1.442695, %v481_v37  ;;  %v4572_v31 = vld [vmem:[%s5916_s3 + $0x128] sm:$0xff] }
  0x27   : > { %649 = vst [vmem:[#allocation2 + $0xc8] sm:$0xff] %v4895_v1  ;;  %v4832_v50 = vpop.eup %4831  ;;  %v920_v51 = vunpack.c.l.b16 %v839_v39  ;;  %v5137_v52 = vsel %vm455_vm5, %v5017_v33, %v4106_v40  ;;  %v847_v29 = vpack.c.bf16 %v5127_v46, %v5127_v46  ;;  %v4091_v53 = vadd.f32 -1.0, %v4830_v43  ;;  %v4565_v33 = vld [vmem:[%s5916_s3 + $0xf0] sm:$0xff]  ;;  %v4759_v34 = vld [vmem:[%s4964_s12 + $0x48] sm:$0xff]   ;;  %v4555_v40 = vld [vmem:[%s5916_s3 + $0xa0] sm:$0xff] }
  0x28   : > { %4802 = vmatpush.bf16.msra.mxu1 %v4543_v18  ;;  %4803 = vmatpush.bf16.msra.mxu2 %v4543_v18  ;;  %650 = vst [vmem:[#allocation2 + $0xd0] sm:$0x3] %v4895_v1  ;;  %v940_v55 = vpack.c.b16 %v913_v28, %v912_v38  ;;  %v921_v58 = vunpack.c.l.b16 %v840_v44  ;;  %v848_v59 = vpack.c.bf16 %v5137_v52, %v5137_v52  ;;  %v4092_v62 = vadd.f32 -1.0, %v4832_v50  ;;  %v4563_v38 = vld [vmem:[%s5916_s3 + $0xe0] sm:$0xff] }
  0x29   : > { %4804 = vmatpush.bf16.msra.mxu3 %v4543_v18  ;;  %1023 = vmatpush.bf16.msra.mxu0 %v4543_v18  ;;  %651 = vst [vmem:[#allocation2 + $0xd8] sm:$0xff] %v4895_v1  ;;  %v928_v63 = vunpack.c.l.b16 %v847_v29  ;;  %v5158_v0 = vsel %vm440_vm6, %v5032_v45, %v4091_v53  ;;  %v4629_v11 = vunpack.c.l.bf16 %v4755_v54  ;;  %4833 = vpow2.f32 %v528_v2  ;;  %v4573_v18 = vld [vmem:[%s5916_s3 + $0x130] sm:$0xff] }
  0x2a   : > { %652 = vst [vmem:[#allocation2 + $0xe0] sm:$0xff] %v4895_v1  ;;  %v944_v5 = vpack.c.b16 %v921_v58, %v920_v51  ;;  %v929_v7 = vunpack.c.l.b16 %v848_v59  ;;  %v5167_v9 = vsel %vm441_vm7, %v5038_v49, %v4092_v62  ;;  %v833_v45 = vpack.c.bf16 %v5158_v0, %v5158_v0  ;;  %v4763_v58 = vld [vmem:[%s4964_s12 + $0x68] sm:$0xff]  }
  0x2b   : > { %653 = vst [vmem:[#allocation2 + $0xe8] sm:$0x3] %v4895_v1  ;;  %1044 = vmatmul.bf16.vlgmr.msra.gmra.mxu1 %v940_v55  ;;  %v834_v13 = vpack.c.bf16 %v5167_v9, %v5167_v9  ;;  %v5176_v14 = vadd.f32 %v4979_v10, %v5081_v16  ;;  %4835 = vpow2.f32 %v530_v3  ;;  %v5181_v49 = vadd.f32 %v4979_v10, %v5091_v21 }
  0x2c   : > { %1563 = vmatpush.bf16.msrb.mxu2 %v4558_v27  ;;  %1249 = vmatpush.bf16.msrb.mxu1 %v4542_v42  ;;  %654 = vst [vmem:[#allocation2 + $0xf0] sm:$0xff] %v4895_v1  ;;  %v948_v56 = vpack.c.b16 %v929_v7, %v928_v63  ;;  %vm448_vm8 = vcmp.gt.f32.partialorder %v5067_v6, 0.0  ;;  %vm449_vm9 = vcmp.gt.f32.partialorder %v5078_v15, 0.0  ;;  %v364_v21 = vmul.f32 %v4969_v4, %v4609_v22  ;;  %v4539_v27 = vld [vmem:[%s5916_s3 + $0x20] sm:$0xff] }
  0x2d   : > { %1909 = vmatpush.bf16.msrb.mxu3 %v4566_v41  ;;  %2255 = vmatpush.bf16.msrb.mxu0 %v4574_v47  ;;  %655 = vst [vmem:[#allocation2 + $0xf8] sm:$0xff] %v4895_v1  ;;  %v488_v16 = vmin.f32 %v5176_v14, 0.0  ;;  %v489_v20 = vmin.f32 %v5181_v49, 0.0  ;;  %v365_v23 = vmul.f32 %v4969_v4, %v4610_v48  ;;  %v5206_v24 = vunpack.c.l.b16 %v833_v45 }
  0x2e   : > { %1024 = vmatmul.bf16.vlgmr.msra.gmra.mxu0 %v936_v12  ;;  %656 = vst [vmem:[#allocation2 + $0x100] sm:$0x3] %v4895_v1  ;;  %1064 = vmatmul.bf16.vlgmr.msra.gmra.mxu2 %v944_v5  ;;  %v4630_v12 = vunpack.c.h.bf16 %v4755_v54  ;;  %v374_v25 = vmul.f32 %v4969_v4, %v4629_v11  ;;  %v5215_v8 = vunpack.c.l.b16 %v834_v13  ;;  %v5218_v36 = vadd.f32 %v4979_v10, %v364_v21  ;;  %v4554_v11 = vld [vmem:[%s5916_s3 + $0x98] sm:$0xff] }
  0x2f   : > { %657 = vst [vmem:[#allocation2 + $0x108] sm:$0xff] %v4895_v1  ;;  %1084 = vmatmul.bf16.vlgmr.msra.gmra.mxu3 %v948_v56  ;;  %v544_v30 = vmul.f32 1.442695, %v488_v16  ;;  %v546_v22 = vmul.f32 1.442695, %v489_v20  ;;  %v5221_v37 = vadd.f32 %v4979_v10, %v365_v23  ;;  %v4834_v39 = vpop.eup %4833  ;;  %vm456_vm10 = vcmp.gt.f32.partialorder %v5176_v14, 0.0 }
  0x30   : > { %1564 = vmatpush.bf16.msrb.mxu2 %v4557_v60  ;;  %1250 = vmatpush.bf16.msrb.mxu1 %v4541_v61  ;;  %658 = vst [vmem:[#allocation2 + $0x110] sm:$0xff] %v4895_v1  ;;  %v375_v32 = vmul.f32 %v4969_v4, %v4630_v12  ;;  %v5235_v41 = vadd.f32 %v4979_v10, %v374_v25  ;;  %v4099_v28 = vadd.f32 -1.0, %v4834_v39  ;;  %vm457_vm11 = vcmp.gt.f32.partialorder %v5181_v49, 0.0  ;;  %v5291_v20 = vld [vmem:[%s4964_s12 + $0x8] sm:$0xff]   ;;  %v4538_v39 = vld [vmem:[%s5916_s3 + $0x18] sm:$0xff] }
  0x31   : > { %1910 = vmatpush.bf16.msrb.mxu3 %v4565_v33  ;;  %659 = vst [vmem:[#allocation2 + $0x118] sm:$0x3] %v4895_v1  ;;  %2256 = vmatpush.bf16.msrb.mxu0 %v4573_v18  ;;  %4837 = vpow2.f32 %v544_v30  ;;  %v4836_v43 = vpop.eup %4835  ;;  %v4645_v44 = vunpack.c.l.bf16 %v4759_v34  ;;  %v464_v48 = vmin.f32 %v5218_v36, 0.0  ;;  %v465_v50 = vmin.f32 %v5221_v37, 0.0 }
  0x32   : > { %660 = vst [vmem:[#allocation2 + $0x120] sm:$0xff] %v4895_v1  ;;  %v5238_v42 = vadd.f32 %v4979_v10, %v375_v32  ;;  %4839 = vpow2.f32 %v546_v22  ;;  %v4100_v47 = vadd.f32 -1.0, %v4836_v43  ;;  %v4646_v51 = vunpack.c.h.bf16 %v4759_v34  ;;  %v4562_v22 = vld [vmem:[%s5916_s3 + $0xd8] sm:$0xff] }
  0x33   : > { %661 = vst [vmem:[#allocation2 + $0x128] sm:$0xff] %v4895_v1  ;;  %v941_v29 = vpack.c.b16 %v5215_v8, %v5206_v24  ;;  %v5251_v53 = vsel %vm448_vm8, %v5067_v6, %v4099_v28  ;;  %v474_v54 = vmin.f32 %v5235_v41, 0.0  ;;  %vm432_vm12 = vcmp.gt.f32.partialorder %v5218_v36, 0.0 }
  0x34   : > { %1565 = vmatpush.bf16.msrb.mxu2 %v4556_v57  ;;  %1251 = vmatpush.bf16.msrb.mxu1 %v4540_v19  ;;  %662 = vst [vmem:[#allocation2 + $0x130] sm:$0x3] %v4895_v1  ;;  %v475_v55 = vmin.f32 %v5238_v42, 0.0  ;;  %v5260_v59 = vsel %vm449_vm9, %v5078_v15, %v4100_v47  ;;  %v841_v60 = vpack.c.bf16 %v5251_v53, %v5251_v53  ;;  %v496_v6 = vmul.f32 1.442695, %v464_v48  ;;  %v4553_v47 = vld [vmem:[%s5916_s3 + $0x90] sm:$0xff] }
  0x35   : > { %1911 = vmatpush.bf16.msrb.mxu3 %v4564_v17  ;;  %663 = vst [vmem:[#allocation2 + $0x138] sm:$0xff] %v4895_v1  ;;  %2257 = vmatpush.bf16.msrb.mxu0 %v4572_v31  ;;  %v498_v33 = vmul.f32 1.442695, %v465_v50  ;;  %v842_v61 = vpack.c.bf16 %v5260_v59, %v5260_v59  ;;  %vm433_vm13 = vcmp.gt.f32.partialorder %v5221_v37, 0.0  ;;  %v516_v62 = vmul.f32 1.442695, %v474_v54 }
  0x36   : > { %664 = vst [vmem:[#allocation2 + $0x140] sm:$0xff] %v4895_v1  ;;  %v518_v63 = vmul.f32 1.442695, %v475_v55  ;;  %v382_v15 = vmul.f32 %v4969_v4, %v4645_v44  ;;  %v922_v3 = vunpack.c.l.b16 %v841_v60  ;;  %4841 = vpow2.f32 %v496_v6  ;;  %v4561_v54 = vld [vmem:[%s5916_s3 + $0xd0] sm:$0xff]  ;;  %v4570_v55 = vld [vmem:[%s5916_s3 + $0x118] sm:$0xff] }
  0x37   : > { %665 = vst [vmem:[#allocation2 + $0x148] sm:$0x3] %v4895_v1  ;;  %v4838_v2 = vpop.eup %4837  ;;  %v383_v5 = vmul.f32 %v4969_v4, %v4646_v51  ;;  %v4661_v7 = vunpack.c.l.bf16 %v4763_v58  ;;  %v923_v13 = vunpack.c.l.b16 %v842_v61  ;;  %4843 = vpow2.f32 %v498_v33  ;;  %v4537_v61 = vld [vmem:[%s5916_s3 + $0x10] sm:$0xff] }
  0x38   : > { %1566 = vmatpush.bf16.msrb.mxu2 %v4555_v40  ;;  %1252 = vmatpush.bf16.msrb.mxu1 %v4539_v27  ;;  %666 = vst [vmem:[#allocation2 + $0x150] sm:$0xff] %v4895_v1  ;;  %v4840_v45 = vpop.eup %4839  ;;  %v4107_v56 = vadd.f32 -1.0, %v4838_v2  ;;  %v5277_v57 = vadd.f32 %v4979_v10, %v382_v15  ;;  %4845 = vpow2.f32 %v516_v62  ;;  %v4662_v17 = vunpack.c.h.bf16 %v4763_v58 }
  0x39   : > { %1912 = vmatpush.bf16.msrb.mxu3 %v4563_v38  ;;  %667 = vst [vmem:[#allocation2 + $0x158] sm:$0xff] %v4895_v1  ;;  %v4108_v12 = vadd.f32 -1.0, %v4840_v45  ;;  %v5281_v16 = vadd.f32 %v4979_v10, %v383_v5  ;;  %v945_v18 = vpack.c.b16 %v923_v13, %v922_v3  ;;  %vm442_vm14 = vcmp.gt.f32.partialorder %v5235_v41, 0.0  ;;  %v4571_v38 = vld [vmem:[%s5916_s3 + $0x120] sm:$0xff]  ;;  %v4756_v3 = vld [vmem:[%s4964_s12 + $0x30] sm:$0xff]  }
  0x3a   : > { %668 = vst [vmem:[#allocation2 + $0x160] sm:$0x3] %v4895_v1  ;;  %v5287_v19 = vsel %vm456_vm10, %v5176_v14, %v4107_v56  ;;  %4847 = vpow2.f32 %v518_v63  ;;  %vm443_vm15 = vcmp.gt.f32.partialorder %v5238_v42, 0.0  ;;  %v482_v14 = vmin.f32 %v5277_v57, 0.0  ;;  %2258 = vmatpush.bf16.msrb.mxu0 %v4571_v38 }
  0x3b   : > { %669 = vst [vmem:[#allocation2 + $0x168] sm:$0xff] %v4895_v1  ;;  %1049 = vmatmul.bf16.gmra.mxu1 %v941_v29  ;;  %v5297_v21 = vsel %vm457_vm11, %v5181_v49, %v4108_v12  ;;  %v849_v23 = vpack.c.bf16 %v5287_v19, %v5287_v19  ;;  %v483_v30 = vmin.f32 %v5281_v16, 0.0  ;;  %v390_v31 = vmul.f32 %v4969_v4, %v4661_v7 }
  0x3c   : > { %1567 = vmatpush.bf16.msrb.mxu2 %v4554_v11  ;;  %670 = vst [vmem:[#allocation2 + $0x170] sm:$0xff] %v4895_v1  ;;  %v850_v24 = vpack.c.bf16 %v5297_v21, %v5297_v21  ;;  %v391_v49 = vmul.f32 %v4969_v4, %v4662_v17  ;;  %v4842_v25 = vpop.eup %4841  ;;  %vm450_vm0 = vcmp.gt.f32.partialorder %v5277_v57, 0.0  ;;  %v532_v34 = vmul.f32 1.442695, %v482_v14  ;;  %1253 = vmatpush.bf16.msrb.mxu1 %v4538_v39 }
  0x3d   : > { %671 = vst [vmem:[#allocation2 + $0x178] sm:$0x3] %v4895_v1  ;;  %v930_v32 = vunpack.c.l.b16 %v849_v23  ;;  %v4613_v8 = vunpack.c.l.bf16 %v5291_v20  ;;  %v4844_v40 = vpop.eup %4843  ;;  %v4083_v43 = vadd.f32 -1.0, %v4842_v25  ;;  %v534_v28 = vmul.f32 1.442695, %v483_v30  ;;  %1913 = vmatpush.bf16.msrb.mxu3 %v4562_v22 }
  0x3e   : > { %672 = vst [vmem:[#allocation2 + $0x180] sm:$0xff] %v4895_v1  ;;  %1069 = vmatmul.bf16.gmra.mxu2 %v945_v18  ;;  %v931_v27 = vunpack.c.l.b16 %v850_v24  ;;  %v5323_v44 = vadd.f32 %v4979_v10, %v390_v31  ;;  %v4846_v48 = vpop.eup %4845  ;;  %v4084_v50 = vadd.f32 -1.0, %v4844_v40  ;;  %4849 = vpow2.f32 %v532_v34  ;;  %2259 = vmatpush.bf16.msrb.mxu0 %v4570_v55  ;;  %v4552_v55 = vld [vmem:[%s5916_s3 + $0x88] sm:$0xff] }
  0x3f   : > { %673 = vst [vmem:[#allocation2 + $0x188] sm:$0xff] %v4895_v1  ;;  %v5330_v51 = vadd.f32 %v4979_v10, %v391_v49  ;;  %v4614_v29 = vunpack.c.h.bf16 %v5291_v20  ;;  %v5343_v6 = vsel %vm432_vm12, %v5218_v36, %v4083_v43  ;;  %v4093_v33 = vadd.f32 -1.0, %v4846_v48 }
  0x40   : > { %674 = vst [vmem:[#allocation2 + $0x190] sm:$0x3] %v4895_v1  ;;  %v4848_v58 = vpop.eup %4847  ;;  %v949_v60 = vpack.c.b16 %v931_v27, %v930_v32  ;;  %4851 = vpow2.f32 %v534_v28  ;;  %1568 = vmatpush.bf16.msrb.mxu2 %v4553_v47  ;;  %v5352_v62 = vsel %vm433_vm13, %v5221_v37, %v4084_v50  ;;  %v825_v36 = vpack.c.bf16 %v5343_v6, %v5343_v6 }
  0x41   : > { %675 = vst [vmem:[#allocation2 + $0x198] sm:$0xff] %v4895_v1  ;;  %v4094_v63 = vadd.f32 -1.0, %v4848_v58  ;;  %v366_v15 = vmul.f32 %v4969_v4, %v4613_v8  ;;  %v826_v2 = vpack.c.bf16 %v5352_v62, %v5352_v62  ;;  %vm451_vm1 = vcmp.gt.f32.partialorder %v5281_v16, 0.0  ;;  %1914 = vmatpush.bf16.msrb.mxu3 %v4561_v54  ;;  %1254 = vmatpush.bf16.msrb.mxu1 %v4537_v61  ;;  %v4764_v54 = vld [vmem:[%s4964_s12 + $0x70] sm:$0xff]  }
  0x42   : > { %676 = vst [vmem:[#allocation2 + $0x1a0] sm:$0xff] %v4895_v1  ;;  %1089 = vmatmul.bf16.gmra.mxu3 %v949_v60  ;;  %v490_v37 = vmin.f32 %v5323_v44, 0.0  ;;  %v906_v5 = vunpack.c.l.b16 %v825_v36  ;;  %v491_v11 = vmin.f32 %v5330_v51, 0.0  ;;  %v367_v13 = vmul.f32 %v4969_v4, %v4614_v29 }
  0x43   : > { %677 = vst [vmem:[#allocation2 + $0x1a8] sm:$0x3] %v4895_v1  ;;  %v5363_v1 = vsel %vm442_vm14, %v5235_v41, %v4093_v33  ;;  %v907_v41 = vunpack.c.l.b16 %v826_v2  ;;  %v5383_v17 = vadd.f32 %v4979_v10, %v366_v15  ;;  %v4633_v18 = vunpack.c.l.bf16 %v4756_v3 }
  0x44   : > { %693 = vst [vmem:[#allocation2 + $0xc1] sm:$0xff] %v5101_v35  ;;  %v5372_v35 = vsel %vm443_vm15, %v5238_v42, %v4094_v63  ;;  %v835_v7 = vpack.c.bf16 %v5363_v1, %v5363_v1  ;;  %v4850_v56 = vpop.eup %4849  ;;  %v550_v12 = vmul.f32 1.442695, %v491_v11  ;;  %vm458_vm2 = vcmp.gt.f32.partialorder %v5323_v44, 0.0  ;;  %1569 = vmatpush.bf16.msrb.mxu2 %v4552_v55 }
  0x45   : > { %694 = vst [vmem:[#allocation2 + $0xc9] sm:$0xff] %v5108_v26  ;;  %v836_v45 = vpack.c.bf16 %v5372_v35, %v5372_v35  ;;  %v548_v26 = vmul.f32 1.442695, %v490_v37  ;;  %v4101_v14 = vadd.f32 -1.0, %v4850_v56  ;;  %v466_v31 = vmin.f32 %v5383_v17, 0.0  ;;  %v4560_v56 = vld [vmem:[%s5916_s3 + $0xc8] sm:$0xff] }
  0x46   : > { %701 = vst [vmem:[#allocation2 + $0x121] sm:$0xff] %v5127_v46  ;;  %v916_v42 = vunpack.c.l.b16 %v835_v7  ;;  %v4852_v20 = vpop.eup %4851  ;;  %v5386_v46 = vpack.c.b16 %v907_v41, %v906_v5  ;;  %v4634_v49 = vunpack.c.h.bf16 %v4756_v3  ;;  %vm459_vm3 = vcmp.gt.f32.partialorder %v5330_v51, 0.0  ;;  %v4752_v41 = vld [vmem:[%s4964_s12 + $0x10] sm:$0xff]   ;;  %1915 = vmatpush.bf16.msrb.mxu3 %v4560_v56  ;;  %v4606_v56 = vld [vmem:[%s5916_s3 + $0x238] sm:$0xff] }
  0x47   : > { %702 = vst [vmem:[#allocation2 + $0x129] sm:$0xff] %v5137_v52  ;;  %v917_v23 = vunpack.c.l.b16 %v836_v45  ;;  %4853 = vpow2.f32 %v548_v26  ;;  %v4102_v24 = vadd.f32 -1.0, %v4852_v20  ;;  %v5391_v52 = vadd.f32 %v4979_v10, %v367_v13 }
  0x48   : > { %687 = vst [vmem:[#allocation2 + $0x79] sm:$0xff] %v5158_v0  ;;  %4855 = vpow2.f32 %v550_v12  ;;  %1029 = vmatmul.bf16.gmra.mxu0 %v5386_v46  ;;  %v610_v30 = vsel %vm450_vm0, %v5277_v57, %v4101_v14  ;;  %v500_v57 = vmul.f32 1.442695, %v466_v31  ;;  %v376_v8 = vmul.f32 %v4969_v4, %v4633_v18  ;;  %v4536_v14 = vld [vmem:[%s5916_s3 + $0x8] sm:$0xff]  ;;  %v4559_v31 = vld [vmem:[%s5916_s3 + $0xc0] sm:$0xff] }
  0x49   : > { %688 = vst [vmem:[#allocation2 + $0x81] sm:$0xff] %v5167_v9  ;;  %v942_v0 = vpack.c.b16 %v917_v23, %v916_v42  ;;  %v4760_v9 = vld [vmem:[%s4964_s12 + $0x50] sm:$0xff]   ;;  %v611_v25 = vsel %vm451_vm1, %v5281_v16, %v4102_v24  ;;  %v843_v32 = vpack.c.bf16 %v610_v30, %v610_v30  ;;  %v377_v22 = vmul.f32 %v4969_v4, %v4634_v49  ;;  %v4551_v24 = vld [vmem:[%s5916_s3 + $0x80] sm:$0xff] }
  0x4a   : > { %695 = vst [vmem:[#allocation2 + $0xd9] sm:$0xff] %v5251_v53  ;;  %v467_v53 = vmin.f32 %v5391_v52, 0.0  ;;  %v844_v34 = vpack.c.bf16 %v611_v25, %v611_v25  ;;  %v4649_v39 = vunpack.c.l.bf16 %v4760_v9  ;;  %v4650_v16 = vunpack.c.h.bf16 %v4760_v9  ;;  %v4569_v23 = vld [vmem:[%s5916_s3 + $0x110] sm:$0xff]  ;;  %1255 = vmatpush.bf16.msrb.mxu1 %v4536_v14  ;;  %1570 = vmatpush.bf16.msrb.mxu2 %v4551_v24  ;;  %v4883_v24 = vld [vmem:[#allocation2] sm:$0xff] }
  0x4b   : > { %696 = vst [vmem:[#allocation2 + $0xe1] sm:$0xff] %v5260_v59  ;;  %1054 = vmatmul.bf16.gmra.mxu1 %v942_v0  ;;  %v924_v59 = vunpack.c.l.b16 %v843_v32  ;;  %4857 = vpow2.f32 %v500_v57  ;;  %v5415_v43 = vadd.f32 %v4979_v10, %v377_v22  ;;  %vm434_vm4 = vcmp.gt.f32.partialorder %v5383_v17, 0.0  ;;  %2260 = vmatpush.bf16.msrb.mxu0 %v4569_v23  ;;  %v4535_v57 = vld [vmem:[%s5916_s3] sm:$0xff] }
  0x4c   : > { %703 = vst [vmem:[#allocation2 + $0x139] sm:$0xff] %v5287_v19  ;;  %v502_v38 = vmul.f32 1.442695, %v467_v53  ;;  %v925_v27 = vunpack.c.l.b16 %v844_v34  ;;  %v5412_v19 = vadd.f32 %v4979_v10, %v376_v8  ;;  %v384_v47 = vmul.f32 %v4969_v4, %v4649_v39  ;;  %v4568_v34 = vld [vmem:[%s5916_s3 + $0x108] sm:$0xff]  ;;  %1916 = vmatpush.bf16.msrb.mxu3 %v4559_v31 }
  0x4d   : > { %704 = vst [vmem:[#allocation2 + $0x141] sm:$0xff] %v5297_v21  ;;  %v4854_v40 = vpop.eup %4853  ;;  %v385_v48 = vmul.f32 %v4969_v4, %v4650_v16  ;;  %v4665_v2 = vunpack.c.l.bf16 %v4764_v54  ;;  %vm435_vm5 = vcmp.gt.f32.partialorder %v5391_v52, 0.0  ;;  %v4666_v11 = vunpack.c.h.bf16 %v4764_v54  ;;  %v4881_v16 = vld [vmem:[%s5914_s1] ss:$0 sm:$0xff] }
  0x4e   : > { %679 = vst [vmem:[#allocation2 + $0x19] sm:$0xff] %v5343_v6  ;;  %v4856_v28 = vpop.eup %4855  ;;  %v4109_v21 = vadd.f32 -1.0, %v4854_v40  ;;  %4859 = vpow2.f32 %v502_v38  ;;  %v946_v50 = vpack.c.b16 %v925_v27, %v924_v59  ;;  %v476_v60 = vmin.f32 %v5412_v19, 0.0  ;;  %v5501_v54 = vld [vmem:[%s5915_s2] ss:$0 sm:$0xff]  ;;  %1256 = vmatpush.bf16.msrb.mxu1 %v4535_v57 }
  0x4f   : > { %680 = vst [vmem:[#allocation2 + $0x21] sm:$0xff] %v5352_v62  ;;  %v4110_v29 = vadd.f32 -1.0, %v4856_v28  ;;  %v477_v6 = vmin.f32 %v5415_v43, 0.0  ;;  %v5432_v33 = vadd.f32 %v4979_v10, %v384_v47  ;;  %v5439_v36 = vadd.f32 %v4979_v10, %v385_v48  ;;  %2261 = vmatpush.bf16.msrb.mxu0 %v4568_v34 }
  0x50   : > { %689 = vst [vmem:[#allocation2 + $0x91] sm:$0xff] %v5363_v1  ;;  %v618_v58 = vsel %vm458_vm2, %v5323_v44, %v4109_v21  ;;  %1074 = vmatmul.bf16.gmra.mxu2 %v946_v50  ;;  %v520_v63 = vmul.f32 1.442695, %v476_v60  ;;  %v392_v18 = vmul.f32 %v4969_v4, %v4665_v2  ;;  %v393_v20 = vmul.f32 %v4969_v4, %v4666_v11 }
  0x51   : > { %690 = vst [vmem:[#allocation2 + $0x99] sm:$0xff] %v5372_v35  ;;  %v619_v61 = vsel %vm459_vm3, %v5330_v51, %v4110_v29  ;;  %v851_v62 = vpack.c.bf16 %v618_v58, %v618_v58  ;;  %v522_v15 = vmul.f32 1.442695, %v477_v6  ;;  %v4858_v1 = vpop.eup %4857  ;;  %v484_v51 = vmin.f32 %v5432_v33, 0.0 }
  0x52   : > { %697 = vst [vmem:[#allocation2 + $0xf1] sm:$0xff] %v610_v30  ;;  %v852_v44 = vpack.c.bf16 %v619_v61, %v619_v61  ;;  %v485_v3 = vmin.f32 %v5439_v36, 0.0  ;;  %v4085_v7 = vadd.f32 -1.0, %v4858_v1  ;;  %4861 = vpow2.f32 %v520_v63 }
  0x53   : > { %698 = vst [vmem:[#allocation2 + $0xf9] sm:$0xff] %v611_v25  ;;  %v932_v37 = vunpack.c.l.b16 %v851_v62  ;;  %4863 = vpow2.f32 %v522_v15  ;;  %v536_v26 = vmul.f32 1.442695, %v484_v51  ;;  %v4617_v30 = vunpack.c.l.bf16 %v4752_v41 }
  0x54   : > { %705 = vst [vmem:[#allocation2 + $0x151] sm:$0xff] %v618_v58  ;;  %v4860_v5 = vpop.eup %4859  ;;  %v933_v35 = vunpack.c.l.b16 %v852_v44  ;;  %v538_v13 = vmul.f32 1.442695, %v485_v3  ;;  %v594_v12 = vsel %vm434_vm4, %v5383_v17, %v4085_v7  ;;  %v5469_v9 = vadd.f32 %v4979_v10, %v392_v18  ;;  %v4590_v44 = vld [vmem:[%s5916_s3 + $0x1b8] sm:$0xff] }
  0x55   : > { %706 = vst [vmem:[#allocation2 + $0x159] sm:$0xff] %v619_v61  ;;  %v4086_v45 = vadd.f32 -1.0, %v4860_v5  ;;  %v827_v0 = vpack.c.bf16 %v594_v12, %v594_v12  ;;  %4865 = vpow2.f32 %v536_v26  ;;  %v5472_v25 = vadd.f32 %v4979_v10, %v393_v20  ;;  %2948 = vmatpush.bf16.msra.mxu2 %v4590_v44  ;;  %v4598_v26 = vld [vmem:[%s5916_s3 + $0x1f8] sm:$0xff] }
  0x56   : > { %v950_v42 = vpack.c.b16 %v933_v35, %v932_v37  ;;  %681 = vst [vmem:[#allocation2 + $0x31] sm:$0xff] %v594_v12  ;;  %4867 = vpow2.f32 %v538_v13  ;;  %v4618_v32 = vunpack.c.h.bf16 %v4752_v41  ;;  %v368_v53 = vmul.f32 %v4969_v4, %v4617_v30  ;;  %v4582_v13 = vld [vmem:[%s5916_s3 + $0x178] sm:$0xff]  ;;  %3294 = vmatpush.bf16.msra.mxu3 %v4598_v26  ;;  %v1339_v30 = vld [vmem:[#allocation2 + $0xa] sm:$0xff] }
  0x57   : > { %v595_v17 = vsel %vm435_vm5, %v5391_v52, %v4086_v45  ;;  %v908_v52 = vunpack.c.l.b16 %v827_v0  ;;  %vm444_vm6 = vcmp.gt.f32.partialorder %v5412_v19, 0.0  ;;  %vm445_vm7 = vcmp.gt.f32.partialorder %v5415_v43, 0.0  ;;  %2601 = vmatpush.bf16.msra.mxu1 %v4582_v13  ;;  %v1338_v0 = vld [vmem:[#allocation2 + $0x2] sm:$0xff] }
  0x58   : > { %1094 = vmatmul.bf16.gmra.mxu3 %v950_v42  ;;  %682 = vst [vmem:[#allocation2 + $0x39] sm:$0xff] %v595_v17  ;;  %v828_v49 = vpack.c.bf16 %v595_v17, %v595_v17  ;;  %v4862_v8 = vpop.eup %4861  ;;  %v492_v59 = vmin.f32 %v5469_v9, 0.0  ;;  %vm452_vm8 = vcmp.gt.f32.partialorder %v5432_v33, 0.0  ;;  %v493_v39 = vmin.f32 %v5472_v25, 0.0 }
  0x59   : > { %v4864_v4 = vpop.eup %4863  ;;  %v4095_v38 = vadd.f32 -1.0, %v4862_v8  ;;  %v369_v40 = vmul.f32 %v4881_v16, %v4618_v32  ;;  %v5492_v47 = vadd.f32 %v4979_v10, %v368_v53  ;;  %vm453_vm9 = vcmp.gt.f32.partialorder %v5439_v36, 0.0  ;;  %v4567_v10 = vld [vmem:[%s5916_s3 + $0x100] sm:$0xff] }
  0x5a   : > { %v909_v22 = vunpack.c.l.b16 %v828_v49  ;;  %v4096_v28 = vadd.f32 -1.0, %v4864_v4  ;;  %v552_v21 = vmul.f32 1.442695, %v492_v59  ;;  %v554_v29 = vmul.f32 1.442695, %v493_v39  ;;  %2262 = vmatpush.bf16.msrb.mxu0 %v4567_v10 }
  0x5b   : > { %v4866_v48 = vpop.eup %4865  ;;  %v604_v50 = vsel %vm444_vm6, %v5412_v19, %v4095_v38  ;;  %v5504_v55 = vadd.f32 %v5501_v54, %v369_v40  ;;  %v468_v2 = vmin.f32 %v5492_v47, 0.0  ;;  %vm460_vm10 = vcmp.gt.f32.partialorder %v5469_v9, 0.0 }
  0x5c   : > { %v5489_v27 = vpack.c.b16 %v909_v22, %v908_v52  ;;  %v4868_v58 = vpop.eup %4867  ;;  %v605_v19 = vsel %vm445_vm7, %v5415_v43, %v4096_v28  ;;  %691 = vst [vmem:[#allocation2 + $0xa9] sm:$0xff] %v604_v50  ;;  %v837_v60 = vpack.c.bf16 %v604_v50, %v604_v50  ;;  %v4103_v6 = vadd.f32 -1.0, %v4866_v48  ;;  %v1684_v28 = vld [vmem:[#allocation2 + $0x18] sm:$0xff] }
  0x5d   : > { %4869 = vpow2.f32 %v552_v21  ;;  %692 = vst [vmem:[#allocation2 + $0xb1] sm:$0xff] %v605_v19  ;;  %v838_v61 = vpack.c.bf16 %v605_v19, %v605_v19  ;;  %v4104_v62 = vadd.f32 -1.0, %v4868_v58  ;;  %v469_v43 = vmin.f32 %v5504_v55, 0.0  ;;  %v1685_v21 = vld [vmem:[#allocation2 + $0x20] sm:$0xff] }
  0x5e   : > { %1034 = vmatmul.bf16.gmra.mxu0 %v5489_v27  ;;  %4871 = vpow2.f32 %v554_v29  ;;  %v918_v63 = vunpack.c.l.b16 %v837_v60  ;;  %v612_v15 = vsel %vm452_vm8, %v5432_v33, %v4103_v6  ;;  %v504_v5 = vmul.f32 1.442695, %v468_v2  ;;  %v1340_v60 = vld [vmem:[#allocation2 + $0x1a] sm:$0xff]  ;;  %v1341_v6 = vld [vmem:[#allocation2 + $0x22] sm:$0xff] }
  0x5f   : > { %v919_v1 = vunpack.c.l.b16 %v838_v61  ;;  %v613_v37 = vsel %vm453_vm9, %v5439_v36, %v4104_v62  ;;  %699 = vst [vmem:[#allocation2 + $0x109] sm:$0xff] %v612_v15  ;;  %v845_v51 = vpack.c.bf16 %v612_v15, %v612_v15  ;;  %v506_v35 = vmul.f32 1.442695, %v469_v43  ;;  %3640 = vmatpush.bf16.msra.mxu0 %v4606_v56  ;;  %v1686_v43 = vld [vmem:[#allocation2 + $0x30] sm:$0xff] }
  0x60   : > { %700 = vst [vmem:[#allocation2 + $0x111] sm:$0xff] %v613_v37  ;;  %v846_v3 = vpack.c.bf16 %v613_v37, %v613_v37  ;;  %4873 = vpow2.f32 %v504_v5  ;;  %vm461_vm11 = vcmp.gt.f32.partialorder %v5472_v25, 0.0  ;;  %v743_v17 = vpack.c.bf16 %v4883_v24, %v4883_v24  ;;  %v4597_v5 = vld [vmem:[%s5916_s3 + $0x1f0] sm:$0xff] }
  0x61   : > { %v5524_v7 = vpack.c.b16 %v919_v1, %v918_v63  ;;  %v926_v33 = vunpack.c.l.b16 %v845_v51  ;;  %4875 = vpow2.f32 %v506_v35  ;;  %vm436_vm12 = vcmp.gt.f32.partialorder %v5492_v47, 0.0  ;;  %v4589_v63 = vld [vmem:[%s5916_s3 + $0x1b0] sm:$0xff]  ;;  %v1687_v1 = vld [vmem:[#allocation2 + $0x38] sm:$0xff]  ;;  %3295 = vmatpush.bf16.msra.mxu3 %v4597_v5 }
  0x62   : > { %v927_v41 = vunpack.c.l.b16 %v846_v3  ;;  %vm437_vm13 = vcmp.gt.f32.partialorder %v5504_v55, 0.0  ;;  %v1371_v34 = vpack.c.bf16 %v1339_v30, %v1339_v30  ;;  %v1137_v22 = vunpack.c.l.b16 %v743_v17  ;;  %2949 = vmatpush.bf16.msra.mxu2 %v4589_v63  ;;  %v4581_v35 = vld [vmem:[%s5916_s3 + $0x170] sm:$0xff] }
  0x63   : > { %v4870_v11 = vpop.eup %4869  ;;  %1059 = vmatmul.bf16.gmra.mxu1 %v5524_v7  ;;  %v1716_v10 = vpack.c.bf16 %v1684_v28, %v1684_v28  ;;  %v1717_v58 = vpack.c.bf16 %v1685_v21, %v1685_v21  ;;  %v1372_v62 = vpack.c.bf16 %v1340_v60, %v1340_v60  ;;  %v1373_v44 = vpack.c.bf16 %v1341_v6, %v1341_v6 }
  0x64   : > { %v4872_v45 = vpop.eup %4871  ;;  %v4111_v36 = vadd.f32 -1.0, %v4870_v11  ;;  %v947_v42 = vpack.c.b16 %v927_v41, %v926_v33  ;;  %v1452_v40 = vunpack.c.l.b16 %v1371_v34  ;;  %v1169_v50 = vpack.c.b16 %v1137_v22, %v1137_v22  ;;  %v4605_v33 = vld [vmem:[%s5916_s3 + $0x230] sm:$0xff]  ;;  %2602 = vmatpush.bf16.msra.mxu1 %v4581_v35  ;;  %v1691_v34 = vld [vmem:[#allocation2 + $0x68] sm:$0xff] }
  0x65   : > { %v4112_v12 = vadd.f32 -1.0, %v4872_v45  ;;  %v1798_v19 = vunpack.c.l.b16 %v1717_v58  ;;  %v1453_v15 = vunpack.c.l.b16 %v1372_v62  ;;  %v1454_v2 = vunpack.c.l.b16 %v1373_v44  ;;  %3641 = vmatpush.bf16.msra.mxu0 %v4605_v33  ;;  %v1343_v45 = vld [vmem:[#allocation2 + $0x3a] sm:$0xff]  ;;  %v4596_v22 = vld [vmem:[%s5916_s3 + $0x1e8] sm:$0xff] }
  0x66   : > { %v620_v18 = vsel %vm460_vm10, %v5469_v9, %v4111_v36  ;;  %1079 = vmatmul.bf16.gmra.mxu2 %v947_v42  ;;  %v4874_v31 = vpop.eup %4873  ;;  %v1718_v37 = vpack.c.bf16 %v1686_v43, %v1686_v43  ;;  %v1719_v51 = vpack.c.bf16 %v1687_v1, %v1687_v1  ;;  %v1375_v13 = vpack.c.bf16 %v1343_v45, %v1343_v45  ;;  %v1693_v62 = vld [vmem:[#allocation2 + $0x80] sm:$0xff] }
  0x67   : > { %v621_v20 = vsel %vm461_vm11, %v5472_v25, %v4112_v12  ;;  %707 = vst [vmem:[#allocation2 + $0x169] sm:$0xff] %v620_v18  ;;  %v853_v23 = vpack.c.bf16 %v620_v18, %v620_v18  ;;  %v4876_v52 = vpop.eup %4875  ;;  %v4087_v32 = vadd.f32 -1.0, %v4874_v31  ;;  %v1370_v25 = vpack.c.bf16 %v1338_v0, %v1338_v0  ;;  %3296 = vmatpush.bf16.msra.mxu3 %v4596_v22  ;;  %v1348_v45 = vld [vmem:[#allocation2 + $0x7a] sm:$0xff] }
  0x68   : > { %708 = vst [vmem:[#allocation2 + $0x171] sm:$0xff] %v621_v20  ;;  %v854_v14 = vpack.c.bf16 %v621_v20, %v621_v20  ;;  %v4088_v53 = vadd.f32 -1.0, %v4876_v52  ;;  %v1484_v3 = vpack.c.b16 %v1454_v2, %v1453_v15  ;;  %v1799_v11 = vunpack.c.l.b16 %v1718_v37 }
  0x69   : > { %v934_v49 = vunpack.c.l.b16 %v853_v23  ;;  %v596_v8 = vsel %vm436_vm12, %v5492_v47, %v4087_v32  ;;  %v1451_v16 = vunpack.c.l.b16 %v1370_v25  ;;  %v1800_v41 = vunpack.c.l.b16 %v1719_v51  ;;  %v1690_v25 = vld [vmem:[#allocation2 + $0x60] sm:$0xff] }
  0x6a   : > { %v935_v9 = vunpack.c.l.b16 %v854_v14  ;;  %v597_v59 = vsel %vm437_vm13, %v5504_v55, %v4088_v53  ;;  %683 = vst [vmem:[#allocation2 + $0x49] sm:$0xff] %v596_v8  ;;  %v829_v4 = vpack.c.bf16 %v596_v8, %v596_v8  ;;  %v1797_v55 = vunpack.c.l.b16 %v1716_v10  ;;  %v2038_v51 = vld [vmem:[#allocation2 + $0x79] sm:$0xff] }
  0x6b   : > { %684 = vst [vmem:[#allocation2 + $0x51] sm:$0xff] %v597_v59  ;;  %v830_v38 = vpack.c.bf16 %v597_v59, %v597_v59  ;;  %v1483_v47 = vpack.c.b16 %v1452_v40, %v1451_v16  ;;  %v1830_v36 = vpack.c.b16 %v1800_v41, %v1799_v11  ;;  %v1456_v42 = vunpack.c.l.b16 %v1375_v13  ;;  %v4580_v59 = vld [vmem:[%s5916_s3 + $0x168] sm:$0xff] }
  0x6c   : > { %v951_v57 = vpack.c.b16 %v935_v9, %v934_v49  ;;  %v910_v39 = vunpack.c.l.b16 %v829_v4  ;;  %v1829_v61 = vpack.c.b16 %v1798_v19, %v1797_v55  ;;  %v4588_v9 = vld [vmem:[%s5916_s3 + $0x1a8] sm:$0xff]  ;;  %2603 = vmatpush.bf16.msra.mxu1 %v4580_v59  ;;  %v1725_v43 = vpack.c.bf16 %v1693_v62, %v1693_v62 }
  0x6d   : > { %v911_v48 = vunpack.c.l.b16 %v830_v38  ;;  %2950 = vmatpush.bf16.msra.mxu2 %v4588_v9  ;;  %v4604_v4 = vld [vmem:[%s5916_s3 + $0x228] sm:$0xff]  ;;  %v2070_v11 = vpack.c.bf16 %v2038_v51, %v2038_v51 }
  0x6e   : > { %1099 = vmatmul.bf16.gmra.mxu3 %v951_v57  ;;  %v1723_v57 = vpack.c.bf16 %v1691_v34, %v1691_v34  ;;  %v2036_v38 = vld [vmem:[#allocation2 + $0x61] sm:$0xff]  ;;  %3642 = vmatpush.bf16.msra.mxu0 %v4604_v4  ;;  %v1806_v33 = vunpack.c.l.b16 %v1725_v43 }
  0x6f   : > { %v5544_v29 = vpack.c.b16 %v911_v48, %v910_v39  ;;  %v2037_v39 = vld [vmem:[#allocation2 + $0x69] sm:$0xff]  ;;  %v2068_v21 = vpack.c.bf16 %v2036_v38, %v2036_v38  ;;  %v4579_v34 = vld [vmem:[%s5916_s3 + $0x160] sm:$0xff] }
  0x70   : > { %v1804_v40 = vunpack.c.l.b16 %v1723_v57  ;;  %v2069_v48 = vpack.c.bf16 %v2037_v39, %v2037_v39  ;;  %v2040_v57 = vld [vmem:[#allocation2 + $0x91] sm:$0xff]  ;;  %2604 = vmatpush.bf16.msra.mxu1 %v4579_v34 }
  0x71   : > { %1039 = vmatmul.bf16.gmra.mxu0 %v5544_v29  ;;  %v1688_v12 = vld [vmem:[#allocation2 + $0x48] sm:$0xff]  ;;  %v2149_v55 = vunpack.c.l.b16 %v2068_v21  ;;  %v2072_v4 = vpack.c.bf16 %v2040_v57, %v2040_v57  ;;  %v1350_v39 = vld [vmem:[#allocation2 + $0x92] sm:$0xff] }
  0x72   : > { %v1689_v18 = vld [vmem:[#allocation2 + $0x50] sm:$0xff]  ;;  %v1720_v20 = vpack.c.bf16 %v1688_v12, %v1688_v12  ;;  %v2150_v19 = vunpack.c.l.b16 %v2069_v48  ;;  %v2151_v12 = vunpack.c.l.b16 %v2070_v11  ;;  %v4578_v34 = vld [vmem:[%s5916_s3 + $0x158] sm:$0xff] }
  0x73   : > { %1257 = vmatmul.bf16.vlgmr.msrb.gmra.mxu1 %v1169_v50  ;;  %v1721_v23 = vpack.c.bf16 %v1689_v18, %v1689_v18  ;;  %v1344_v0 = vld [vmem:[#allocation2 + $0x4a] sm:$0xff]  ;;  %v1345_v30 = vld [vmem:[#allocation2 + $0x52] sm:$0xff]  ;;  %v1346_v50 = vld [vmem:[#allocation2 + $0x62] sm:$0xff] }
  0x74   : > { %v1801_v24 = vunpack.c.l.b16 %v1720_v20  ;;  %v1376_v49 = vpack.c.bf16 %v1344_v0, %v1344_v0  ;;  %v1377_v52 = vpack.c.bf16 %v1345_v30, %v1345_v30  ;;  %v1378_v58 = vpack.c.bf16 %v1346_v50, %v1346_v50  ;;  %v4587_v20 = vld [vmem:[%s5916_s3 + $0x1a0] sm:$0xff]  ;;  %v1694_v0 = vld [vmem:[#allocation2 + $0x90] sm:$0xff]  ;;  %v1695_v30 = vld [vmem:[#allocation2 + $0x98] sm:$0xff]  ;;  %2605 = vmatpush.bf16.msra.mxu1 %v4578_v34 }
  0x75   : > { %v1802_v17 = vunpack.c.l.b16 %v1721_v23  ;;  %v2178_v15 = vpack.c.b16 %v2150_v19, %v2149_v55  ;;  %2951 = vmatpush.bf16.msra.mxu2 %v4587_v20  ;;  %v1382_v50 = vpack.c.bf16 %v1350_v39, %v1350_v39  ;;  %v2045_v57 = vld [vmem:[#allocation2 + $0xc9] sm:$0xff] }
  0x76   : > { %1571 = vmatmul.bf16.vlgmr.msrb.gmra.mxu2 %v1483_v47  ;;  %v1457_v32 = vunpack.c.l.b16 %v1376_v49  ;;  %v1458_v53 = vunpack.c.l.b16 %v1377_v52  ;;  %v1459_v60 = vunpack.c.l.b16 %v1378_v58  ;;  %v1726_v49 = vpack.c.bf16 %v1694_v0, %v1694_v0  ;;  %v1354_v39 = vld [vmem:[#allocation2 + $0xc2] sm:$0xff] }
  0x77   : > { %v1831_v31 = vpack.c.b16 %v1802_v17, %v1801_v24  ;;  %v1727_v52 = vpack.c.bf16 %v1695_v30, %v1695_v30  ;;  %v1463_v19 = vunpack.c.l.b16 %v1382_v50  ;;  %v4602_v50 = vld [vmem:[%s5916_s3 + $0x218] sm:$0xff] }
  0x78   : > { %v1486_v8 = vpack.c.b16 %v1458_v53, %v1457_v32  ;;  %v1807_v22 = vunpack.c.l.b16 %v1726_v49 }
  0x79   : > { %v1808_v59 = vunpack.c.l.b16 %v1727_v52 }
  0x7b   : > { %v1834_v48 = vpack.c.b16 %v1808_v59, %v1807_v22 }
  0x7e   : > { %1917 = vmatmul.bf16.vlgmr.msrb.gmra.mxu3 %v1829_v61 }
  0x81   : > { %2263 = vmatmul.bf16.vlgmr.msrb.gmra.mxu0 %v5386_v46  ;;  %v1342_v46 = vld [vmem:[#allocation2 + $0x32] sm:$0xff] }
  0x82   : > { %v1374_v26 = vpack.c.bf16 %v1342_v46, %v1342_v46 }
  0x83   : > { %1262 = vmatmul.bf16.gmra.mxu1 %v1829_v61  ;;  %v1692_v61 = vld [vmem:[#allocation2 + $0x78] sm:$0xff] }
  0x84   : > { %v1455_v56 = vunpack.c.l.b16 %v1374_v26  ;;  %v1724_v2 = vpack.c.bf16 %v1692_v61, %v1692_v61  ;;  %v1697_v61 = vld [vmem:[#allocation2 + $0xb0] sm:$0xff] }
  0x86   : > { %1576 = vmatmul.bf16.gmra.mxu2 %v1484_v3  ;;  %v1485_v14 = vpack.c.b16 %v1456_v42, %v1455_v56  ;;  %v2039_v3 = vld [vmem:[#allocation2 + $0x81] sm:$0xff]  ;;  %v1805_v35 = vunpack.c.l.b16 %v1724_v2  ;;  %v1380_v56 = vpack.c.bf16 %v1348_v45, %v1348_v45  ;;  %v1729_v2 = vpack.c.bf16 %v1697_v61, %v1697_v61  ;;  %v1353_v45 = vld [vmem:[#allocation2 + $0xb2] sm:$0xff] }
  0x87   : > { %v2071_v41 = vpack.c.bf16 %v2039_v3, %v2039_v3 }
  0x88   : > { %v1833_v13 = vpack.c.b16 %v1806_v33, %v1805_v35  ;;  %v1461_v24 = vunpack.c.l.b16 %v1380_v56  ;;  %v1810_v35 = vunpack.c.l.b16 %v1729_v2  ;;  %v1385_v56 = vpack.c.bf16 %v1353_v45, %v1353_v45  ;;  %v1701_v2 = vld [vmem:[#allocation2 + $0xe0] sm:$0xff] }
  0x89   : > { %v2152_v18 = vunpack.c.l.b16 %v2071_v41  ;;  %v1352_v41 = vld [vmem:[#allocation2 + $0xaa] sm:$0xff] }
  0x8a   : > { %v1466_v20 = vunpack.c.l.b16 %v1385_v56 }
  0x8e   : > { %1922 = vmatmul.bf16.gmra.mxu3 %v1830_v36 }
  0x91   : > { %2268 = vmatmul.bf16.gmra.mxu0 %v5489_v27  ;;  %v1722_v27 = vpack.c.bf16 %v1690_v25, %v1690_v25  ;;  %v4595_v25 = vld [vmem:[%s5916_s3 + $0x1e0] sm:$0xff] }
  0x92   : > { %3297 = vmatpush.bf16.msra.mxu3 %v4595_v25  ;;  %v4594_v25 = vld [vmem:[%s5916_s3 + $0x1d8] sm:$0xff] }
  0x93   : > { %1267 = vmatmul.bf16.gmra.mxu1 %v1830_v36  ;;  %v1803_v16 = vunpack.c.l.b16 %v1722_v27  ;;  %v1349_v36 = vld [vmem:[#allocation2 + $0x82] sm:$0xff] }
  0x94   : > { %v1381_v42 = vpack.c.bf16 %v1349_v36, %v1349_v36  ;;  %v4603_v27 = vld [vmem:[%s5916_s3 + $0x220] sm:$0xff] }
  0x95   : > { %v1832_v10 = vpack.c.b16 %v1804_v40, %v1803_v16  ;;  %3643 = vmatpush.bf16.msra.mxu0 %v4603_v27  ;;  %v1351_v16 = vld [vmem:[#allocation2 + $0x9a] sm:$0xff] }
  0x96   : > { %1581 = vmatmul.bf16.gmra.mxu2 %v1485_v14  ;;  %v1462_v17 = vunpack.c.l.b16 %v1381_v42  ;;  %v2044_v27 = vld [vmem:[#allocation2 + $0xc1] sm:$0xff]  ;;  %3298 = vmatpush.bf16.msra.mxu3 %v4594_v25 }
  0x98   : > { %v1488_v32 = vpack.c.b16 %v1462_v17, %v1461_v24  ;;  %v1698_v24 = vld [vmem:[#allocation2 + $0xc0] sm:$0xff]  ;;  %v1699_v17 = vld [vmem:[#allocation2 + $0xc8] sm:$0xff] }
  0x99   : > { %v1730_v49 = vpack.c.bf16 %v1698_v24, %v1698_v24  ;;  %v1731_v52 = vpack.c.bf16 %v1699_v17, %v1699_v17  ;;  %3644 = vmatpush.bf16.msra.mxu0 %v4602_v50 }
  0x9b   : > { %v1812_v22 = vunpack.c.l.b16 %v1731_v52  ;;  %v1356_v52 = vld [vmem:[#allocation2 + $0xda] sm:$0xff] }
  0x9e   : > { %1927 = vmatmul.bf16.gmra.mxu3 %v1831_v31 }
  0xa1   : > { %2273 = vmatmul.bf16.gmra.mxu0 %v5544_v29  ;;  %v1347_v29 = vld [vmem:[#allocation2 + $0x6a] sm:$0xff] }
  0xa2   : > { %v1379_v47 = vpack.c.bf16 %v1347_v29, %v1347_v29  ;;  %v1383_v29 = vpack.c.bf16 %v1351_v16, %v1351_v16  ;;  %v1355_v16 = vld [vmem:[#allocation2 + $0xca] sm:$0xff] }
  0xa3   : > { %1272 = vmatmul.bf16.gmra.mxu1 %v1831_v31  ;;  %v2179_v31 = vpack.c.b16 %v2152_v18, %v2151_v12 }
  0xa4   : > { %v1460_v6 = vunpack.c.l.b16 %v1379_v47 }
  0xa6   : > { %1586 = vmatmul.bf16.gmra.mxu2 %v1486_v8  ;;  %v1487_v1 = vpack.c.b16 %v1460_v6, %v1459_v60  ;;  %v2041_v8 = vld [vmem:[#allocation2 + $0x99] sm:$0xff]  ;;  %v1464_v60 = vunpack.c.l.b16 %v1383_v29  ;;  %v1696_v6 = vld [vmem:[#allocation2 + $0xa8] sm:$0xff] }
  0xa7   : > { %v2073_v38 = vpack.c.bf16 %v2041_v8, %v2041_v8  ;;  %v1811_v8 = vunpack.c.l.b16 %v1730_v49 }
  0xa8   : > { %v5574_v28 = vpop.f32.mrf.mxu1  ;;  %v1489_v51 = vpack.c.b16 %v1464_v60, %v1463_v19  ;;  %v1387_v19 = vpack.c.bf16 %v1355_v16, %v1355_v16 }
  0xa9   : > { %v2154_v58 = vunpack.c.l.b16 %v2073_v38  ;;  %v2077_v38 = vpack.c.bf16 %v2045_v57, %v2045_v57  ;;  %v1836_v29 = vpack.c.b16 %v1812_v22, %v1811_v8 }
  0xab   : > { %v5580_v37 = vpop.f32.mrf.mxu0 }
  0xae   : > { %1932 = vmatmul.bf16.gmra.mxu3 %v1832_v10 }
  0xb0   : > { %v5578_v63 = vpop.f32.mrf.mxu1 }
  0xb1   : > { %v5576_v44 = vpop.f32.mrf.mxu2  ;;  %2278 = vmatmul.bf16.gmra.mxu0 %v2178_v15  ;;  %v1728_v15 = vpack.c.bf16 %v1696_v6, %v1696_v6  ;;  %v2158_v6 = vunpack.c.l.b16 %v2077_v38 }
  0xb2   : > { %v5582_v5 = vpop.f32.mrf.mxu3 }
  0xb3   : > { %1277 = vmatmul.bf16.gmra.mxu1 %v1832_v10  ;;  %v5591_v23 = vpop.f32.mrf.mxu0  ;;  %v2153_v10 = vunpack.c.l.b16 %v2072_v4  ;;  %v1809_v3 = vunpack.c.l.b16 %v1728_v15  ;;  %v1700_v15 = vld [vmem:[#allocation2 + $0xd8] sm:$0xff] }
  0xb5   : > { %v2180_v62 = vpack.c.b16 %v2154_v58, %v2153_v10  ;;  %v1835_v36 = vpack.c.b16 %v1810_v35, %v1809_v3  ;;  %v1386_v58 = vpack.c.bf16 %v1354_v39, %v1354_v39  ;;  %v1388_v39 = vpack.c.bf16 %v1356_v52, %v1356_v52 }
  0xb6   : > { %1591 = vmatmul.bf16.gmra.mxu2 %v1487_v1 }
  0xb7   : > { %v1467_v61 = vunpack.c.l.b16 %v1386_v58  ;;  %v1469_v58 = vunpack.c.l.b16 %v1388_v39 }
  0xb8   : > { %v5586_v26 = vpop.f32.mrf.mxu1 }
  0xb9   : > { %v5584_v46 = vpop.f32.mrf.mxu2 }
  0xba   : > { %v5593_v14 = vpop.f32.mrf.mxu3 }
  0xbe   : > { %1937 = vmatmul.bf16.gmra.mxu3 %v1833_v13 }
  0xc0   : > { %v5597_v53 = vpop.f32.mrf.mxu1 }
  0xc1   : > { %v5595_v9 = vpop.f32.mrf.mxu2  ;;  %2283 = vmatmul.bf16.gmra.mxu0 %v2179_v31  ;;  %v4586_v31 = vld [vmem:[%s5916_s3 + $0x198] sm:$0xff] }
  0xc2   : > { %2952 = vmatpush.bf16.msra.mxu2 %v4586_v31 }
  0xc3   : > { %1282 = vmatmul.bf16.gmra.mxu1 %v1833_v13  ;;  %v1384_v13 = vpack.c.bf16 %v1352_v41, %v1352_v41 }
  0xc5   : > { %v5608_v40 = vpop.f32.mrf.mxu0  ;;  %v5610_v21 = vpop.f32.mrf.mxu3  ;;  %v1465_v18 = vunpack.c.l.b16 %v1384_v13  ;;  %v1733_v13 = vpack.c.bf16 %v1701_v2, %v1701_v2 }
  0xc6   : > { %1596 = vmatmul.bf16.gmra.mxu2 %v1488_v32 }
  0xc7   : > { %v1490_v32 = vpack.c.b16 %v1466_v20, %v1465_v18  ;;  %v2046_v18 = vld [vmem:[#allocation2 + $0xd9] sm:$0xff]  ;;  %v2047_v20 = vld [vmem:[#allocation2 + $0xe1] sm:$0xff]  ;;  %v1814_v17 = vunpack.c.l.b16 %v1733_v13 }
  0xc8   : > { %v5614_v55 = vpop.f32.mrf.mxu1  ;;  %v2078_v31 = vpack.c.bf16 %v2046_v18, %v2046_v18  ;;  %v2079_v49 = vpack.c.bf16 %v2047_v20, %v2047_v20  ;;  %v4593_v20 = vld [vmem:[%s5916_s3 + $0x1d0] sm:$0xff] }
  0xc9   : > { %v5612_v47 = vpop.f32.mrf.mxu2  ;;  %3299 = vmatpush.bf16.msra.mxu3 %v4593_v20 }
  0xca   : > { %v2159_v50 = vunpack.c.l.b16 %v2078_v31  ;;  %v2048_v31 = vld [vmem:[#allocation2 + $0xf1] sm:$0xff] }
  0xcd   : > { %v5616_v43 = vpop.f32.mrf.mxu0  ;;  %v5618_v1 = vpop.f32.mrf.mxu3 }
  0xce   : > { %1942 = vmatmul.bf16.gmra.mxu3 %v1834_v48 }
  0xd0   : > { %v5622_v11 = vpop.f32.mrf.mxu1 }
  0xd1   : > { %2288 = vmatmul.bf16.gmra.mxu0 %v2180_v62  ;;  %v1468_v62 = vunpack.c.l.b16 %v1387_v19 }
  0xd3   : > { %1287 = vmatmul.bf16.gmra.mxu1 %v1834_v48  ;;  %v5620_v33 = vpop.f32.mrf.mxu2  ;;  %v1491_v56 = vpack.c.b16 %v1468_v62, %v1467_v61 }
  0xd6   : > { %1601 = vmatmul.bf16.gmra.mxu2 %v1489_v51 }
  0xdb   : > { %v5624_v42 = vpop.f32.mrf.mxu0  ;;  %v5626_v12 = vpop.f32.mrf.mxu3 }
  0xdc   : > { %v5628_v0 = vpop.f32.mrf.mxu2 }
  0xde   : > { %1947 = vmatmul.bf16.gmra.mxu3 %v1835_v36 }
  0xe0   : > { %v5630_v30 = vpop.f32.mrf.mxu1 }
  0xe1   : > { %2293 = vmatmul.bf16.gmra.mxu0 %v5524_v7  ;;  %v2076_v7 = vpack.c.bf16 %v2044_v27, %v2044_v27 }
  0xe3   : > { %1292 = vmatmul.bf16.gmra.mxu1 %v1835_v36  ;;  %v5642_v59 = vpop.f32.mrf.mxu0  ;;  %v5644_v4 = vpop.f32.mrf.mxu3  ;;  %v2157_v60 = vunpack.c.l.b16 %v2076_v7  ;;  %v1732_v36 = vpack.c.bf16 %v1700_v15, %v1700_v15 }
  0xe5   : > { %v2182_v51 = vpack.c.b16 %v2158_v6, %v2157_v60  ;;  %v1813_v24 = vunpack.c.l.b16 %v1732_v36  ;;  %v1702_v60 = vld [vmem:[#allocation2 + $0xf0] sm:$0xff]  ;;  %v1703_v6 = vld [vmem:[#allocation2 + $0xf8] sm:$0xff] }
  0xe6   : > { %1606 = vmatmul.bf16.gmra.mxu2 %v1490_v32  ;;  %v1357_v32 = vld [vmem:[#allocation2 + $0xe2] sm:$0xff]  ;;  %v1735_v36 = vpack.c.bf16 %v1703_v6, %v1703_v6 }
  0xe7   : > { %v1837_v57 = vpack.c.b16 %v1814_v17, %v1813_v24  ;;  %v1389_v16 = vpack.c.bf16 %v1357_v32, %v1357_v32  ;;  %v4577_v24 = vld [vmem:[%s5916_s3 + $0x150] sm:$0xff] }
  0xe8   : > { %v5646_v48 = vpop.f32.mrf.mxu1  ;;  %v1816_v32 = vunpack.c.l.b16 %v1735_v36  ;;  %2606 = vmatpush.bf16.msra.mxu1 %v4577_v24 }
  0xe9   : > { %v5651_v10 = vpop.f32.mrf.mxu2  ;;  %v1470_v19 = vunpack.c.l.b16 %v1389_v16 }
  0xeb   : > { %v1492_v18 = vpack.c.b16 %v1470_v19, %v1469_v58 }
  0xee   : > { %1952 = vmatmul.bf16.gmra.mxu3 %v1836_v29  ;;  %v5653_v3 = vpop.f32.mrf.mxu0 }
  0xf0   : > { %v1258_v45 = vpop.f32.mrf.mxu1 }
  0xf1   : > { %v5655_v35 = vpop.f32.mrf.mxu3  ;;  %v5657_v41 = vpop.f32.mrf.mxu2  ;;  %2298 = vmatmul.bf16.gmra.mxu0 %v2182_v51  ;;  %v1259_v27 = vadd.f32 %v1258_v45, %v5580_v37  ;;  %v4585_v37 = vld [vmem:[%s5916_s3 + $0x190] sm:$0xff] }
  0xf2   : > { %2953 = vmatpush.bf16.msra.mxu2 %v4585_v37 }
  0xf3   : > { %1297 = vmatmul.bf16.gmra.mxu1 %v1836_v29  ;;  %v2160_v29 = vunpack.c.l.b16 %v2079_v49  ;;  %v2049_v49 = vld [vmem:[#allocation2 + $0xf9] sm:$0xff] }
  0xf5   : > { %v2183_v61 = vpack.c.b16 %v2160_v29, %v2159_v50 }
  0xf6   : > { %1611 = vmatmul.bf16.gmra.mxu2 %v1491_v56  ;;  %v5659_v25 = vpop.f32.mrf.mxu0 }
  0xf8   : > { %v1260_v22 = vpop.f32.mrf.mxu1 }
  0xf9   : > { %v5661_v34 = vpop.f32.mrf.mxu3  ;;  %v1572_v8 = vpop.f32.mrf.mxu2  ;;  %v1261_v38 = vadd.f32 %v1260_v22, %v5591_v23  ;;  %v1734_v23 = vpack.c.bf16 %v1702_v60, %v1702_v60 }
  0xfa   : > { %v1652_v7 = vadd.f32 %v1572_v8, %v1259_v27  ;;  %v2081_v27 = vpack.c.bf16 %v2049_v49, %v2049_v49  ;;  %v1359_v8 = vld [vmem:[#allocation2 + $0xfa] sm:$0xff] }
  0xfb   : > { %v1815_v52 = vunpack.c.l.b16 %v1734_v23  ;;  %v1391_v6 = vpack.c.bf16 %v1359_v8, %v1359_v8 }
  0xfd   : > { %v1838_v16 = vpack.c.b16 %v1816_v32, %v1815_v52 }
  0xfe   : > { %1957 = vmatmul.bf16.gmra.mxu3 %v1837_v57  ;;  %v2264_v62 = vpop.f32.mrf.mxu0 }
 0x100   : > { %v1263_v45 = vpop.f32.mrf.mxu1 }
 0x101   : > { %v1918_v15 = vpop.f32.mrf.mxu3  ;;  %v1574_v51 = vpop.f32.mrf.mxu2  ;;  %v1264_v56 = vadd.f32 %v1263_v45, %v5608_v40  ;;  %2303 = vmatmul.bf16.gmra.mxu0 %v2183_v61  ;;  %v2080_v40 = vpack.c.bf16 %v2048_v31, %v2048_v31  ;;  %v1705_v45 = vld [vmem:[#allocation2 + $0x110] sm:$0xff] }
 0x102   : > { %v1998_v2 = vadd.f32 %v1918_v15, %v1652_v7  ;;  %v1653_v13 = vadd.f32 %v1574_v51, %v1261_v38  ;;  %v4601_v38 = vld [vmem:[%s5916_s3 + $0x210] sm:$0xff]  ;;  %v1704_v51 = vld [vmem:[#allocation2 + $0x108] sm:$0xff] }
 0x103   : > { %1302 = vmatmul.bf16.gmra.mxu1 %v1837_v57  ;;  %v1358_v57 = vld [vmem:[#allocation2 + $0xf2] sm:$0xff]  ;;  %3645 = vmatpush.bf16.msra.mxu0 %v4601_v38  ;;  %v2161_v61 = vunpack.c.l.b16 %v2080_v40  ;;  %v1736_v24 = vpack.c.bf16 %v1704_v51, %v1704_v51  ;;  %v2050_v40 = vld [vmem:[#allocation2 + $0x109] sm:$0xff] }
 0x104   : > { %v5675_v17 = vadd.f32 %v2264_v62, %v1998_v2  ;;  %v1390_v60 = vpack.c.bf16 %v1358_v57, %v1358_v57  ;;  %v2162_v62 = vunpack.c.l.b16 %v2081_v27  ;;  %v1472_v2 = vunpack.c.l.b16 %v1391_v6  ;;  %v2051_v27 = vld [vmem:[#allocation2 + $0x111] sm:$0xff] }
 0x105   : > { %v1817_v57 = vunpack.c.l.b16 %v1736_v24  ;;  %v1360_v38 = vld [vmem:[#allocation2 + $0x10a] sm:$0xff] }
 0x106   : > { %1616 = vmatmul.bf16.gmra.mxu2 %v1492_v18  ;;  %v2266_v22 = vpop.f32.mrf.mxu0  ;;  %v1471_v37 = vunpack.c.l.b16 %v1390_v60  ;;  %v2184_v23 = vpack.c.b16 %v2162_v62, %v2161_v61  ;;  %v1392_v61 = vpack.c.bf16 %v1360_v38, %v1360_v38  ;;  %v4584_v24 = vld [vmem:[%s5916_s3 + $0x188] sm:$0xff] }
 0x107   : > { %2954 = vmatpush.bf16.msra.mxu2 %v4584_v24  ;;  %v2052_v38 = vld [vmem:[#allocation2 + $0x121] sm:$0xff]  ;;  %v1708_v24 = vld [vmem:[#allocation2 + $0x138] sm:$0xff] }
 0x108   : > { %v1265_v29 = vpop.f32.mrf.mxu1  ;;  %v1493_v52 = vpack.c.b16 %v1472_v2, %v1471_v37 }
 0x109   : > { %v1920_v7 = vpop.f32.mrf.mxu3  ;;  %v1577_v50 = vpop.f32.mrf.mxu2  ;;  %v1266_v19 = vadd.f32 %v1265_v29, %v5616_v43  ;;  %v1737_v43 = vpack.c.bf16 %v1705_v45, %v1705_v45  ;;  %v1473_v45 = vunpack.c.l.b16 %v1392_v61 }
 0x10a   : > { %v1999_v39 = vadd.f32 %v1920_v7, %v1653_v13  ;;  %v1654_v58 = vadd.f32 %v1577_v50, %v1264_v56  ;;  %v2083_v7 = vpack.c.bf16 %v2051_v27, %v2051_v27 }
 0x10b   : > { %v1818_v8 = vunpack.c.l.b16 %v1737_v43 }
 0x10c   : > { %v5681_v15 = vadd.f32 %v2266_v22, %v1999_v39  ;;  %v2082_v22 = vpack.c.bf16 %v2050_v40, %v2050_v40  ;;  %v1361_v39 = vld [vmem:[#allocation2 + $0x112] sm:$0xff]  ;;  %v2164_v2 = vunpack.c.l.b16 %v2083_v7 }
 0x10d   : > { %v1393_v62 = vpack.c.bf16 %v1361_v39, %v1361_v39  ;;  %v2053_v39 = vld [vmem:[#allocation2 + $0x129] sm:$0xff] }
 0x10e   : > { %1962 = vmatmul.bf16.gmra.mxu3 %v1838_v16  ;;  %v2269_v36 = vpop.f32.mrf.mxu0  ;;  %v2163_v37 = vunpack.c.l.b16 %v2082_v22  ;;  %v4576_v22 = vld [vmem:[%s5916_s3 + $0x148] sm:$0xff] }
 0x10f   : > { %2607 = vmatpush.bf16.msra.mxu1 %v4576_v22  ;;  %v1740_v22 = vpack.c.bf16 %v1708_v24, %v1708_v24  ;;  %v1364_v24 = vld [vmem:[#allocation2 + $0x13a] sm:$0xff] }
 0x110   : > { %v1268_v56 = vpop.f32.mrf.mxu1 }
 0x111   : > { %v1923_v13 = vpop.f32.mrf.mxu3  ;;  %v1579_v20 = vpop.f32.mrf.mxu2  ;;  %v1269_v49 = vadd.f32 %v1268_v56, %v5624_v42  ;;  %2308 = vmatmul.bf16.gmra.mxu0 %v2184_v23  ;;  %v1474_v23 = vunpack.c.l.b16 %v1393_v62 }
 0x112   : > { %v2000_v18 = vadd.f32 %v1923_v13, %v1654_v58  ;;  %v1655_v31 = vadd.f32 %v1579_v20, %v1266_v19  ;;  %v1839_v19 = vpack.c.b16 %v1818_v8, %v1817_v57  ;;  %v1707_v13 = vld [vmem:[#allocation2 + $0x128] sm:$0xff] }
 0x113   : > { %1307 = vmatmul.bf16.gmra.mxu1 %v1838_v16  ;;  %v1494_v57 = vpack.c.b16 %v1474_v23, %v1473_v45  ;;  %v4592_v8 = vld [vmem:[%s5916_s3 + $0x1c8] sm:$0xff] }
 0x114   : > { %v5684_v32 = vadd.f32 %v2269_v36, %v2000_v18  ;;  %v1706_v36 = vld [vmem:[#allocation2 + $0x120] sm:$0xff]  ;;  %v2185_v18 = vpack.c.b16 %v2164_v2, %v2163_v37  ;;  %3300 = vmatpush.bf16.msra.mxu3 %v4592_v8 }
 0x116   : > { %1621 = vmatmul.bf16.gmra.mxu2 %v1493_v52  ;;  %v2271_v50 = vpop.f32.mrf.mxu0  ;;  %v1739_v52 = vpack.c.bf16 %v1707_v13, %v1707_v13 }
 0x118   : > { %v1270_v42 = vpop.f32.mrf.mxu1 }
 0x119   : > { %v1925_v29 = vpop.f32.mrf.mxu3  ;;  %v1582_v60 = vpop.f32.mrf.mxu2  ;;  %v1271_v16 = vadd.f32 %v1270_v42, %v5642_v59 }
 0x11a   : > { %v2001_v58 = vadd.f32 %v1925_v29, %v1655_v31  ;;  %v1656_v6 = vadd.f32 %v1582_v60, %v1269_v49  ;;  %v1738_v49 = vpack.c.bf16 %v1706_v36, %v1706_v36  ;;  %v1820_v29 = vunpack.c.l.b16 %v1739_v52  ;;  %v1363_v60 = vld [vmem:[#allocation2 + $0x12a] sm:$0xff] }
 0x11b   : > { %v1395_v13 = vpack.c.bf16 %v1363_v60, %v1363_v60 }
 0x11c   : > { %v5687_v51 = vadd.f32 %v2271_v50, %v2001_v58  ;;  %v1819_v50 = vunpack.c.l.b16 %v1738_v49  ;;  %v2085_v58 = vpack.c.bf16 %v2053_v39, %v2053_v39  ;;  %v4765_v49 = vld [vmem:[%s4964_s12 + $0x78] sm:$0xff]  }
 0x11e   : > { %1967 = vmatmul.bf16.gmra.mxu3 %v1839_v19  ;;  %v2274_v20 = vpop.f32.mrf.mxu0  ;;  %v1840_v62 = vpack.c.b16 %v1820_v29, %v1819_v50  ;;  %v4884_v29 = vld [vmem:[%s5914_s1] ss:$0 sm:$0xff] }
 0x120   : > { %v1273_v31 = vpop.f32.mrf.mxu1 }
 0x121   : > { %v1928_v56 = vpop.f32.mrf.mxu3  ;;  %v1584_v59 = vpop.f32.mrf.mxu2  ;;  %v1274_v27 = vadd.f32 %v1273_v31, %v5653_v3  ;;  %2313 = vmatmul.bf16.gmra.mxu0 %v2185_v18  ;;  %v2084_v3 = vpack.c.bf16 %v2052_v38, %v2052_v38  ;;  %v1709_v31 = vld [vmem:[#allocation2 + $0x140] sm:$0xff] }
 0x122   : > { %v2002_v43 = vadd.f32 %v1928_v56, %v1656_v6  ;;  %v1657_v40 = vadd.f32 %v1584_v59, %v1271_v16  ;;  %v4600_v16 = vld [vmem:[%s5916_s3 + $0x208] sm:$0xff]  ;;  %v1476_v59 = vunpack.c.l.b16 %v1395_v13  ;;  %v1741_v50 = vpack.c.bf16 %v1709_v31, %v1709_v31 }
 0x123   : > { %1312 = vmatmul.bf16.gmra.mxu1 %v1839_v19  ;;  %v1362_v19 = vld [vmem:[#allocation2 + $0x122] sm:$0xff]  ;;  %3646 = vmatpush.bf16.msra.mxu0 %v4600_v16  ;;  %v2165_v18 = vunpack.c.l.b16 %v2084_v3 }
 0x124   : > { %v5699_v7 = vadd.f32 %v2274_v20, %v2002_v43  ;;  %v1394_v36 = vpack.c.bf16 %v1362_v19, %v1362_v19  ;;  %v2166_v20 = vunpack.c.l.b16 %v2085_v58 }
 0x126   : > { %1626 = vmatmul.bf16.gmra.mxu2 %v1494_v57  ;;  %v2276_v42 = vpop.f32.mrf.mxu0  ;;  %v1475_v43 = vunpack.c.l.b16 %v1394_v36  ;;  %v2186_v52 = vpack.c.b16 %v2166_v20, %v2165_v18  ;;  %v4670_v57 = vunpack.c.h.bf16 %v4765_v49 }
 0x128   : > { %v1275_v2 = vpop.f32.mrf.mxu1  ;;  %v395_v58 = vmul.f32 %v4884_v29, %v4670_v57  ;;  %v1495_v60 = vpack.c.b16 %v1476_v59, %v1475_v43 }
 0x129   : > { %v1930_v6 = vpop.f32.mrf.mxu3  ;;  %v1587_v37 = vpop.f32.mrf.mxu2  ;;  %v1276_v23 = vadd.f32 %v1275_v2, %v5659_v25  ;;  %v1821_v2 = vunpack.c.l.b16 %v1740_v22 }
 0x12a   : > { %v2003_v61 = vadd.f32 %v1930_v6, %v1657_v40  ;;  %v1658_v45 = vadd.f32 %v1587_v37, %v1274_v27  ;;  %v4669_v40 = vunpack.c.l.bf16 %v4765_v49  ;;  %v431_v6 = vadd.f32 %v5501_v54, %v395_v58  ;;  %v2055_v37 = vld [vmem:[#allocation2 + $0x141] sm:$0xff] }
 0x12b   : > { %v2087_v20 = vpack.c.bf16 %v2055_v37, %v2055_v37 }
 0x12c   : > { %v5705_v56 = vadd.f32 %v2276_v42, %v2003_v61  ;;  %v394_v3 = vmul.f32 %v4884_v29, %v4669_v40  ;;  %v2054_v61 = vld [vmem:[#allocation2 + $0x139] sm:$0xff]  ;;  %v495_v13 = vmin.f32 %v431_v6, 0.0  ;;  %v1710_v29 = vld [vmem:[#allocation2 + $0x150] sm:$0xff]  ;;  %vm463_vm15 = vcmp.gt.f32.partialorder %v431_v6, 0.0 }
 0x12d   : > { %v2086_v18 = vpack.c.bf16 %v2054_v61, %v2054_v61 }
 0x12e   : > { %1972 = vmatmul.bf16.gmra.mxu3 %v1840_v62  ;;  %v2279_v8 = vpop.f32.mrf.mxu0  ;;  %v430_v42 = vadd.f32 %v5501_v54, %v394_v3  ;;  %v558_v59 = vmul.f32 1.442695, %v495_v13  ;;  %v1711_v3 = vld [vmem:[#allocation2 + $0x158] sm:$0xff]  ;;  %v4583_v13 = vld [vmem:[%s5916_s3 + $0x180] sm:$0xff] }
 0x12f   : > { %2955 = vmatpush.bf16.msra.mxu2 %v4583_v13 }
 0x130   : > { %v1278_v39 = vpop.f32.mrf.mxu1  ;;  %v494_v36 = vmin.f32 %v430_v42, 0.0  ;;  %vm462_vm14 = vcmp.gt.f32.partialorder %v430_v42, 0.0 }
 0x131   : > { %v1933_v27 = vpop.f32.mrf.mxu3  ;;  %v1589_v38 = vpop.f32.mrf.mxu2  ;;  %2318 = vmatmul.bf16.gmra.mxu0 %v2186_v52  ;;  %v1279_v49 = vadd.f32 %v1278_v39, %v5574_v28 }
 0x132   : > { %v2004_v25 = vadd.f32 %v1933_v27, %v1658_v45  ;;  %v1659_v19 = vadd.f32 %v1589_v38, %v1276_v23  ;;  %v1822_v45 = vunpack.c.l.b16 %v1741_v50  ;;  %v1365_v23 = vld [vmem:[#allocation2 + $0x142] sm:$0xff]  ;;  %v556_v43 = vmul.f32 1.442695, %v494_v36 }
 0x133   : > { %1317 = vmatmul.bf16.gmra.mxu1 %v1840_v62  ;;  %v1396_v27 = vpack.c.bf16 %v1364_v24, %v1364_v24  ;;  %v1397_v22 = vpack.c.bf16 %v1365_v23, %v1365_v23  ;;  %v2168_v38 = vunpack.c.l.b16 %v2087_v20  ;;  %v1743_v36 = vpack.c.bf16 %v1711_v3, %v1711_v3 }
 0x134   : > { %v5713_v16 = vadd.f32 %v2279_v8, %v2004_v25  ;;  %v1841_v52 = vpack.c.b16 %v1822_v45, %v1821_v2  ;;  %4877 = vpow2.f32 %v556_v43  ;;  %v2167_v25 = vunpack.c.l.b16 %v2086_v18 }
 0x135   : > { %4879 = vpow2.f32 %v558_v59  ;;  %v1477_v58 = vunpack.c.l.b16 %v1396_v27  ;;  %v1742_v45 = vpack.c.bf16 %v1710_v29, %v1710_v29 }
 0x136   : > { %1631 = vmatmul.bf16.gmra.mxu2 %v1495_v60  ;;  %v2281_v62 = vpop.f32.mrf.mxu0  ;;  %v1478_v60 = vunpack.c.l.b16 %v1397_v22  ;;  %v2187_v28 = vpack.c.b16 %v2168_v38, %v2167_v25  ;;  %v1366_v25 = vld [vmem:[#allocation2 + $0x152] sm:$0xff]  ;;  %v1367_v38 = vld [vmem:[#allocation2 + $0x15a] sm:$0xff] }
 0x138   : > { %v1280_v57 = vpop.f32.mrf.mxu1 }
 0x139   : > { %v1935_v31 = vpop.f32.mrf.mxu3  ;;  %v1592_v40 = vpop.f32.mrf.mxu2  ;;  %v1281_v2 = vadd.f32 %v1280_v57, %v5578_v63  ;;  %v4591_v63 = vld [vmem:[%s5916_s3 + $0x1c0] sm:$0xff]  ;;  %v2056_v57 = vld [vmem:[#allocation2 + $0x151] sm:$0xff] }
 0x13a   : > { %v2005_v54 = vadd.f32 %v1935_v31, %v1659_v19  ;;  %v1660_v8 = vadd.f32 %v1592_v40, %v1279_v49  ;;  %v4878_v61 = vpop.eup %4877  ;;  %v4575_v49 = vld [vmem:[%s5916_s3 + $0x140] sm:$0xff]  ;;  %3301 = vmatpush.bf16.msra.mxu3 %v4591_v63  ;;  %v2088_v27 = vpack.c.bf16 %v2056_v57, %v2056_v57 }
 0x13b   : > { %v4880_v39 = vpop.eup %4879  ;;  %v4113_v18 = vadd.f32 -1.0, %v4878_v61  ;;  %2608 = vmatpush.bf16.msra.mxu1 %v4575_v49 }
 0x13c   : > { %v5716_v50 = vadd.f32 %v2281_v62, %v2005_v54  ;;  %v4114_v43 = vadd.f32 -1.0, %v4880_v39  ;;  %v1496_v62 = vpack.c.b16 %v1478_v60, %v1477_v58  ;;  %v4599_v58 = vld [vmem:[%s5916_s3 + $0x200] sm:$0xff] }
 0x13d   : > { %v5722_v31 = vsel %vm462_vm14, %v430_v42, %v4113_v18  ;;  %v1823_v42 = vunpack.c.l.b16 %v1742_v45  ;;  %3647 = vmatpush.bf16.msra.mxu0 %v4599_v58  ;;  %v2169_v45 = vunpack.c.l.b16 %v2088_v27 }
 0x13e   : > { %1977 = vmatmul.bf16.gmra.mxu3 %v1841_v52  ;;  %v2284_v19 = vpop.f32.mrf.mxu0  ;;  %v5730_v54 = vsel %vm463_vm15, %v431_v6, %v4114_v43  ;;  %709 = vst [vmem:[#allocation2 + $0x181] sm:$0xff] %v5722_v31 }
 0x13f   : > { %710 = vst [vmem:[#allocation2 + $0x189] sm:$0xff] %v5730_v54 }
 0x140   : > { %v1283_v23 = vpop.f32.mrf.mxu1 }
 0x141   : > { %v1938_v37 = vpop.f32.mrf.mxu3  ;;  %v1594_v24 = vpop.f32.mrf.mxu2  ;;  %2323 = vmatmul.bf16.gmra.mxu0 %v2187_v28  ;;  %v1284_v3 = vadd.f32 %v1283_v23, %v5586_v26  ;;  %v1712_v26 = vld [vmem:[#allocation2 + $0x168] sm:$0xff] }
 0x142   : > { %v2006_v20 = vadd.f32 %v1938_v37, %v1660_v8  ;;  %v1661_v59 = vadd.f32 %v1594_v24, %v1281_v2  ;;  %v2057_v8 = vld [vmem:[#allocation2 + $0x159] sm:$0xff]  ;;  %v1398_v37 = vpack.c.bf16 %v1366_v25, %v1366_v25  ;;  %v1399_v2 = vpack.c.bf16 %v1367_v38, %v1367_v38  ;;  %v1713_v24 = vld [vmem:[#allocation2 + $0x170] sm:$0xff] }
 0x143   : > { %1322 = vmatmul.bf16.gmra.mxu1 %v1841_v52  ;;  %v1824_v52 = vunpack.c.l.b16 %v1743_v36  ;;  %v2089_v22 = vpack.c.bf16 %v2057_v8, %v2057_v8  ;;  %v1744_v8 = vpack.c.bf16 %v1712_v26, %v1712_v26  ;;  %v2058_v25 = vld [vmem:[#allocation2 + $0x169] sm:$0xff]  ;;  %v2059_v38 = vld [vmem:[#allocation2 + $0x171] sm:$0xff] }
 0x144   : > { %v5733_v40 = vadd.f32 %v2284_v19, %v2006_v20  ;;  %v1479_v18 = vunpack.c.l.b16 %v1398_v37  ;;  %v1480_v20 = vunpack.c.l.b16 %v1399_v2  ;;  %v2091_v58 = vpack.c.bf16 %v2059_v38, %v2059_v38 }
 0x145   : > { %v1842_v61 = vpack.c.b16 %v1824_v52, %v1823_v42  ;;  %v2170_v36 = vunpack.c.l.b16 %v2089_v22  ;;  %v1745_v42 = vpack.c.bf16 %v1713_v24, %v1713_v24 }
 0x146   : > { %1636 = vmatmul.bf16.gmra.mxu2 %v1496_v62  ;;  %v2286_v29 = vpop.f32.mrf.mxu0  ;;  %v1497_v27 = vpack.c.b16 %v1480_v20, %v1479_v18  ;;  %v2172_v24 = vunpack.c.l.b16 %v2091_v58  ;;  %v2376_v58 = vld [vmem:[#allocation2 + $0x1a] sm:$0xff] }
 0x147   : > { %v2188_v23 = vpack.c.b16 %v2170_v36, %v2169_v45 }
 0x148   : > { %v1285_v39 = vpop.f32.mrf.mxu1 }
 0x149   : > { %v1940_v6 = vpop.f32.mrf.mxu3  ;;  %v1597_v28 = vpop.f32.mrf.mxu2 }
 0x14a   : > { %v2007_v60 = vadd.f32 %v1940_v6, %v1661_v59  ;;  %v1662_v19 = vadd.f32 %v1597_v28, %v1284_v3  ;;  %v1286_v59 = vadd.f32 %v1285_v39, %v5597_v53  ;;  %v1826_v6 = vunpack.c.l.b16 %v1745_v42  ;;  %v1369_v53 = vld [vmem:[#allocation2 + $0x172] sm:$0xff] }
 0x14b   : > { %v2090_v3 = vpack.c.bf16 %v2058_v25, %v2058_v25  ;;  %v1401_v20 = vpack.c.bf16 %v1369_v53, %v1369_v53 }
 0x14c   : > { %v5740_v13 = vadd.f32 %v2286_v29, %v2007_v60  ;;  %v1825_v29 = vunpack.c.l.b16 %v1744_v8  ;;  %v1368_v60 = vld [vmem:[#allocation2 + $0x16a] sm:$0xff] }
 0x14d   : > { %v1400_v18 = vpack.c.bf16 %v1368_v60, %v1368_v60  ;;  %v2171_v26 = vunpack.c.l.b16 %v2090_v3  ;;  %v2377_v60 = vld [vmem:[#allocation2 + $0x22] sm:$0xff] }
 0x14e   : > { %1982 = vmatmul.bf16.gmra.mxu3 %v1842_v61  ;;  %v2289_v43 = vpop.f32.mrf.mxu0  ;;  %v1843_v2 = vpack.c.b16 %v1826_v6, %v1825_v29 }
 0x150   : > { %v1288_v57 = vpop.f32.mrf.mxu1 }
 0x151   : > { %v1943_v62 = vpop.f32.mrf.mxu3  ;;  %v1599_v49 = vpop.f32.mrf.mxu2  ;;  %2328 = vmatmul.bf16.gmra.mxu0 %v2188_v23 }
 0x152   : > { %v2008_v63 = vadd.f32 %v1943_v62, %v1662_v19  ;;  %v1663_v52 = vadd.f32 %v1599_v49, %v1286_v59  ;;  %v1289_v19 = vadd.f32 %v1288_v57, %v5614_v55  ;;  %v1482_v62 = vunpack.c.l.b16 %v1401_v20  ;;  %v1714_v59 = vld [vmem:[#allocation2 + $0x180] sm:$0xff] }
 0x153   : > { %1327 = vmatmul.bf16.gmra.mxu1 %v1842_v61  ;;  %v2189_v49 = vpack.c.b16 %v2172_v24, %v2171_v26  ;;  %v1746_v25 = vpack.c.bf16 %v1714_v59, %v1714_v59 }
 0x154   : > { %v5743_v22 = vadd.f32 %v2289_v43, %v2008_v63  ;;  %v1481_v43 = vunpack.c.l.b16 %v1400_v18  ;;  %v1715_v63 = vld [vmem:[#allocation2 + $0x188] sm:$0xff] }
 0x155   : > { %v1747_v38 = vpack.c.bf16 %v1715_v63, %v1715_v63  ;;  %v1827_v53 = vunpack.c.l.b16 %v1746_v25  ;;  %v3070_v25 = vld [vmem:[#allocation2 + $0x39] sm:$0xff] }
 0x156   : > { %1641 = vmatmul.bf16.gmra.mxu2 %v1497_v27  ;;  %v2291_v28 = vpop.f32.mrf.mxu0  ;;  %v1498_v6 = vpack.c.b16 %v1482_v62, %v1481_v43 }
 0x158   : > { %v1290_v36 = vpop.f32.mrf.mxu1 }
 0x159   : > { %v1945_v39 = vpop.f32.mrf.mxu3  ;;  %v1602_v45 = vpop.f32.mrf.mxu2  ;;  %v1291_v55 = vadd.f32 %v1290_v36, %v5622_v11  ;;  %v2093_v11 = vpack.c.bf16 %v5730_v54, %v5730_v54  ;;  %v2724_v36 = vld [vmem:[#allocation2 + $0x38] sm:$0xff] }
 0x15a   : > { %v2009_v37 = vadd.f32 %v1945_v39, %v1663_v52  ;;  %v1664_v61 = vadd.f32 %v1602_v45, %v1289_v19  ;;  %v2092_v39 = vpack.c.bf16 %v5722_v31, %v5722_v31  ;;  %v2408_v19 = vpack.c.bf16 %v2376_v58, %v2376_v58  ;;  %v2723_v45 = vld [vmem:[#allocation2 + $0x30] sm:$0xff] }
 0x15b   : > { %v2755_v63 = vpack.c.bf16 %v2723_v45, %v2723_v45  ;;  %v2174_v31 = vunpack.c.l.b16 %v2093_v11  ;;  %v3415_v45 = vld [vmem:[#allocation2 + $0x32] sm:$0xff] }
 0x15c   : > { %v5746_v23 = vadd.f32 %v2291_v28, %v2009_v37  ;;  %v1828_v28 = vunpack.c.l.b16 %v1747_v38  ;;  %v2409_v37 = vpack.c.bf16 %v2377_v60, %v2377_v60  ;;  %v2173_v62 = vunpack.c.l.b16 %v2092_v39 }
 0x15d   : > { %v3102_v39 = vpack.c.bf16 %v3070_v25, %v3070_v25 }
 0x15e   : > { %1987 = vmatmul.bf16.gmra.mxu3 %v1843_v2  ;;  %v2294_v8 = vpop.f32.mrf.mxu0  ;;  %v1844_v26 = vpack.c.b16 %v1828_v28, %v1827_v53  ;;  %v2190_v38 = vpack.c.b16 %v2174_v31, %v2173_v62 }
 0x160   : > { %v1293_v27 = vpop.f32.mrf.mxu1 }
 0x161   : > { %v1948_v42 = vpop.f32.mrf.mxu3  ;;  %v1604_v52 = vpop.f32.mrf.mxu2  ;;  %2333 = vmatmul.bf16.gmra.mxu0 %v2189_v49  ;;  %v2756_v49 = vpack.c.bf16 %v2724_v36, %v2724_v36  ;;  %v3416_v36 = vld [vmem:[#allocation2 + $0x3a] sm:$0xff] }
 0x162   : > { %v2010_v57 = vadd.f32 %v1948_v42, %v1664_v61  ;;  %v1665_v29 = vadd.f32 %v1604_v52, %v1291_v55  ;;  %v2490_v42 = vunpack.c.l.b16 %v2409_v37  ;;  %v2836_v55 = vunpack.c.l.b16 %v2755_v63  ;;  %v3069_v52 = vld [vmem:[#allocation2 + $0x31] sm:$0xff] }
 0x163   : > { %1332 = vmatmul.bf16.gmra.mxu1 %v1843_v2  ;;  %v1294_v2 = vadd.f32 %v1293_v27, %v5630_v30  ;;  %v3101_v28 = vpack.c.bf16 %v3069_v52, %v3069_v52 }
 0x164   : > { %v5749_v3 = vadd.f32 %v2294_v8, %v2010_v57  ;;  %v2489_v8 = vunpack.c.l.b16 %v2408_v19  ;;  %v2837_v57 = vunpack.c.l.b16 %v2756_v49 }
 0x166   : > { %1646 = vmatmul.bf16.gmra.mxu2 %v1498_v6  ;;  %v2296_v61 = vpop.f32.mrf.mxu0  ;;  %v2521_v30 = vpack.c.b16 %v2490_v42, %v2489_v8  ;;  %v2868_v19 = vpack.c.b16 %v2837_v57, %v2836_v55 }
 0x168   : > { %v1295_v43 = vpop.f32.mrf.mxu1 }
 0x169   : > { %v1950_v18 = vpop.f32.mrf.mxu3  ;;  %v1607_v24 = vpop.f32.mrf.mxu2  ;;  %v1296_v6 = vadd.f32 %v1295_v43, %v5646_v48  ;;  %v2726_v48 = vld [vmem:[#allocation2 + $0x50] sm:$0xff] }
 0x16a   : > { %v2011_v20 = vadd.f32 %v1950_v18, %v1665_v29  ;;  %v1666_v59 = vadd.f32 %v1607_v24, %v1294_v2  ;;  %v3183_v18 = vunpack.c.l.b16 %v3102_v39  ;;  %v3447_v2 = vpack.c.bf16 %v3415_v45, %v3415_v45 }
 0x16b   : > { %v2758_v55 = vpack.c.bf16 %v2726_v48, %v2726_v48 }
 0x16c   : > { %v5756_v54 = vadd.f32 %v2296_v61, %v2011_v20  ;;  %v3182_v61 = vunpack.c.l.b16 %v3101_v28  ;;  %v3448_v20 = vpack.c.bf16 %v3416_v36, %v3416_v36  ;;  %v3528_v57 = vunpack.c.l.b16 %v3447_v2  ;;  %v3418_v2 = vld [vmem:[#allocation2 + $0x52] sm:$0xff] }
 0x16e   : > { %1992 = vmatmul.bf16.gmra.mxu3 %v1844_v26  ;;  %v2299_v27 = vpop.f32.mrf.mxu0  ;;  %v2725_v26 = vld [vmem:[#allocation2 + $0x48] sm:$0xff]  ;;  %v3214_v63 = vpack.c.b16 %v3183_v18, %v3182_v61  ;;  %v3529_v52 = vunpack.c.l.b16 %v3448_v20 }
 0x16f   : > { %v2757_v42 = vpack.c.bf16 %v2725_v26, %v2725_v26  ;;  %v3417_v18 = vld [vmem:[#allocation2 + $0x4a] sm:$0xff] }
 0x170   : > { %v1298_v53 = vpop.f32.mrf.mxu1  ;;  %v3449_v48 = vpack.c.bf16 %v3417_v18, %v3417_v18 }
 0x171   : > { %v1953_v29 = vpop.f32.mrf.mxu3  ;;  %v1609_v60 = vpop.f32.mrf.mxu2  ;;  %2338 = vmatmul.bf16.gmra.mxu0 %v2190_v38  ;;  %v1299_v62 = vadd.f32 %v1298_v53, %v5576_v44  ;;  %v2838_v38 = vunpack.c.l.b16 %v2757_v42 }
 0x172   : > { %v2012_v58 = vadd.f32 %v1953_v29, %v1666_v59  ;;  %v1667_v11 = vadd.f32 %v1609_v60, %v1296_v6  ;;  %v3072_v29 = vld [vmem:[#allocation2 + $0x51] sm:$0xff]  ;;  %v3560_v6 = vpack.c.b16 %v3529_v52, %v3528_v57 }
 0x173   : > { %2609 = vmatmul.bf16.vlgmr.msra.gmra.mxu1 %v2521_v30  ;;  %v2839_v30 = vunpack.c.l.b16 %v2758_v55 }
 0x174   : > { %v5759_v37 = vadd.f32 %v2299_v27, %v2012_v58  ;;  %v3071_v27 = vld [vmem:[#allocation2 + $0x49] sm:$0xff] }
 0x175   : > { %v2869_v36 = vpack.c.b16 %v2839_v30, %v2838_v38  ;;  %v3530_v38 = vunpack.c.l.b16 %v3449_v48  ;;  %v3420_v48 = vld [vmem:[#allocation2 + $0x6a] sm:$0xff] }
 0x176   : > { %2956 = vmatmul.bf16.vlgmr.msra.gmra.mxu2 %v2868_v19  ;;  %v2301_v24 = vpop.f32.mrf.mxu0  ;;  %v3104_v19 = vpack.c.bf16 %v3072_v29, %v3072_v29 }
 0x178   : > { %v1300_v31 = vpop.f32.mrf.mxu1  ;;  %v3185_v26 = vunpack.c.l.b16 %v3104_v19 }
 0x179   : > { %v1955_v43 = vpop.f32.mrf.mxu3  ;;  %v1612_v49 = vpop.f32.mrf.mxu2  ;;  %v1301_v44 = vadd.f32 %v1300_v31, %v5584_v46  ;;  %v2728_v46 = vld [vmem:[#allocation2 + $0x68] sm:$0xff] }
 0x17a   : > { %v2013_v59 = vadd.f32 %v1955_v43, %v1667_v11  ;;  %v1668_v8 = vadd.f32 %v1612_v49, %v1299_v62  ;;  %v3103_v11 = vpack.c.bf16 %v3071_v27, %v3071_v27  ;;  %v2727_v43 = vld [vmem:[#allocation2 + $0x60] sm:$0xff]  ;;  %v2760_v52 = vpack.c.bf16 %v2728_v46, %v2728_v46 }
 0x17b   : > { %v2759_v57 = vpack.c.bf16 %v2727_v43, %v2727_v43 }
 0x17c   : > { %v5762_v25 = vadd.f32 %v2301_v24, %v2013_v59  ;;  %v3184_v20 = vunpack.c.l.b16 %v3103_v11  ;;  %v3450_v24 = vpack.c.bf16 %v3418_v2, %v3418_v2 }
 0x17d   : > { %v2840_v29 = vunpack.c.l.b16 %v2759_v57 }
 0x17e   : > { %3302 = vmatmul.bf16.vlgmr.msra.gmra.mxu3 %v3214_v63  ;;  %v2304_v58 = vpop.f32.mrf.mxu0  ;;  %v3215_v31 = vpack.c.b16 %v3185_v26, %v3184_v20  ;;  %v3531_v30 = vunpack.c.l.b16 %v3450_v24  ;;  %v3419_v26 = vld [vmem:[#allocation2 + $0x62] sm:$0xff] }
 0x17f   : > { %v3451_v46 = vpack.c.bf16 %v3419_v26, %v3419_v26 }
 0x180   : > { %v1303_v39 = vpop.f32.mrf.mxu1 }
 0x181   : > { %v1958_v60 = vpop.f32.mrf.mxu3  ;;  %v1614_v28 = vpop.f32.mrf.mxu2  ;;  %3648 = vmatmul.bf16.vlgmr.msra.gmra.mxu0 %v3560_v6  ;;  %v1304_v63 = vadd.f32 %v1303_v39, %v5595_v9 }
 0x182   : > { %v2014_v53 = vadd.f32 %v1958_v60, %v1668_v8  ;;  %v1669_v45 = vadd.f32 %v1614_v28, %v1301_v44  ;;  %v3074_v60 = vld [vmem:[#allocation2 + $0x69] sm:$0xff]  ;;  %v3561_v44 = vpack.c.b16 %v3531_v30, %v3530_v38 }
 0x183   : > { %2614 = vmatmul.bf16.gmra.mxu1 %v3560_v6  ;;  %v2841_v6 = vunpack.c.l.b16 %v2760_v52 }
 0x184   : > { %v5765_v61 = vadd.f32 %v2304_v58, %v2014_v53  ;;  %v3073_v58 = vld [vmem:[#allocation2 + $0x61] sm:$0xff] }
 0x185   : > { %v2870_v2 = vpack.c.b16 %v2841_v6, %v2840_v29  ;;  %v3532_v29 = vunpack.c.l.b16 %v3451_v46  ;;  %v3422_v46 = vld [vmem:[#allocation2 + $0x82] sm:$0xff] }
 0x186   : > { %2961 = vmatmul.bf16.gmra.mxu2 %v2869_v36  ;;  %v2306_v62 = vpop.f32.mrf.mxu0  ;;  %v3106_v36 = vpack.c.bf16 %v3074_v60, %v3074_v60 }
 0x188   : > { %v1305_v42 = vpop.f32.mrf.mxu1  ;;  %v3187_v43 = vunpack.c.l.b16 %v3106_v36 }
 0x189   : > { %v1960_v59 = vpop.f32.mrf.mxu3  ;;  %v1617_v8 = vpop.f32.mrf.mxu2  ;;  %v1306_v9 = vadd.f32 %v1305_v42, %v5612_v47  ;;  %v2730_v47 = vld [vmem:[#allocation2 + $0x80] sm:$0xff] }
 0x18a   : > { %v2015_v49 = vadd.f32 %v1960_v59, %v1669_v45  ;;  %v1670_v55 = vadd.f32 %v1617_v8, %v1304_v63  ;;  %v3105_v45 = vpack.c.bf16 %v3073_v58, %v3073_v58  ;;  %v2729_v59 = vld [vmem:[#allocation2 + $0x78] sm:$0xff]  ;;  %v2762_v30 = vpack.c.bf16 %v2730_v47, %v2730_v47 }
 0x18b   : > { %v2761_v38 = vpack.c.bf16 %v2729_v59, %v2729_v59 }
 0x18c   : > { %v5768_v27 = vadd.f32 %v2306_v62, %v2015_v49  ;;  %v3186_v24 = vunpack.c.l.b16 %v3105_v45  ;;  %v3452_v62 = vpack.c.bf16 %v3420_v48, %v3420_v48 }
 0x18d   : > { %v2842_v60 = vunpack.c.l.b16 %v2761_v38 }
 0x18e   : > { %3307 = vmatmul.bf16.gmra.mxu3 %v3215_v31  ;;  %v2309_v53 = vpop.f32.mrf.mxu0  ;;  %v3216_v42 = vpack.c.b16 %v3187_v43, %v3186_v24  ;;  %v3533_v6 = vunpack.c.l.b16 %v3452_v62  ;;  %v3421_v43 = vld [vmem:[#allocation2 + $0x7a] sm:$0xff] }
 0x18f   : > { %v3453_v47 = vpack.c.bf16 %v3421_v43, %v3421_v43 }
 0x190   : > { %v1308_v19 = vpop.f32.mrf.mxu1 }
 0x191   : > { %v1963_v28 = vpop.f32.mrf.mxu3  ;;  %v1619_v11 = vpop.f32.mrf.mxu2  ;;  %3653 = vmatmul.bf16.gmra.mxu0 %v3561_v44  ;;  %v1309_v31 = vadd.f32 %v1308_v19, %v5620_v33 }
 0x192   : > { %v2016_v39 = vadd.f32 %v1963_v28, %v1670_v55  ;;  %v1671_v18 = vadd.f32 %v1619_v11, %v1306_v9  ;;  %v3076_v28 = vld [vmem:[#allocation2 + $0x81] sm:$0xff]  ;;  %v3562_v9 = vpack.c.b16 %v3533_v6, %v3532_v29 }
 0x193   : > { %2619 = vmatmul.bf16.gmra.mxu1 %v3561_v44  ;;  %v2843_v44 = vunpack.c.l.b16 %v2762_v30 }
 0x194   : > { %v5771_v20 = vadd.f32 %v2309_v53, %v2016_v39  ;;  %v3075_v53 = vld [vmem:[#allocation2 + $0x79] sm:$0xff] }
 0x195   : > { %v2871_v48 = vpack.c.b16 %v2843_v44, %v2842_v60  ;;  %v3534_v60 = vunpack.c.l.b16 %v3453_v47  ;;  %v3424_v47 = vld [vmem:[#allocation2 + $0x9a] sm:$0xff] }
 0x196   : > { %2966 = vmatmul.bf16.gmra.mxu2 %v2870_v2  ;;  %v2311_v63 = vpop.f32.mrf.mxu0  ;;  %v3108_v2 = vpack.c.bf16 %v3076_v28, %v3076_v28 }
 0x198   : > { %v1310_v57 = vpop.f32.mrf.mxu1  ;;  %v3189_v59 = vunpack.c.l.b16 %v3108_v2 }
 0x199   : > { %v1965_v49 = vpop.f32.mrf.mxu3  ;;  %v1622_v55 = vpop.f32.mrf.mxu2  ;;  %v1311_v33 = vadd.f32 %v1310_v57, %v5628_v0  ;;  %v2732_v0 = vld [vmem:[#allocation2 + $0x98] sm:$0xff] }
 0x19a   : > { %v2017_v8 = vadd.f32 %v1965_v49, %v1671_v18  ;;  %v1672_v52 = vadd.f32 %v1622_v55, %v1309_v31  ;;  %v3107_v18 = vpack.c.bf16 %v3075_v53, %v3075_v53  ;;  %v2731_v49 = vld [vmem:[#allocation2 + $0x90] sm:$0xff]  ;;  %v2764_v6 = vpack.c.bf16 %v2732_v0, %v2732_v0 }
 0x19b   : > { %v2763_v29 = vpack.c.bf16 %v2731_v49, %v2731_v49 }
 0x19c   : > { %v5774_v58 = vadd.f32 %v2311_v63, %v2017_v8  ;;  %v3188_v62 = vunpack.c.l.b16 %v3107_v18  ;;  %v3454_v63 = vpack.c.bf16 %v3422_v46, %v3422_v46 }
 0x19d   : > { %v2844_v28 = vunpack.c.l.b16 %v2763_v29 }
 0x19e   : > { %3312 = vmatmul.bf16.gmra.mxu3 %v3216_v42  ;;  %v2314_v39 = vpop.f32.mrf.mxu0  ;;  %v3217_v57 = vpack.c.b16 %v3189_v59, %v3188_v62  ;;  %v3535_v44 = vunpack.c.l.b16 %v3454_v63  ;;  %v3423_v59 = vld [vmem:[#allocation2 + $0x92] sm:$0xff] }
 0x19f   : > { %v3455_v0 = vpack.c.bf16 %v3423_v59, %v3423_v59 }
 0x1a0   : > { %v1313_v36 = vpop.f32.mrf.mxu1 }
 0x1a1   : > { %v1968_v11 = vpop.f32.mrf.mxu3  ;;  %v1624_v45 = vpop.f32.mrf.mxu2  ;;  %3658 = vmatmul.bf16.gmra.mxu0 %v3562_v9  ;;  %v1314_v42 = vadd.f32 %v1313_v36, %v5651_v10 }
 0x1a2   : > { %v2018_v19 = vadd.f32 %v1968_v11, %v1672_v52  ;;  %v1673_v26 = vadd.f32 %v1624_v45, %v1311_v33  ;;  %v3078_v11 = vld [vmem:[#allocation2 + $0x99] sm:$0xff]  ;;  %v3563_v33 = vpack.c.b16 %v3535_v44, %v3534_v60 }
 0x1a3   : > { %2624 = vmatmul.bf16.gmra.mxu1 %v3562_v9  ;;  %v2845_v9 = vunpack.c.l.b16 %v2764_v6 }
 0x1a4   : > { %v5777_v24 = vadd.f32 %v2314_v39, %v2018_v19  ;;  %v3077_v39 = vld [vmem:[#allocation2 + $0x91] sm:$0xff] }
 0x1a5   : > { %v2872_v46 = vpack.c.b16 %v2845_v9, %v2844_v28  ;;  %v3536_v28 = vunpack.c.l.b16 %v3455_v0  ;;  %v3426_v0 = vld [vmem:[#allocation2 + $0xb2] sm:$0xff] }
 0x1a6   : > { %2971 = vmatmul.bf16.gmra.mxu2 %v2871_v48  ;;  %v2316_v31 = vpop.f32.mrf.mxu0  ;;  %v3110_v48 = vpack.c.bf16 %v3078_v11, %v3078_v11 }
 0x1a8   : > { %v1315_v38 = vpop.f32.mrf.mxu1  ;;  %v3191_v49 = vunpack.c.l.b16 %v3110_v48 }
 0x1a9   : > { %v1970_v8 = vpop.f32.mrf.mxu3  ;;  %v1627_v52 = vpop.f32.mrf.mxu2  ;;  %v1316_v10 = vadd.f32 %v1315_v38, %v5657_v41  ;;  %v2734_v41 = vld [vmem:[#allocation2 + $0xb0] sm:$0xff] }
 0x1aa   : > { %v2019_v55 = vadd.f32 %v1970_v8, %v1673_v26  ;;  %v1674_v30 = vadd.f32 %v1627_v52, %v1314_v42  ;;  %v3109_v26 = vpack.c.bf16 %v3077_v39, %v3077_v39  ;;  %v2733_v8 = vld [vmem:[#allocation2 + $0xa8] sm:$0xff]  ;;  %v2766_v44 = vpack.c.bf16 %v2734_v41, %v2734_v41 }
 0x1ab   : > { %v2765_v60 = vpack.c.bf16 %v2733_v8, %v2733_v8 }
 0x1ac   : > { %v5780_v53 = vadd.f32 %v2316_v31, %v2019_v55  ;;  %v3190_v63 = vunpack.c.l.b16 %v3109_v26  ;;  %v3456_v31 = vpack.c.bf16 %v3424_v47, %v3424_v47 }
 0x1ad   : > { %v2846_v11 = vunpack.c.l.b16 %v2765_v60 }
 0x1ae   : > { %3317 = vmatmul.bf16.gmra.mxu3 %v3217_v57  ;;  %v2319_v19 = vpop.f32.mrf.mxu0  ;;  %v3218_v38 = vpack.c.b16 %v3191_v49, %v3190_v63  ;;  %v3537_v9 = vunpack.c.l.b16 %v3456_v31  ;;  %v3425_v49 = vld [vmem:[#allocation2 + $0xaa] sm:$0xff] }
 0x1af   : > { %v3457_v41 = vpack.c.bf16 %v3425_v49, %v3425_v49 }
 0x1b0   : > { %v1318_v2 = vpop.f32.mrf.mxu1 }
 0x1b1   : > { %v1973_v45 = vpop.f32.mrf.mxu3  ;;  %v1629_v18 = vpop.f32.mrf.mxu2  ;;  %3663 = vmatmul.bf16.gmra.mxu0 %v3563_v33  ;;  %v1319_v57 = vadd.f32 %v1318_v2, %v5582_v5 }
 0x1b2   : > { %v2020_v36 = vadd.f32 %v1973_v45, %v1674_v30  ;;  %v1675_v43 = vadd.f32 %v1629_v18, %v1316_v10  ;;  %v3080_v45 = vld [vmem:[#allocation2 + $0xb1] sm:$0xff]  ;;  %v3564_v10 = vpack.c.b16 %v3537_v9, %v3536_v28 }
 0x1b3   : > { %2629 = vmatmul.bf16.gmra.mxu1 %v3563_v33  ;;  %v2847_v33 = vunpack.c.l.b16 %v2766_v44 }
 0x1b4   : > { %v5783_v62 = vadd.f32 %v2319_v19, %v2020_v36  ;;  %v3079_v19 = vld [vmem:[#allocation2 + $0xa9] sm:$0xff] }
 0x1b5   : > { %v2873_v47 = vpack.c.b16 %v2847_v33, %v2846_v11  ;;  %v3538_v11 = vunpack.c.l.b16 %v3457_v41  ;;  %v3428_v41 = vld [vmem:[#allocation2 + $0xca] sm:$0xff] }
 0x1b6   : > { %2976 = vmatmul.bf16.gmra.mxu2 %v2872_v46  ;;  %v2321_v42 = vpop.f32.mrf.mxu0  ;;  %v3112_v46 = vpack.c.bf16 %v3080_v45, %v3080_v45 }
 0x1b8   : > { %v1320_v29 = vpop.f32.mrf.mxu1  ;;  %v3193_v8 = vunpack.c.l.b16 %v3112_v46 }
 0x1b9   : > { %v1975_v55 = vpop.f32.mrf.mxu3  ;;  %v1632_v30 = vpop.f32.mrf.mxu2  ;;  %v1321_v5 = vadd.f32 %v1320_v29, %v5593_v14  ;;  %v2736_v14 = vld [vmem:[#allocation2 + $0xc8] sm:$0xff] }
 0x1ba   : > { %v2021_v52 = vadd.f32 %v1975_v55, %v1675_v43  ;;  %v1676_v6 = vadd.f32 %v1632_v30, %v1319_v57  ;;  %v3111_v43 = vpack.c.bf16 %v3079_v19, %v3079_v19  ;;  %v2735_v55 = vld [vmem:[#allocation2 + $0xc0] sm:$0xff]  ;;  %v2768_v9 = vpack.c.bf16 %v2736_v14, %v2736_v14 }
 0x1bb   : > { %v2767_v28 = vpack.c.bf16 %v2735_v55, %v2735_v55 }
 0x1bc   : > { %v5786_v39 = vadd.f32 %v2321_v42, %v2021_v52  ;;  %v3192_v31 = vunpack.c.l.b16 %v3111_v43  ;;  %v3458_v42 = vpack.c.bf16 %v3426_v0, %v3426_v0 }
 0x1bd   : > { %v2848_v45 = vunpack.c.l.b16 %v2767_v28 }
 0x1be   : > { %3322 = vmatmul.bf16.gmra.mxu3 %v3218_v38  ;;  %v2324_v36 = vpop.f32.mrf.mxu0  ;;  %v3219_v29 = vpack.c.b16 %v3193_v8, %v3192_v31  ;;  %v3539_v33 = vunpack.c.l.b16 %v3458_v42  ;;  %v3427_v8 = vld [vmem:[#allocation2 + $0xc2] sm:$0xff] }
 0x1bf   : > { %v3459_v14 = vpack.c.bf16 %v3427_v8, %v3427_v8 }
 0x1c0   : > { %v1323_v48 = vpop.f32.mrf.mxu1 }
 0x1c1   : > { %v1978_v18 = vpop.f32.mrf.mxu3  ;;  %v1634_v26 = vpop.f32.mrf.mxu2  ;;  %3668 = vmatmul.bf16.gmra.mxu0 %v3564_v10  ;;  %v1324_v38 = vadd.f32 %v1323_v48, %v5610_v21 }
 0x1c2   : > { %v2022_v2 = vadd.f32 %v1978_v18, %v1676_v6  ;;  %v1677_v59 = vadd.f32 %v1634_v26, %v1321_v5  ;;  %v3082_v18 = vld [vmem:[#allocation2 + $0xc9] sm:$0xff]  ;;  %v3565_v5 = vpack.c.b16 %v3539_v33, %v3538_v11 }
 0x1c3   : > { %2634 = vmatmul.bf16.gmra.mxu1 %v3564_v10  ;;  %v2849_v10 = vunpack.c.l.b16 %v2768_v9 }
 0x1c4   : > { %v5789_v63 = vadd.f32 %v2324_v36, %v2022_v2  ;;  %v3081_v36 = vld [vmem:[#allocation2 + $0xc1] sm:$0xff] }
 0x1c5   : > { %v2874_v0 = vpack.c.b16 %v2849_v10, %v2848_v45  ;;  %v3540_v45 = vunpack.c.l.b16 %v3459_v14  ;;  %v3430_v14 = vld [vmem:[#allocation2 + $0xe2] sm:$0xff] }
 0x1c6   : > { %2981 = vmatmul.bf16.gmra.mxu2 %v2873_v47  ;;  %v2326_v57 = vpop.f32.mrf.mxu0  ;;  %v3114_v47 = vpack.c.bf16 %v3082_v18, %v3082_v18 }
 0x1c8   : > { %v1325_v60 = vpop.f32.mrf.mxu1  ;;  %v3195_v55 = vunpack.c.l.b16 %v3114_v47 }
 0x1c9   : > { %v1980_v52 = vpop.f32.mrf.mxu3  ;;  %v1637_v6 = vpop.f32.mrf.mxu2  ;;  %v1326_v21 = vadd.f32 %v1325_v60, %v5618_v1  ;;  %v2738_v1 = vld [vmem:[#allocation2 + $0xe0] sm:$0xff] }
 0x1ca   : > { %v2023_v30 = vadd.f32 %v1980_v52, %v1677_v59  ;;  %v1678_v44 = vadd.f32 %v1637_v6, %v1324_v38  ;;  %v3113_v59 = vpack.c.bf16 %v3081_v36, %v3081_v36  ;;  %v2737_v52 = vld [vmem:[#allocation2 + $0xd8] sm:$0xff]  ;;  %v2770_v33 = vpack.c.bf16 %v2738_v1, %v2738_v1 }
 0x1cb   : > { %v2769_v11 = vpack.c.bf16 %v2737_v52, %v2737_v52 }
 0x1cc   : > { %v5792_v19 = vadd.f32 %v2326_v57, %v2023_v30  ;;  %v3194_v42 = vunpack.c.l.b16 %v3113_v59  ;;  %v3460_v57 = vpack.c.bf16 %v3428_v41, %v3428_v41 }
 0x1cd   : > { %v2850_v18 = vunpack.c.l.b16 %v2769_v11 }
 0x1ce   : > { %3327 = vmatmul.bf16.gmra.mxu3 %v3219_v29  ;;  %v2329_v2 = vpop.f32.mrf.mxu0  ;;  %v3220_v60 = vpack.c.b16 %v3195_v55, %v3194_v42  ;;  %v3541_v10 = vunpack.c.l.b16 %v3460_v57  ;;  %v3429_v55 = vld [vmem:[#allocation2 + $0xda] sm:$0xff] }
 0x1cf   : > { %v3461_v1 = vpack.c.bf16 %v3429_v55, %v3429_v55 }
 0x1d0   : > { %v1328_v46 = vpop.f32.mrf.mxu1 }
 0x1d1   : > { %v1983_v26 = vpop.f32.mrf.mxu3  ;;  %v1639_v43 = vpop.f32.mrf.mxu2  ;;  %3673 = vmatmul.bf16.gmra.mxu0 %v3565_v5  ;;  %v1329_v29 = vadd.f32 %v1328_v46, %v5626_v12 }
 0x1d2   : > { %v2024_v48 = vadd.f32 %v1983_v26, %v1678_v44  ;;  %v1679_v49 = vadd.f32 %v1639_v43, %v1326_v21  ;;  %v3084_v26 = vld [vmem:[#allocation2 + $0xe1] sm:$0xff]  ;;  %v3566_v21 = vpack.c.b16 %v3541_v10, %v3540_v45 }
 0x1d3   : > { %2639 = vmatmul.bf16.gmra.mxu1 %v3565_v5  ;;  %v2851_v5 = vunpack.c.l.b16 %v2770_v33 }
 0x1d4   : > { %v5795_v31 = vadd.f32 %v2329_v2, %v2024_v48  ;;  %v3083_v2 = vld [vmem:[#allocation2 + $0xd9] sm:$0xff] }
 0x1d5   : > { %v2875_v41 = vpack.c.b16 %v2851_v5, %v2850_v18  ;;  %v3542_v18 = vunpack.c.l.b16 %v3461_v1  ;;  %v3432_v1 = vld [vmem:[#allocation2 + $0xfa] sm:$0xff] }
 0x1d6   : > { %2986 = vmatmul.bf16.gmra.mxu2 %v2874_v0  ;;  %v2331_v38 = vpop.f32.mrf.mxu0  ;;  %v3116_v0 = vpack.c.bf16 %v3084_v26, %v3084_v26 }
 0x1d8   : > { %v1330_v28 = vpop.f32.mrf.mxu1  ;;  %v3197_v52 = vunpack.c.l.b16 %v3116_v0 }
 0x1d9   : > { %v1985_v30 = vpop.f32.mrf.mxu3  ;;  %v1642_v44 = vpop.f32.mrf.mxu2  ;;  %v1331_v12 = vadd.f32 %v1330_v28, %v5644_v4  ;;  %v2740_v4 = vld [vmem:[#allocation2 + $0xf8] sm:$0xff] }
 0x1da   : > { %v2025_v6 = vadd.f32 %v1985_v30, %v1679_v49  ;;  %v1680_v9 = vadd.f32 %v1642_v44, %v1329_v29  ;;  %v3115_v49 = vpack.c.bf16 %v3083_v2, %v3083_v2  ;;  %v2739_v30 = vld [vmem:[#allocation2 + $0xf0] sm:$0xff]  ;;  %v2772_v10 = vpack.c.bf16 %v2740_v4, %v2740_v4 }
 0x1db   : > { %v2771_v45 = vpack.c.bf16 %v2739_v30, %v2739_v30 }
 0x1dc   : > { %v5798_v36 = vadd.f32 %v2331_v38, %v2025_v6  ;;  %v3196_v57 = vunpack.c.l.b16 %v3115_v49  ;;  %v3462_v38 = vpack.c.bf16 %v3430_v14, %v3430_v14 }
 0x1dd   : > { %v2852_v26 = vunpack.c.l.b16 %v2771_v45 }
 0x1de   : > { %3332 = vmatmul.bf16.gmra.mxu3 %v3220_v60  ;;  %v2334_v48 = vpop.f32.mrf.mxu0  ;;  %v3221_v28 = vpack.c.b16 %v3197_v52, %v3196_v57  ;;  %v3543_v5 = vunpack.c.l.b16 %v3462_v38  ;;  %v3431_v52 = vld [vmem:[#allocation2 + $0xf2] sm:$0xff] }
 0x1df   : > { %v3463_v4 = vpack.c.bf16 %v3431_v52, %v3431_v52 }
 0x1e0   : > { %v1333_v47 = vpop.f32.mrf.mxu1 }
 0x1e1   : > { %v1988_v43 = vpop.f32.mrf.mxu3  ;;  %v1644_v59 = vpop.f32.mrf.mxu2  ;;  %3678 = vmatmul.bf16.gmra.mxu0 %v3566_v21  ;;  %v1334_v60 = vadd.f32 %v1333_v47, %v5655_v35 }
 0x1e2   : > { %v2026_v46 = vadd.f32 %v1988_v43, %v1680_v9  ;;  %v1681_v8 = vadd.f32 %v1644_v59, %v1331_v12  ;;  %v3086_v43 = vld [vmem:[#allocation2 + $0xf9] sm:$0xff]  ;;  %v3567_v12 = vpack.c.b16 %v3543_v5, %v3542_v18  ;;  %v3544_v18 = vunpack.c.l.b16 %v3463_v4 }
 0x1e3   : > { %2644 = vmatmul.bf16.gmra.mxu1 %v3566_v21  ;;  %v2853_v21 = vunpack.c.l.b16 %v2772_v10 }
 0x1e4   : > { %v5801_v42 = vadd.f32 %v2334_v48, %v2026_v46  ;;  %v3085_v48 = vld [vmem:[#allocation2 + $0xf1] sm:$0xff] }
 0x1e5   : > { %v2876_v14 = vpack.c.b16 %v2853_v21, %v2852_v26 }
 0x1e6   : > { %2991 = vmatmul.bf16.gmra.mxu2 %v2875_v41  ;;  %v2336_v29 = vpop.f32.mrf.mxu0  ;;  %v3118_v41 = vpack.c.bf16 %v3086_v43, %v3086_v43 }
 0x1e8   : > { %v1335_v11 = vpop.f32.mrf.mxu1  ;;  %v3199_v30 = vunpack.c.l.b16 %v3118_v41 }
 0x1e9   : > { %v1990_v6 = vpop.f32.mrf.mxu3  ;;  %v1647_v9 = vpop.f32.mrf.mxu2  ;;  %v1336_v35 = vadd.f32 %v1335_v11, %v5661_v34  ;;  %v2742_v34 = vld [vmem:[#allocation2 + $0x110] sm:$0xff] }
 0x1ea   : > { %v2027_v44 = vadd.f32 %v1990_v6, %v1681_v8  ;;  %v1682_v33 = vadd.f32 %v1647_v9, %v1334_v60  ;;  %v3117_v8 = vpack.c.bf16 %v3085_v48, %v3085_v48  ;;  %v2741_v6 = vld [vmem:[#allocation2 + $0x108] sm:$0xff]  ;;  %v2774_v10 = vpack.c.bf16 %v2742_v34, %v2742_v34 }
 0x1eb   : > { %v2773_v45 = vpack.c.bf16 %v2741_v6, %v2741_v6 }
 0x1ec   : > { %v5804_v2 = vadd.f32 %v2336_v29, %v2027_v44  ;;  %v3198_v38 = vunpack.c.l.b16 %v3117_v8  ;;  %v3464_v29 = vpack.c.bf16 %v3432_v1, %v3432_v1  ;;  %v2855_v43 = vunpack.c.l.b16 %v2774_v10 }
 0x1ed   : > { %v2854_v48 = vunpack.c.l.b16 %v2773_v45 }
 0x1ee   : > { %3337 = vmatmul.bf16.gmra.mxu3 %v3221_v28  ;;  %v2339_v46 = vpop.f32.mrf.mxu0  ;;  %v3222_v9 = vpack.c.b16 %v3199_v30, %v3198_v38  ;;  %v3545_v5 = vunpack.c.l.b16 %v3464_v29 }
 0x1ef   : > { %v2877_v52 = vpack.c.b16 %v2855_v43, %v2854_v48 }
 0x1f0   : > { %v2610_v0 = vpop.f32.mrf.mxu1 }
 0x1f1   : > { %v1993_v59 = vpop.f32.mrf.mxu3  ;;  %v1649_v49 = vpop.f32.mrf.mxu2  ;;  %3683 = vmatmul.bf16.gmra.mxu0 %v3567_v12  ;;  %v2690_v21 = vadd.f32 %v2610_v0, %v5675_v17  ;;  %v3433_v17 = vld [vmem:[#allocation2 + $0x10a] sm:$0xff]  ;;  %v3434_v0 = vld [vmem:[#allocation2 + $0x112] sm:$0xff] }
 0x1f2   : > { %v2028_v47 = vadd.f32 %v1993_v59, %v1682_v33  ;;  %v1683_v55 = vadd.f32 %v1649_v49, %v1336_v35  ;;  %v3568_v59 = vpack.c.b16 %v3545_v5, %v3544_v18  ;;  %v3465_v6 = vpack.c.bf16 %v3433_v17, %v3433_v17 }
 0x1f3   : > { %2649 = vmatmul.bf16.gmra.mxu1 %v3567_v12  ;;  %v3087_v12 = vld [vmem:[#allocation2 + $0x109] sm:$0xff]  ;;  %v3466_v34 = vpack.c.bf16 %v3434_v0, %v3434_v0 }
 0x1f4   : > { %v5807_v57 = vadd.f32 %v2339_v46, %v2028_v47  ;;  %v3088_v46 = vld [vmem:[#allocation2 + $0x111] sm:$0xff]  ;;  %v3546_v5 = vunpack.c.l.b16 %v3465_v6 }
 0x1f6   : > { %2996 = vmatmul.bf16.gmra.mxu2 %v2876_v14  ;;  %v2341_v60 = vpop.f32.mrf.mxu0  ;;  %v3120_v14 = vpack.c.bf16 %v3088_v46, %v3088_v46 }
 0x1f8   : > { %v2612_v33 = vpop.f32.mrf.mxu1  ;;  %v3201_v29 = vunpack.c.l.b16 %v3120_v14  ;;  %v3089_v14 = vld [vmem:[#allocation2 + $0x121] sm:$0xff] }
 0x1f9   : > { %v1995_v44 = vpop.f32.mrf.mxu3  ;;  %v2957_v11 = vpop.f32.mrf.mxu2  ;;  %v2691_v38 = vadd.f32 %v2612_v33, %v5681_v15 }
 0x1fa   : > { %v2029_v28 = vadd.f32 %v1995_v44, %v1683_v55  ;;  %v3037_v35 = vadd.f32 %v2957_v11, %v2690_v21  ;;  %v3119_v55 = vpack.c.bf16 %v3087_v12, %v3087_v12  ;;  %v5816_v44 = vld [vmem:[%s5917_s4] ss:$0 sm:$0xff]  ;;  %v3547_v21 = vunpack.c.l.b16 %v3466_v34 }
 0x1fb   : > { %v3121_v34 = vpack.c.bf16 %v3089_v14, %v3089_v14 }
 0x1fc   : > { %v5809_v26 = vadd.f32 %v2341_v60, %v2029_v28  ;;  %v3200_v4 = vunpack.c.l.b16 %v3119_v55  ;;  %v2743_v28 = vld [vmem:[#allocation2 + $0x120] sm:$0xff] }
 0x1fd   : > { %v2775_v48 = vpack.c.bf16 %v2743_v28, %v2743_v28 }
 0x1fe   : > { %3342 = vmatmul.bf16.gmra.mxu3 %v3222_v9  ;;  %v3649_v47 = vpop.f32.mrf.mxu0  ;;  %v2744_v9 = vld [vmem:[#allocation2 + $0x128] sm:$0xff]  ;;  %v3223_v45 = vpack.c.b16 %v3201_v29, %v3200_v4 }
 0x1ff   : > { %v2776_v43 = vpack.c.bf16 %v2744_v9, %v2744_v9 }
 0x200   : > { %v2615_v41 = vpop.f32.mrf.mxu1 }
 0x201   : > { %v3303_v49 = vpop.f32.mrf.mxu3  ;;  %v2959_v8 = vpop.f32.mrf.mxu2  ;;  %3688 = vmatmul.bf16.gmra.mxu0 %v3568_v59  ;;  %v2857_v55 = vunpack.c.l.b16 %v2776_v43 }
 0x202   : > { %v3383_v1 = vadd.f32 %v3303_v49, %v3037_v35  ;;  %v3038_v30 = vadd.f32 %v2959_v8, %v2691_v38  ;;  %v3569_v49 = vpack.c.b16 %v3547_v21, %v3546_v5  ;;  %v2856_v8 = vunpack.c.l.b16 %v2775_v48 }
 0x203   : > { %2654 = vmatmul.bf16.gmra.mxu1 %v3568_v59  ;;  %v2692_v59 = vadd.f32 %v2615_v41, %v5684_v32  ;;  %v3202_v5 = vunpack.c.l.b16 %v3121_v34 }
 0x204   : > { %v3729_v60 = vadd.f32 %v3649_v47, %v3383_v1  ;;  %v2878_v28 = vpack.c.b16 %v2857_v55, %v2856_v8 }
 0x206   : > { %3001 = vmatmul.bf16.gmra.mxu2 %v2877_v52  ;;  %v3651_v11 = vpop.f32.mrf.mxu0  ;;  %v3765_v12 = vadd.f32 %v5816_v44, %v3729_v60  ;;  %v3090_v52 = vld [vmem:[#allocation2 + $0x129] sm:$0xff] }
 0x207   : > { %v3122_v60 = vpack.c.bf16 %v3090_v52, %v3090_v52 }
 0x208   : > { %v2617_v18 = vpop.f32.mrf.mxu1  ;;  %v3899_v1 = vmul.f32 %v3765_v12, %v3765_v12 }
 0x209   : > { %v3305_v15 = vpop.f32.mrf.mxu3  ;;  %v2962_v10 = vpop.f32.mrf.mxu2  ;;  %v3203_v21 = vunpack.c.l.b16 %v3122_v60  ;;  %v3091_v60 = vld [vmem:[#allocation2 + $0x139] sm:$0xff] }
 0x20a   : > { %v3384_v33 = vadd.f32 %v3305_v15, %v3038_v30  ;;  %v3039_v47 = vadd.f32 %v2962_v10, %v2692_v59  ;;  %v3435_v15 = vld [vmem:[#allocation2 + $0x122] sm:$0xff]  ;;  %v2745_v59 = vld [vmem:[#allocation2 + $0x138] sm:$0xff] }
 0x20b   : > { %v2777_v52 = vpack.c.bf16 %v2745_v59, %v2745_v59 }
 0x20c   : > { %v3730_v46 = vadd.f32 %v3651_v11, %v3384_v33  ;;  %v2693_v11 = vadd.f32 %v2617_v18, %v5687_v51  ;;  %v3436_v33 = vld [vmem:[#allocation2 + $0x12a] sm:$0xff]  ;;  %v3224_v51 = vpack.c.b16 %v3203_v21, %v3202_v5 }
 0x20e   : > { %v3766_v35 = vadd.f32 %v5816_v44, %v3730_v46  ;;  %3347 = vmatmul.bf16.gmra.mxu3 %v3223_v45  ;;  %v3654_v41 = vpop.f32.mrf.mxu0  ;;  %v3468_v46 = vpack.c.bf16 %v3436_v33, %v3436_v33 }
 0x210   : > { %v4674_v38 = vpack.c.bf16 %v3766_v35, %v3765_v12  ;;  %v3861_v17 = vadd.f32 %v3766_v35, %v3765_v12  ;;  %v3900_v32 = vmul.f32 %v3766_v35, %v3766_v35  ;;  %v2620_v6 = vpop.f32.mrf.mxu1  ;;  %v3467_v12 = vpack.c.bf16 %v3435_v15, %v3435_v15  ;;  %v2746_v35 = vld [vmem:[#allocation2 + $0x140] sm:$0xff] }
 0x211   : > { %v3308_v0 = vpop.f32.mrf.mxu3  ;;  %v2964_v29 = vpop.f32.mrf.mxu2  ;;  %3693 = vmatmul.bf16.gmra.mxu0 %v3569_v49 }
 0x212   : > { %4675 = vst [vmem:[%s5826_s11] sm:$0xff] %v4674_v38   ;;  %v3931_v30 = vadd.f32 %v3900_v32, %v3899_v1  ;;  %v3385_v4 = vadd.f32 %v3308_v0, %v3039_v47  ;;  %v3040_v10 = vadd.f32 %v2964_v29, %v2693_v11  ;;  %v2778_v1 = vpack.c.bf16 %v2746_v35, %v2746_v35 }
 0x213   : > { %2659 = vmatmul.bf16.gmra.mxu1 %v3569_v49  ;;  %v2694_v32 = vadd.f32 %v2620_v6, %v5699_v7  ;;  %v2858_v29 = vunpack.c.l.b16 %v2777_v52 }
 0x214   : > { %v3731_v9 = vadd.f32 %v3654_v41, %v3385_v4  ;;  %v3548_v41 = vunpack.c.l.b16 %v3467_v12  ;;  %v2859_v34 = vunpack.c.l.b16 %v2778_v1 }
 0x216   : > { %v3767_v45 = vadd.f32 %v5816_v44, %v3731_v9  ;;  %3006 = vmatmul.bf16.gmra.mxu2 %v2878_v28  ;;  %v3656_v47 = vpop.f32.mrf.mxu0 }
 0x218   : > { %v3862_v48 = vadd.f32 %v3861_v17, %v3767_v45  ;;  %v3901_v43 = vmul.f32 %v3767_v45, %v3767_v45  ;;  %v2622_v49 = vpop.f32.mrf.mxu1  ;;  %v3549_v17 = vunpack.c.l.b16 %v3468_v46  ;;  %v2879_v46 = vpack.c.b16 %v2859_v34, %v2858_v29 }
 0x219   : > { %v3310_v8 = vpop.f32.mrf.mxu3  ;;  %v2967_v18 = vpop.f32.mrf.mxu2  ;;  %v2695_v35 = vadd.f32 %v2622_v49, %v5705_v56 }
 0x21a   : > { %v3932_v55 = vadd.f32 %v3931_v30, %v3901_v43  ;;  %v3386_v14 = vadd.f32 %v3310_v8, %v3040_v10  ;;  %v3041_v4 = vadd.f32 %v2967_v18, %v2694_v32  ;;  %v3092_v30 = vld [vmem:[#allocation2 + $0x141] sm:$0xff]  ;;  %v3570_v15 = vpack.c.b16 %v3549_v17, %v3548_v41  ;;  %v2748_v32 = vld [vmem:[#allocation2 + $0x158] sm:$0xff] }
 0x21b   : > { %v3123_v43 = vpack.c.bf16 %v3091_v60, %v3091_v60  ;;  %v3124_v12 = vpack.c.bf16 %v3092_v30, %v3092_v30  ;;  %v2780_v60 = vpack.c.bf16 %v2748_v32, %v2748_v32 }
 0x21c   : > { %v3732_v38 = vadd.f32 %v3656_v47, %v3386_v14  ;;  %v3437_v47 = vld [vmem:[#allocation2 + $0x13a] sm:$0xff] }
 0x21d   : > { %v3204_v14 = vunpack.c.l.b16 %v3123_v43  ;;  %v3469_v52 = vpack.c.bf16 %v3437_v47, %v3437_v47 }
 0x21e   : > { %v3768_v0 = vadd.f32 %v5816_v44, %v3732_v38  ;;  %3352 = vmatmul.bf16.gmra.mxu3 %v3224_v51  ;;  %v3659_v33 = vpop.f32.mrf.mxu0  ;;  %v3205_v51 = vunpack.c.l.b16 %v3124_v12  ;;  %v2747_v38 = vld [vmem:[#allocation2 + $0x150] sm:$0xff] }
 0x21f   : > { %v2779_v34 = vpack.c.bf16 %v2747_v38, %v2747_v38  ;;  %v3439_v38 = vld [vmem:[#allocation2 + $0x152] sm:$0xff] }
 0x220   : > { %v4679_v28 = vpack.c.bf16 %v3768_v0, %v3767_v45  ;;  %v3863_v9 = vadd.f32 %v3862_v48, %v3768_v0  ;;  %v3902_v11 = vmul.f32 %v3768_v0, %v3768_v0  ;;  %v2625_v21 = vpop.f32.mrf.mxu1  ;;  %v3438_v45 = vld [vmem:[#allocation2 + $0x142] sm:$0xff]  ;;  %v3225_v56 = vpack.c.b16 %v3205_v51, %v3204_v14 }
 0x221   : > { %v3313_v10 = vpop.f32.mrf.mxu3  ;;  %v2969_v6 = vpop.f32.mrf.mxu2  ;;  %3698 = vmatmul.bf16.gmra.mxu0 %v3570_v15  ;;  %v3470_v1 = vpack.c.bf16 %v3438_v45, %v3438_v45 }
 0x222   : > { %4766 = vst [vmem:[%s5826_s11 + $0x8] sm:$0xff] %v4679_v28   ;;  %v3933_v5 = vadd.f32 %v3932_v55, %v3902_v11  ;;  %v3387_v7 = vadd.f32 %v3313_v10, %v3041_v4  ;;  %v3042_v8 = vadd.f32 %v2969_v6, %v2695_v35  ;;  %v2696_v28 = vadd.f32 %v2625_v21, %v5713_v16  ;;  %v3093_v6 = vld [vmem:[#allocation2 + $0x151] sm:$0xff] }
 0x223   : > { %2664 = vmatmul.bf16.gmra.mxu1 %v3570_v15  ;;  %v3550_v11 = vunpack.c.l.b16 %v3469_v52  ;;  %v2860_v10 = vunpack.c.l.b16 %v2779_v34  ;;  %v3125_v14 = vpack.c.bf16 %v3093_v6, %v3093_v6  ;;  %v2749_v34 = vld [vmem:[#allocation2 + $0x168] sm:$0xff] }
 0x224   : > { %v3733_v59 = vadd.f32 %v3659_v33, %v3387_v7  ;;  %v2861_v7 = vunpack.c.l.b16 %v2780_v60  ;;  %v2750_v60 = vld [vmem:[#allocation2 + $0x170] sm:$0xff] }
 0x226   : > { %v3769_v48 = vadd.f32 %v5816_v44, %v3733_v59  ;;  %3011 = vmatmul.bf16.gmra.mxu2 %v2879_v46  ;;  %v3661_v41 = vpop.f32.mrf.mxu0 }
 0x228   : > { %v3864_v55 = vadd.f32 %v3863_v9, %v3769_v48  ;;  %v3903_v18 = vmul.f32 %v3769_v48, %v3769_v48  ;;  %v2627_v29 = vpop.f32.mrf.mxu1  ;;  %v3551_v9 = vunpack.c.l.b16 %v3470_v1 }
 0x229   : > { %v3315_v17 = vpop.f32.mrf.mxu3  ;;  %v2972_v49 = vpop.f32.mrf.mxu2  ;;  %v2697_v1 = vadd.f32 %v2627_v29, %v5716_v50 }
 0x22a   : > { %v3934_v0 = vadd.f32 %v3933_v5, %v3903_v18  ;;  %v3388_v4 = vadd.f32 %v3315_v17, %v3042_v8  ;;  %v3043_v33 = vadd.f32 %v2972_v49, %v2696_v28  ;;  %v3094_v5 = vld [vmem:[#allocation2 + $0x159] sm:$0xff]  ;;  %v3571_v59 = vpack.c.b16 %v3551_v9, %v3550_v11 }
 0x22b   : > { %v3126_v51 = vpack.c.bf16 %v3094_v5, %v3094_v5  ;;  %v2880_v18 = vpack.c.b16 %v2861_v7, %v2860_v10  ;;  %v2782_v10 = vpack.c.bf16 %v2750_v60, %v2750_v60 }
 0x22c   : > { %v3734_v30 = vadd.f32 %v3661_v41, %v3388_v4  ;;  %v3206_v41 = vunpack.c.l.b16 %v3125_v14 }
 0x22d   : > { %v3207_v17 = vunpack.c.l.b16 %v3126_v51 }
 0x22e   : > { %v3770_v15 = vadd.f32 %v5816_v44, %v3734_v30  ;;  %3357 = vmatmul.bf16.gmra.mxu3 %v3225_v56  ;;  %v3664_v35 = vpop.f32.mrf.mxu0  ;;  %v3471_v56 = vpack.c.bf16 %v3439_v38, %v3439_v38 }
 0x22f   : > { %v3226_v50 = vpack.c.b16 %v3207_v17, %v3206_v41 }
 0x230   : > { %v4684_v43 = vpack.c.bf16 %v3770_v15, %v3769_v48  ;;  %v3865_v12 = vadd.f32 %v3864_v55, %v3770_v15  ;;  %v3904_v46 = vmul.f32 %v3770_v15, %v3770_v15  ;;  %v2630_v8 = vpop.f32.mrf.mxu1  ;;  %v3440_v48 = vld [vmem:[#allocation2 + $0x15a] sm:$0xff]  ;;  %v3552_v5 = vunpack.c.l.b16 %v3471_v56  ;;  %v3441_v56 = vld [vmem:[#allocation2 + $0x16a] sm:$0xff] }
 0x231   : > { %v3318_v47 = vpop.f32.mrf.mxu3  ;;  %v2974_v21 = vpop.f32.mrf.mxu2  ;;  %3703 = vmatmul.bf16.gmra.mxu0 %v3571_v59  ;;  %v3472_v49 = vpack.c.bf16 %v3440_v48, %v3440_v48  ;;  %v2698_v6 = vadd.f32 %v2630_v8, %v5733_v40 }
 0x232   : > { %4767 = vst [vmem:[%s5826_s11 + $0x10] sm:$0xff] %v4684_v43   ;;  %v3935_v45 = vadd.f32 %v3934_v0, %v3904_v46  ;;  %v3389_v16 = vadd.f32 %v3318_v47, %v3043_v33  ;;  %v3044_v32 = vadd.f32 %v2974_v21, %v2697_v1  ;;  %v2781_v33 = vpack.c.bf16 %v2749_v34, %v2749_v34  ;;  %v3095_v47 = vld [vmem:[#allocation2 + $0x169] sm:$0xff] }
 0x233   : > { %2669 = vmatmul.bf16.gmra.mxu1 %v3571_v59  ;;  %v3553_v43 = vunpack.c.l.b16 %v3472_v49  ;;  %v3127_v48 = vpack.c.bf16 %v3095_v47, %v3095_v47 }
 0x234   : > { %v3735_v52 = vadd.f32 %v3664_v35, %v3389_v16  ;;  %v2862_v59 = vunpack.c.l.b16 %v2781_v33  ;;  %v2863_v35 = vunpack.c.l.b16 %v2782_v10 }
 0x235   : > { %v3572_v51 = vpack.c.b16 %v3553_v43, %v3552_v5  ;;  %v3208_v34 = vunpack.c.l.b16 %v3127_v48 }
 0x236   : > { %v3771_v55 = vadd.f32 %v5816_v44, %v3735_v52  ;;  %3016 = vmatmul.bf16.gmra.mxu2 %v2880_v18  ;;  %v3666_v30 = vpop.f32.mrf.mxu0  ;;  %v2881_v41 = vpack.c.b16 %v2863_v35, %v2862_v59 }
 0x238   : > { %v3866_v0 = vadd.f32 %v3865_v12, %v3771_v55  ;;  %v3905_v4 = vmul.f32 %v3771_v55, %v3771_v55  ;;  %v2632_v15 = vpop.f32.mrf.mxu1 }
 0x239   : > { %v3320_v28 = vpop.f32.mrf.mxu3  ;;  %v2977_v29 = vpop.f32.mrf.mxu2 }
 0x23a   : > { %v3936_v11 = vadd.f32 %v3935_v45, %v3905_v4  ;;  %v3390_v9 = vadd.f32 %v3320_v28, %v3044_v32  ;;  %v3045_v46 = vadd.f32 %v2977_v29, %v2698_v6  ;;  %v3096_v45 = vld [vmem:[#allocation2 + $0x171] sm:$0xff]  ;;  %v2699_v4 = vadd.f32 %v2632_v15, %v5740_v13  ;;  %v2752_v29 = vld [vmem:[#allocation2 + $0x188] sm:$0xff] }
 0x23b   : > { %v3128_v32 = vpack.c.bf16 %v3096_v45, %v3096_v45 }
 0x23c   : > { %v3736_v7 = vadd.f32 %v3666_v30, %v3390_v9 }
 0x23d   : > { %v3209_v60 = vunpack.c.l.b16 %v3128_v32 }
 0x23e   : > { %v3772_v12 = vadd.f32 %v5816_v44, %v3736_v7  ;;  %3362 = vmatmul.bf16.gmra.mxu3 %v3226_v50  ;;  %v3669_v18 = vpop.f32.mrf.mxu0  ;;  %v2751_v50 = vld [vmem:[#allocation2 + $0x180] sm:$0xff] }
 0x23f   : > { %v3227_v13 = vpack.c.b16 %v3209_v60, %v3208_v34  ;;  %v2783_v43 = vpack.c.bf16 %v2751_v50, %v2751_v50  ;;  %v3443_v60 = vld [vmem:[#allocation2 + $0x182] sm:$0xff] }
 0x240   : > { %v4689_v16 = vpack.c.bf16 %v3772_v12, %v3771_v55  ;;  %v3867_v21 = vadd.f32 %v3866_v0, %v3772_v12  ;;  %v3906_v14 = vmul.f32 %v3772_v12, %v3772_v12  ;;  %v2635_v38 = vpop.f32.mrf.mxu1  ;;  %v3442_v55 = vld [vmem:[#allocation2 + $0x172] sm:$0xff]  ;;  %v2784_v12 = vpack.c.bf16 %v2752_v29, %v2752_v29 }
 0x241   : > { %v3323_v52 = vpop.f32.mrf.mxu3  ;;  %v2979_v8 = vpop.f32.mrf.mxu2  ;;  %3708 = vmatmul.bf16.gmra.mxu0 %v3572_v51  ;;  %v3474_v9 = vpack.c.bf16 %v3442_v55, %v3442_v55  ;;  %v2700_v59 = vadd.f32 %v2635_v38, %v5743_v22 }
 0x242   : > { %4768 = vst [vmem:[%s5826_s11 + $0x18] sm:$0xff] %v4689_v16   ;;  %v3937_v1 = vadd.f32 %v3936_v11, %v3906_v14  ;;  %v3391_v40 = vadd.f32 %v3323_v52, %v3045_v46  ;;  %v3046_v49 = vadd.f32 %v2979_v8, %v2699_v4  ;;  %v3473_v11 = vpack.c.bf16 %v3441_v56, %v3441_v56 }
 0x243   : > { %2674 = vmatmul.bf16.gmra.mxu1 %v3572_v51  ;;  %v3555_v47 = vunpack.c.l.b16 %v3474_v9  ;;  %v2865_v14 = vunpack.c.l.b16 %v2784_v12  ;;  %v3097_v51 = vld [vmem:[#allocation2 + $0x181] sm:$0xff] }
 0x244   : > { %v3737_v17 = vadd.f32 %v3669_v18, %v3391_v40  ;;  %v3554_v35 = vunpack.c.l.b16 %v3473_v11  ;;  %v3098_v18 = vld [vmem:[#allocation2 + $0x189] sm:$0xff]  ;;  %v3129_v4 = vpack.c.bf16 %v3097_v51, %v3097_v51  ;;  %v3099_v51 = vld [vmem:[#allocation2 + $0x199] sm:$0xff] }
 0x245   : > { %v3130_v56 = vpack.c.bf16 %v3098_v18, %v3098_v18  ;;  %v3100_v18 = vld [vmem:[#allocation2 + $0x1a1] sm:$0xff] }
 0x246   : > { %v3773_v0 = vadd.f32 %v5816_v44, %v3737_v17  ;;  %3021 = vmatmul.bf16.gmra.mxu2 %v2881_v41  ;;  %v3671_v33 = vpop.f32.mrf.mxu0  ;;  %v3573_v8 = vpack.c.b16 %v3555_v47, %v3554_v35  ;;  %v3210_v11 = vunpack.c.l.b16 %v3129_v4  ;;  %v3132_v4 = vpack.c.bf16 %v3100_v18, %v3100_v18 }
 0x247   : > { %v3211_v9 = vunpack.c.l.b16 %v3130_v56 }
 0x248   : > { %v3868_v30 = vadd.f32 %v3867_v21, %v3773_v0  ;;  %v3907_v28 = vmul.f32 %v3773_v0, %v3773_v0  ;;  %v2637_v5 = vpop.f32.mrf.mxu1  ;;  %v2864_v21 = vunpack.c.l.b16 %v2783_v43 }
 0x249   : > { %v3325_v10 = vpop.f32.mrf.mxu3  ;;  %v2982_v15 = vpop.f32.mrf.mxu2  ;;  %v2701_v34 = vadd.f32 %v2637_v5, %v5746_v23  ;;  %v3228_v43 = vpack.c.b16 %v3211_v9, %v3210_v11  ;;  %v4885_v5 = vld [vmem:[#allocation2] sm:$0xff]  ;;  %v3213_v11 = vunpack.c.l.b16 %v3132_v4 }
 0x24a   : > { %v3938_v7 = vadd.f32 %v3937_v1, %v3907_v28  ;;  %v3392_v6 = vadd.f32 %v3325_v10, %v3046_v49  ;;  %v3047_v16 = vadd.f32 %v2982_v15, %v2700_v59  ;;  %v2882_v55 = vpack.c.b16 %v2865_v14, %v2864_v21 }
 0x24c   : > { %v3738_v46 = vadd.f32 %v3671_v33, %v3392_v6  ;;  %v3475_v33 = vpack.c.bf16 %v3443_v60, %v3443_v60  ;;  %v3446_v60 = vld [vmem:[#allocation2 + $0x1a2] sm:$0xff] }
 0x24e   : > { %v3774_v45 = vadd.f32 %v5816_v44, %v3738_v46  ;;  %3367 = vmatmul.bf16.gmra.mxu3 %v3227_v13  ;;  %v3674_v48 = vpop.f32.mrf.mxu0  ;;  %v2785_v46 = vpack.c.bf16 %v4885_v5, %v4885_v5  ;;  %v3556_v47 = vunpack.c.l.b16 %v3475_v33  ;;  %v3478_v33 = vpack.c.bf16 %v3446_v60, %v3446_v60 }
 0x250   : > { %v4694_v52 = vpack.c.bf16 %v3774_v45, %v3773_v0  ;;  %v3869_v1 = vadd.f32 %v3868_v30, %v3774_v45  ;;  %v3908_v40 = vmul.f32 %v3774_v45, %v3774_v45  ;;  %v2640_v17 = vpop.f32.mrf.mxu1  ;;  %v3444_v0 = vld [vmem:[#allocation2 + $0x18a] sm:$0xff]  ;;  %v2866_v14 = vunpack.c.l.b16 %v2785_v46 }
 0x251   : > { %v3328_v32 = vpop.f32.mrf.mxu3  ;;  %v2984_v38 = vpop.f32.mrf.mxu2  ;;  %3713 = vmatmul.bf16.gmra.mxu0 %v3573_v8  ;;  %v3476_v10 = vpack.c.bf16 %v3444_v0, %v3444_v0  ;;  %v2702_v35 = vadd.f32 %v2640_v17, %v5749_v3  ;;  %v3131_v17 = vpack.c.bf16 %v3099_v51, %v3099_v51  ;;  %v3559_v46 = vunpack.c.l.b16 %v3478_v33 }
 0x252   : > { %4769 = vst [vmem:[%s5826_s11 + $0x20] sm:$0xff] %v4694_v52   ;;  %v3939_v41 = vadd.f32 %v3938_v7, %v3908_v40  ;;  %v3393_v22 = vadd.f32 %v3328_v32, %v3047_v16  ;;  %v3048_v28 = vadd.f32 %v2984_v38, %v2701_v34  ;;  %v2883_v56 = vpack.c.b16 %v2866_v14, %v2866_v14  ;;  %v3445_v34 = vld [vmem:[#allocation2 + $0x19a] sm:$0xff] }
 0x253   : > { %2679 = vmatmul.bf16.gmra.mxu1 %v3573_v8  ;;  %v3557_v45 = vunpack.c.l.b16 %v3476_v10 }
 0x254   : > { %v3739_v49 = vadd.f32 %v3674_v48, %v3393_v22 }
 0x255   : > { %v3574_v8 = vpack.c.b16 %v3557_v45, %v3556_v47 }
 0x256   : > { %v3775_v30 = vadd.f32 %v5816_v44, %v3739_v49  ;;  %3026 = vmatmul.bf16.gmra.mxu2 %v2882_v55  ;;  %v3676_v7 = vpop.f32.mrf.mxu0 }
 0x258   : > { %v3870_v50 = vadd.f32 %v3869_v1, %v3775_v30  ;;  %v3909_v29 = vmul.f32 %v3775_v30, %v3775_v30  ;;  %v2642_v23 = vpop.f32.mrf.mxu1 }
 0x259   : > { %v3330_v6 = vpop.f32.mrf.mxu3  ;;  %v2987_v12 = vpop.f32.mrf.mxu2  ;;  %v2703_v49 = vadd.f32 %v2642_v23, %v5756_v54 }
 0x25a   : > { %v3940_v13 = vadd.f32 %v3939_v41, %v3909_v29  ;;  %v3394_v15 = vadd.f32 %v3330_v6, %v3048_v28  ;;  %v3049_v21 = vadd.f32 %v2987_v12, %v2702_v35  ;;  %v3212_v28 = vunpack.c.l.b16 %v3131_v17 }
 0x25b   : > { %v3477_v29 = vpack.c.bf16 %v3445_v34, %v3445_v34 }
 0x25c   : > { %v3740_v59 = vadd.f32 %v3676_v7, %v3394_v15  ;;  %v3229_v15 = vpack.c.b16 %v3213_v11, %v3212_v28 }
 0x25d   : > { %v3558_v5 = vunpack.c.l.b16 %v3477_v29 }
 0x25e   : > { %v3776_v16 = vadd.f32 %v5816_v44, %v3740_v59  ;;  %3372 = vmatmul.bf16.gmra.mxu3 %v3228_v43  ;;  %v3679_v48 = vpop.f32.mrf.mxu0 }
 0x260   : > { %v4699_v52 = vpack.c.bf16 %v3776_v16, %v3775_v30  ;;  %v3871_v1 = vadd.f32 %v3870_v50, %v3776_v16  ;;  %v3910_v40 = vmul.f32 %v3776_v16, %v3776_v16  ;;  %v2645_v3 = vpop.f32.mrf.mxu1 }
 0x261   : > { %v3333_v32 = vpop.f32.mrf.mxu3  ;;  %v2989_v38 = vpop.f32.mrf.mxu2  ;;  %3718 = vmatmul.bf16.gmra.mxu0 %v3574_v8  ;;  %v2704_v23 = vadd.f32 %v2645_v3, %v5759_v37 }
 0x262   : > { %4770 = vst [vmem:[%s5826_s11 + $0x28] sm:$0xff] %v4699_v52   ;;  %v3941_v41 = vadd.f32 %v3940_v13, %v3910_v40  ;;  %v3395_v22 = vadd.f32 %v3333_v32, %v3049_v21  ;;  %v3050_v30 = vadd.f32 %v2989_v38, %v2703_v49  ;;  %v3575_v21 = vpack.c.b16 %v3559_v46, %v3558_v5 }
 0x263   : > { %2684 = vmatmul.bf16.gmra.mxu1 %v3574_v8 }
 0x264   : > { %v3741_v55 = vadd.f32 %v3679_v48, %v3395_v22 }
 0x266   : > { %v3777_v0 = vadd.f32 %v5816_v44, %v3741_v55  ;;  %3031 = vmatmul.bf16.gmra.mxu2 %v2883_v56  ;;  %v3681_v10 = vpop.f32.mrf.mxu0 }
 0x268   : > { %v3872_v9 = vadd.f32 %v3871_v1, %v3777_v0  ;;  %v3911_v50 = vmul.f32 %v3777_v0, %v3777_v0  ;;  %v2647_v43 = vpop.f32.mrf.mxu1 }
 0x269   : > { %v3335_v7 = vpop.f32.mrf.mxu3  ;;  %v2992_v54 = vpop.f32.mrf.mxu2  ;;  %v2705_v37 = vadd.f32 %v2647_v43, %v5762_v25 }
 0x26a   : > { %v3942_v6 = vadd.f32 %v3941_v41, %v3911_v50  ;;  %v3396_v13 = vadd.f32 %v3335_v7, %v3050_v30  ;;  %v3051_v35 = vadd.f32 %v2992_v54, %v2704_v23 }
 0x26c   : > { %v3742_v12 = vadd.f32 %v3681_v10, %v3396_v13 }
 0x26e   : > { %v3778_v59 = vadd.f32 %v5816_v44, %v3742_v12  ;;  %3377 = vmatmul.bf16.gmra.mxu3 %v3229_v15  ;;  %v3684_v14 = vpop.f32.mrf.mxu0 }
 0x270   : > { %v4704_v47 = vpack.c.bf16 %v3778_v59, %v3777_v0  ;;  %v3873_v45 = vadd.f32 %v3872_v9, %v3778_v59  ;;  %v3912_v16 = vmul.f32 %v3778_v59, %v3778_v59  ;;  %v2650_v40 = vpop.f32.mrf.mxu1 }
 0x271   : > { %v3338_v51 = vpop.f32.mrf.mxu3  ;;  %v2994_v1 = vpop.f32.mrf.mxu2  ;;  %3723 = vmatmul.bf16.gmra.mxu0 %v3575_v21  ;;  %v2706_v34 = vadd.f32 %v2650_v40, %v5765_v61 }
 0x272   : > { %4771 = vst [vmem:[%s5826_s11 + $0x30] sm:$0xff] %v4704_v47   ;;  %v3943_v18 = vadd.f32 %v3942_v6, %v3912_v16  ;;  %v3397_v52 = vadd.f32 %v3338_v51, %v3051_v35  ;;  %v3052_v32 = vadd.f32 %v2994_v1, %v2705_v37 }
 0x274   : > { %v3743_v8 = vadd.f32 %v3684_v14, %v3397_v52 }
 0x276   : > { %v3779_v48 = vadd.f32 %v5816_v44, %v3743_v8  ;;  %v3686_v38 = vpop.f32.mrf.mxu0 }
 0x278   : > { %v3874_v41 = vadd.f32 %v3873_v45, %v3779_v48  ;;  %v3913_v22 = vmul.f32 %v3779_v48, %v3779_v48  ;;  %v2652_v55 = vpop.f32.mrf.mxu1 }
 0x279   : > { %v3340_v3 = vpop.f32.mrf.mxu3  ;;  %v2997_v56 = vpop.f32.mrf.mxu2  ;;  %v2707_v6 = vadd.f32 %v2652_v55, %v5768_v27 }
 0x27a   : > { %v3944_v17 = vadd.f32 %v3943_v18, %v3913_v22  ;;  %v3398_v4 = vadd.f32 %v3340_v3, %v3052_v32  ;;  %v3053_v0 = vadd.f32 %v2997_v56, %v2706_v34 }
 0x27c   : > { %v3744_v49 = vadd.f32 %v3686_v38, %v3398_v4 }
 0x27e   : > { %v3780_v60 = vadd.f32 %v5816_v44, %v3744_v49  ;;  %v3689_v11 = vpop.f32.mrf.mxu0 }
 0x280   : > { %v4709_v30 = vpack.c.bf16 %v3780_v60, %v3779_v48  ;;  %v3875_v25 = vadd.f32 %v3874_v41, %v3780_v60  ;;  %v3914_v28 = vmul.f32 %v3780_v60, %v3780_v60  ;;  %v2655_v10 = vpop.f32.mrf.mxu1 }
 0x281   : > { %v3343_v9 = vpop.f32.mrf.mxu3  ;;  %v2999_v33 = vpop.f32.mrf.mxu2  ;;  %v2708_v47 = vadd.f32 %v2655_v10, %v5771_v20 }
 0x282   : > { %4772 = vst [vmem:[%s5826_s11 + $0x38] sm:$0xff] %v4709_v30   ;;  %v3945_v50 = vadd.f32 %v3944_v17, %v3914_v28  ;;  %v3399_v29 = vadd.f32 %v3343_v9, %v3053_v0  ;;  %v3054_v15 = vadd.f32 %v2999_v33, %v2707_v6 }
 0x284   : > { %v3745_v7 = vadd.f32 %v3689_v11, %v3399_v29 }
 0x286   : > { %v3781_v13 = vadd.f32 %v5816_v44, %v3745_v7  ;;  %v3691_v43 = vpop.f32.mrf.mxu0 }
 0x288   : > { %v3876_v61 = vadd.f32 %v3875_v25, %v3781_v13  ;;  %v3915_v54 = vmul.f32 %v3781_v13, %v3781_v13  ;;  %v2657_v59 = vpop.f32.mrf.mxu1 }
 0x289   : > { %v3345_v12 = vpop.f32.mrf.mxu3  ;;  %v3002_v46 = vpop.f32.mrf.mxu2  ;;  %v2709_v48 = vadd.f32 %v2657_v59, %v5774_v58 }
 0x28a   : > { %v3946_v23 = vadd.f32 %v3945_v50, %v3915_v54  ;;  %v3400_v5 = vadd.f32 %v3345_v12, %v3054_v15  ;;  %v3055_v16 = vadd.f32 %v3002_v46, %v2708_v47 }
 0x28c   : > { %v3746_v35 = vadd.f32 %v3691_v43, %v3400_v5 }
 0x28e   : > { %v3782_v45 = vadd.f32 %v5816_v44, %v3746_v35  ;;  %v3694_v51 = vpop.f32.mrf.mxu0 }
 0x290   : > { %v4714_v21 = vpack.c.bf16 %v3782_v45, %v3781_v13  ;;  %v3877_v27 = vadd.f32 %v3876_v61, %v3782_v45  ;;  %v3916_v14 = vmul.f32 %v3782_v45, %v3782_v45  ;;  %v2660_v8 = vpop.f32.mrf.mxu1 }
 0x291   : > { %v3348_v18 = vpop.f32.mrf.mxu3  ;;  %v3004_v40 = vpop.f32.mrf.mxu2  ;;  %v2710_v34 = vadd.f32 %v2660_v8, %v5777_v24 }
 0x292   : > { %4773 = vst [vmem:[%s5826_s11 + $0x40] sm:$0xff] %v4714_v21   ;;  %v3947_v52 = vadd.f32 %v3946_v23, %v3916_v14  ;;  %v3401_v1 = vadd.f32 %v3348_v18, %v3055_v16  ;;  %v3056_v41 = vadd.f32 %v3004_v40, %v2709_v48 }
 0x294   : > { %v3747_v37 = vadd.f32 %v3694_v51, %v3401_v1 }
 0x296   : > { %v3783_v32 = vadd.f32 %v5816_v44, %v3747_v37  ;;  %v3696_v38 = vpop.f32.mrf.mxu0 }
 0x298   : > { %v3878_v20 = vadd.f32 %v3877_v27, %v3783_v32  ;;  %v3917_v22 = vmul.f32 %v3783_v32, %v3783_v32  ;;  %v2662_v55 = vpop.f32.mrf.mxu1 }
 0x299   : > { %v3350_v3 = vpop.f32.mrf.mxu3  ;;  %v3007_v56 = vpop.f32.mrf.mxu2  ;;  %v2711_v7 = vadd.f32 %v2662_v55, %v5780_v53 }
 0x29a   : > { %v3948_v17 = vadd.f32 %v3947_v52, %v3917_v22  ;;  %v3402_v4 = vadd.f32 %v3350_v3, %v3056_v41  ;;  %v3057_v0 = vadd.f32 %v3007_v56, %v2710_v34 }
 0x29c   : > { %v3748_v49 = vadd.f32 %v3696_v38, %v3402_v4 }
 0x29e   : > { %v3784_v60 = vadd.f32 %v5816_v44, %v3748_v49  ;;  %v3699_v28 = vpop.f32.mrf.mxu0 }
 0x2a0   : > { %v4719_v30 = vpack.c.bf16 %v3784_v60, %v3783_v32  ;;  %v3879_v58 = vadd.f32 %v3878_v20, %v3784_v60  ;;  %v3918_v25 = vmul.f32 %v3784_v60, %v3784_v60  ;;  %v2665_v33 = vpop.f32.mrf.mxu1 }
 0x2a1   : > { %v3353_v11 = vpop.f32.mrf.mxu3  ;;  %v3009_v29 = vpop.f32.mrf.mxu2  ;;  %v2712_v59 = vadd.f32 %v2665_v33, %v5783_v62 }
 0x2a2   : > { %4774 = vst [vmem:[%s5826_s11 + $0x48] sm:$0xff] %v4719_v30   ;;  %v3949_v9 = vadd.f32 %v3948_v17, %v3918_v25  ;;  %v3403_v50 = vadd.f32 %v3353_v11, %v3057_v0  ;;  %v3058_v13 = vadd.f32 %v3009_v29, %v2711_v7 }
 0x2a4   : > { %v3749_v10 = vadd.f32 %v3699_v28, %v3403_v50 }
 0x2a6   : > { %v3785_v6 = vadd.f32 %v5816_v44, %v3749_v10  ;;  %v3701_v61 = vpop.f32.mrf.mxu0 }
 0x2a8   : > { %v3880_v24 = vadd.f32 %v3879_v58, %v3785_v6  ;;  %v3919_v15 = vmul.f32 %v3785_v6, %v3785_v6  ;;  %v2667_v5 = vpop.f32.mrf.mxu1 }
 0x2a9   : > { %v3355_v54 = vpop.f32.mrf.mxu3  ;;  %v3012_v23 = vpop.f32.mrf.mxu2  ;;  %v2713_v40 = vadd.f32 %v2667_v5, %v5786_v39 }
 0x2aa   : > { %v3950_v43 = vadd.f32 %v3949_v9, %v3919_v15  ;;  %v3404_v12 = vadd.f32 %v3355_v54, %v3058_v13  ;;  %v3059_v47 = vadd.f32 %v3012_v23, %v2712_v59 }
 0x2ac   : > { %v3750_v46 = vadd.f32 %v3701_v61, %v3404_v12 }
 0x2ae   : > { %v3786_v35 = vadd.f32 %v5816_v44, %v3750_v46  ;;  %v3704_v21 = vpop.f32.mrf.mxu0 }
 0x2b0   : > { %v4724_v45 = vpack.c.bf16 %v3786_v35, %v3785_v6  ;;  %v3881_v53 = vadd.f32 %v3880_v24, %v3786_v35  ;;  %v3920_v16 = vmul.f32 %v3786_v35, %v3786_v35  ;;  %v2670_v52 = vpop.f32.mrf.mxu1 }
 0x2b1   : > { %v3358_v27 = vpop.f32.mrf.mxu3  ;;  %v3014_v18 = vpop.f32.mrf.mxu2  ;;  %v2714_v4 = vadd.f32 %v2670_v52, %v5789_v63 }
 0x2b2   : > { %4775 = vst [vmem:[%s5826_s11 + $0x50] sm:$0xff] %v4724_v45   ;;  %v3951_v14 = vadd.f32 %v3950_v43, %v3920_v16  ;;  %v3405_v51 = vadd.f32 %v3358_v27, %v3059_v47  ;;  %v3060_v37 = vadd.f32 %v3014_v18, %v2713_v40 }
 0x2b4   : > { %v3751_v1 = vadd.f32 %v3704_v21, %v3405_v51 }
 0x2b6   : > { %v3787_v8 = vadd.f32 %v5816_v44, %v3751_v1  ;;  %v3706_v32 = vpop.f32.mrf.mxu0 }
 0x2b8   : > { %v3882_v62 = vadd.f32 %v3881_v53, %v3787_v8  ;;  %v3921_v48 = vmul.f32 %v3787_v8, %v3787_v8  ;;  %v2672_v3 = vpop.f32.mrf.mxu1 }
 0x2b9   : > { %v3360_v41 = vpop.f32.mrf.mxu3  ;;  %v3017_v38 = vpop.f32.mrf.mxu2  ;;  %v2715_v9 = vadd.f32 %v2672_v3, %v5792_v19 }
 0x2ba   : > { %v3952_v20 = vadd.f32 %v3951_v14, %v3921_v48  ;;  %v3406_v22 = vadd.f32 %v3360_v41, %v3060_v37  ;;  %v3061_v55 = vadd.f32 %v3017_v38, %v2714_v4 }
 0x2bc   : > { %v3752_v17 = vadd.f32 %v3706_v32, %v3406_v22 }
 0x2be   : > { %v3788_v56 = vadd.f32 %v5816_v44, %v3752_v17  ;;  %v3709_v60 = vpop.f32.mrf.mxu0 }
 0x2c0   : > { %v4729_v49 = vpack.c.bf16 %v3788_v56, %v3787_v8  ;;  %v3883_v39 = vadd.f32 %v3882_v62, %v3788_v56  ;;  %v3922_v34 = vmul.f32 %v3788_v56, %v3788_v56  ;;  %v2675_v28 = vpop.f32.mrf.mxu1 }
 0x2c1   : > { %v3363_v0 = vpop.f32.mrf.mxu3  ;;  %v3019_v25 = vpop.f32.mrf.mxu2  ;;  %v2716_v54 = vadd.f32 %v2675_v28, %v5795_v31 }
 0x2c2   : > { %4776 = vst [vmem:[%s5826_s11 + $0x58] sm:$0xff] %v4729_v49   ;;  %v3953_v30 = vadd.f32 %v3952_v20, %v3922_v34  ;;  %v3407_v58 = vadd.f32 %v3363_v0, %v3061_v55  ;;  %v3062_v29 = vadd.f32 %v3019_v25, %v2715_v9 }
 0x2c4   : > { %v3753_v11 = vadd.f32 %v3709_v60, %v3407_v58 }
 0x2c6   : > { %v3789_v50 = vadd.f32 %v5816_v44, %v3753_v11  ;;  %v3711_v10 = vpop.f32.mrf.mxu0 }
 0x2c8   : > { %v3884_v63 = vadd.f32 %v3883_v39, %v3789_v50  ;;  %v3923_v33 = vmul.f32 %v3789_v50, %v3789_v50  ;;  %v2677_v15 = vpop.f32.mrf.mxu1 }
 0x2c9   : > { %v3365_v7 = vpop.f32.mrf.mxu3  ;;  %v3022_v24 = vpop.f32.mrf.mxu2  ;;  %v2717_v21 = vadd.f32 %v2677_v15, %v5798_v36 }
 0x2ca   : > { %v3954_v6 = vadd.f32 %v3953_v30, %v3923_v33  ;;  %v3408_v13 = vadd.f32 %v3365_v7, %v3062_v29  ;;  %v3063_v12 = vadd.f32 %v3022_v24, %v2716_v54 }
 0x2cc   : > { %v3754_v61 = vadd.f32 %v3711_v10, %v3408_v13 }
 0x2ce   : > { %v3790_v43 = vadd.f32 %v5816_v44, %v3754_v61  ;;  %v3714_v46 = vpop.f32.mrf.mxu0 }
 0x2d0   : > { %v4734_v23 = vpack.c.bf16 %v3790_v43, %v3789_v50  ;;  %v3885_v19 = vadd.f32 %v3884_v63, %v3790_v43  ;;  %v3924_v5 = vmul.f32 %v3790_v43, %v3790_v43  ;;  %v2680_v53 = vpop.f32.mrf.mxu1 }
 0x2d1   : > { %v3368_v59 = vpop.f32.mrf.mxu3  ;;  %v3024_v45 = vpop.f32.mrf.mxu2  ;;  %v2718_v62 = vadd.f32 %v2680_v53, %v5801_v42  ;;  %v4886_v42 = vld [vmem:[%s5917_s4] ss:$0 sm:$0xff] }
 0x2d2   : > { %4777 = vst [vmem:[%s5826_s11 + $0x60] sm:$0xff] %v4734_v23   ;;  %v3955_v35 = vadd.f32 %v3954_v6, %v3924_v5  ;;  %v3409_v47 = vadd.f32 %v3368_v59, %v3063_v12  ;;  %v3064_v14 = vadd.f32 %v3024_v45, %v2717_v21 }
 0x2d4   : > { %v3755_v16 = vadd.f32 %v3714_v46, %v3409_v47 }
 0x2d6   : > { %v3791_v27 = vadd.f32 %v5816_v44, %v3755_v16  ;;  %v3716_v18 = vpop.f32.mrf.mxu0 }
 0x2d8   : > { %v3886_v31 = vadd.f32 %v3885_v19, %v3791_v27  ;;  %v3925_v51 = vmul.f32 %v3791_v27, %v3791_v27  ;;  %v2682_v48 = vpop.f32.mrf.mxu1 }
 0x2d9   : > { %v3370_v52 = vpop.f32.mrf.mxu3  ;;  %v3027_v8 = vpop.f32.mrf.mxu2  ;;  %v2719_v49 = vadd.f32 %v2682_v48, %v5804_v2 }
 0x2da   : > { %v3956_v1 = vadd.f32 %v3955_v35, %v3925_v51  ;;  %v3410_v40 = vadd.f32 %v3370_v52, %v3064_v14  ;;  %v3065_v41 = vadd.f32 %v3027_v8, %v2718_v62 }
 0x2dc   : > { %v3756_v37 = vadd.f32 %v3716_v18, %v3410_v40 }
 0x2de   : > { %v3792_v32 = vadd.f32 %v5816_v44, %v3756_v37  ;;  %v3719_v38 = vpop.f32.mrf.mxu0 }
 0x2e0   : > { %v4739_v20 = vpack.c.bf16 %v3792_v32, %v3791_v27  ;;  %v3887_v36 = vadd.f32 %v3886_v31, %v3792_v32  ;;  %v3926_v22 = vmul.f32 %v3792_v32, %v3792_v32  ;;  %v2685_v44 = vpop.f32.mrf.mxu1 }
 0x2e1   : > { %v3373_v3 = vpop.f32.mrf.mxu3  ;;  %v3029_v56 = vpop.f32.mrf.mxu2  ;;  %v2720_v50 = vadd.f32 %v2685_v44, %v5807_v57 }
 0x2e2   : > { %4778 = vst [vmem:[%s5826_s11 + $0x68] sm:$0xff] %v4739_v20   ;;  %v3957_v17 = vadd.f32 %v3956_v1, %v3926_v22  ;;  %v3411_v4 = vadd.f32 %v3373_v3, %v3065_v41  ;;  %v3066_v34 = vadd.f32 %v3029_v56, %v2719_v49 }
 0x2e4   : > { %v3757_v55 = vadd.f32 %v3719_v38, %v3411_v4 }
 0x2e6   : > { %v3793_v39 = vadd.f32 %v4886_v42, %v3757_v55  ;;  %v3721_v30 = vpop.f32.mrf.mxu0 }
 0x2e8   : > { %v3888_v60 = vadd.f32 %v3887_v36, %v3793_v39  ;;  %v3927_v0 = vmul.f32 %v3793_v39, %v3793_v39  ;;  %v2687_v7 = vpop.f32.mrf.mxu1 }
 0x2e9   : > { %v3375_v58 = vpop.f32.mrf.mxu3  ;;  %v3032_v11 = vpop.f32.mrf.mxu2  ;;  %v2721_v43 = vadd.f32 %v2687_v7, %v5809_v26 }
 0x2ea   : > { %v3958_v25 = vadd.f32 %v3957_v17, %v3927_v0  ;;  %v3412_v28 = vadd.f32 %v3375_v58, %v3066_v34  ;;  %v3067_v2 = vadd.f32 %v3032_v11, %v2720_v50 }
 0x2ec   : > { %v3758_v9 = vadd.f32 %v3721_v30, %v3412_v28 }
 0x2ee   : > { %v3794_v29 = vadd.f32 %v4886_v42, %v3758_v9  ;;  %v3724_v6 = vpop.f32.mrf.mxu0 }
 0x2f0   : > { %v4744_v63 = vpack.c.bf16 %v3794_v29, %v3793_v39  ;;  %v3889_v33 = vadd.f32 %v3888_v60, %v3794_v29  ;;  %v3928_v10 = vmul.f32 %v3794_v29, %v3794_v29 }
 0x2f1   : > { %v3378_v13 = vpop.f32.mrf.mxu3  ;;  %v3034_v61 = vpop.f32.mrf.mxu2 }
 0x2f2   : > { %4779 = vst [vmem:[%s5826_s11 + $0x70] sm:$0xff] %v4744_v63   ;;  %v3959_v24 = vadd.f32 %v3958_v25, %v3928_v10  ;;  %v3413_v15 = vadd.f32 %v3378_v13, %v3067_v2  ;;  %v3068_v23 = vadd.f32 %v3034_v61, %v2721_v43 }
 0x2f4   : > { %v3759_v54 = vadd.f32 %v3724_v6, %v3413_v15 }
 0x2f6   : > { %v3795_v12 = vadd.f32 %v4886_v42, %v3759_v54  ;;  %v3726_v35 = vpop.f32.mrf.mxu0 }
 0x2f8   : > { %v3890_v19 = vadd.f32 %v3889_v33, %v3795_v12  ;;  %v3929_v57 = vmul.f32 %v3795_v12, %v3795_v12 }
 0x2f9   : > { %v3380_v5 = vpop.f32.mrf.mxu3 }
 0x2fa   : > { %v3960_v46 = vadd.f32 %v3959_v24, %v3929_v57  ;;  %v3414_v59 = vadd.f32 %v3380_v5, %v3068_v23 }
 0x2fc   : > { %v3760_v47 = vadd.f32 %v3726_v35, %v3414_v59 }
 0x2fe   : > { %v3796_v45 = vadd.f32 %v4886_v42, %v3760_v47 }
 0x300   : > { %v4749_v53 = vpack.c.bf16 %v3796_v45, %v3795_v12  ;;  %v3891_v16 = vadd.f32 %v3890_v19, %v3796_v45  ;;  %v3930_v21 = vmul.f32 %v3796_v45, %v3796_v45 }
 0x302   : > { %4780 = vst [vmem:[%s5826_s11 + $0x78] sm:$0xff] %v4749_v53   ;;  %v3892_v27 = vrot.slane %v3891_v16, 4  ;;  %v3961_v14 = vadd.f32 %v3960_v46, %v3930_v21 }
 0x304   : > { %v3893_v31 = vadd.f32 %v3892_v27, %v3891_v16  ;;  %v3962_v26 = vrot.slane %v3961_v14, 4 }
 0x306   : > { %v3894_v51 = vrot.slane %v3893_v31, 2  ;;  %v3963_v18 = vadd.f32 %v3962_v26, %v3961_v14 }
 0x308   : > { %v3895_v52 = vadd.f32 %v3894_v51, %v3893_v31  ;;  %v3964_v1 = vrot.slane %v3963_v18, 2 }
 0x30a   : > { %v3896_v40 = vrot.slane %v3895_v52, 1  ;;  %v3965_v8 = vadd.f32 %v3964_v1, %v3963_v18 }
 0x30c   : > { %v3897_v37 = vadd.f32 %v3896_v40, %v3895_v52  ;;  %v3966_v62 = vrot.slane %v3965_v8, 1 }
 0x30e   : > { %3898 = vst [vmem:[%s292_s16] sm:$0x1] %v3897_v37  ;;  %v3967_v48 = vadd.f32 %v3966_v62, %v3965_v8 }
 0x310   : > { %3968 = vst [vmem:[%s295_s19] sm:$0x1] %v3967_v48 }
 0x311 PF: > { %s18_s24 = sadd.s32 1, %s4893_s24  }
 0x312   : > { %p15_p4 = scmp.ge.s32.totalorder %s18_s24, 4  }
 0x314   :  { %17 = sbr.rel (!%p15_p4) target bundleno = 1 (0x1), region = 104 }

</bundles_post_ra>
